<compile_context>
chip_gen: v6e
topology: v6e:2x2x1
jax: 0.10.0
libtpu: 0.0.40
codegen_flags: <defaults>
</compile_context>

<pallas_src>
import math

import jax
import jax.numpy as jnp
from jax import lax
from jax.experimental import pallas as pl
from jax.experimental.pallas import tpu as pltpu

B = 2
L_IN = 2000
K1, C1 = 5, 32
K2, C2 = 5, 64
L1 = L_IN - K1 + 1        # 1996
P1 = L1 // 2              # 998
L2 = P1 - K2 + 1          # 994
P2 = L2 // 2              # 497
FLAT = C2 * P2            # 31808 (torch flatten size)

# Lane-dense padded sizes
P2_PAD = 512              # pooled conv2 length padded to a multiple of 128
FLAT_PAD = C2 * P2_PAD    # 32768

# conv-stage layout (all tap reads contiguous; no stride-2 gathers)
XQ = 640                  # 4-way de-interleaved input plane length (4*640 >= 2052)
HQ = 640                  # h1 even/odd scratch plane length
Q_CHUNK = 128             # conv1 "q" columns per chunk (q indexes pooled pairs)
N_QCH = 4                 # 4*128 q cols -> 1024 pooled conv1 cols (>= 998 real)
CH2 = 128                 # pooled conv2 columns per chunk
N_CH2 = 4                 # 4*128 = 512 pooled conv2 cols (>= 497 real)

HID = 128
N_POS = 24
N_FORCE = 1
N_HEAD = N_POS + N_FORCE  # 25

# fc1 tiling: 2-way K split (parallel, one per v7x core) x 1 reduction step
N_SPLIT = 2
TK = 16384                # reduction tile per grid step (int8 tile = 2 MB)
K_SPLIT = FLAT_PAD // N_SPLIT
INNER = K_SPLIT // TK     # 1
SUB_K = 2048              # in-kernel dequant/matmul sub-chunk (temp ~1 MB f32)

assert N_SPLIT * INNER * TK == FLAT_PAD
assert TK % SUB_K == 0


# ---------------------------------------------------------------------------
# Kernel 1: conv1 -> relu -> pool -> conv2 -> relu -> pool   (one batch row
# per grid step; maxpool fused into the conv phases; de-interleaved layouts so
# every tap read is a contiguous (.,128) slice)
# ---------------------------------------------------------------------------
def features_kernel(x_ref, w1_ref, b1_ref, w2_ref, b2_ref, o_ref, s1e, s1o):
    w1 = w1_ref[...]                       # (C1, K1)
    b1 = b1_ref[...]                       # (C1, 1)
    b2 = b2_ref[...]                       # (C2, 1)

    # Zero the scratch tails (cols 512..639) read only by padded conv2 columns.
    s1e[:, 512:] = jnp.zeros((C1, HQ - 512), jnp.float32)
    s1o[:, 512:] = jnp.zeros((C1, HQ - 512), jnp.float32)

    # --- conv1 -> relu -> maxpool(2); pooled output stored de-interleaved ----
    # conv1 col m = sum_t w1[:,t] * x[m+t]; pooled col p = max(col 2p, 2p+1)
    #   s1e[:, q] = pooled col 2q   = max(conv col 4q,   4q+1)   (phases 0,1)
    #   s1o[:, q] = pooled col 2q+1 = max(conv col 4q+2, 4q+3)   (phases 2,3)
    # x arrives 4-way de-interleaved: x_ref[0, p, j] = x[4j + p], so the tap
    # read x[4q + r + t] is plane (r+t)%4 at contiguous offset q + (r+t)//4.
    for c in range(N_QCH):
        q0 = c * Q_CHUNK
        ph = []
        for r in range(4):
            acc = jnp.zeros((C1, Q_CHUNK), jnp.float32)
            for t in range(K1):
                s = r + t
                xs = x_ref[0, (s % 4):(s % 4) + 1,
                           pl.ds(q0 + s // 4, Q_CHUNK)]          # (1, 128)
                acc = acc + w1[:, t:t + 1] * xs                  # (C1, 128)
            ph.append(acc)
        s1e[:, q0:q0 + Q_CHUNK] = jnp.maximum(jnp.maximum(ph[0], ph[1]) + b1, 0.0)
        s1o[:, q0:q0 + Q_CHUNK] = jnp.maximum(jnp.maximum(ph[2], ph[3]) + b1, 0.0)

    # --- conv2 -> relu -> maxpool(2); contiguous tap reads from s1e/s1o ------
    # conv2 col n = sum_t W2[:,:,t] @ h1[:, n+t]; pooled col p = max(2p, 2p+1)
    # even phase (col 2p)  tap t: h1[2p+t]   -> s1e[p+t/2]   (t even) / s1o[p+(t-1)/2] (t odd)
    # odd  phase (col 2p+1)tap t: h1[2p+1+t] -> s1o[p+t/2]   (t even) / s1e[p+(t+1)/2] (t odd)
    for c in range(N_CH2):
        p0 = c * CH2
        acc_e = jnp.zeros((C2, CH2), jnp.float32)
        acc_o = jnp.zeros((C2, CH2), jnp.float32)
        for t in range(K2):
            wt = w2_ref[t]                                       # (C2, C1)
            if t % 2 == 0:
                he = s1e[:, p0 + t // 2: p0 + t // 2 + CH2]
                ho = s1o[:, p0 + t // 2: p0 + t // 2 + CH2]
            else:
                he = s1o[:, p0 + (t - 1) // 2: p0 + (t - 1) // 2 + CH2]
                ho = s1e[:, p0 + (t + 1) // 2: p0 + (t + 1) // 2 + CH2]
            acc_e = acc_e + jnp.dot(wt, he, preferred_element_type=jnp.float32)
            acc_o = acc_o + jnp.dot(wt, ho, preferred_element_type=jnp.float32)
        pooled = jnp.maximum(jnp.maximum(acc_e, acc_o) + b2, 0.0)  # (C2, 128)
        # cols >= 497 contain finite padded-compute values; the matching fc1
        # weight rows are exactly zero (also after int8 quant), so harmless.
        o_ref[0, :, p0:p0 + CH2] = pooled.astype(o_ref.dtype)


# ---------------------------------------------------------------------------
# Kernel 2: partial fc1 matmul with int8 weight dequantized chunk-wise.
# grid = (N_SPLIT parallel K-halves, INNER reduction steps).  Each split writes
# its own (B, HID) partial; scale/bias/relu/heads happen in a tiny JAX epilogue.
# ---------------------------------------------------------------------------
def fc1_partial_kernel(x_ref, w_ref, o_ref, acc_ref):
    @pl.when(pl.program_id(1) == 0)
    def _():
        acc_ref[...] = jnp.zeros_like(acc_ref)

    def body(j, acc):
        j0 = pl.multiple_of(j * SUB_K, SUB_K)
        xs = x_ref[:, pl.ds(j0, SUB_K)].astype(jnp.float32)      # (B, SUB_K)
        ws = w_ref[pl.ds(j0, SUB_K), :].astype(jnp.float32)      # (SUB_K, HID)
        return acc + jnp.dot(xs, ws, preferred_element_type=jnp.float32)

    acc_ref[...] += lax.fori_loop(0, TK // SUB_K, body,
                                  jnp.zeros((B, HID), jnp.float32))

    @pl.when(pl.program_id(1) == pl.num_programs(1) - 1)
    def _():
        o_ref[0] = acc_ref[...]


# ---------------------------------------------------------------------------
# One-time parameter preparation (NOT part of the per-call forward pass)
# ---------------------------------------------------------------------------
def prepare_params(params):
    (w1, b1, w2, b2, wfc1, bfc1, wpos, bpos, wfrc, bfrc) = params
    # conv2 weight (C2, C1, K2) -> tap-major (K2, C2, C1)
    w2t = jnp.transpose(w2, (2, 0, 1))
    # fc1 weight (C2*497, HID) -> lane-dense (C2*512, HID); padded rows are 0.
    wp = jnp.pad(wfc1.reshape(C2, P2, HID), ((0, 0), (0, P2_PAD - P2), (0, 0)))
    wp = wp.reshape(FLAT_PAD, HID)
    # Symmetric per-output-column int8 quantization (zero-point 0, so padded
    # rows quantize to exactly zero); scale folded into the f32 epilogue.
    wscale = jnp.maximum(jnp.max(jnp.abs(wp), axis=0, keepdims=True), 1e-30) / 127.0
    wq = jnp.round(wp / wscale).clip(-127, 127).astype(jnp.int8)   # (FLAT_PAD, HID)
    # fuse both heads into one (HID, 25) weight / (1, 25) bias
    whead = jnp.concatenate([wpos, wfrc], axis=1)
    bhead = jnp.concatenate([bpos, bfrc], axis=1)
    return (w1, b1, w2t, b2, wq, wscale, bfc1, whead, bhead)


# ---------------------------------------------------------------------------
# Forward pass
# ---------------------------------------------------------------------------
def fbgnet_forward(x, prepared):
    (w1, b1, w2t, b2, wq, wscale, bfc1, whead, bhead) = prepared

    # tiny (~20 KB) glue: zero-pad and 4-way de-interleave the input so every
    # conv tap read inside the kernel is a contiguous 128-lane slice.
    x_pad = jnp.pad(x, ((0, 0), (0, 4 * XQ - L_IN)))
    x4 = x_pad.reshape(B, XQ, 4).transpose(0, 2, 1)              # (B, 4, XQ)

    feat = pl.pallas_call(
        features_kernel,
        out_shape=jax.ShapeDtypeStruct((B, C2, P2_PAD), jnp.bfloat16),
        grid=(B,),
        in_specs=[
            pl.BlockSpec((1, 4, XQ), lambda b: (b, 0, 0)),
            pl.BlockSpec((C1, K1), lambda b: (0, 0)),
            pl.BlockSpec((C1, 1), lambda b: (0, 0)),
            pl.BlockSpec((K2, C2, C1), lambda b: (0, 0, 0)),
            pl.BlockSpec((C2, 1), lambda b: (0, 0)),
        ],
        out_specs=pl.BlockSpec((1, C2, P2_PAD), lambda b: (b, 0, 0)),
        scratch_shapes=[pltpu.VMEM((C1, HQ), jnp.float32),
                        pltpu.VMEM((C1, HQ), jnp.float32)],
        compiler_params=pltpu.CompilerParams(
            dimension_semantics=("parallel",)),
    )(x4, w1, b1, w2t, b2)

    # lane-dense flatten; padded fc1 weight rows are zero, so no masking needed
    flat = feat.reshape(B, FLAT_PAD)                             # (B, 32768) bf16

    partial = pl.pallas_call(
        fc1_partial_kernel,
        out_shape=jax.ShapeDtypeStruct((N_SPLIT, B, HID), jnp.float32),
        grid=(N_SPLIT, INNER),
        in_specs=[
            pl.BlockSpec((B, TK), lambda s, k: (0, s * INNER + k)),
            pl.BlockSpec((TK, HID), lambda s, k: (s * INNER + k, 0)),
        ],
        out_specs=pl.BlockSpec((1, B, HID), lambda s, k: (s, 0, 0)),
        scratch_shapes=[pltpu.VMEM((B, HID), jnp.float32)],
        compiler_params=pltpu.CompilerParams(
            dimension_semantics=("parallel", "arbitrary")),
    )(flat, wq)

    # tiny epilogue (B=2): sum the K-split partials, apply the int8 per-column
    # dequant scale + bias + relu, then both fused heads.
    h = jnp.maximum(partial.sum(axis=0) * wscale + bfc1, 0.0)    # (B, HID)
    heads = jnp.dot(h, whead, precision=jax.lax.Precision.HIGHEST) + bhead
    return heads[:, :N_POS], heads[:, N_POS:]


# ---------------------------------------------------------------------------
# Pure-JAX reference (same math, plain XLA) for a sanity check
# ---------------------------------------------------------------------------
def reference(x, params):
    (w1, b1, w2, b2, wfc1, bfc1, wpos, bpos, wfrc, bfrc) = params
    hp = jax.lax.Precision.HIGHEST
    # conv1 (cross-correlation, like torch Conv1d)
    a1 = jnp.stack([x[:, t:t + L1] for t in range(K1)], axis=-1)       # (B,L1,K1)
    c1 = jnp.einsum('blt,ct->bcl', a1, w1, precision=hp) + b1[:, 0][None, :, None]
    h1 = jnp.maximum(c1, 0.0).reshape(B, C1, P1, 2).max(-1)            # (B,C1,P1)
    # conv2 (torch weight layout (out, in, k))
    a2 = jnp.stack([h1[:, :, t:t + L2] for t in range(K2)], axis=-1)   # (B,C1,L2,K2)
    c2 = jnp.einsum('bilt,oit->bol', a2, w2, precision=hp) + b2[:, 0][None, :, None]
    h2 = jnp.maximum(c2, 0.0).reshape(B, C2, P2, 2).max(-1)            # (B,C2,P2)
    flat = h2.reshape(B, FLAT)
    h = jnp.maximum(jnp.dot(flat, wfc1, precision=hp) + bfc1, 0.0)
    pos = jnp.dot(h, wpos, precision=hp) + bpos
    force = jnp.dot(h, wfrc, precision=hp) + bfrc
    return pos, force


if __name__ == "__main__":
    key = jax.random.PRNGKey(0)
    ks = jax.random.split(key, 11)

    def uni(k, shape, fan_in):
        bound = 1.0 / math.sqrt(fan_in)
        return jax.random.uniform(k, shape, jnp.float32, -bound, bound)

    x = jax.random.normal(ks[0], (B, L_IN), jnp.float32)

    params = (
        uni(ks[1], (C1, K1), K1),                 # conv1 weight (out, k), in_ch=1
        uni(ks[2], (C1, 1), K1),                  # conv1 bias
        uni(ks[3], (C2, C1, K2), C1 * K2),        # conv2 weight (out, in, k)
        uni(ks[4], (C2, 1), C1 * K2),             # conv2 bias
        uni(ks[5], (FLAT, HID), FLAT),            # fc1 weight (K, N) = W^T
        uni(ks[6], (1, HID), FLAT),               # fc1 bias
        uni(ks[7], (HID, N_POS), HID),            # fc_position weight (W^T)
        uni(ks[8], (1, N_POS), HID),              # fc_position bias
        uni(ks[9], (HID, N_FORCE), HID),          # fc_force weight (W^T)
        uni(ks[10], (1, N_FORCE), HID),           # fc_force bias
    )

    prepared = prepare_params(params)             # one-time layout/pad/int8 prep

    pos, force = jax.jit(fbgnet_forward)(x, prepared)
    jax.block_until_ready((pos, force))
    assert pos.shape == (B, N_POS) and force.shape == (B, N_FORCE)

    pos_ref, force_ref = jax.jit(reference)(x, params)
    jax.block_until_ready((pos_ref, force_ref))
    assert jnp.allclose(pos, pos_ref, rtol=2e-2, atol=2e-2), "position mismatch"
    assert jnp.allclose(force, force_ref, rtol=2e-2, atol=2e-2), "force mismatch"

    print("KERNEL_OK")
</pallas_src>

<mosaic_0001>
module attributes {stable_mosaic.version = 11 : i64} {
  func.func @features_kernel(%arg0: i32, %arg1: memref<1x4x640xf32, #tpu.memory_space<vmem>>, %arg2: memref<32x5xf32, #tpu.memory_space<vmem>>, %arg3: memref<32x1xf32, #tpu.memory_space<vmem>>, %arg4: memref<5x64x32xf32, #tpu.memory_space<vmem>>, %arg5: memref<64x1xf32, #tpu.memory_space<vmem>>, %arg6: memref<1x64x512xbf16, #tpu.memory_space<vmem>>, %arg7: memref<32x640xf32, #tpu.memory_space<vmem>>, %arg8: memref<32x640xf32, #tpu.memory_space<vmem>>) attributes {dimension_semantics = [#tpu.dimension_semantics<parallel>], iteration_bounds = array<i64: 2>, scalar_prefetch = 0 : i64, scratch_operands = 2 : i64, tpu.core_type = #tpu.core_type<tc>, window_params = [{transform_indices = @transform_0, window_bounds = array<i64: 1, 4, 640>}, {pipeline_mode = #tpu.pipeline_mode<synchronous>, transform_indices = @transform_1, window_bounds = array<i64: 32, 5>}, {pipeline_mode = #tpu.pipeline_mode<synchronous>, transform_indices = @transform_2, window_bounds = array<i64: 32, 1>}, {pipeline_mode = #tpu.pipeline_mode<synchronous>, transform_indices = @transform_3, window_bounds = array<i64: 5, 64, 32>}, {pipeline_mode = #tpu.pipeline_mode<synchronous>, transform_indices = @transform_4, window_bounds = array<i64: 64, 1>}, {transform_indices = @transform_5, window_bounds = array<i64: 1, 64, 512>}]} {
    %c0 = arith.constant 0 : index
    %c0_0 = arith.constant 0 : index
    %0 = vector.load %arg2[%c0, %c0_0] : memref<32x5xf32, #tpu.memory_space<vmem>>, vector<32x5xf32>
    %c0_1 = arith.constant 0 : index
    %c0_2 = arith.constant 0 : index
    %1 = vector.load %arg3[%c0_1, %c0_2] : memref<32x1xf32, #tpu.memory_space<vmem>>, vector<32x1xf32>
    %c0_3 = arith.constant 0 : index
    %c0_4 = arith.constant 0 : index
    %2 = vector.load %arg5[%c0_3, %c0_4] : memref<64x1xf32, #tpu.memory_space<vmem>>, vector<64x1xf32>
    %cst = arith.constant 0.000000e+00 : f32
    %3 = vector.broadcast %cst : f32 to vector<32x128xf32>
    %c0_5 = arith.constant 0 : index
    %c512 = arith.constant 512 : index
    %4 = vector.load %arg7[%c0_5, %c512] : memref<32x640xf32, #tpu.memory_space<vmem>>, vector<32x128xf32>
    tpu.vector_store %arg7[%c0_5, %c512], %3 {strides = array<i32>} : memref<32x640xf32, #tpu.memory_space<vmem>>, vector<32x128xf32>,
    %cst_6 = arith.constant 0.000000e+00 : f32
    %5 = vector.broadcast %cst_6 : f32 to vector<32x128xf32>
    %c0_7 = arith.constant 0 : index
    %c512_8 = arith.constant 512 : index
    %6 = vector.load %arg8[%c0_7, %c512_8] : memref<32x640xf32, #tpu.memory_space<vmem>>, vector<32x128xf32>
    tpu.vector_store %arg8[%c0_7, %c512_8], %5 {strides = array<i32>} : memref<32x640xf32, #tpu.memory_space<vmem>>, vector<32x128xf32>,
    %cst_9 = arith.constant 0.000000e+00 : f32
    %7 = vector.broadcast %cst_9 : f32 to vector<32x128xf32>
    %c0_10 = arith.constant 0 : index
    %c0_11 = arith.constant 0 : index
    %c0_12 = arith.constant 0 : index
    %8 = vector.load %arg1[%c0_10, %c0_11, %c0_12] : memref<1x4x640xf32, #tpu.memory_space<vmem>>, vector<1x1x128xf32>
    %9 = vector.shape_cast %8 : vector<1x1x128xf32> to vector<1x128xf32>
    %10 = vector.extract_strided_slice %0 {offsets = [0, 0], sizes = [32, 1], strides = [1, 1]} : vector<32x5xf32> to vector<32x1xf32>
    %11 = vector.broadcast %10 : vector<32x1xf32> to vector<32x128xf32>
    %12 = vector.broadcast %9 : vector<1x128xf32> to vector<32x128xf32>
    %13 = arith.mulf %11, %12 : vector<32x128xf32>
    %14 = arith.addf %7, %13 : vector<32x128xf32>
    %c0_13 = arith.constant 0 : index
    %c1 = arith.constant 1 : index
    %c0_14 = arith.constant 0 : index
    %15 = vector.load %arg1[%c0_13, %c1, %c0_14] : memref<1x4x640xf32, #tpu.memory_space<vmem>>, vector<1x1x128xf32>
    %16 = vector.shape_cast %15 : vector<1x1x128xf32> to vector<1x128xf32>
    %17 = vector.extract_strided_slice %0 {offsets = [0, 1], sizes = [32, 1], strides = [1, 1]} : vector<32x5xf32> to vector<32x1xf32>
    %18 = vector.broadcast %17 : vector<32x1xf32> to vector<32x128xf32>
    %19 = vector.broadcast %16 : vector<1x128xf32> to vector<32x128xf32>
    %20 = arith.mulf %18, %19 : vector<32x128xf32>
    %21 = arith.addf %14, %20 : vector<32x128xf32>
    %c0_15 = arith.constant 0 : index
    %c2 = arith.constant 2 : index
    %c0_16 = arith.constant 0 : index
    %22 = vector.load %arg1[%c0_15, %c2, %c0_16] : memref<1x4x640xf32, #tpu.memory_space<vmem>>, vector<1x1x128xf32>
    %23 = vector.shape_cast %22 : vector<1x1x128xf32> to vector<1x128xf32>
    %24 = vector.extract_strided_slice %0 {offsets = [0, 2], sizes = [32, 1], strides = [1, 1]} : vector<32x5xf32> to vector<32x1xf32>
    %25 = vector.broadcast %24 : vector<32x1xf32> to vector<32x128xf32>
    %26 = vector.broadcast %23 : vector<1x128xf32> to vector<32x128xf32>
    %27 = arith.mulf %25, %26 : vector<32x128xf32>
    %28 = arith.addf %21, %27 : vector<32x128xf32>
    %c0_17 = arith.constant 0 : index
    %c3 = arith.constant 3 : index
    %c0_18 = arith.constant 0 : index
    %29 = vector.load %arg1[%c0_17, %c3, %c0_18] : memref<1x4x640xf32, #tpu.memory_space<vmem>>, vector<1x1x128xf32>
    %30 = vector.shape_cast %29 : vector<1x1x128xf32> to vector<1x128xf32>
    %31 = vector.extract_strided_slice %0 {offsets = [0, 3], sizes = [32, 1], strides = [1, 1]} : vector<32x5xf32> to vector<32x1xf32>
    %32 = vector.broadcast %31 : vector<32x1xf32> to vector<32x128xf32>
    %33 = vector.broadcast %30 : vector<1x128xf32> to vector<32x128xf32>
    %34 = arith.mulf %32, %33 : vector<32x128xf32>
    %35 = arith.addf %28, %34 : vector<32x128xf32>
    %c0_19 = arith.constant 0 : index
    %c0_20 = arith.constant 0 : index
    %c1_21 = arith.constant 1 : index
    %36 = vector.load %arg1[%c0_19, %c0_20, %c1_21] : memref<1x4x640xf32, #tpu.memory_space<vmem>>, vector<1x1x128xf32>
    %37 = vector.shape_cast %36 : vector<1x1x128xf32> to vector<1x128xf32>
    %38 = vector.extract_strided_slice %0 {offsets = [0, 4], sizes = [32, 1], strides = [1, 1]} : vector<32x5xf32> to vector<32x1xf32>
    %39 = vector.broadcast %38 : vector<32x1xf32> to vector<32x128xf32>
    %40 = vector.broadcast %37 : vector<1x128xf32> to vector<32x128xf32>
    %41 = arith.mulf %39, %40 : vector<32x128xf32>
    %42 = arith.addf %35, %41 : vector<32x128xf32>
    %cst_22 = arith.constant 0.000000e+00 : f32
    %43 = vector.broadcast %cst_22 : f32 to vector<32x128xf32>
    %c0_23 = arith.constant 0 : index
    %c1_24 = arith.constant 1 : index
    %c0_25 = arith.constant 0 : index
    %44 = vector.load %arg1[%c0_23, %c1_24, %c0_25] : memref<1x4x640xf32, #tpu.memory_space<vmem>>, vector<1x1x128xf32>
    %45 = vector.shape_cast %44 : vector<1x1x128xf32> to vector<1x128xf32>
    %46 = vector.extract_strided_slice %0 {offsets = [0, 0], sizes = [32, 1], strides = [1, 1]} : vector<32x5xf32> to vector<32x1xf32>
    %47 = vector.broadcast %46 : vector<32x1xf32> to vector<32x128xf32>
    %48 = vector.broadcast %45 : vector<1x128xf32> to vector<32x128xf32>
    %49 = arith.mulf %47, %48 : vector<32x128xf32>
    %50 = arith.addf %43, %49 : vector<32x128xf32>
    %c0_26 = arith.constant 0 : index
    %c2_27 = arith.constant 2 : index
    %c0_28 = arith.constant 0 : index
    %51 = vector.load %arg1[%c0_26, %c2_27, %c0_28] : memref<1x4x640xf32, #tpu.memory_space<vmem>>, vector<1x1x128xf32>
    %52 = vector.shape_cast %51 : vector<1x1x128xf32> to vector<1x128xf32>
    %53 = vector.extract_strided_slice %0 {offsets = [0, 1], sizes = [32, 1], strides = [1, 1]} : vector<32x5xf32> to vector<32x1xf32>
    %54 = vector.broadcast %53 : vector<32x1xf32> to vector<32x128xf32>
    %55 = vector.broadcast %52 : vector<1x128xf32> to vector<32x128xf32>
    %56 = arith.mulf %54, %55 : vector<32x128xf32>
    %57 = arith.addf %50, %56 : vector<32x128xf32>
    %c0_29 = arith.constant 0 : index
    %c3_30 = arith.constant 3 : index
    %c0_31 = arith.constant 0 : index
    %58 = vector.load %arg1[%c0_29, %c3_30, %c0_31] : memref<1x4x640xf32, #tpu.memory_space<vmem>>, vector<1x1x128xf32>
    %59 = vector.shape_cast %58 : vector<1x1x128xf32> to vector<1x128xf32>
    %60 = vector.extract_strided_slice %0 {offsets = [0, 2], sizes = [32, 1], strides = [1, 1]} : vector<32x5xf32> to vector<32x1xf32>
    %61 = vector.broadcast %60 : vector<32x1xf32> to vector<32x128xf32>
    %62 = vector.broadcast %59 : vector<1x128xf32> to vector<32x128xf32>
    %63 = arith.mulf %61, %62 : vector<32x128xf32>
    %64 = arith.addf %57, %63 : vector<32x128xf32>
    %c0_32 = arith.constant 0 : index
    %c0_33 = arith.constant 0 : index
    %c1_34 = arith.constant 1 : index
    %65 = vector.load %arg1[%c0_32, %c0_33, %c1_34] : memref<1x4x640xf32, #tpu.memory_space<vmem>>, vector<1x1x128xf32>
    %66 = vector.shape_cast %65 : vector<1x1x128xf32> to vector<1x128xf32>
    %67 = vector.extract_strided_slice %0 {offsets = [0, 3], sizes = [32, 1], strides = [1, 1]} : vector<32x5xf32> to vector<32x1xf32>
    %68 = vector.broadcast %67 : vector<32x1xf32> to vector<32x128xf32>
    %69 = vector.broadcast %66 : vector<1x128xf32> to vector<32x128xf32>
    %70 = arith.mulf %68, %69 : vector<32x128xf32>
    %71 = arith.addf %64, %70 : vector<32x128xf32>
    %c0_35 = arith.constant 0 : index
    %c1_36 = arith.constant 1 : index
    %c1_37 = arith.constant 1 : index
    %72 = vector.load %arg1[%c0_35, %c1_36, %c1_37] : memref<1x4x640xf32, #tpu.memory_space<vmem>>, vector<1x1x128xf32>
    %73 = vector.shape_cast %72 : vector<1x1x128xf32> to vector<1x128xf32>
    %74 = vector.extract_strided_slice %0 {offsets = [0, 4], sizes = [32, 1], strides = [1, 1]} : vector<32x5xf32> to vector<32x1xf32>
    %75 = vector.broadcast %74 : vector<32x1xf32> to vector<32x128xf32>
    %76 = vector.broadcast %73 : vector<1x128xf32> to vector<32x128xf32>
    %77 = arith.mulf %75, %76 : vector<32x128xf32>
    %78 = arith.addf %71, %77 : vector<32x128xf32>
    %cst_38 = arith.constant 0.000000e+00 : f32
    %79 = vector.broadcast %cst_38 : f32 to vector<32x128xf32>
    %c0_39 = arith.constant 0 : index
    %c2_40 = arith.constant 2 : index
    %c0_41 = arith.constant 0 : index
    %80 = vector.load %arg1[%c0_39, %c2_40, %c0_41] : memref<1x4x640xf32, #tpu.memory_space<vmem>>, vector<1x1x128xf32>
    %81 = vector.shape_cast %80 : vector<1x1x128xf32> to vector<1x128xf32>
    %82 = vector.extract_strided_slice %0 {offsets = [0, 0], sizes = [32, 1], strides = [1, 1]} : vector<32x5xf32> to vector<32x1xf32>
    %83 = vector.broadcast %82 : vector<32x1xf32> to vector<32x128xf32>
    %84 = vector.broadcast %81 : vector<1x128xf32> to vector<32x128xf32>
    %85 = arith.mulf %83, %84 : vector<32x128xf32>
    %86 = arith.addf %79, %85 : vector<32x128xf32>
    %c0_42 = arith.constant 0 : index
    %c3_43 = arith.constant 3 : index
    %c0_44 = arith.constant 0 : index
    %87 = vector.load %arg1[%c0_42, %c3_43, %c0_44] : memref<1x4x640xf32, #tpu.memory_space<vmem>>, vector<1x1x128xf32>
    %88 = vector.shape_cast %87 : vector<1x1x128xf32> to vector<1x128xf32>
    %89 = vector.extract_strided_slice %0 {offsets = [0, 1], sizes = [32, 1], strides = [1, 1]} : vector<32x5xf32> to vector<32x1xf32>
    %90 = vector.broadcast %89 : vector<32x1xf32> to vector<32x128xf32>
    %91 = vector.broadcast %88 : vector<1x128xf32> to vector<32x128xf32>
    %92 = arith.mulf %90, %91 : vector<32x128xf32>
    %93 = arith.addf %86, %92 : vector<32x128xf32>
    %c0_45 = arith.constant 0 : index
    %c0_46 = arith.constant 0 : index
    %c1_47 = arith.constant 1 : index
    %94 = vector.load %arg1[%c0_45, %c0_46, %c1_47] : memref<1x4x640xf32, #tpu.memory_space<vmem>>, vector<1x1x128xf32>
    %95 = vector.shape_cast %94 : vector<1x1x128xf32> to vector<1x128xf32>
    %96 = vector.extract_strided_slice %0 {offsets = [0, 2], sizes = [32, 1], strides = [1, 1]} : vector<32x5xf32> to vector<32x1xf32>
    %97 = vector.broadcast %96 : vector<32x1xf32> to vector<32x128xf32>
    %98 = vector.broadcast %95 : vector<1x128xf32> to vector<32x128xf32>
    %99 = arith.mulf %97, %98 : vector<32x128xf32>
    %100 = arith.addf %93, %99 : vector<32x128xf32>
    %c0_48 = arith.constant 0 : index
    %c1_49 = arith.constant 1 : index
    %c1_50 = arith.constant 1 : index
    %101 = vector.load %arg1[%c0_48, %c1_49, %c1_50] : memref<1x4x640xf32, #tpu.memory_space<vmem>>, vector<1x1x128xf32>
    %102 = vector.shape_cast %101 : vector<1x1x128xf32> to vector<1x128xf32>
    %103 = vector.extract_strided_slice %0 {offsets = [0, 3], sizes = [32, 1], strides = [1, 1]} : vector<32x5xf32> to vector<32x1xf32>
    %104 = vector.broadcast %103 : vector<32x1xf32> to vector<32x128xf32>
    %105 = vector.broadcast %102 : vector<1x128xf32> to vector<32x128xf32>
    %106 = arith.mulf %104, %105 : vector<32x128xf32>
    %107 = arith.addf %100, %106 : vector<32x128xf32>
    %c0_51 = arith.constant 0 : index
    %c2_52 = arith.constant 2 : index
    %c1_53 = arith.constant 1 : index
    %108 = vector.load %arg1[%c0_51, %c2_52, %c1_53] : memref<1x4x640xf32, #tpu.memory_space<vmem>>, vector<1x1x128xf32>
    %109 = vector.shape_cast %108 : vector<1x1x128xf32> to vector<1x128xf32>
    %110 = vector.extract_strided_slice %0 {offsets = [0, 4], sizes = [32, 1], strides = [1, 1]} : vector<32x5xf32> to vector<32x1xf32>
    %111 = vector.broadcast %110 : vector<32x1xf32> to vector<32x128xf32>
    %112 = vector.broadcast %109 : vector<1x128xf32> to vector<32x128xf32>
    %113 = arith.mulf %111, %112 : vector<32x128xf32>
    %114 = arith.addf %107, %113 : vector<32x128xf32>
    %cst_54 = arith.constant 0.000000e+00 : f32
    %115 = vector.broadcast %cst_54 : f32 to vector<32x128xf32>
    %c0_55 = arith.constant 0 : index
    %c3_56 = arith.constant 3 : index
    %c0_57 = arith.constant 0 : index
    %116 = vector.load %arg1[%c0_55, %c3_56, %c0_57] : memref<1x4x640xf32, #tpu.memory_space<vmem>>, vector<1x1x128xf32>
    %117 = vector.shape_cast %116 : vector<1x1x128xf32> to vector<1x128xf32>
    %118 = vector.extract_strided_slice %0 {offsets = [0, 0], sizes = [32, 1], strides = [1, 1]} : vector<32x5xf32> to vector<32x1xf32>
    %119 = vector.broadcast %118 : vector<32x1xf32> to vector<32x128xf32>
    %120 = vector.broadcast %117 : vector<1x128xf32> to vector<32x128xf32>
    %121 = arith.mulf %119, %120 : vector<32x128xf32>
    %122 = arith.addf %115, %121 : vector<32x128xf32>
    %c0_58 = arith.constant 0 : index
    %c0_59 = arith.constant 0 : index
    %c1_60 = arith.constant 1 : index
    %123 = vector.load %arg1[%c0_58, %c0_59, %c1_60] : memref<1x4x640xf32, #tpu.memory_space<vmem>>, vector<1x1x128xf32>
    %124 = vector.shape_cast %123 : vector<1x1x128xf32> to vector<1x128xf32>
    %125 = vector.extract_strided_slice %0 {offsets = [0, 1], sizes = [32, 1], strides = [1, 1]} : vector<32x5xf32> to vector<32x1xf32>
    %126 = vector.broadcast %125 : vector<32x1xf32> to vector<32x128xf32>
    %127 = vector.broadcast %124 : vector<1x128xf32> to vector<32x128xf32>
    %128 = arith.mulf %126, %127 : vector<32x128xf32>
    %129 = arith.addf %122, %128 : vector<32x128xf32>
    %c0_61 = arith.constant 0 : index
    %c1_62 = arith.constant 1 : index
    %c1_63 = arith.constant 1 : index
    %130 = vector.load %arg1[%c0_61, %c1_62, %c1_63] : memref<1x4x640xf32, #tpu.memory_space<vmem>>, vector<1x1x128xf32>
    %131 = vector.shape_cast %130 : vector<1x1x128xf32> to vector<1x128xf32>
    %132 = vector.extract_strided_slice %0 {offsets = [0, 2], sizes = [32, 1], strides = [1, 1]} : vector<32x5xf32> to vector<32x1xf32>
    %133 = vector.broadcast %132 : vector<32x1xf32> to vector<32x128xf32>
    %134 = vector.broadcast %131 : vector<1x128xf32> to vector<32x128xf32>
    %135 = arith.mulf %133, %134 : vector<32x128xf32>
    %136 = arith.addf %129, %135 : vector<32x128xf32>
    %c0_64 = arith.constant 0 : index
    %c2_65 = arith.constant 2 : index
    %c1_66 = arith.constant 1 : index
    %137 = vector.load %arg1[%c0_64, %c2_65, %c1_66] : memref<1x4x640xf32, #tpu.memory_space<vmem>>, vector<1x1x128xf32>
    %138 = vector.shape_cast %137 : vector<1x1x128xf32> to vector<1x128xf32>
    %139 = vector.extract_strided_slice %0 {offsets = [0, 3], sizes = [32, 1], strides = [1, 1]} : vector<32x5xf32> to vector<32x1xf32>
    %140 = vector.broadcast %139 : vector<32x1xf32> to vector<32x128xf32>
    %141 = vector.broadcast %138 : vector<1x128xf32> to vector<32x128xf32>
    %142 = arith.mulf %140, %141 : vector<32x128xf32>
    %143 = arith.addf %136, %142 : vector<32x128xf32>
    %c0_67 = arith.constant 0 : index
    %c3_68 = arith.constant 3 : index
    %c1_69 = arith.constant 1 : index
    %144 = vector.load %arg1[%c0_67, %c3_68, %c1_69] : memref<1x4x640xf32, #tpu.memory_space<vmem>>, vector<1x1x128xf32>
    %145 = vector.shape_cast %144 : vector<1x1x128xf32> to vector<1x128xf32>
    %146 = vector.extract_strided_slice %0 {offsets = [0, 4], sizes = [32, 1], strides = [1, 1]} : vector<32x5xf32> to vector<32x1xf32>
    %147 = vector.broadcast %146 : vector<32x1xf32> to vector<32x128xf32>
    %148 = vector.broadcast %145 : vector<1x128xf32> to vector<32x128xf32>
    %149 = arith.mulf %147, %148 : vector<32x128xf32>
    %150 = arith.addf %143, %149 : vector<32x128xf32>
    %151 = arith.maximumf %42, %78 : vector<32x128xf32>
    %152 = vector.broadcast %1 : vector<32x1xf32> to vector<32x128xf32>
    %153 = arith.addf %151, %152 : vector<32x128xf32>
    %cst_70 = arith.constant 0.000000e+00 : f32
    %154 = vector.broadcast %cst_70 : f32 to vector<32x128xf32>
    %155 = arith.maximumf %153, %154 : vector<32x128xf32>
    %c0_71 = arith.constant 0 : index
    %c0_72 = arith.constant 0 : index
    %156 = vector.load %arg7[%c0_71, %c0_72] : memref<32x640xf32, #tpu.memory_space<vmem>>, vector<32x128xf32>
    tpu.vector_store %arg7[%c0_71, %c0_72], %155 {strides = array<i32>} : memref<32x640xf32, #tpu.memory_space<vmem>>, vector<32x128xf32>,
    %157 = arith.maximumf %114, %150 : vector<32x128xf32>
    %158 = vector.broadcast %1 : vector<32x1xf32> to vector<32x128xf32>
    %159 = arith.addf %157, %158 : vector<32x128xf32>
    %cst_73 = arith.constant 0.000000e+00 : f32
    %160 = vector.broadcast %cst_73 : f32 to vector<32x128xf32>
    %161 = arith.maximumf %159, %160 : vector<32x128xf32>
    %c0_74 = arith.constant 0 : index
    %c0_75 = arith.constant 0 : index
    %162 = vector.load %arg8[%c0_74, %c0_75] : memref<32x640xf32, #tpu.memory_space<vmem>>, vector<32x128xf32>
    tpu.vector_store %arg8[%c0_74, %c0_75], %161 {strides = array<i32>} : memref<32x640xf32, #tpu.memory_space<vmem>>, vector<32x128xf32>,
    %cst_76 = arith.constant 0.000000e+00 : f32
    %163 = vector.broadcast %cst_76 : f32 to vector<32x128xf32>
    %c0_77 = arith.constant 0 : index
    %c0_78 = arith.constant 0 : index
    %c128 = arith.constant 128 : index
    %164 = vector.load %arg1[%c0_77, %c0_78, %c128] : memref<1x4x640xf32, #tpu.memory_space<vmem>>, vector<1x1x128xf32>
    %165 = vector.shape_cast %164 : vector<1x1x128xf32> to vector<1x128xf32>
    %166 = vector.extract_strided_slice %0 {offsets = [0, 0], sizes = [32, 1], strides = [1, 1]} : vector<32x5xf32> to vector<32x1xf32>
    %167 = vector.broadcast %166 : vector<32x1xf32> to vector<32x128xf32>
    %168 = vector.broadcast %165 : vector<1x128xf32> to vector<32x128xf32>
    %169 = arith.mulf %167, %168 : vector<32x128xf32>
    %170 = arith.addf %163, %169 : vector<32x128xf32>
    %c0_79 = arith.constant 0 : index
    %c1_80 = arith.constant 1 : index
    %c128_81 = arith.constant 128 : index
    %171 = vector.load %arg1[%c0_79, %c1_80, %c128_81] : memref<1x4x640xf32, #tpu.memory_space<vmem>>, vector<1x1x128xf32>
    %172 = vector.shape_cast %171 : vector<1x1x128xf32> to vector<1x128xf32>
    %173 = vector.extract_strided_slice %0 {offsets = [0, 1], sizes = [32, 1], strides = [1, 1]} : vector<32x5xf32> to vector<32x1xf32>
    %174 = vector.broadcast %173 : vector<32x1xf32> to vector<32x128xf32>
    %175 = vector.broadcast %172 : vector<1x128xf32> to vector<32x128xf32>
    %176 = arith.mulf %174, %175 : vector<32x128xf32>
    %177 = arith.addf %170, %176 : vector<32x128xf32>
    %c0_82 = arith.constant 0 : index
    %c2_83 = arith.constant 2 : index
    %c128_84 = arith.constant 128 : index
    %178 = vector.load %arg1[%c0_82, %c2_83, %c128_84] : memref<1x4x640xf32, #tpu.memory_space<vmem>>, vector<1x1x128xf32>
    %179 = vector.shape_cast %178 : vector<1x1x128xf32> to vector<1x128xf32>
    %180 = vector.extract_strided_slice %0 {offsets = [0, 2], sizes = [32, 1], strides = [1, 1]} : vector<32x5xf32> to vector<32x1xf32>
    %181 = vector.broadcast %180 : vector<32x1xf32> to vector<32x128xf32>
    %182 = vector.broadcast %179 : vector<1x128xf32> to vector<32x128xf32>
    %183 = arith.mulf %181, %182 : vector<32x128xf32>
    %184 = arith.addf %177, %183 : vector<32x128xf32>
    %c0_85 = arith.constant 0 : index
    %c3_86 = arith.constant 3 : index
    %c128_87 = arith.constant 128 : index
    %185 = vector.load %arg1[%c0_85, %c3_86, %c128_87] : memref<1x4x640xf32, #tpu.memory_space<vmem>>, vector<1x1x128xf32>
    %186 = vector.shape_cast %185 : vector<1x1x128xf32> to vector<1x128xf32>
    %187 = vector.extract_strided_slice %0 {offsets = [0, 3], sizes = [32, 1], strides = [1, 1]} : vector<32x5xf32> to vector<32x1xf32>
    %188 = vector.broadcast %187 : vector<32x1xf32> to vector<32x128xf32>
    %189 = vector.broadcast %186 : vector<1x128xf32> to vector<32x128xf32>
    %190 = arith.mulf %188, %189 : vector<32x128xf32>
    %191 = arith.addf %184, %190 : vector<32x128xf32>
    %c0_88 = arith.constant 0 : index
    %c0_89 = arith.constant 0 : index
    %c129 = arith.constant 129 : index
    %192 = vector.load %arg1[%c0_88, %c0_89, %c129] : memref<1x4x640xf32, #tpu.memory_space<vmem>>, vector<1x1x128xf32>
    %193 = vector.shape_cast %192 : vector<1x1x128xf32> to vector<1x128xf32>
    %194 = vector.extract_strided_slice %0 {offsets = [0, 4], sizes = [32, 1], strides = [1, 1]} : vector<32x5xf32> to vector<32x1xf32>
    %195 = vector.broadcast %194 : vector<32x1xf32> to vector<32x128xf32>
    %196 = vector.broadcast %193 : vector<1x128xf32> to vector<32x128xf32>
    %197 = arith.mulf %195, %196 : vector<32x128xf32>
    %198 = arith.addf %191, %197 : vector<32x128xf32>
    %cst_90 = arith.constant 0.000000e+00 : f32
    %199 = vector.broadcast %cst_90 : f32 to vector<32x128xf32>
    %c0_91 = arith.constant 0 : index
    %c1_92 = arith.constant 1 : index
    %c128_93 = arith.constant 128 : index
    %200 = vector.load %arg1[%c0_91, %c1_92, %c128_93] : memref<1x4x640xf32, #tpu.memory_space<vmem>>, vector<1x1x128xf32>
    %201 = vector.shape_cast %200 : vector<1x1x128xf32> to vector<1x128xf32>
    %202 = vector.extract_strided_slice %0 {offsets = [0, 0], sizes = [32, 1], strides = [1, 1]} : vector<32x5xf32> to vector<32x1xf32>
    %203 = vector.broadcast %202 : vector<32x1xf32> to vector<32x128xf32>
    %204 = vector.broadcast %201 : vector<1x128xf32> to vector<32x128xf32>
    %205 = arith.mulf %203, %204 : vector<32x128xf32>
    %206 = arith.addf %199, %205 : vector<32x128xf32>
    %c0_94 = arith.constant 0 : index
    %c2_95 = arith.constant 2 : index
    %c128_96 = arith.constant 128 : index
    %207 = vector.load %arg1[%c0_94, %c2_95, %c128_96] : memref<1x4x640xf32, #tpu.memory_space<vmem>>, vector<1x1x128xf32>
    %208 = vector.shape_cast %207 : vector<1x1x128xf32> to vector<1x128xf32>
    %209 = vector.extract_strided_slice %0 {offsets = [0, 1], sizes = [32, 1], strides = [1, 1]} : vector<32x5xf32> to vector<32x1xf32>
    %210 = vector.broadcast %209 : vector<32x1xf32> to vector<32x128xf32>
    %211 = vector.broadcast %208 : vector<1x128xf32> to vector<32x128xf32>
    %212 = arith.mulf %210, %211 : vector<32x128xf32>
    %213 = arith.addf %206, %212 : vector<32x128xf32>
    %c0_97 = arith.constant 0 : index
    %c3_98 = arith.constant 3 : index
    %c128_99 = arith.constant 128 : index
    %214 = vector.load %arg1[%c0_97, %c3_98, %c128_99] : memref<1x4x640xf32, #tpu.memory_space<vmem>>, vector<1x1x128xf32>
    %215 = vector.shape_cast %214 : vector<1x1x128xf32> to vector<1x128xf32>
    %216 = vector.extract_strided_slice %0 {offsets = [0, 2], sizes = [32, 1], strides = [1, 1]} : vector<32x5xf32> to vector<32x1xf32>
    %217 = vector.broadcast %216 : vector<32x1xf32> to vector<32x128xf32>
    %218 = vector.broadcast %215 : vector<1x128xf32> to vector<32x128xf32>
    %219 = arith.mulf %217, %218 : vector<32x128xf32>
    %220 = arith.addf %213, %219 : vector<32x128xf32>
    %c0_100 = arith.constant 0 : index
    %c0_101 = arith.constant 0 : index
    %c129_102 = arith.constant 129 : index
    %221 = vector.load %arg1[%c0_100, %c0_101, %c129_102] : memref<1x4x640xf32, #tpu.memory_space<vmem>>, vector<1x1x128xf32>
    %222 = vector.shape_cast %221 : vector<1x1x128xf32> to vector<1x128xf32>
    %223 = vector.extract_strided_slice %0 {offsets = [0, 3], sizes = [32, 1], strides = [1, 1]} : vector<32x5xf32> to vector<32x1xf32>
    %224 = vector.broadcast %223 : vector<32x1xf32> to vector<32x128xf32>
    %225 = vector.broadcast %222 : vector<1x128xf32> to vector<32x128xf32>
    %226 = arith.mulf %224, %225 : vector<32x128xf32>
    %227 = arith.addf %220, %226 : vector<32x128xf32>
    %c0_103 = arith.constant 0 : index
    %c1_104 = arith.constant 1 : index
    %c129_105 = arith.constant 129 : index
    %228 = vector.load %arg1[%c0_103, %c1_104, %c129_105] : memref<1x4x640xf32, #tpu.memory_space<vmem>>, vector<1x1x128xf32>
    %229 = vector.shape_cast %228 : vector<1x1x128xf32> to vector<1x128xf32>
    %230 = vector.extract_strided_slice %0 {offsets = [0, 4], sizes = [32, 1], strides = [1, 1]} : vector<32x5xf32> to vector<32x1xf32>
    %231 = vector.broadcast %230 : vector<32x1xf32> to vector<32x128xf32>
    %232 = vector.broadcast %229 : vector<1x128xf32> to vector<32x128xf32>
    %233 = arith.mulf %231, %232 : vector<32x128xf32>
    %234 = arith.addf %227, %233 : vector<32x128xf32>
    %cst_106 = arith.constant 0.000000e+00 : f32
    %235 = vector.broadcast %cst_106 : f32 to vector<32x128xf32>
    %c0_107 = arith.constant 0 : index
    %c2_108 = arith.constant 2 : index
    %c128_109 = arith.constant 128 : index
    %236 = vector.load %arg1[%c0_107, %c2_108, %c128_109] : memref<1x4x640xf32, #tpu.memory_space<vmem>>, vector<1x1x128xf32>
    %237 = vector.shape_cast %236 : vector<1x1x128xf32> to vector<1x128xf32>
    %238 = vector.extract_strided_slice %0 {offsets = [0, 0], sizes = [32, 1], strides = [1, 1]} : vector<32x5xf32> to vector<32x1xf32>
    %239 = vector.broadcast %238 : vector<32x1xf32> to vector<32x128xf32>
    %240 = vector.broadcast %237 : vector<1x128xf32> to vector<32x128xf32>
    %241 = arith.mulf %239, %240 : vector<32x128xf32>
    %242 = arith.addf %235, %241 : vector<32x128xf32>
    %c0_110 = arith.constant 0 : index
    %c3_111 = arith.constant 3 : index
    %c128_112 = arith.constant 128 : index
    %243 = vector.load %arg1[%c0_110, %c3_111, %c128_112] : memref<1x4x640xf32, #tpu.memory_space<vmem>>, vector<1x1x128xf32>
    %244 = vector.shape_cast %243 : vector<1x1x128xf32> to vector<1x128xf32>
    %245 = vector.extract_strided_slice %0 {offsets = [0, 1], sizes = [32, 1], strides = [1, 1]} : vector<32x5xf32> to vector<32x1xf32>
    %246 = vector.broadcast %245 : vector<32x1xf32> to vector<32x128xf32>
    %247 = vector.broadcast %244 : vector<1x128xf32> to vector<32x128xf32>
    %248 = arith.mulf %246, %247 : vector<32x128xf32>
    %249 = arith.addf %242, %248 : vector<32x128xf32>
    %c0_113 = arith.constant 0 : index
    %c0_114 = arith.constant 0 : index
    %c129_115 = arith.constant 129 : index
    %250 = vector.load %arg1[%c0_113, %c0_114, %c129_115] : memref<1x4x640xf32, #tpu.memory_space<vmem>>, vector<1x1x128xf32>
    %251 = vector.shape_cast %250 : vector<1x1x128xf32> to vector<1x128xf32>
    %252 = vector.extract_strided_slice %0 {offsets = [0, 2], sizes = [32, 1], strides = [1, 1]} : vector<32x5xf32> to vector<32x1xf32>
    %253 = vector.broadcast %252 : vector<32x1xf32> to vector<32x128xf32>
    %254 = vector.broadcast %251 : vector<1x128xf32> to vector<32x128xf32>
    %255 = arith.mulf %253, %254 : vector<32x128xf32>
    %256 = arith.addf %249, %255 : vector<32x128xf32>
    %c0_116 = arith.constant 0 : index
    %c1_117 = arith.constant 1 : index
    %c129_118 = arith.constant 129 : index
    %257 = vector.load %arg1[%c0_116, %c1_117, %c129_118] : memref<1x4x640xf32, #tpu.memory_space<vmem>>, vector<1x1x128xf32>
    %258 = vector.shape_cast %257 : vector<1x1x128xf32> to vector<1x128xf32>
    %259 = vector.extract_strided_slice %0 {offsets = [0, 3], sizes = [32, 1], strides = [1, 1]} : vector<32x5xf32> to vector<32x1xf32>
    %260 = vector.broadcast %259 : vector<32x1xf32> to vector<32x128xf32>
    %261 = vector.broadcast %258 : vector<1x128xf32> to vector<32x128xf32>
    %262 = arith.mulf %260, %261 : vector<32x128xf32>
    %263 = arith.addf %256, %262 : vector<32x128xf32>
    %c0_119 = arith.constant 0 : index
    %c2_120 = arith.constant 2 : index
    %c129_121 = arith.constant 129 : index
    %264 = vector.load %arg1[%c0_119, %c2_120, %c129_121] : memref<1x4x640xf32, #tpu.memory_space<vmem>>, vector<1x1x128xf32>
    %265 = vector.shape_cast %264 : vector<1x1x128xf32> to vector<1x128xf32>
    %266 = vector.extract_strided_slice %0 {offsets = [0, 4], sizes = [32, 1], strides = [1, 1]} : vector<32x5xf32> to vector<32x1xf32>
    %267 = vector.broadcast %266 : vector<32x1xf32> to vector<32x128xf32>
    %268 = vector.broadcast %265 : vector<1x128xf32> to vector<32x128xf32>
    %269 = arith.mulf %267, %268 : vector<32x128xf32>
    %270 = arith.addf %263, %269 : vector<32x128xf32>
    %cst_122 = arith.constant 0.000000e+00 : f32
    %271 = vector.broadcast %cst_122 : f32 to vector<32x128xf32>
    %c0_123 = arith.constant 0 : index
    %c3_124 = arith.constant 3 : index
    %c128_125 = arith.constant 128 : index
    %272 = vector.load %arg1[%c0_123, %c3_124, %c128_125] : memref<1x4x640xf32, #tpu.memory_space<vmem>>, vector<1x1x128xf32>
    %273 = vector.shape_cast %272 : vector<1x1x128xf32> to vector<1x128xf32>
    %274 = vector.extract_strided_slice %0 {offsets = [0, 0], sizes = [32, 1], strides = [1, 1]} : vector<32x5xf32> to vector<32x1xf32>
    %275 = vector.broadcast %274 : vector<32x1xf32> to vector<32x128xf32>
    %276 = vector.broadcast %273 : vector<1x128xf32> to vector<32x128xf32>
    %277 = arith.mulf %275, %276 : vector<32x128xf32>
    %278 = arith.addf %271, %277 : vector<32x128xf32>
    %c0_126 = arith.constant 0 : index
    %c0_127 = arith.constant 0 : index
    %c129_128 = arith.constant 129 : index
    %279 = vector.load %arg1[%c0_126, %c0_127, %c129_128] : memref<1x4x640xf32, #tpu.memory_space<vmem>>, vector<1x1x128xf32>
    %280 = vector.shape_cast %279 : vector<1x1x128xf32> to vector<1x128xf32>
    %281 = vector.extract_strided_slice %0 {offsets = [0, 1], sizes = [32, 1], strides = [1, 1]} : vector<32x5xf32> to vector<32x1xf32>
    %282 = vector.broadcast %281 : vector<32x1xf32> to vector<32x128xf32>
    %283 = vector.broadcast %280 : vector<1x128xf32> to vector<32x128xf32>
    %284 = arith.mulf %282, %283 : vector<32x128xf32>
    %285 = arith.addf %278, %284 : vector<32x128xf32>
    %c0_129 = arith.constant 0 : index
    %c1_130 = arith.constant 1 : index
    %c129_131 = arith.constant 129 : index
    %286 = vector.load %arg1[%c0_129, %c1_130, %c129_131] : memref<1x4x640xf32, #tpu.memory_space<vmem>>, vector<1x1x128xf32>
    %287 = vector.shape_cast %286 : vector<1x1x128xf32> to vector<1x128xf32>
    %288 = vector.extract_strided_slice %0 {offsets = [0, 2], sizes = [32, 1], strides = [1, 1]} : vector<32x5xf32> to vector<32x1xf32>
    %289 = vector.broadcast %288 : vector<32x1xf32> to vector<32x128xf32>
    %290 = vector.broadcast %287 : vector<1x128xf32> to vector<32x128xf32>
    %291 = arith.mulf %289, %290 : vector<32x128xf32>
    %292 = arith.addf %285, %291 : vector<32x128xf32>
    %c0_132 = arith.constant 0 : index
    %c2_133 = arith.constant 2 : index
    %c129_134 = arith.constant 129 : index
    %293 = vector.load %arg1[%c0_132, %c2_133, %c129_134] : memref<1x4x640xf32, #tpu.memory_space<vmem>>, vector<1x1x128xf32>
    %294 = vector.shape_cast %293 : vector<1x1x128xf32> to vector<1x128xf32>
    %295 = vector.extract_strided_slice %0 {offsets = [0, 3], sizes = [32, 1], strides = [1, 1]} : vector<32x5xf32> to vector<32x1xf32>
    %296 = vector.broadcast %295 : vector<32x1xf32> to vector<32x128xf32>
    %297 = vector.broadcast %294 : vector<1x128xf32> to vector<32x128xf32>
    %298 = arith.mulf %296, %297 : vector<32x128xf32>
    %299 = arith.addf %292, %298 : vector<32x128xf32>
    %c0_135 = arith.constant 0 : index
    %c3_136 = arith.constant 3 : index
    %c129_137 = arith.constant 129 : index
    %300 = vector.load %arg1[%c0_135, %c3_136, %c129_137] : memref<1x4x640xf32, #tpu.memory_space<vmem>>, vector<1x1x128xf32>
    %301 = vector.shape_cast %300 : vector<1x1x128xf32> to vector<1x128xf32>
    %302 = vector.extract_strided_slice %0 {offsets = [0, 4], sizes = [32, 1], strides = [1, 1]} : vector<32x5xf32> to vector<32x1xf32>
    %303 = vector.broadcast %302 : vector<32x1xf32> to vector<32x128xf32>
    %304 = vector.broadcast %301 : vector<1x128xf32> to vector<32x128xf32>
    %305 = arith.mulf %303, %304 : vector<32x128xf32>
    %306 = arith.addf %299, %305 : vector<32x128xf32>
    %307 = arith.maximumf %198, %234 : vector<32x128xf32>
    %308 = vector.broadcast %1 : vector<32x1xf32> to vector<32x128xf32>
    %309 = arith.addf %307, %308 : vector<32x128xf32>
    %cst_138 = arith.constant 0.000000e+00 : f32
    %310 = vector.broadcast %cst_138 : f32 to vector<32x128xf32>
    %311 = arith.maximumf %309, %310 : vector<32x128xf32>
    %c0_139 = arith.constant 0 : index
    %c128_140 = arith.constant 128 : index
    %312 = vector.load %arg7[%c0_139, %c128_140] : memref<32x640xf32, #tpu.memory_space<vmem>>, vector<32x128xf32>
    tpu.vector_store %arg7[%c0_139, %c128_140], %311 {strides = array<i32>} : memref<32x640xf32, #tpu.memory_space<vmem>>, vector<32x128xf32>,
    %313 = arith.maximumf %270, %306 : vector<32x128xf32>
    %314 = vector.broadcast %1 : vector<32x1xf32> to vector<32x128xf32>
    %315 = arith.addf %313, %314 : vector<32x128xf32>
    %cst_141 = arith.constant 0.000000e+00 : f32
    %316 = vector.broadcast %cst_141 : f32 to vector<32x128xf32>
    %317 = arith.maximumf %315, %316 : vector<32x128xf32>
    %c0_142 = arith.constant 0 : index
    %c128_143 = arith.constant 128 : index
    %318 = vector.load %arg8[%c0_142, %c128_143] : memref<32x640xf32, #tpu.memory_space<vmem>>, vector<32x128xf32>
    tpu.vector_store %arg8[%c0_142, %c128_143], %317 {strides = array<i32>} : memref<32x640xf32, #tpu.memory_space<vmem>>, vector<32x128xf32>,
    %cst_144 = arith.constant 0.000000e+00 : f32
    %319 = vector.broadcast %cst_144 : f32 to vector<32x128xf32>
    %c0_145 = arith.constant 0 : index
    %c0_146 = arith.constant 0 : index
    %c256 = arith.constant 256 : index
    %320 = vector.load %arg1[%c0_145, %c0_146, %c256] : memref<1x4x640xf32, #tpu.memory_space<vmem>>, vector<1x1x128xf32>
    %321 = vector.shape_cast %320 : vector<1x1x128xf32> to vector<1x128xf32>
    %322 = vector.extract_strided_slice %0 {offsets = [0, 0], sizes = [32, 1], strides = [1, 1]} : vector<32x5xf32> to vector<32x1xf32>
    %323 = vector.broadcast %322 : vector<32x1xf32> to vector<32x128xf32>
    %324 = vector.broadcast %321 : vector<1x128xf32> to vector<32x128xf32>
    %325 = arith.mulf %323, %324 : vector<32x128xf32>
    %326 = arith.addf %319, %325 : vector<32x128xf32>
    %c0_147 = arith.constant 0 : index
    %c1_148 = arith.constant 1 : index
    %c256_149 = arith.constant 256 : index
    %327 = vector.load %arg1[%c0_147, %c1_148, %c256_149] : memref<1x4x640xf32, #tpu.memory_space<vmem>>, vector<1x1x128xf32>
    %328 = vector.shape_cast %327 : vector<1x1x128xf32> to vector<1x128xf32>
    %329 = vector.extract_strided_slice %0 {offsets = [0, 1], sizes = [32, 1], strides = [1, 1]} : vector<32x5xf32> to vector<32x1xf32>
    %330 = vector.broadcast %329 : vector<32x1xf32> to vector<32x128xf32>
    %331 = vector.broadcast %328 : vector<1x128xf32> to vector<32x128xf32>
    %332 = arith.mulf %330, %331 : vector<32x128xf32>
    %333 = arith.addf %326, %332 : vector<32x128xf32>
    %c0_150 = arith.constant 0 : index
    %c2_151 = arith.constant 2 : index
    %c256_152 = arith.constant 256 : index
    %334 = vector.load %arg1[%c0_150, %c2_151, %c256_152] : memref<1x4x640xf32, #tpu.memory_space<vmem>>, vector<1x1x128xf32>
    %335 = vector.shape_cast %334 : vector<1x1x128xf32> to vector<1x128xf32>
    %336 = vector.extract_strided_slice %0 {offsets = [0, 2], sizes = [32, 1], strides = [1, 1]} : vector<32x5xf32> to vector<32x1xf32>
    %337 = vector.broadcast %336 : vector<32x1xf32> to vector<32x128xf32>
    %338 = vector.broadcast %335 : vector<1x128xf32> to vector<32x128xf32>
    %339 = arith.mulf %337, %338 : vector<32x128xf32>
    %340 = arith.addf %333, %339 : vector<32x128xf32>
    %c0_153 = arith.constant 0 : index
    %c3_154 = arith.constant 3 : index
    %c256_155 = arith.constant 256 : index
    %341 = vector.load %arg1[%c0_153, %c3_154, %c256_155] : memref<1x4x640xf32, #tpu.memory_space<vmem>>, vector<1x1x128xf32>
    %342 = vector.shape_cast %341 : vector<1x1x128xf32> to vector<1x128xf32>
    %343 = vector.extract_strided_slice %0 {offsets = [0, 3], sizes = [32, 1], strides = [1, 1]} : vector<32x5xf32> to vector<32x1xf32>
    %344 = vector.broadcast %343 : vector<32x1xf32> to vector<32x128xf32>
    %345 = vector.broadcast %342 : vector<1x128xf32> to vector<32x128xf32>
    %346 = arith.mulf %344, %345 : vector<32x128xf32>
    %347 = arith.addf %340, %346 : vector<32x128xf32>
    %c0_156 = arith.constant 0 : index
    %c0_157 = arith.constant 0 : index
    %c257 = arith.constant 257 : index
    %348 = vector.load %arg1[%c0_156, %c0_157, %c257] : memref<1x4x640xf32, #tpu.memory_space<vmem>>, vector<1x1x128xf32>
    %349 = vector.shape_cast %348 : vector<1x1x128xf32> to vector<1x128xf32>
    %350 = vector.extract_strided_slice %0 {offsets = [0, 4], sizes = [32, 1], strides = [1, 1]} : vector<32x5xf32> to vector<32x1xf32>
    %351 = vector.broadcast %350 : vector<32x1xf32> to vector<32x128xf32>
    %352 = vector.broadcast %349 : vector<1x128xf32> to vector<32x128xf32>
    %353 = arith.mulf %351, %352 : vector<32x128xf32>
    %354 = arith.addf %347, %353 : vector<32x128xf32>
    %cst_158 = arith.constant 0.000000e+00 : f32
    %355 = vector.broadcast %cst_158 : f32 to vector<32x128xf32>
    %c0_159 = arith.constant 0 : index
    %c1_160 = arith.constant 1 : index
    %c256_161 = arith.constant 256 : index
    %356 = vector.load %arg1[%c0_159, %c1_160, %c256_161] : memref<1x4x640xf32, #tpu.memory_space<vmem>>, vector<1x1x128xf32>
    %357 = vector.shape_cast %356 : vector<1x1x128xf32> to vector<1x128xf32>
    %358 = vector.extract_strided_slice %0 {offsets = [0, 0], sizes = [32, 1], strides = [1, 1]} : vector<32x5xf32> to vector<32x1xf32>
    %359 = vector.broadcast %358 : vector<32x1xf32> to vector<32x128xf32>
    %360 = vector.broadcast %357 : vector<1x128xf32> to vector<32x128xf32>
    %361 = arith.mulf %359, %360 : vector<32x128xf32>
    %362 = arith.addf %355, %361 : vector<32x128xf32>
    %c0_162 = arith.constant 0 : index
    %c2_163 = arith.constant 2 : index
    %c256_164 = arith.constant 256 : index
    %363 = vector.load %arg1[%c0_162, %c2_163, %c256_164] : memref<1x4x640xf32, #tpu.memory_space<vmem>>, vector<1x1x128xf32>
    %364 = vector.shape_cast %363 : vector<1x1x128xf32> to vector<1x128xf32>
    %365 = vector.extract_strided_slice %0 {offsets = [0, 1], sizes = [32, 1], strides = [1, 1]} : vector<32x5xf32> to vector<32x1xf32>
    %366 = vector.broadcast %365 : vector<32x1xf32> to vector<32x128xf32>
    %367 = vector.broadcast %364 : vector<1x128xf32> to vector<32x128xf32>
    %368 = arith.mulf %366, %367 : vector<32x128xf32>
    %369 = arith.addf %362, %368 : vector<32x128xf32>
    %c0_165 = arith.constant 0 : index
    %c3_166 = arith.constant 3 : index
    %c256_167 = arith.constant 256 : index
    %370 = vector.load %arg1[%c0_165, %c3_166, %c256_167] : memref<1x4x640xf32, #tpu.memory_space<vmem>>, vector<1x1x128xf32>
    %371 = vector.shape_cast %370 : vector<1x1x128xf32> to vector<1x128xf32>
    %372 = vector.extract_strided_slice %0 {offsets = [0, 2], sizes = [32, 1], strides = [1, 1]} : vector<32x5xf32> to vector<32x1xf32>
    %373 = vector.broadcast %372 : vector<32x1xf32> to vector<32x128xf32>
    %374 = vector.broadcast %371 : vector<1x128xf32> to vector<32x128xf32>
    %375 = arith.mulf %373, %374 : vector<32x128xf32>
    %376 = arith.addf %369, %375 : vector<32x128xf32>
    %c0_168 = arith.constant 0 : index
    %c0_169 = arith.constant 0 : index
    %c257_170 = arith.constant 257 : index
    %377 = vector.load %arg1[%c0_168, %c0_169, %c257_170] : memref<1x4x640xf32, #tpu.memory_space<vmem>>, vector<1x1x128xf32>
    %378 = vector.shape_cast %377 : vector<1x1x128xf32> to vector<1x128xf32>
    %379 = vector.extract_strided_slice %0 {offsets = [0, 3], sizes = [32, 1], strides = [1, 1]} : vector<32x5xf32> to vector<32x1xf32>
    %380 = vector.broadcast %379 : vector<32x1xf32> to vector<32x128xf32>
    %381 = vector.broadcast %378 : vector<1x128xf32> to vector<32x128xf32>
    %382 = arith.mulf %380, %381 : vector<32x128xf32>
    %383 = arith.addf %376, %382 : vector<32x128xf32>
    %c0_171 = arith.constant 0 : index
    %c1_172 = arith.constant 1 : index
    %c257_173 = arith.constant 257 : index
    %384 = vector.load %arg1[%c0_171, %c1_172, %c257_173] : memref<1x4x640xf32, #tpu.memory_space<vmem>>, vector<1x1x128xf32>
    %385 = vector.shape_cast %384 : vector<1x1x128xf32> to vector<1x128xf32>
    %386 = vector.extract_strided_slice %0 {offsets = [0, 4], sizes = [32, 1], strides = [1, 1]} : vector<32x5xf32> to vector<32x1xf32>
    %387 = vector.broadcast %386 : vector<32x1xf32> to vector<32x128xf32>
    %388 = vector.broadcast %385 : vector<1x128xf32> to vector<32x128xf32>
    %389 = arith.mulf %387, %388 : vector<32x128xf32>
    %390 = arith.addf %383, %389 : vector<32x128xf32>
    %cst_174 = arith.constant 0.000000e+00 : f32
    %391 = vector.broadcast %cst_174 : f32 to vector<32x128xf32>
    %c0_175 = arith.constant 0 : index
    %c2_176 = arith.constant 2 : index
    %c256_177 = arith.constant 256 : index
    %392 = vector.load %arg1[%c0_175, %c2_176, %c256_177] : memref<1x4x640xf32, #tpu.memory_space<vmem>>, vector<1x1x128xf32>
    %393 = vector.shape_cast %392 : vector<1x1x128xf32> to vector<1x128xf32>
    %394 = vector.extract_strided_slice %0 {offsets = [0, 0], sizes = [32, 1], strides = [1, 1]} : vector<32x5xf32> to vector<32x1xf32>
    %395 = vector.broadcast %394 : vector<32x1xf32> to vector<32x128xf32>
    %396 = vector.broadcast %393 : vector<1x128xf32> to vector<32x128xf32>
    %397 = arith.mulf %395, %396 : vector<32x128xf32>
    %398 = arith.addf %391, %397 : vector<32x128xf32>
    %c0_178 = arith.constant 0 : index
    %c3_179 = arith.constant 3 : index
    %c256_180 = arith.constant 256 : index
    %399 = vector.load %arg1[%c0_178, %c3_179, %c256_180] : memref<1x4x640xf32, #tpu.memory_space<vmem>>, vector<1x1x128xf32>
    %400 = vector.shape_cast %399 : vector<1x1x128xf32> to vector<1x128xf32>
    %401 = vector.extract_strided_slice %0 {offsets = [0, 1], sizes = [32, 1], strides = [1, 1]} : vector<32x5xf32> to vector<32x1xf32>
    %402 = vector.broadcast %401 : vector<32x1xf32> to vector<32x128xf32>
    %403 = vector.broadcast %400 : vector<1x128xf32> to vector<32x128xf32>
    %404 = arith.mulf %402, %403 : vector<32x128xf32>
    %405 = arith.addf %398, %404 : vector<32x128xf32>
    %c0_181 = arith.constant 0 : index
    %c0_182 = arith.constant 0 : index
    %c257_183 = arith.constant 257 : index
    %406 = vector.load %arg1[%c0_181, %c0_182, %c257_183] : memref<1x4x640xf32, #tpu.memory_space<vmem>>, vector<1x1x128xf32>
    %407 = vector.shape_cast %406 : vector<1x1x128xf32> to vector<1x128xf32>
    %408 = vector.extract_strided_slice %0 {offsets = [0, 2], sizes = [32, 1], strides = [1, 1]} : vector<32x5xf32> to vector<32x1xf32>
    %409 = vector.broadcast %408 : vector<32x1xf32> to vector<32x128xf32>
    %410 = vector.broadcast %407 : vector<1x128xf32> to vector<32x128xf32>
    %411 = arith.mulf %409, %410 : vector<32x128xf32>
    %412 = arith.addf %405, %411 : vector<32x128xf32>
    %c0_184 = arith.constant 0 : index
    %c1_185 = arith.constant 1 : index
    %c257_186 = arith.constant 257 : index
    %413 = vector.load %arg1[%c0_184, %c1_185, %c257_186] : memref<1x4x640xf32, #tpu.memory_space<vmem>>, vector<1x1x128xf32>
    %414 = vector.shape_cast %413 : vector<1x1x128xf32> to vector<1x128xf32>
    %415 = vector.extract_strided_slice %0 {offsets = [0, 3], sizes = [32, 1], strides = [1, 1]} : vector<32x5xf32> to vector<32x1xf32>
    %416 = vector.broadcast %415 : vector<32x1xf32> to vector<32x128xf32>
    %417 = vector.broadcast %414 : vector<1x128xf32> to vector<32x128xf32>
    %418 = arith.mulf %416, %417 : vector<32x128xf32>
    %419 = arith.addf %412, %418 : vector<32x128xf32>
    %c0_187 = arith.constant 0 : index
    %c2_188 = arith.constant 2 : index
    %c257_189 = arith.constant 257 : index
    %420 = vector.load %arg1[%c0_187, %c2_188, %c257_189] : memref<1x4x640xf32, #tpu.memory_space<vmem>>, vector<1x1x128xf32>
    %421 = vector.shape_cast %420 : vector<1x1x128xf32> to vector<1x128xf32>
    %422 = vector.extract_strided_slice %0 {offsets = [0, 4], sizes = [32, 1], strides = [1, 1]} : vector<32x5xf32> to vector<32x1xf32>
    %423 = vector.broadcast %422 : vector<32x1xf32> to vector<32x128xf32>
    %424 = vector.broadcast %421 : vector<1x128xf32> to vector<32x128xf32>
    %425 = arith.mulf %423, %424 : vector<32x128xf32>
    %426 = arith.addf %419, %425 : vector<32x128xf32>
    %cst_190 = arith.constant 0.000000e+00 : f32
    %427 = vector.broadcast %cst_190 : f32 to vector<32x128xf32>
    %c0_191 = arith.constant 0 : index
    %c3_192 = arith.constant 3 : index
    %c256_193 = arith.constant 256 : index
    %428 = vector.load %arg1[%c0_191, %c3_192, %c256_193] : memref<1x4x640xf32, #tpu.memory_space<vmem>>, vector<1x1x128xf32>
    %429 = vector.shape_cast %428 : vector<1x1x128xf32> to vector<1x128xf32>
    %430 = vector.extract_strided_slice %0 {offsets = [0, 0], sizes = [32, 1], strides = [1, 1]} : vector<32x5xf32> to vector<32x1xf32>
    %431 = vector.broadcast %430 : vector<32x1xf32> to vector<32x128xf32>
    %432 = vector.broadcast %429 : vector<1x128xf32> to vector<32x128xf32>
    %433 = arith.mulf %431, %432 : vector<32x128xf32>
    %434 = arith.addf %427, %433 : vector<32x128xf32>
    %c0_194 = arith.constant 0 : index
    %c0_195 = arith.constant 0 : index
    %c257_196 = arith.constant 257 : index
    %435 = vector.load %arg1[%c0_194, %c0_195, %c257_196] : memref<1x4x640xf32, #tpu.memory_space<vmem>>, vector<1x1x128xf32>
    %436 = vector.shape_cast %435 : vector<1x1x128xf32> to vector<1x128xf32>
    %437 = vector.extract_strided_slice %0 {offsets = [0, 1], sizes = [32, 1], strides = [1, 1]} : vector<32x5xf32> to vector<32x1xf32>
    %438 = vector.broadcast %437 : vector<32x1xf32> to vector<32x128xf32>
    %439 = vector.broadcast %436 : vector<1x128xf32> to vector<32x128xf32>
    %440 = arith.mulf %438, %439 : vector<32x128xf32>
    %441 = arith.addf %434, %440 : vector<32x128xf32>
    %c0_197 = arith.constant 0 : index
    %c1_198 = arith.constant 1 : index
    %c257_199 = arith.constant 257 : index
    %442 = vector.load %arg1[%c0_197, %c1_198, %c257_199] : memref<1x4x640xf32, #tpu.memory_space<vmem>>, vector<1x1x128xf32>
    %443 = vector.shape_cast %442 : vector<1x1x128xf32> to vector<1x128xf32>
    %444 = vector.extract_strided_slice %0 {offsets = [0, 2], sizes = [32, 1], strides = [1, 1]} : vector<32x5xf32> to vector<32x1xf32>
    %445 = vector.broadcast %444 : vector<32x1xf32> to vector<32x128xf32>
    %446 = vector.broadcast %443 : vector<1x128xf32> to vector<32x128xf32>
    %447 = arith.mulf %445, %446 : vector<32x128xf32>
    %448 = arith.addf %441, %447 : vector<32x128xf32>
    %c0_200 = arith.constant 0 : index
    %c2_201 = arith.constant 2 : index
    %c257_202 = arith.constant 257 : index
    %449 = vector.load %arg1[%c0_200, %c2_201, %c257_202] : memref<1x4x640xf32, #tpu.memory_space<vmem>>, vector<1x1x128xf32>
    %450 = vector.shape_cast %449 : vector<1x1x128xf32> to vector<1x128xf32>
    %451 = vector.extract_strided_slice %0 {offsets = [0, 3], sizes = [32, 1], strides = [1, 1]} : vector<32x5xf32> to vector<32x1xf32>
    %452 = vector.broadcast %451 : vector<32x1xf32> to vector<32x128xf32>
    %453 = vector.broadcast %450 : vector<1x128xf32> to vector<32x128xf32>
    %454 = arith.mulf %452, %453 : vector<32x128xf32>
    %455 = arith.addf %448, %454 : vector<32x128xf32>
    %c0_203 = arith.constant 0 : index
    %c3_204 = arith.constant 3 : index
    %c257_205 = arith.constant 257 : index
    %456 = vector.load %arg1[%c0_203, %c3_204, %c257_205] : memref<1x4x640xf32, #tpu.memory_space<vmem>>, vector<1x1x128xf32>
    %457 = vector.shape_cast %456 : vector<1x1x128xf32> to vector<1x128xf32>
    %458 = vector.extract_strided_slice %0 {offsets = [0, 4], sizes = [32, 1], strides = [1, 1]} : vector<32x5xf32> to vector<32x1xf32>
    %459 = vector.broadcast %458 : vector<32x1xf32> to vector<32x128xf32>
    %460 = vector.broadcast %457 : vector<1x128xf32> to vector<32x128xf32>
    %461 = arith.mulf %459, %460 : vector<32x128xf32>
    %462 = arith.addf %455, %461 : vector<32x128xf32>
    %463 = arith.maximumf %354, %390 : vector<32x128xf32>
    %464 = vector.broadcast %1 : vector<32x1xf32> to vector<32x128xf32>
    %465 = arith.addf %463, %464 : vector<32x128xf32>
    %cst_206 = arith.constant 0.000000e+00 : f32
    %466 = vector.broadcast %cst_206 : f32 to vector<32x128xf32>
    %467 = arith.maximumf %465, %466 : vector<32x128xf32>
    %c0_207 = arith.constant 0 : index
    %c256_208 = arith.constant 256 : index
    %468 = vector.load %arg7[%c0_207, %c256_208] : memref<32x640xf32, #tpu.memory_space<vmem>>, vector<32x128xf32>
    tpu.vector_store %arg7[%c0_207, %c256_208], %467 {strides = array<i32>} : memref<32x640xf32, #tpu.memory_space<vmem>>, vector<32x128xf32>,
    %469 = arith.maximumf %426, %462 : vector<32x128xf32>
    %470 = vector.broadcast %1 : vector<32x1xf32> to vector<32x128xf32>
    %471 = arith.addf %469, %470 : vector<32x128xf32>
    %cst_209 = arith.constant 0.000000e+00 : f32
    %472 = vector.broadcast %cst_209 : f32 to vector<32x128xf32>
    %473 = arith.maximumf %471, %472 : vector<32x128xf32>
    %c0_210 = arith.constant 0 : index
    %c256_211 = arith.constant 256 : index
    %474 = vector.load %arg8[%c0_210, %c256_211] : memref<32x640xf32, #tpu.memory_space<vmem>>, vector<32x128xf32>
    tpu.vector_store %arg8[%c0_210, %c256_211], %473 {strides = array<i32>} : memref<32x640xf32, #tpu.memory_space<vmem>>, vector<32x128xf32>,
    %cst_212 = arith.constant 0.000000e+00 : f32
    %475 = vector.broadcast %cst_212 : f32 to vector<32x128xf32>
    %c0_213 = arith.constant 0 : index
    %c0_214 = arith.constant 0 : index
    %c384 = arith.constant 384 : index
    %476 = vector.load %arg1[%c0_213, %c0_214, %c384] : memref<1x4x640xf32, #tpu.memory_space<vmem>>, vector<1x1x128xf32>
    %477 = vector.shape_cast %476 : vector<1x1x128xf32> to vector<1x128xf32>
    %478 = vector.extract_strided_slice %0 {offsets = [0, 0], sizes = [32, 1], strides = [1, 1]} : vector<32x5xf32> to vector<32x1xf32>
    %479 = vector.broadcast %478 : vector<32x1xf32> to vector<32x128xf32>
    %480 = vector.broadcast %477 : vector<1x128xf32> to vector<32x128xf32>
    %481 = arith.mulf %479, %480 : vector<32x128xf32>
    %482 = arith.addf %475, %481 : vector<32x128xf32>
    %c0_215 = arith.constant 0 : index
    %c1_216 = arith.constant 1 : index
    %c384_217 = arith.constant 384 : index
    %483 = vector.load %arg1[%c0_215, %c1_216, %c384_217] : memref<1x4x640xf32, #tpu.memory_space<vmem>>, vector<1x1x128xf32>
    %484 = vector.shape_cast %483 : vector<1x1x128xf32> to vector<1x128xf32>
    %485 = vector.extract_strided_slice %0 {offsets = [0, 1], sizes = [32, 1], strides = [1, 1]} : vector<32x5xf32> to vector<32x1xf32>
    %486 = vector.broadcast %485 : vector<32x1xf32> to vector<32x128xf32>
    %487 = vector.broadcast %484 : vector<1x128xf32> to vector<32x128xf32>
    %488 = arith.mulf %486, %487 : vector<32x128xf32>
    %489 = arith.addf %482, %488 : vector<32x128xf32>
    %c0_218 = arith.constant 0 : index
    %c2_219 = arith.constant 2 : index
    %c384_220 = arith.constant 384 : index
    %490 = vector.load %arg1[%c0_218, %c2_219, %c384_220] : memref<1x4x640xf32, #tpu.memory_space<vmem>>, vector<1x1x128xf32>
    %491 = vector.shape_cast %490 : vector<1x1x128xf32> to vector<1x128xf32>
    %492 = vector.extract_strided_slice %0 {offsets = [0, 2], sizes = [32, 1], strides = [1, 1]} : vector<32x5xf32> to vector<32x1xf32>
    %493 = vector.broadcast %492 : vector<32x1xf32> to vector<32x128xf32>
    %494 = vector.broadcast %491 : vector<1x128xf32> to vector<32x128xf32>
    %495 = arith.mulf %493, %494 : vector<32x128xf32>
    %496 = arith.addf %489, %495 : vector<32x128xf32>
    %c0_221 = arith.constant 0 : index
    %c3_222 = arith.constant 3 : index
    %c384_223 = arith.constant 384 : index
    %497 = vector.load %arg1[%c0_221, %c3_222, %c384_223] : memref<1x4x640xf32, #tpu.memory_space<vmem>>, vector<1x1x128xf32>
    %498 = vector.shape_cast %497 : vector<1x1x128xf32> to vector<1x128xf32>
    %499 = vector.extract_strided_slice %0 {offsets = [0, 3], sizes = [32, 1], strides = [1, 1]} : vector<32x5xf32> to vector<32x1xf32>
    %500 = vector.broadcast %499 : vector<32x1xf32> to vector<32x128xf32>
    %501 = vector.broadcast %498 : vector<1x128xf32> to vector<32x128xf32>
    %502 = arith.mulf %500, %501 : vector<32x128xf32>
    %503 = arith.addf %496, %502 : vector<32x128xf32>
    %c0_224 = arith.constant 0 : index
    %c0_225 = arith.constant 0 : index
    %c385 = arith.constant 385 : index
    %504 = vector.load %arg1[%c0_224, %c0_225, %c385] : memref<1x4x640xf32, #tpu.memory_space<vmem>>, vector<1x1x128xf32>
    %505 = vector.shape_cast %504 : vector<1x1x128xf32> to vector<1x128xf32>
    %506 = vector.extract_strided_slice %0 {offsets = [0, 4], sizes = [32, 1], strides = [1, 1]} : vector<32x5xf32> to vector<32x1xf32>
    %507 = vector.broadcast %506 : vector<32x1xf32> to vector<32x128xf32>
    %508 = vector.broadcast %505 : vector<1x128xf32> to vector<32x128xf32>
    %509 = arith.mulf %507, %508 : vector<32x128xf32>
    %510 = arith.addf %503, %509 : vector<32x128xf32>
    %cst_226 = arith.constant 0.000000e+00 : f32
    %511 = vector.broadcast %cst_226 : f32 to vector<32x128xf32>
    %c0_227 = arith.constant 0 : index
    %c1_228 = arith.constant 1 : index
    %c384_229 = arith.constant 384 : index
    %512 = vector.load %arg1[%c0_227, %c1_228, %c384_229] : memref<1x4x640xf32, #tpu.memory_space<vmem>>, vector<1x1x128xf32>
    %513 = vector.shape_cast %512 : vector<1x1x128xf32> to vector<1x128xf32>
    %514 = vector.extract_strided_slice %0 {offsets = [0, 0], sizes = [32, 1], strides = [1, 1]} : vector<32x5xf32> to vector<32x1xf32>
    %515 = vector.broadcast %514 : vector<32x1xf32> to vector<32x128xf32>
    %516 = vector.broadcast %513 : vector<1x128xf32> to vector<32x128xf32>
    %517 = arith.mulf %515, %516 : vector<32x128xf32>
    %518 = arith.addf %511, %517 : vector<32x128xf32>
    %c0_230 = arith.constant 0 : index
    %c2_231 = arith.constant 2 : index
    %c384_232 = arith.constant 384 : index
    %519 = vector.load %arg1[%c0_230, %c2_231, %c384_232] : memref<1x4x640xf32, #tpu.memory_space<vmem>>, vector<1x1x128xf32>
    %520 = vector.shape_cast %519 : vector<1x1x128xf32> to vector<1x128xf32>
    %521 = vector.extract_strided_slice %0 {offsets = [0, 1], sizes = [32, 1], strides = [1, 1]} : vector<32x5xf32> to vector<32x1xf32>
    %522 = vector.broadcast %521 : vector<32x1xf32> to vector<32x128xf32>
    %523 = vector.broadcast %520 : vector<1x128xf32> to vector<32x128xf32>
    %524 = arith.mulf %522, %523 : vector<32x128xf32>
    %525 = arith.addf %518, %524 : vector<32x128xf32>
    %c0_233 = arith.constant 0 : index
    %c3_234 = arith.constant 3 : index
    %c384_235 = arith.constant 384 : index
    %526 = vector.load %arg1[%c0_233, %c3_234, %c384_235] : memref<1x4x640xf32, #tpu.memory_space<vmem>>, vector<1x1x128xf32>
    %527 = vector.shape_cast %526 : vector<1x1x128xf32> to vector<1x128xf32>
    %528 = vector.extract_strided_slice %0 {offsets = [0, 2], sizes = [32, 1], strides = [1, 1]} : vector<32x5xf32> to vector<32x1xf32>
    %529 = vector.broadcast %528 : vector<32x1xf32> to vector<32x128xf32>
    %530 = vector.broadcast %527 : vector<1x128xf32> to vector<32x128xf32>
    %531 = arith.mulf %529, %530 : vector<32x128xf32>
    %532 = arith.addf %525, %531 : vector<32x128xf32>
    %c0_236 = arith.constant 0 : index
    %c0_237 = arith.constant 0 : index
    %c385_238 = arith.constant 385 : index
    %533 = vector.load %arg1[%c0_236, %c0_237, %c385_238] : memref<1x4x640xf32, #tpu.memory_space<vmem>>, vector<1x1x128xf32>
    %534 = vector.shape_cast %533 : vector<1x1x128xf32> to vector<1x128xf32>
    %535 = vector.extract_strided_slice %0 {offsets = [0, 3], sizes = [32, 1], strides = [1, 1]} : vector<32x5xf32> to vector<32x1xf32>
    %536 = vector.broadcast %535 : vector<32x1xf32> to vector<32x128xf32>
    %537 = vector.broadcast %534 : vector<1x128xf32> to vector<32x128xf32>
    %538 = arith.mulf %536, %537 : vector<32x128xf32>
    %539 = arith.addf %532, %538 : vector<32x128xf32>
    %c0_239 = arith.constant 0 : index
    %c1_240 = arith.constant 1 : index
    %c385_241 = arith.constant 385 : index
    %540 = vector.load %arg1[%c0_239, %c1_240, %c385_241] : memref<1x4x640xf32, #tpu.memory_space<vmem>>, vector<1x1x128xf32>
    %541 = vector.shape_cast %540 : vector<1x1x128xf32> to vector<1x128xf32>
    %542 = vector.extract_strided_slice %0 {offsets = [0, 4], sizes = [32, 1], strides = [1, 1]} : vector<32x5xf32> to vector<32x1xf32>
    %543 = vector.broadcast %542 : vector<32x1xf32> to vector<32x128xf32>
    %544 = vector.broadcast %541 : vector<1x128xf32> to vector<32x128xf32>
    %545 = arith.mulf %543, %544 : vector<32x128xf32>
    %546 = arith.addf %539, %545 : vector<32x128xf32>
    %cst_242 = arith.constant 0.000000e+00 : f32
    %547 = vector.broadcast %cst_242 : f32 to vector<32x128xf32>
    %c0_243 = arith.constant 0 : index
    %c2_244 = arith.constant 2 : index
    %c384_245 = arith.constant 384 : index
    %548 = vector.load %arg1[%c0_243, %c2_244, %c384_245] : memref<1x4x640xf32, #tpu.memory_space<vmem>>, vector<1x1x128xf32>
    %549 = vector.shape_cast %548 : vector<1x1x128xf32> to vector<1x128xf32>
    %550 = vector.extract_strided_slice %0 {offsets = [0, 0], sizes = [32, 1], strides = [1, 1]} : vector<32x5xf32> to vector<32x1xf32>
    %551 = vector.broadcast %550 : vector<32x1xf32> to vector<32x128xf32>
    %552 = vector.broadcast %549 : vector<1x128xf32> to vector<32x128xf32>
    %553 = arith.mulf %551, %552 : vector<32x128xf32>
    %554 = arith.addf %547, %553 : vector<32x128xf32>
    %c0_246 = arith.constant 0 : index
    %c3_247 = arith.constant 3 : index
    %c384_248 = arith.constant 384 : index
    %555 = vector.load %arg1[%c0_246, %c3_247, %c384_248] : memref<1x4x640xf32, #tpu.memory_space<vmem>>, vector<1x1x128xf32>
    %556 = vector.shape_cast %555 : vector<1x1x128xf32> to vector<1x128xf32>
    %557 = vector.extract_strided_slice %0 {offsets = [0, 1], sizes = [32, 1], strides = [1, 1]} : vector<32x5xf32> to vector<32x1xf32>
    %558 = vector.broadcast %557 : vector<32x1xf32> to vector<32x128xf32>
    %559 = vector.broadcast %556 : vector<1x128xf32> to vector<32x128xf32>
    %560 = arith.mulf %558, %559 : vector<32x128xf32>
    %561 = arith.addf %554, %560 : vector<32x128xf32>
    %c0_249 = arith.constant 0 : index
    %c0_250 = arith.constant 0 : index
    %c385_251 = arith.constant 385 : index
    %562 = vector.load %arg1[%c0_249, %c0_250, %c385_251] : memref<1x4x640xf32, #tpu.memory_space<vmem>>, vector<1x1x128xf32>
    %563 = vector.shape_cast %562 : vector<1x1x128xf32> to vector<1x128xf32>
    %564 = vector.extract_strided_slice %0 {offsets = [0, 2], sizes = [32, 1], strides = [1, 1]} : vector<32x5xf32> to vector<32x1xf32>
    %565 = vector.broadcast %564 : vector<32x1xf32> to vector<32x128xf32>
    %566 = vector.broadcast %563 : vector<1x128xf32> to vector<32x128xf32>
    %567 = arith.mulf %565, %566 : vector<32x128xf32>
    %568 = arith.addf %561, %567 : vector<32x128xf32>
    %c0_252 = arith.constant 0 : index
    %c1_253 = arith.constant 1 : index
    %c385_254 = arith.constant 385 : index
    %569 = vector.load %arg1[%c0_252, %c1_253, %c385_254] : memref<1x4x640xf32, #tpu.memory_space<vmem>>, vector<1x1x128xf32>
    %570 = vector.shape_cast %569 : vector<1x1x128xf32> to vector<1x128xf32>
    %571 = vector.extract_strided_slice %0 {offsets = [0, 3], sizes = [32, 1], strides = [1, 1]} : vector<32x5xf32> to vector<32x1xf32>
    %572 = vector.broadcast %571 : vector<32x1xf32> to vector<32x128xf32>
    %573 = vector.broadcast %570 : vector<1x128xf32> to vector<32x128xf32>
    %574 = arith.mulf %572, %573 : vector<32x128xf32>
    %575 = arith.addf %568, %574 : vector<32x128xf32>
    %c0_255 = arith.constant 0 : index
    %c2_256 = arith.constant 2 : index
    %c385_257 = arith.constant 385 : index
    %576 = vector.load %arg1[%c0_255, %c2_256, %c385_257] : memref<1x4x640xf32, #tpu.memory_space<vmem>>, vector<1x1x128xf32>
    %577 = vector.shape_cast %576 : vector<1x1x128xf32> to vector<1x128xf32>
    %578 = vector.extract_strided_slice %0 {offsets = [0, 4], sizes = [32, 1], strides = [1, 1]} : vector<32x5xf32> to vector<32x1xf32>
    %579 = vector.broadcast %578 : vector<32x1xf32> to vector<32x128xf32>
    %580 = vector.broadcast %577 : vector<1x128xf32> to vector<32x128xf32>
    %581 = arith.mulf %579, %580 : vector<32x128xf32>
    %582 = arith.addf %575, %581 : vector<32x128xf32>
    %cst_258 = arith.constant 0.000000e+00 : f32
    %583 = vector.broadcast %cst_258 : f32 to vector<32x128xf32>
    %c0_259 = arith.constant 0 : index
    %c3_260 = arith.constant 3 : index
    %c384_261 = arith.constant 384 : index
    %584 = vector.load %arg1[%c0_259, %c3_260, %c384_261] : memref<1x4x640xf32, #tpu.memory_space<vmem>>, vector<1x1x128xf32>
    %585 = vector.shape_cast %584 : vector<1x1x128xf32> to vector<1x128xf32>
    %586 = vector.extract_strided_slice %0 {offsets = [0, 0], sizes = [32, 1], strides = [1, 1]} : vector<32x5xf32> to vector<32x1xf32>
    %587 = vector.broadcast %586 : vector<32x1xf32> to vector<32x128xf32>
    %588 = vector.broadcast %585 : vector<1x128xf32> to vector<32x128xf32>
    %589 = arith.mulf %587, %588 : vector<32x128xf32>
    %590 = arith.addf %583, %589 : vector<32x128xf32>
    %c0_262 = arith.constant 0 : index
    %c0_263 = arith.constant 0 : index
    %c385_264 = arith.constant 385 : index
    %591 = vector.load %arg1[%c0_262, %c0_263, %c385_264] : memref<1x4x640xf32, #tpu.memory_space<vmem>>, vector<1x1x128xf32>
    %592 = vector.shape_cast %591 : vector<1x1x128xf32> to vector<1x128xf32>
    %593 = vector.extract_strided_slice %0 {offsets = [0, 1], sizes = [32, 1], strides = [1, 1]} : vector<32x5xf32> to vector<32x1xf32>
    %594 = vector.broadcast %593 : vector<32x1xf32> to vector<32x128xf32>
    %595 = vector.broadcast %592 : vector<1x128xf32> to vector<32x128xf32>
    %596 = arith.mulf %594, %595 : vector<32x128xf32>
    %597 = arith.addf %590, %596 : vector<32x128xf32>
    %c0_265 = arith.constant 0 : index
    %c1_266 = arith.constant 1 : index
    %c385_267 = arith.constant 385 : index
    %598 = vector.load %arg1[%c0_265, %c1_266, %c385_267] : memref<1x4x640xf32, #tpu.memory_space<vmem>>, vector<1x1x128xf32>
    %599 = vector.shape_cast %598 : vector<1x1x128xf32> to vector<1x128xf32>
    %600 = vector.extract_strided_slice %0 {offsets = [0, 2], sizes = [32, 1], strides = [1, 1]} : vector<32x5xf32> to vector<32x1xf32>
    %601 = vector.broadcast %600 : vector<32x1xf32> to vector<32x128xf32>
    %602 = vector.broadcast %599 : vector<1x128xf32> to vector<32x128xf32>
    %603 = arith.mulf %601, %602 : vector<32x128xf32>
    %604 = arith.addf %597, %603 : vector<32x128xf32>
    %c0_268 = arith.constant 0 : index
    %c2_269 = arith.constant 2 : index
    %c385_270 = arith.constant 385 : index
    %605 = vector.load %arg1[%c0_268, %c2_269, %c385_270] : memref<1x4x640xf32, #tpu.memory_space<vmem>>, vector<1x1x128xf32>
    %606 = vector.shape_cast %605 : vector<1x1x128xf32> to vector<1x128xf32>
    %607 = vector.extract_strided_slice %0 {offsets = [0, 3], sizes = [32, 1], strides = [1, 1]} : vector<32x5xf32> to vector<32x1xf32>
    %608 = vector.broadcast %607 : vector<32x1xf32> to vector<32x128xf32>
    %609 = vector.broadcast %606 : vector<1x128xf32> to vector<32x128xf32>
    %610 = arith.mulf %608, %609 : vector<32x128xf32>
    %611 = arith.addf %604, %610 : vector<32x128xf32>
    %c0_271 = arith.constant 0 : index
    %c3_272 = arith.constant 3 : index
    %c385_273 = arith.constant 385 : index
    %612 = vector.load %arg1[%c0_271, %c3_272, %c385_273] : memref<1x4x640xf32, #tpu.memory_space<vmem>>, vector<1x1x128xf32>
    %613 = vector.shape_cast %612 : vector<1x1x128xf32> to vector<1x128xf32>
    %614 = vector.extract_strided_slice %0 {offsets = [0, 4], sizes = [32, 1], strides = [1, 1]} : vector<32x5xf32> to vector<32x1xf32>
    %615 = vector.broadcast %614 : vector<32x1xf32> to vector<32x128xf32>
    %616 = vector.broadcast %613 : vector<1x128xf32> to vector<32x128xf32>
    %617 = arith.mulf %615, %616 : vector<32x128xf32>
    %618 = arith.addf %611, %617 : vector<32x128xf32>
    %619 = arith.maximumf %510, %546 : vector<32x128xf32>
    %620 = vector.broadcast %1 : vector<32x1xf32> to vector<32x128xf32>
    %621 = arith.addf %619, %620 : vector<32x128xf32>
    %cst_274 = arith.constant 0.000000e+00 : f32
    %622 = vector.broadcast %cst_274 : f32 to vector<32x128xf32>
    %623 = arith.maximumf %621, %622 : vector<32x128xf32>
    %c0_275 = arith.constant 0 : index
    %c384_276 = arith.constant 384 : index
    %624 = vector.load %arg7[%c0_275, %c384_276] : memref<32x640xf32, #tpu.memory_space<vmem>>, vector<32x128xf32>
    tpu.vector_store %arg7[%c0_275, %c384_276], %623 {strides = array<i32>} : memref<32x640xf32, #tpu.memory_space<vmem>>, vector<32x128xf32>,
    %625 = arith.maximumf %582, %618 : vector<32x128xf32>
    %626 = vector.broadcast %1 : vector<32x1xf32> to vector<32x128xf32>
    %627 = arith.addf %625, %626 : vector<32x128xf32>
    %cst_277 = arith.constant 0.000000e+00 : f32
    %628 = vector.broadcast %cst_277 : f32 to vector<32x128xf32>
    %629 = arith.maximumf %627, %628 : vector<32x128xf32>
    %c0_278 = arith.constant 0 : index
    %c384_279 = arith.constant 384 : index
    %630 = vector.load %arg8[%c0_278, %c384_279] : memref<32x640xf32, #tpu.memory_space<vmem>>, vector<32x128xf32>
    tpu.vector_store %arg8[%c0_278, %c384_279], %629 {strides = array<i32>} : memref<32x640xf32, #tpu.memory_space<vmem>>, vector<32x128xf32>,
    %cst_280 = arith.constant 0.000000e+00 : f32
    %631 = vector.broadcast %cst_280 : f32 to vector<64x128xf32>
    %cst_281 = arith.constant 0.000000e+00 : f32
    %632 = vector.broadcast %cst_281 : f32 to vector<64x128xf32>
    %c0_282 = arith.constant 0 : index
    %c0_283 = arith.constant 0 : index
    %c0_284 = arith.constant 0 : index
    %633 = vector.load %arg4[%c0_282, %c0_283, %c0_284] : memref<5x64x32xf32, #tpu.memory_space<vmem>>, vector<1x64x32xf32>
    %634 = vector.shape_cast %633 : vector<1x64x32xf32> to vector<64x32xf32>
    %c0_285 = arith.constant 0 : index
    %c0_286 = arith.constant 0 : index
    %635 = vector.load %arg7[%c0_285, %c0_286] : memref<32x640xf32, #tpu.memory_space<vmem>>, vector<32x128xf32>
    %c0_287 = arith.constant 0 : index
    %c0_288 = arith.constant 0 : index
    %636 = vector.load %arg8[%c0_287, %c0_288] : memref<32x640xf32, #tpu.memory_space<vmem>>, vector<32x128xf32>
    %cst_289 = arith.constant dense<0.000000e+00> : vector<64x128xf32>
    %637 = tpu.matmul %634, %635, %cst_289 {dimension_numbers = #tpu.dot_dimension_numbers<[1], [0], [0], [1], [0, 0, 1, 1], [], []>} : vector<64x32xf32>, vector<32x128xf32>, vector<64x128xf32> -> vector<64x128xf32>
    %638 = arith.addf %631, %637 : vector<64x128xf32>
    %cst_290 = arith.constant dense<0.000000e+00> : vector<64x128xf32>
    %639 = tpu.matmul %634, %636, %cst_290 {dimension_numbers = #tpu.dot_dimension_numbers<[1], [0], [0], [1], [0, 0, 1, 1], [], []>} : vector<64x32xf32>, vector<32x128xf32>, vector<64x128xf32> -> vector<64x128xf32>
    %640 = arith.addf %632, %639 : vector<64x128xf32>
    %c1_291 = arith.constant 1 : index
    %c0_292 = arith.constant 0 : index
    %c0_293 = arith.constant 0 : index
    %641 = vector.load %arg4[%c1_291, %c0_292, %c0_293] : memref<5x64x32xf32, #tpu.memory_space<vmem>>, vector<1x64x32xf32>
    %642 = vector.shape_cast %641 : vector<1x64x32xf32> to vector<64x32xf32>
    %c0_294 = arith.constant 0 : index
    %c0_295 = arith.constant 0 : index
    %643 = vector.load %arg8[%c0_294, %c0_295] : memref<32x640xf32, #tpu.memory_space<vmem>>, vector<32x128xf32>
    %c0_296 = arith.constant 0 : index
    %c1_297 = arith.constant 1 : index
    %644 = vector.load %arg7[%c0_296, %c1_297] : memref<32x640xf32, #tpu.memory_space<vmem>>, vector<32x128xf32>
    %cst_298 = arith.constant dense<0.000000e+00> : vector<64x128xf32>
    %645 = tpu.matmul %642, %643, %cst_298 {dimension_numbers = #tpu.dot_dimension_numbers<[1], [0], [0], [1], [0, 0, 1, 1], [], []>} : vector<64x32xf32>, vector<32x128xf32>, vector<64x128xf32> -> vector<64x128xf32>
    %646 = arith.addf %638, %645 : vector<64x128xf32>
    %cst_299 = arith.constant dense<0.000000e+00> : vector<64x128xf32>
    %647 = tpu.matmul %642, %644, %cst_299 {dimension_numbers = #tpu.dot_dimension_numbers<[1], [0], [0], [1], [0, 0, 1, 1], [], []>} : vector<64x32xf32>, vector<32x128xf32>, vector<64x128xf32> -> vector<64x128xf32>
    %648 = arith.addf %640, %647 : vector<64x128xf32>
    %c2_300 = arith.constant 2 : index
    %c0_301 = arith.constant 0 : index
    %c0_302 = arith.constant 0 : index
    %649 = vector.load %arg4[%c2_300, %c0_301, %c0_302] : memref<5x64x32xf32, #tpu.memory_space<vmem>>, vector<1x64x32xf32>
    %650 = vector.shape_cast %649 : vector<1x64x32xf32> to vector<64x32xf32>
    %c0_303 = arith.constant 0 : index
    %c1_304 = arith.constant 1 : index
    %651 = vector.load %arg7[%c0_303, %c1_304] : memref<32x640xf32, #tpu.memory_space<vmem>>, vector<32x128xf32>
    %c0_305 = arith.constant 0 : index
    %c1_306 = arith.constant 1 : index
    %652 = vector.load %arg8[%c0_305, %c1_306] : memref<32x640xf32, #tpu.memory_space<vmem>>, vector<32x128xf32>
    %cst_307 = arith.constant dense<0.000000e+00> : vector<64x128xf32>
    %653 = tpu.matmul %650, %651, %cst_307 {dimension_numbers = #tpu.dot_dimension_numbers<[1], [0], [0], [1], [0, 0, 1, 1], [], []>} : vector<64x32xf32>, vector<32x128xf32>, vector<64x128xf32> -> vector<64x128xf32>
    %654 = arith.addf %646, %653 : vector<64x128xf32>
    %cst_308 = arith.constant dense<0.000000e+00> : vector<64x128xf32>
    %655 = tpu.matmul %650, %652, %cst_308 {dimension_numbers = #tpu.dot_dimension_numbers<[1], [0], [0], [1], [0, 0, 1, 1], [], []>} : vector<64x32xf32>, vector<32x128xf32>, vector<64x128xf32> -> vector<64x128xf32>
    %656 = arith.addf %648, %655 : vector<64x128xf32>
    %c3_309 = arith.constant 3 : index
    %c0_310 = arith.constant 0 : index
    %c0_311 = arith.constant 0 : index
    %657 = vector.load %arg4[%c3_309, %c0_310, %c0_311] : memref<5x64x32xf32, #tpu.memory_space<vmem>>, vector<1x64x32xf32>
    %658 = vector.shape_cast %657 : vector<1x64x32xf32> to vector<64x32xf32>
    %c0_312 = arith.constant 0 : index
    %c1_313 = arith.constant 1 : index
    %659 = vector.load %arg8[%c0_312, %c1_313] : memref<32x640xf32, #tpu.memory_space<vmem>>, vector<32x128xf32>
    %c0_314 = arith.constant 0 : index
    %c2_315 = arith.constant 2 : index
    %660 = vector.load %arg7[%c0_314, %c2_315] : memref<32x640xf32, #tpu.memory_space<vmem>>, vector<32x128xf32>
    %cst_316 = arith.constant dense<0.000000e+00> : vector<64x128xf32>
    %661 = tpu.matmul %658, %659, %cst_316 {dimension_numbers = #tpu.dot_dimension_numbers<[1], [0], [0], [1], [0, 0, 1, 1], [], []>} : vector<64x32xf32>, vector<32x128xf32>, vector<64x128xf32> -> vector<64x128xf32>
    %662 = arith.addf %654, %661 : vector<64x128xf32>
    %cst_317 = arith.constant dense<0.000000e+00> : vector<64x128xf32>
    %663 = tpu.matmul %658, %660, %cst_317 {dimension_numbers = #tpu.dot_dimension_numbers<[1], [0], [0], [1], [0, 0, 1, 1], [], []>} : vector<64x32xf32>, vector<32x128xf32>, vector<64x128xf32> -> vector<64x128xf32>
    %664 = arith.addf %656, %663 : vector<64x128xf32>
    %c4 = arith.constant 4 : index
    %c0_318 = arith.constant 0 : index
    %c0_319 = arith.constant 0 : index
    %665 = vector.load %arg4[%c4, %c0_318, %c0_319] : memref<5x64x32xf32, #tpu.memory_space<vmem>>, vector<1x64x32xf32>
    %666 = vector.shape_cast %665 : vector<1x64x32xf32> to vector<64x32xf32>
    %c0_320 = arith.constant 0 : index
    %c2_321 = arith.constant 2 : index
    %667 = vector.load %arg7[%c0_320, %c2_321] : memref<32x640xf32, #tpu.memory_space<vmem>>, vector<32x128xf32>
    %c0_322 = arith.constant 0 : index
    %c2_323 = arith.constant 2 : index
    %668 = vector.load %arg8[%c0_322, %c2_323] : memref<32x640xf32, #tpu.memory_space<vmem>>, vector<32x128xf32>
    %cst_324 = arith.constant dense<0.000000e+00> : vector<64x128xf32>
    %669 = tpu.matmul %666, %667, %cst_324 {dimension_numbers = #tpu.dot_dimension_numbers<[1], [0], [0], [1], [0, 0, 1, 1], [], []>} : vector<64x32xf32>, vector<32x128xf32>, vector<64x128xf32> -> vector<64x128xf32>
    %670 = arith.addf %662, %669 : vector<64x128xf32>
    %cst_325 = arith.constant dense<0.000000e+00> : vector<64x128xf32>
    %671 = tpu.matmul %666, %668, %cst_325 {dimension_numbers = #tpu.dot_dimension_numbers<[1], [0], [0], [1], [0, 0, 1, 1], [], []>} : vector<64x32xf32>, vector<32x128xf32>, vector<64x128xf32> -> vector<64x128xf32>
    %672 = arith.addf %664, %671 : vector<64x128xf32>
    %673 = arith.maximumf %670, %672 : vector<64x128xf32>
    %674 = vector.broadcast %2 : vector<64x1xf32> to vector<64x128xf32>
    %675 = arith.addf %673, %674 : vector<64x128xf32>
    %cst_326 = arith.constant 0.000000e+00 : f32
    %676 = vector.broadcast %cst_326 : f32 to vector<64x128xf32>
    %677 = arith.maximumf %675, %676 : vector<64x128xf32>
    %678 = arith.truncf %677 : vector<64x128xf32> to vector<64x128xbf16>
    %c0_327 = arith.constant 0 : index
    %c0_328 = arith.constant 0 : index
    %c0_329 = arith.constant 0 : index
    %679 = vector.load %arg6[%c0_327, %c0_328, %c0_329] : memref<1x64x512xbf16, #tpu.memory_space<vmem>>, vector<1x64x128xbf16>
    %680 = vector.shape_cast %679 : vector<1x64x128xbf16> to vector<64x128xbf16>
    %681 = vector.shape_cast %678 : vector<64x128xbf16> to vector<1x64x128xbf16>
    tpu.vector_store %arg6[%c0_327, %c0_328, %c0_329], %681 {strides = array<i32>} : memref<1x64x512xbf16, #tpu.memory_space<vmem>>, vector<1x64x128xbf16>,
    %cst_330 = arith.constant 0.000000e+00 : f32
    %682 = vector.broadcast %cst_330 : f32 to vector<64x128xf32>
    %cst_331 = arith.constant 0.000000e+00 : f32
    %683 = vector.broadcast %cst_331 : f32 to vector<64x128xf32>
    %c0_332 = arith.constant 0 : index
    %c0_333 = arith.constant 0 : index
    %c0_334 = arith.constant 0 : index
    %684 = vector.load %arg4[%c0_332, %c0_333, %c0_334] : memref<5x64x32xf32, #tpu.memory_space<vmem>>, vector<1x64x32xf32>
    %685 = vector.shape_cast %684 : vector<1x64x32xf32> to vector<64x32xf32>
    %c0_335 = arith.constant 0 : index
    %c128_336 = arith.constant 128 : index
    %686 = vector.load %arg7[%c0_335, %c128_336] : memref<32x640xf32, #tpu.memory_space<vmem>>, vector<32x128xf32>
    %c0_337 = arith.constant 0 : index
    %c128_338 = arith.constant 128 : index
    %687 = vector.load %arg8[%c0_337, %c128_338] : memref<32x640xf32, #tpu.memory_space<vmem>>, vector<32x128xf32>
    %cst_339 = arith.constant dense<0.000000e+00> : vector<64x128xf32>
    %688 = tpu.matmul %685, %686, %cst_339 {dimension_numbers = #tpu.dot_dimension_numbers<[1], [0], [0], [1], [0, 0, 1, 1], [], []>} : vector<64x32xf32>, vector<32x128xf32>, vector<64x128xf32> -> vector<64x128xf32>
    %689 = arith.addf %682, %688 : vector<64x128xf32>
    %cst_340 = arith.constant dense<0.000000e+00> : vector<64x128xf32>
    %690 = tpu.matmul %685, %687, %cst_340 {dimension_numbers = #tpu.dot_dimension_numbers<[1], [0], [0], [1], [0, 0, 1, 1], [], []>} : vector<64x32xf32>, vector<32x128xf32>, vector<64x128xf32> -> vector<64x128xf32>
    %691 = arith.addf %683, %690 : vector<64x128xf32>
    %c1_341 = arith.constant 1 : index
    %c0_342 = arith.constant 0 : index
    %c0_343 = arith.constant 0 : index
    %692 = vector.load %arg4[%c1_341, %c0_342, %c0_343] : memref<5x64x32xf32, #tpu.memory_space<vmem>>, vector<1x64x32xf32>
    %693 = vector.shape_cast %692 : vector<1x64x32xf32> to vector<64x32xf32>
    %c0_344 = arith.constant 0 : index
    %c128_345 = arith.constant 128 : index
    %694 = vector.load %arg8[%c0_344, %c128_345] : memref<32x640xf32, #tpu.memory_space<vmem>>, vector<32x128xf32>
    %c0_346 = arith.constant 0 : index
    %c129_347 = arith.constant 129 : index
    %695 = vector.load %arg7[%c0_346, %c129_347] : memref<32x640xf32, #tpu.memory_space<vmem>>, vector<32x128xf32>
    %cst_348 = arith.constant dense<0.000000e+00> : vector<64x128xf32>
    %696 = tpu.matmul %693, %694, %cst_348 {dimension_numbers = #tpu.dot_dimension_numbers<[1], [0], [0], [1], [0, 0, 1, 1], [], []>} : vector<64x32xf32>, vector<32x128xf32>, vector<64x128xf32> -> vector<64x128xf32>
    %697 = arith.addf %689, %696 : vector<64x128xf32>
    %cst_349 = arith.constant dense<0.000000e+00> : vector<64x128xf32>
    %698 = tpu.matmul %693, %695, %cst_349 {dimension_numbers = #tpu.dot_dimension_numbers<[1], [0], [0], [1], [0, 0, 1, 1], [], []>} : vector<64x32xf32>, vector<32x128xf32>, vector<64x128xf32> -> vector<64x128xf32>
    %699 = arith.addf %691, %698 : vector<64x128xf32>
    %c2_350 = arith.constant 2 : index
    %c0_351 = arith.constant 0 : index
    %c0_352 = arith.constant 0 : index
    %700 = vector.load %arg4[%c2_350, %c0_351, %c0_352] : memref<5x64x32xf32, #tpu.memory_space<vmem>>, vector<1x64x32xf32>
    %701 = vector.shape_cast %700 : vector<1x64x32xf32> to vector<64x32xf32>
    %c0_353 = arith.constant 0 : index
    %c129_354 = arith.constant 129 : index
    %702 = vector.load %arg7[%c0_353, %c129_354] : memref<32x640xf32, #tpu.memory_space<vmem>>, vector<32x128xf32>
    %c0_355 = arith.constant 0 : index
    %c129_356 = arith.constant 129 : index
    %703 = vector.load %arg8[%c0_355, %c129_356] : memref<32x640xf32, #tpu.memory_space<vmem>>, vector<32x128xf32>
    %cst_357 = arith.constant dense<0.000000e+00> : vector<64x128xf32>
    %704 = tpu.matmul %701, %702, %cst_357 {dimension_numbers = #tpu.dot_dimension_numbers<[1], [0], [0], [1], [0, 0, 1, 1], [], []>} : vector<64x32xf32>, vector<32x128xf32>, vector<64x128xf32> -> vector<64x128xf32>
    %705 = arith.addf %697, %704 : vector<64x128xf32>
    %cst_358 = arith.constant dense<0.000000e+00> : vector<64x128xf32>
    %706 = tpu.matmul %701, %703, %cst_358 {dimension_numbers = #tpu.dot_dimension_numbers<[1], [0], [0], [1], [0, 0, 1, 1], [], []>} : vector<64x32xf32>, vector<32x128xf32>, vector<64x128xf32> -> vector<64x128xf32>
    %707 = arith.addf %699, %706 : vector<64x128xf32>
    %c3_359 = arith.constant 3 : index
    %c0_360 = arith.constant 0 : index
    %c0_361 = arith.constant 0 : index
    %708 = vector.load %arg4[%c3_359, %c0_360, %c0_361] : memref<5x64x32xf32, #tpu.memory_space<vmem>>, vector<1x64x32xf32>
    %709 = vector.shape_cast %708 : vector<1x64x32xf32> to vector<64x32xf32>
    %c0_362 = arith.constant 0 : index
    %c129_363 = arith.constant 129 : index
    %710 = vector.load %arg8[%c0_362, %c129_363] : memref<32x640xf32, #tpu.memory_space<vmem>>, vector<32x128xf32>
    %c0_364 = arith.constant 0 : index
    %c130 = arith.constant 130 : index
    %711 = vector.load %arg7[%c0_364, %c130] : memref<32x640xf32, #tpu.memory_space<vmem>>, vector<32x128xf32>
    %cst_365 = arith.constant dense<0.000000e+00> : vector<64x128xf32>
    %712 = tpu.matmul %709, %710, %cst_365 {dimension_numbers = #tpu.dot_dimension_numbers<[1], [0], [0], [1], [0, 0, 1, 1], [], []>} : vector<64x32xf32>, vector<32x128xf32>, vector<64x128xf32> -> vector<64x128xf32>
    %713 = arith.addf %705, %712 : vector<64x128xf32>
    %cst_366 = arith.constant dense<0.000000e+00> : vector<64x128xf32>
    %714 = tpu.matmul %709, %711, %cst_366 {dimension_numbers = #tpu.dot_dimension_numbers<[1], [0], [0], [1], [0, 0, 1, 1], [], []>} : vector<64x32xf32>, vector<32x128xf32>, vector<64x128xf32> -> vector<64x128xf32>
    %715 = arith.addf %707, %714 : vector<64x128xf32>
    %c4_367 = arith.constant 4 : index
    %c0_368 = arith.constant 0 : index
    %c0_369 = arith.constant 0 : index
    %716 = vector.load %arg4[%c4_367, %c0_368, %c0_369] : memref<5x64x32xf32, #tpu.memory_space<vmem>>, vector<1x64x32xf32>
    %717 = vector.shape_cast %716 : vector<1x64x32xf32> to vector<64x32xf32>
    %c0_370 = arith.constant 0 : index
    %c130_371 = arith.constant 130 : index
    %718 = vector.load %arg7[%c0_370, %c130_371] : memref<32x640xf32, #tpu.memory_space<vmem>>, vector<32x128xf32>
    %c0_372 = arith.constant 0 : index
    %c130_373 = arith.constant 130 : index
    %719 = vector.load %arg8[%c0_372, %c130_373] : memref<32x640xf32, #tpu.memory_space<vmem>>, vector<32x128xf32>
    %cst_374 = arith.constant dense<0.000000e+00> : vector<64x128xf32>
    %720 = tpu.matmul %717, %718, %cst_374 {dimension_numbers = #tpu.dot_dimension_numbers<[1], [0], [0], [1], [0, 0, 1, 1], [], []>} : vector<64x32xf32>, vector<32x128xf32>, vector<64x128xf32> -> vector<64x128xf32>
    %721 = arith.addf %713, %720 : vector<64x128xf32>
    %cst_375 = arith.constant dense<0.000000e+00> : vector<64x128xf32>
    %722 = tpu.matmul %717, %719, %cst_375 {dimension_numbers = #tpu.dot_dimension_numbers<[1], [0], [0], [1], [0, 0, 1, 1], [], []>} : vector<64x32xf32>, vector<32x128xf32>, vector<64x128xf32> -> vector<64x128xf32>
    %723 = arith.addf %715, %722 : vector<64x128xf32>
    %724 = arith.maximumf %721, %723 : vector<64x128xf32>
    %725 = vector.broadcast %2 : vector<64x1xf32> to vector<64x128xf32>
    %726 = arith.addf %724, %725 : vector<64x128xf32>
    %cst_376 = arith.constant 0.000000e+00 : f32
    %727 = vector.broadcast %cst_376 : f32 to vector<64x128xf32>
    %728 = arith.maximumf %726, %727 : vector<64x128xf32>
    %729 = arith.truncf %728 : vector<64x128xf32> to vector<64x128xbf16>
    %c0_377 = arith.constant 0 : index
    %c0_378 = arith.constant 0 : index
    %c128_379 = arith.constant 128 : index
    %730 = vector.load %arg6[%c0_377, %c0_378, %c128_379] : memref<1x64x512xbf16, #tpu.memory_space<vmem>>, vector<1x64x128xbf16>
    %731 = vector.shape_cast %730 : vector<1x64x128xbf16> to vector<64x128xbf16>
    %732 = vector.shape_cast %729 : vector<64x128xbf16> to vector<1x64x128xbf16>
    tpu.vector_store %arg6[%c0_377, %c0_378, %c128_379], %732 {strides = array<i32>} : memref<1x64x512xbf16, #tpu.memory_space<vmem>>, vector<1x64x128xbf16>,
    %cst_380 = arith.constant 0.000000e+00 : f32
    %733 = vector.broadcast %cst_380 : f32 to vector<64x128xf32>
    %cst_381 = arith.constant 0.000000e+00 : f32
    %734 = vector.broadcast %cst_381 : f32 to vector<64x128xf32>
    %c0_382 = arith.constant 0 : index
    %c0_383 = arith.constant 0 : index
    %c0_384 = arith.constant 0 : index
    %735 = vector.load %arg4[%c0_382, %c0_383, %c0_384] : memref<5x64x32xf32, #tpu.memory_space<vmem>>, vector<1x64x32xf32>
    %736 = vector.shape_cast %735 : vector<1x64x32xf32> to vector<64x32xf32>
    %c0_385 = arith.constant 0 : index
    %c256_386 = arith.constant 256 : index
    %737 = vector.load %arg7[%c0_385, %c256_386] : memref<32x640xf32, #tpu.memory_space<vmem>>, vector<32x128xf32>
    %c0_387 = arith.constant 0 : index
    %c256_388 = arith.constant 256 : index
    %738 = vector.load %arg8[%c0_387, %c256_388] : memref<32x640xf32, #tpu.memory_space<vmem>>, vector<32x128xf32>
    %cst_389 = arith.constant dense<0.000000e+00> : vector<64x128xf32>
    %739 = tpu.matmul %736, %737, %cst_389 {dimension_numbers = #tpu.dot_dimension_numbers<[1], [0], [0], [1], [0, 0, 1, 1], [], []>} : vector<64x32xf32>, vector<32x128xf32>, vector<64x128xf32> -> vector<64x128xf32>
    %740 = arith.addf %733, %739 : vector<64x128xf32>
    %cst_390 = arith.constant dense<0.000000e+00> : vector<64x128xf32>
    %741 = tpu.matmul %736, %738, %cst_390 {dimension_numbers = #tpu.dot_dimension_numbers<[1], [0], [0], [1], [0, 0, 1, 1], [], []>} : vector<64x32xf32>, vector<32x128xf32>, vector<64x128xf32> -> vector<64x128xf32>
    %742 = arith.addf %734, %741 : vector<64x128xf32>
    %c1_391 = arith.constant 1 : index
    %c0_392 = arith.constant 0 : index
    %c0_393 = arith.constant 0 : index
    %743 = vector.load %arg4[%c1_391, %c0_392, %c0_393] : memref<5x64x32xf32, #tpu.memory_space<vmem>>, vector<1x64x32xf32>
    %744 = vector.shape_cast %743 : vector<1x64x32xf32> to vector<64x32xf32>
    %c0_394 = arith.constant 0 : index
    %c256_395 = arith.constant 256 : index
    %745 = vector.load %arg8[%c0_394, %c256_395] : memref<32x640xf32, #tpu.memory_space<vmem>>, vector<32x128xf32>
    %c0_396 = arith.constant 0 : index
    %c257_397 = arith.constant 257 : index
    %746 = vector.load %arg7[%c0_396, %c257_397] : memref<32x640xf32, #tpu.memory_space<vmem>>, vector<32x128xf32>
    %cst_398 = arith.constant dense<0.000000e+00> : vector<64x128xf32>
    %747 = tpu.matmul %744, %745, %cst_398 {dimension_numbers = #tpu.dot_dimension_numbers<[1], [0], [0], [1], [0, 0, 1, 1], [], []>} : vector<64x32xf32>, vector<32x128xf32>, vector<64x128xf32> -> vector<64x128xf32>
    %748 = arith.addf %740, %747 : vector<64x128xf32>
    %cst_399 = arith.constant dense<0.000000e+00> : vector<64x128xf32>
    %749 = tpu.matmul %744, %746, %cst_399 {dimension_numbers = #tpu.dot_dimension_numbers<[1], [0], [0], [1], [0, 0, 1, 1], [], []>} : vector<64x32xf32>, vector<32x128xf32>, vector<64x128xf32> -> vector<64x128xf32>
    %750 = arith.addf %742, %749 : vector<64x128xf32>
    %c2_400 = arith.constant 2 : index
    %c0_401 = arith.constant 0 : index
    %c0_402 = arith.constant 0 : index
    %751 = vector.load %arg4[%c2_400, %c0_401, %c0_402] : memref<5x64x32xf32, #tpu.memory_space<vmem>>, vector<1x64x32xf32>
    %752 = vector.shape_cast %751 : vector<1x64x32xf32> to vector<64x32xf32>
    %c0_403 = arith.constant 0 : index
    %c257_404 = arith.constant 257 : index
    %753 = vector.load %arg7[%c0_403, %c257_404] : memref<32x640xf32, #tpu.memory_space<vmem>>, vector<32x128xf32>
    %c0_405 = arith.constant 0 : index
    %c257_406 = arith.constant 257 : index
    %754 = vector.load %arg8[%c0_405, %c257_406] : memref<32x640xf32, #tpu.memory_space<vmem>>, vector<32x128xf32>
    %cst_407 = arith.constant dense<0.000000e+00> : vector<64x128xf32>
    %755 = tpu.matmul %752, %753, %cst_407 {dimension_numbers = #tpu.dot_dimension_numbers<[1], [0], [0], [1], [0, 0, 1, 1], [], []>} : vector<64x32xf32>, vector<32x128xf32>, vector<64x128xf32> -> vector<64x128xf32>
    %756 = arith.addf %748, %755 : vector<64x128xf32>
    %cst_408 = arith.constant dense<0.000000e+00> : vector<64x128xf32>
    %757 = tpu.matmul %752, %754, %cst_408 {dimension_numbers = #tpu.dot_dimension_numbers<[1], [0], [0], [1], [0, 0, 1, 1], [], []>} : vector<64x32xf32>, vector<32x128xf32>, vector<64x128xf32> -> vector<64x128xf32>
    %758 = arith.addf %750, %757 : vector<64x128xf32>
    %c3_409 = arith.constant 3 : index
    %c0_410 = arith.constant 0 : index
    %c0_411 = arith.constant 0 : index
    %759 = vector.load %arg4[%c3_409, %c0_410, %c0_411] : memref<5x64x32xf32, #tpu.memory_space<vmem>>, vector<1x64x32xf32>
    %760 = vector.shape_cast %759 : vector<1x64x32xf32> to vector<64x32xf32>
    %c0_412 = arith.constant 0 : index
    %c257_413 = arith.constant 257 : index
    %761 = vector.load %arg8[%c0_412, %c257_413] : memref<32x640xf32, #tpu.memory_space<vmem>>, vector<32x128xf32>
    %c0_414 = arith.constant 0 : index
    %c258 = arith.constant 258 : index
    %762 = vector.load %arg7[%c0_414, %c258] : memref<32x640xf32, #tpu.memory_space<vmem>>, vector<32x128xf32>
    %cst_415 = arith.constant dense<0.000000e+00> : vector<64x128xf32>
    %763 = tpu.matmul %760, %761, %cst_415 {dimension_numbers = #tpu.dot_dimension_numbers<[1], [0], [0], [1], [0, 0, 1, 1], [], []>} : vector<64x32xf32>, vector<32x128xf32>, vector<64x128xf32> -> vector<64x128xf32>
    %764 = arith.addf %756, %763 : vector<64x128xf32>
    %cst_416 = arith.constant dense<0.000000e+00> : vector<64x128xf32>
    %765 = tpu.matmul %760, %762, %cst_416 {dimension_numbers = #tpu.dot_dimension_numbers<[1], [0], [0], [1], [0, 0, 1, 1], [], []>} : vector<64x32xf32>, vector<32x128xf32>, vector<64x128xf32> -> vector<64x128xf32>
    %766 = arith.addf %758, %765 : vector<64x128xf32>
    %c4_417 = arith.constant 4 : index
    %c0_418 = arith.constant 0 : index
    %c0_419 = arith.constant 0 : index
    %767 = vector.load %arg4[%c4_417, %c0_418, %c0_419] : memref<5x64x32xf32, #tpu.memory_space<vmem>>, vector<1x64x32xf32>
    %768 = vector.shape_cast %767 : vector<1x64x32xf32> to vector<64x32xf32>
    %c0_420 = arith.constant 0 : index
    %c258_421 = arith.constant 258 : index
    %769 = vector.load %arg7[%c0_420, %c258_421] : memref<32x640xf32, #tpu.memory_space<vmem>>, vector<32x128xf32>
    %c0_422 = arith.constant 0 : index
    %c258_423 = arith.constant 258 : index
    %770 = vector.load %arg8[%c0_422, %c258_423] : memref<32x640xf32, #tpu.memory_space<vmem>>, vector<32x128xf32>
    %cst_424 = arith.constant dense<0.000000e+00> : vector<64x128xf32>
    %771 = tpu.matmul %768, %769, %cst_424 {dimension_numbers = #tpu.dot_dimension_numbers<[1], [0], [0], [1], [0, 0, 1, 1], [], []>} : vector<64x32xf32>, vector<32x128xf32>, vector<64x128xf32> -> vector<64x128xf32>
    %772 = arith.addf %764, %771 : vector<64x128xf32>
    %cst_425 = arith.constant dense<0.000000e+00> : vector<64x128xf32>
    %773 = tpu.matmul %768, %770, %cst_425 {dimension_numbers = #tpu.dot_dimension_numbers<[1], [0], [0], [1], [0, 0, 1, 1], [], []>} : vector<64x32xf32>, vector<32x128xf32>, vector<64x128xf32> -> vector<64x128xf32>
    %774 = arith.addf %766, %773 : vector<64x128xf32>
    %775 = arith.maximumf %772, %774 : vector<64x128xf32>
    %776 = vector.broadcast %2 : vector<64x1xf32> to vector<64x128xf32>
    %777 = arith.addf %775, %776 : vector<64x128xf32>
    %cst_426 = arith.constant 0.000000e+00 : f32
    %778 = vector.broadcast %cst_426 : f32 to vector<64x128xf32>
    %779 = arith.maximumf %777, %778 : vector<64x128xf32>
    %780 = arith.truncf %779 : vector<64x128xf32> to vector<64x128xbf16>
    %c0_427 = arith.constant 0 : index
    %c0_428 = arith.constant 0 : index
    %c256_429 = arith.constant 256 : index
    %781 = vector.load %arg6[%c0_427, %c0_428, %c256_429] : memref<1x64x512xbf16, #tpu.memory_space<vmem>>, vector<1x64x128xbf16>
    %782 = vector.shape_cast %781 : vector<1x64x128xbf16> to vector<64x128xbf16>
    %783 = vector.shape_cast %780 : vector<64x128xbf16> to vector<1x64x128xbf16>
    tpu.vector_store %arg6[%c0_427, %c0_428, %c256_429], %783 {strides = array<i32>} : memref<1x64x512xbf16, #tpu.memory_space<vmem>>, vector<1x64x128xbf16>,
    %cst_430 = arith.constant 0.000000e+00 : f32
    %784 = vector.broadcast %cst_430 : f32 to vector<64x128xf32>
    %cst_431 = arith.constant 0.000000e+00 : f32
    %785 = vector.broadcast %cst_431 : f32 to vector<64x128xf32>
    %c0_432 = arith.constant 0 : index
    %c0_433 = arith.constant 0 : index
    %c0_434 = arith.constant 0 : index
    %786 = vector.load %arg4[%c0_432, %c0_433, %c0_434] : memref<5x64x32xf32, #tpu.memory_space<vmem>>, vector<1x64x32xf32>
    %787 = vector.shape_cast %786 : vector<1x64x32xf32> to vector<64x32xf32>
    %c0_435 = arith.constant 0 : index
    %c384_436 = arith.constant 384 : index
    %788 = vector.load %arg7[%c0_435, %c384_436] : memref<32x640xf32, #tpu.memory_space<vmem>>, vector<32x128xf32>
    %c0_437 = arith.constant 0 : index
    %c384_438 = arith.constant 384 : index
    %789 = vector.load %arg8[%c0_437, %c384_438] : memref<32x640xf32, #tpu.memory_space<vmem>>, vector<32x128xf32>
    %cst_439 = arith.constant dense<0.000000e+00> : vector<64x128xf32>
    %790 = tpu.matmul %787, %788, %cst_439 {dimension_numbers = #tpu.dot_dimension_numbers<[1], [0], [0], [1], [0, 0, 1, 1], [], []>} : vector<64x32xf32>, vector<32x128xf32>, vector<64x128xf32> -> vector<64x128xf32>
    %791 = arith.addf %784, %790 : vector<64x128xf32>
    %cst_440 = arith.constant dense<0.000000e+00> : vector<64x128xf32>
    %792 = tpu.matmul %787, %789, %cst_440 {dimension_numbers = #tpu.dot_dimension_numbers<[1], [0], [0], [1], [0, 0, 1, 1], [], []>} : vector<64x32xf32>, vector<32x128xf32>, vector<64x128xf32> -> vector<64x128xf32>
    %793 = arith.addf %785, %792 : vector<64x128xf32>
    %c1_441 = arith.constant 1 : index
    %c0_442 = arith.constant 0 : index
    %c0_443 = arith.constant 0 : index
    %794 = vector.load %arg4[%c1_441, %c0_442, %c0_443] : memref<5x64x32xf32, #tpu.memory_space<vmem>>, vector<1x64x32xf32>
    %795 = vector.shape_cast %794 : vector<1x64x32xf32> to vector<64x32xf32>
    %c0_444 = arith.constant 0 : index
    %c384_445 = arith.constant 384 : index
    %796 = vector.load %arg8[%c0_444, %c384_445] : memref<32x640xf32, #tpu.memory_space<vmem>>, vector<32x128xf32>
    %c0_446 = arith.constant 0 : index
    %c385_447 = arith.constant 385 : index
    %797 = vector.load %arg7[%c0_446, %c385_447] : memref<32x640xf32, #tpu.memory_space<vmem>>, vector<32x128xf32>
    %cst_448 = arith.constant dense<0.000000e+00> : vector<64x128xf32>
    %798 = tpu.matmul %795, %796, %cst_448 {dimension_numbers = #tpu.dot_dimension_numbers<[1], [0], [0], [1], [0, 0, 1, 1], [], []>} : vector<64x32xf32>, vector<32x128xf32>, vector<64x128xf32> -> vector<64x128xf32>
    %799 = arith.addf %791, %798 : vector<64x128xf32>
    %cst_449 = arith.constant dense<0.000000e+00> : vector<64x128xf32>
    %800 = tpu.matmul %795, %797, %cst_449 {dimension_numbers = #tpu.dot_dimension_numbers<[1], [0], [0], [1], [0, 0, 1, 1], [], []>} : vector<64x32xf32>, vector<32x128xf32>, vector<64x128xf32> -> vector<64x128xf32>
    %801 = arith.addf %793, %800 : vector<64x128xf32>
    %c2_450 = arith.constant 2 : index
    %c0_451 = arith.constant 0 : index
    %c0_452 = arith.constant 0 : index
    %802 = vector.load %arg4[%c2_450, %c0_451, %c0_452] : memref<5x64x32xf32, #tpu.memory_space<vmem>>, vector<1x64x32xf32>
    %803 = vector.shape_cast %802 : vector<1x64x32xf32> to vector<64x32xf32>
    %c0_453 = arith.constant 0 : index
    %c385_454 = arith.constant 385 : index
    %804 = vector.load %arg7[%c0_453, %c385_454] : memref<32x640xf32, #tpu.memory_space<vmem>>, vector<32x128xf32>
    %c0_455 = arith.constant 0 : index
    %c385_456 = arith.constant 385 : index
    %805 = vector.load %arg8[%c0_455, %c385_456] : memref<32x640xf32, #tpu.memory_space<vmem>>, vector<32x128xf32>
    %cst_457 = arith.constant dense<0.000000e+00> : vector<64x128xf32>
    %806 = tpu.matmul %803, %804, %cst_457 {dimension_numbers = #tpu.dot_dimension_numbers<[1], [0], [0], [1], [0, 0, 1, 1], [], []>} : vector<64x32xf32>, vector<32x128xf32>, vector<64x128xf32> -> vector<64x128xf32>
    %807 = arith.addf %799, %806 : vector<64x128xf32>
    %cst_458 = arith.constant dense<0.000000e+00> : vector<64x128xf32>
    %808 = tpu.matmul %803, %805, %cst_458 {dimension_numbers = #tpu.dot_dimension_numbers<[1], [0], [0], [1], [0, 0, 1, 1], [], []>} : vector<64x32xf32>, vector<32x128xf32>, vector<64x128xf32> -> vector<64x128xf32>
    %809 = arith.addf %801, %808 : vector<64x128xf32>
    %c3_459 = arith.constant 3 : index
    %c0_460 = arith.constant 0 : index
    %c0_461 = arith.constant 0 : index
    %810 = vector.load %arg4[%c3_459, %c0_460, %c0_461] : memref<5x64x32xf32, #tpu.memory_space<vmem>>, vector<1x64x32xf32>
    %811 = vector.shape_cast %810 : vector<1x64x32xf32> to vector<64x32xf32>
    %c0_462 = arith.constant 0 : index
    %c385_463 = arith.constant 385 : index
    %812 = vector.load %arg8[%c0_462, %c385_463] : memref<32x640xf32, #tpu.memory_space<vmem>>, vector<32x128xf32>
    %c0_464 = arith.constant 0 : index
    %c386 = arith.constant 386 : index
    %813 = vector.load %arg7[%c0_464, %c386] : memref<32x640xf32, #tpu.memory_space<vmem>>, vector<32x128xf32>
    %cst_465 = arith.constant dense<0.000000e+00> : vector<64x128xf32>
    %814 = tpu.matmul %811, %812, %cst_465 {dimension_numbers = #tpu.dot_dimension_numbers<[1], [0], [0], [1], [0, 0, 1, 1], [], []>} : vector<64x32xf32>, vector<32x128xf32>, vector<64x128xf32> -> vector<64x128xf32>
    %815 = arith.addf %807, %814 : vector<64x128xf32>
    %cst_466 = arith.constant dense<0.000000e+00> : vector<64x128xf32>
    %816 = tpu.matmul %811, %813, %cst_466 {dimension_numbers = #tpu.dot_dimension_numbers<[1], [0], [0], [1], [0, 0, 1, 1], [], []>} : vector<64x32xf32>, vector<32x128xf32>, vector<64x128xf32> -> vector<64x128xf32>
    %817 = arith.addf %809, %816 : vector<64x128xf32>
    %c4_467 = arith.constant 4 : index
    %c0_468 = arith.constant 0 : index
    %c0_469 = arith.constant 0 : index
    %818 = vector.load %arg4[%c4_467, %c0_468, %c0_469] : memref<5x64x32xf32, #tpu.memory_space<vmem>>, vector<1x64x32xf32>
    %819 = vector.shape_cast %818 : vector<1x64x32xf32> to vector<64x32xf32>
    %c0_470 = arith.constant 0 : index
    %c386_471 = arith.constant 386 : index
    %820 = vector.load %arg7[%c0_470, %c386_471] : memref<32x640xf32, #tpu.memory_space<vmem>>, vector<32x128xf32>
    %c0_472 = arith.constant 0 : index
    %c386_473 = arith.constant 386 : index
    %821 = vector.load %arg8[%c0_472, %c386_473] : memref<32x640xf32, #tpu.memory_space<vmem>>, vector<32x128xf32>
    %cst_474 = arith.constant dense<0.000000e+00> : vector<64x128xf32>
    %822 = tpu.matmul %819, %820, %cst_474 {dimension_numbers = #tpu.dot_dimension_numbers<[1], [0], [0], [1], [0, 0, 1, 1], [], []>} : vector<64x32xf32>, vector<32x128xf32>, vector<64x128xf32> -> vector<64x128xf32>
    %823 = arith.addf %815, %822 : vector<64x128xf32>
    %cst_475 = arith.constant dense<0.000000e+00> : vector<64x128xf32>
    %824 = tpu.matmul %819, %821, %cst_475 {dimension_numbers = #tpu.dot_dimension_numbers<[1], [0], [0], [1], [0, 0, 1, 1], [], []>} : vector<64x32xf32>, vector<32x128xf32>, vector<64x128xf32> -> vector<64x128xf32>
    %825 = arith.addf %817, %824 : vector<64x128xf32>
    %826 = arith.maximumf %823, %825 : vector<64x128xf32>
    %827 = vector.broadcast %2 : vector<64x1xf32> to vector<64x128xf32>
    %828 = arith.addf %826, %827 : vector<64x128xf32>
    %cst_476 = arith.constant 0.000000e+00 : f32
    %829 = vector.broadcast %cst_476 : f32 to vector<64x128xf32>
    %830 = arith.maximumf %828, %829 : vector<64x128xf32>
    %831 = arith.truncf %830 : vector<64x128xf32> to vector<64x128xbf16>
    %c0_477 = arith.constant 0 : index
    %c0_478 = arith.constant 0 : index
    %c384_479 = arith.constant 384 : index
    %832 = vector.load %arg6[%c0_477, %c0_478, %c384_479] : memref<1x64x512xbf16, #tpu.memory_space<vmem>>, vector<1x64x128xbf16>
    %833 = vector.shape_cast %832 : vector<1x64x128xbf16> to vector<64x128xbf16>
    %834 = vector.shape_cast %831 : vector<64x128xbf16> to vector<1x64x128xbf16>
    tpu.vector_store %arg6[%c0_477, %c0_478, %c384_479], %834 {strides = array<i32>} : memref<1x64x512xbf16, #tpu.memory_space<vmem>>, vector<1x64x128xbf16>,
    return
  }
  func.func @transform_0(%arg0: i32) -> (i32, i32, i32) {
    %c0_i32 = arith.constant 0 : i32
    %c0_i32_0 = arith.constant 0 : i32
    %c0_i32_1 = arith.constant 0 : i32
    return %arg0, %c0_i32, %c0_i32_0 : i32, i32, i32
  }
  func.func @transform_1(%arg0: i32) -> (i32, i32) {
    %c0_i32 = arith.constant 0 : i32
    %c0_i32_0 = arith.constant 0 : i32
    %c0_i32_1 = arith.constant 0 : i32
    return %c0_i32, %c0_i32_0 : i32, i32
  }
  func.func @transform_2(%arg0: i32) -> (i32, i32) {
    %c0_i32 = arith.constant 0 : i32
    %c0_i32_0 = arith.constant 0 : i32
    %c0_i32_1 = arith.constant 0 : i32
    return %c0_i32, %c0_i32_0 : i32, i32
  }
  func.func @transform_3(%arg0: i32) -> (i32, i32, i32) {
    %c0_i32 = arith.constant 0 : i32
    %c0_i32_0 = arith.constant 0 : i32
    %c0_i32_1 = arith.constant 0 : i32
    %c0_i32_2 = arith.constant 0 : i32
    return %c0_i32, %c0_i32_0, %c0_i32_1 : i32, i32, i32
  }
  func.func @transform_4(%arg0: i32) -> (i32, i32) {
    %c0_i32 = arith.constant 0 : i32
    %c0_i32_0 = arith.constant 0 : i32
    %c0_i32_1 = arith.constant 0 : i32
    return %c0_i32, %c0_i32_0 : i32, i32
  }
  func.func @transform_5(%arg0: i32) -> (i32, i32, i32) {
    %c0_i32 = arith.constant 0 : i32
    %c0_i32_0 = arith.constant 0 : i32
    %c0_i32_1 = arith.constant 0 : i32
    return %arg0, %c0_i32, %c0_i32_0 : i32, i32, i32
  }
}

module attributes {stable_mosaic.version = 11 : i64} {
  func.func @fc1_partial_kernel(%arg0: i32, %arg1: i32, %arg2: memref<2x16384xbf16, #tpu.memory_space<vmem>>, %arg3: memref<16384x128xi8, #tpu.memory_space<vmem>>, %arg4: memref<1x2x128xf32, #tpu.memory_space<vmem>>, %arg5: memref<2x128xf32, #tpu.memory_space<vmem>>) attributes {dimension_semantics = [#tpu.dimension_semantics<parallel>, #tpu.dimension_semantics<arbitrary>], iteration_bounds = array<i64: 2, 1>, scalar_prefetch = 0 : i64, scratch_operands = 1 : i64, tpu.core_type = #tpu.core_type<tc>, window_params = [{transform_indices = @transform_0, window_bounds = array<i64: 2, 16384>}, {transform_indices = @transform_1, window_bounds = array<i64: 16384, 128>}, {transform_indices = @transform_2, window_bounds = array<i64: 1, 2, 128>}]} {
    %c0_i32 = arith.constant 0 : i32
    %0 = arith.cmpi eq, %arg1, %c0_i32 : i32
    %1 = arith.extui %0 : i1 to i32
    %c0_i32_0 = arith.constant 0 : i32
    %2 = arith.cmpi ne, %1, %c0_i32_0 : i32
    scf.if %2 {
      %cst_8 = arith.constant 0.000000e+00 : f32
      %12 = vector.broadcast %cst_8 : f32 to vector<2x128xf32>
      %c0_9 = arith.constant 0 : index
      %c0_10 = arith.constant 0 : index
      %13 = vector.load %arg5[%c0_9, %c0_10] : memref<2x128xf32, #tpu.memory_space<vmem>>, vector<2x128xf32>
      tpu.vector_store %arg5[%c0_9, %c0_10], %12 {strides = array<i32>} : memref<2x128xf32, #tpu.memory_space<vmem>>, vector<2x128xf32>,
    } else {
    }
    %c0 = arith.constant 0 : index
    %c0_1 = arith.constant 0 : index
    %3 = vector.load %arg5[%c0, %c0_1] : memref<2x128xf32, #tpu.memory_space<vmem>>, vector<2x128xf32>
    %cst = arith.constant 0.000000e+00 : f32
    %4 = vector.broadcast %cst : f32 to vector<2x128xf32>
    %c0_i32_2 = arith.constant 0 : i32
    %c8_i32 = arith.constant 8 : i32
    %5 = arith.addi %c0_i32_2, %c8_i32 : i32
    %c1_i32 = arith.constant 1 : i32
    %6 = scf.for %arg6 = %c0_i32_2 to %5 step %c1_i32 iter_args(%arg7 = %4) -> (vector<2x128xf32>)  : i32 {
      %c2048_i32 = arith.constant 2048 : i32
      %12 = arith.muli %arg6, %c2048_i32 : i32
      %13 = tpu.assume_multiple %12, 2048 : i32
      %c0_8 = arith.constant 0 : index
      %14 = arith.index_cast %13 : i32 to index
      %15 = vector.load %arg2[%c0_8, %14] : memref<2x16384xbf16, #tpu.memory_space<vmem>>, vector<2x2048xbf16>
      %16 = arith.extf %15 : vector<2x2048xbf16> to vector<2x2048xf32>
      %17 = arith.index_cast %13 : i32 to index
      %c0_9 = arith.constant 0 : index
      %18 = vector.load %arg3[%17, %c0_9] : memref<16384x128xi8, #tpu.memory_space<vmem>>, vector<2048x128xi8>
      %19 = arith.sitofp %18 : vector<2048x128xi8> to vector<2048x128xf32>
      %cst_10 = arith.constant dense<0.000000e+00> : vector<2x128xf32>
      %20 = tpu.matmul %16, %19, %cst_10 {dimension_numbers = #tpu.dot_dimension_numbers<[1], [0], [0], [1], [0, 0, 1, 1], [], []>} : vector<2x2048xf32>, vector<2048x128xf32>, vector<2x128xf32> -> vector<2x128xf32>
      %21 = arith.addf %arg7, %20 : vector<2x128xf32>
      scf.yield %21 : vector<2x128xf32>
    }
    %c8_i32_3 = arith.constant 8 : i32
    %7 = arith.addf %3, %6 : vector<2x128xf32>
    %c0_4 = arith.constant 0 : index
    %c0_5 = arith.constant 0 : index
    %8 = vector.load %arg5[%c0_4, %c0_5] : memref<2x128xf32, #tpu.memory_space<vmem>>, vector<2x128xf32>
    tpu.vector_store %arg5[%c0_4, %c0_5], %7 {strides = array<i32>} : memref<2x128xf32, #tpu.memory_space<vmem>>, vector<2x128xf32>,
    %c0_i32_6 = arith.constant 0 : i32
    %9 = arith.cmpi eq, %arg1, %c0_i32_6 : i32
    %10 = arith.extui %9 : i1 to i32
    %c0_i32_7 = arith.constant 0 : i32
    %11 = arith.cmpi ne, %10, %c0_i32_7 : i32
    scf.if %11 {
      %c0_8 = arith.constant 0 : index
      %c0_9 = arith.constant 0 : index
      %12 = vector.load %arg5[%c0_8, %c0_9] : memref<2x128xf32, #tpu.memory_space<vmem>>, vector<2x128xf32>
      %c0_10 = arith.constant 0 : index
      %c0_11 = arith.constant 0 : index
      %c0_12 = arith.constant 0 : index
      %13 = vector.load %arg4[%c0_10, %c0_11, %c0_12] : memref<1x2x128xf32, #tpu.memory_space<vmem>>, vector<1x2x128xf32>
      %14 = vector.shape_cast %13 : vector<1x2x128xf32> to vector<2x128xf32>
      %15 = vector.shape_cast %12 : vector<2x128xf32> to vector<1x2x128xf32>
      tpu.vector_store %arg4[%c0_10, %c0_11, %c0_12], %15 {strides = array<i32>} : memref<1x2x128xf32, #tpu.memory_space<vmem>>, vector<1x2x128xf32>,
    } else {
    }
    return
  }
  func.func @transform_0(%arg0: i32, %arg1: i32) -> (i32, i32) {
    %c1_i32 = arith.constant 1 : i32
    %0 = arith.muli %arg0, %c1_i32 : i32
    %1 = arith.addi %0, %arg1 : i32
    %c0_i32 = arith.constant 0 : i32
    %c0_i32_0 = arith.constant 0 : i32
    return %c0_i32, %1 : i32, i32
  }
  func.func @transform_1(%arg0: i32, %arg1: i32) -> (i32, i32) {
    %c1_i32 = arith.constant 1 : i32
    %0 = arith.muli %arg0, %c1_i32 : i32
    %1 = arith.addi %0, %arg1 : i32
    %c0_i32 = arith.constant 0 : i32
    %c0_i32_0 = arith.constant 0 : i32
    return %1, %c0_i32 : i32, i32
  }
  func.func @transform_2(%arg0: i32, %arg1: i32) -> (i32, i32, i32) {
    %c0_i32 = arith.constant 0 : i32
    %c0_i32_0 = arith.constant 0 : i32
    %c0_i32_1 = arith.constant 0 : i32
    return %arg0, %c0_i32, %c0_i32_0 : i32, i32, i32
  }
}

</mosaic_0001>

<bundles_post_ra>
// kernel: fbgnet_forward.3
= control target key start
LH: loop header
LB: loop body
LE: loop exit
PB: predicated region body
PF: predicated region fallthrough
CT: control target
= control target key end

     0   :  { %7 = vsyncpa [#allocation4], 0  ;;  %s2561_s0 = inlined_call_operand.vmem [shape: bf16[2,32768], index: 0, kind: input, shape index: {}]   ;;  %s2562_s1 = inlined_call_operand.hbm [shape: s8[32768,128], index: 1, kind: input, shape index: {}]   ;;  %s2563_s2 = inlined_call_operand.vmem [shape: f32[2,2,128], index: 2, kind: output, shape index: {}]  }
   0x1   :  { %9 = vsyncpa [#allocation4 + $0x1], 0  ;;  %s2301_s9 = smov 0   ;;  %s2303_s10 = smov 0  }
   0x2   :  { %s2305_s11 = smov 0   ;;  %s2307_s12 = smov 0  }
   0x3   :  { %s2309_s13 = smov 0   ;;  %s2311_s14 = smov 0  }
   0x4 LB: > { %s1558_s15 = sadd.s32 4294967295, %s2271_s14   ;;  %s27_s16 = sadd.s32 1, %s2267_s13  ;;  %s2271_s14 = sphi %s2311_s14, %s15_s14   ;;  %s2267_s13 = sphi %s2309_s13, %s2572_s13   ;;  %s2263_s12 = sphi %s2307_s12, %s2571_s12   ;;  %s2259_s11 = sphi %s2305_s11, %s2570_s11   ;;  %s2255_s10 = sphi %s2303_s10, %s2569_s10   ;;  %s2251_s9 = sphi %s2301_s9, %s2568_s9  }
   0x5   : > { %p29_p0 = scmp.ge.s32.totalorder %s27_s16, 2  ;;  %s64_s17 = sadd.s32 1, %s2259_s11 }
   0x6   : > { %p71_p1 = scmp.ne.s32.totalorder %s2259_s11, %s2255_s10  ;;  %p72_p2 = scmp.eq.s32.totalorder %s2271_s14, 0 }
   0x7   : > { %s2574_s16 = smov (%p29_p0, %s27_s16), 0  ;;  %p77_p4 = scmp.ne.s32.totalorder %s2255_s10, %s2251_s9 }
   0x8   : > { %p2337_p3 = por %p72_p2, %p71_p1  ;;  %s61_s19 = ssub.s32 %s2267_s13, %s2574_s16 }
   0x9   : > { %p78_p5 = scmp.eq.s32.totalorder %s1558_s15, 0  ;;  %p62_p6 = scmp.eq.s32.totalorder %s61_s19, 0 }
   0xa   : > { %p2116_p8 = scmp.lt.s32.totalorder %s2271_s14, 2  ;;  %s137_s22 = sand.u32 1, %s2259_s11  }
   0xb   : > { %p2344_p7 = por %p78_p5, %p77_p4  ;;  %s1573_s23 = sshll.u32 %s2267_s13, 16 }
   0xc   : > { %s2350_s21 = scalar_select %p62_p6, %s2259_s11, %s64_s17  }
   0xd   : > { %s1562_s24 = sshll.u32 %s137_s22, 12  ;;  %s148_s27 = scalar_lea.hbm %s2562_s1, %s1573_s23 }
   0xe   : > { %s141_s28 = scalar_lea.vmem [#allocation3], %s1562_s24  ;;  %p2359_p9 = pnand %p2116_p8, %p2337_p3 }
   0xf   : > { %s149_s29 = sshll.u32 %s141_s28, 4  ;;  %s138_s3 = scalar_lea.sflag [#allocation4], %s137_s22  ;;  %s150_s29 = int_to_ptr.vmem [resolvable:$true] %s149_s29 }
  0x10   : > { %p2187_p10 = pneg %p2359_p9  ;;  %s2198_s4 = scalar_lea.vmem %s150_s29, 65536 }
  0x11   : > { %p2199_p11 = scmp.ne.s32.totalorder %s150_s29, %s2198_s4  ;;  %s2281_s5 = smov [#allocation3]  }
  0x12   : > { %s2203_s6 = sshll.u32 %s2281_s5, 4  ;;  %s2204_s6 = int_to_ptr.vmem [resolvable:$false] %s2203_s6 }
  0x13   : > { %p2201_p12 = pnand %p2199_p11, %p2187_p10  ;;  %s2205_s7 = scalar_lea.vmem %s2204_s6, 131072 }
  0x14   : > { %p2206_p0 = scmp.lt.s32.totalorder %s150_s29, %s2204_s6  ;;  %p2207_p1 = scmp.lt.s32.totalorder %s2205_s7, %s2198_s4 }
  0x15   : > { %p2202_p13 = pneg %p2201_p12 }
  0x16   : > { %p2208_p2 = por %p2207_p1, %p2206_p0 }
  0x18   : > { %p2209_p3 = pnand %p2208_p2, %p2202_p13 }
  0x1a   : > { %2212 = shalt.err (!%p2209_p3)
}
  0x1b   : > { %s2282_s8 = smov 128   ;;  %s2283_s9 = smov 8  }
  0x1c   : > { %2115 = dma.hbm_to_vmem [thread:$0]  (!%p2359_p9), %s148_s27, 65536, %s150_s29, %s138_s3, %s2282_s8, %s2282_s8, %s2283_s9  }
  0x1d   : > { %p1565_p4 = scmp.ge.s32.totalorder %s2271_s14, 1  ;;  %p157_p5 = scmp.lt.s32.totalorder %s2271_s14, 3 }
  0x1f   : > { %p158_p6 = pnand %p1565_p4, %p157_p5 }
  0x20   : > { %s163_s15 = sand.u32 (!%p158_p6), 1, %s2255_s10  }
  0x21   : > { %161 = sbr.rel (%p158_p6) target bundleno = 398 (0x18e), region = 28  ;;  %s2370_s17 = sshll.u32 (!%p158_p6), %s163_s15, 12 }
  0x22   : > { %s164_s18 = scalar_lea.sflag (!%p158_p6), [#allocation4], %s163_s15  ;;  %s167_s19 = scalar_lea.vmem (!%p158_p6), [#allocation3], %s2370_s17 }
  0x26   : > { %2246 = dma.done.wait (%p2344_p7), %s164_s18, 65536  }
  0x27   : > { %2248 = vsyncadd (%p2344_p7), %s164_s18, 4294901760  ;;  %s1567_s22 = sshll.u32 %s2263_s12, 7  ;;  %p201_p8 = scmp.lt.s32.totalorder %s2263_s12, 1  ;;  %v2284_v0 = vmov 0.0   ;;  %v2393_v2 = vmov 0.0  }
  0x28   : > { %p194_p9 = scmp.lt.s32.totalorder %s1567_s22, 255  ;;  %209 = vst [vmem:[#allocation2] sm:$0x3] %v2284_v0  ;;  %s2395_s29 = smov 0  }
  0x29   : > { %s2576_s12 = smov (!%p201_p8, %s2263_s12), 1 }
  0x2a   : > { %s2578_s22 = smov (!%p194_p9, %s1567_s22), 255  ;;  %s1568_s23 = sshll.u32 %s2576_s12, 1 }
  0x2b   : > { %s196_s26 = scalar_lea.vmem %s2561_s0, %s2578_s22  ;;  %s2389_s28 = scalar_lea.vmem %s2563_s2, %s1568_s23 }
  0x2f   : > { %v2391_v1 = vld [vmem:[#allocation2] sm:$0x3] }
  0x30 LB: >> { %s1569_s12 = sshll.u32 %s2279_s29, 11  ;;  %v2285_v3 = vmov 1983009808   ;;  %v816_v5 = vlaneseq  ;;  %s216_s29 = sadd.s32 1, %s2279_s29   ;;  %s2279_s29 = sphi %s2395_s29, %s216_s29   ;;  %v2275_v2 = vphi %v2393_v2, %v2567_v2  }
  0x31   : >> { %v814_v4 = vunpack.c.l.s4 %v2285_v3  ;;  %s228_s30 = sshra.s32 %s1569_s12, 5  ;;  %s219_s3 = sshra.s32 %s1569_s12, 7 }
  0x32   : >> { %s1570_s4 = sshll.u32 %s228_s30, 3  ;;  %s2413_s8 = scalar_lea.vmem %s196_s26, %s219_s3  ;;  %v817_v10 = vshrl.u32 %v816_v5, 7 }
  0x33   : >> { %s2406_s5 = scalar_lea.vmem %s167_s19, %s1570_s4 [#allocation3]  ;;  %v815_v9 = vunpack.c.0.s8 %v814_v4  ;;  %v222_v20 = vld [vmem:[%s2413_s8] sm:$0xff]  ;;  %p213_p7 = scmp.ge.s32.totalorder %s216_s29, 8  }
  0x34   : >> { %v239_v6 = vld [vmem:[%s2406_s5 + $0x38] sm:$0xff]  ;;  %v238_v18 = vld [vmem:[%s2406_s5 + $0x30] sm:$0xff]  ;;  %v224_v27 = vunpack.c.l.bf16 %v222_v20  ;;  %v237_v35 = vld [vmem:[%s2406_s5 + $0x28] sm:$0xff]  ;;  %v225_v58 = vunpack.c.h.bf16 %v222_v20 }
  0x35   : >> { %v247_v7 = vld [vmem:[%s2406_s5 + $0x78] sm:$0xff]  ;;  %v1854_v11 = vunpack.c.h.s8.bf16 %v239_v6  ;;  %v1858_v12 = vunpack.c.l.s8.bf16 %v239_v6  ;;  %v246_v19 = vld [vmem:[%s2406_s5 + $0x70] sm:$0xff]  ;;  %v1862_v23 = vunpack.c.h.s8.bf16 %v238_v18  ;;  %v2424_v28 = vsub.s32 %v815_v9, %v817_v10  ;;  %v245_v36 = vld [vmem:[%s2406_s5 + $0x68] sm:$0xff] }
  0x36   : >> { %v235_v8 = vld [vmem:[%s2406_s5 + $0x18] sm:$0xff]  ;;  %v1886_v13 = vunpack.c.h.s8.bf16 %v247_v7  ;;  %v1890_v14 = vunpack.c.l.s8.bf16 %v247_v7  ;;  %v1894_v24 = vunpack.c.h.s8.bf16 %v246_v19  ;;  %v234_v25 = vld [vmem:[%s2406_s5 + $0x10] sm:$0xff]  ;;  %v1866_v31 = vunpack.c.l.s8.bf16 %v238_v18  ;;  %v233_v43 = vld [vmem:[%s2406_s5 + $0x8] sm:$0xff] }
  0x37   : >> { %v243_v15 = vld [vmem:[%s2406_s5 + $0x58] sm:$0xff]  ;;  %v1856_v16 = vunpack.c.h.s8.bf16 %v235_v8  ;;  %1855 = vmatprep.subr.bf16.mxu0 %v1854_v11  ;;  %v1860_v21 = vunpack.c.l.s8.bf16 %v235_v8  ;;  %v242_v26 = vld [vmem:[%s2406_s5 + $0x50] sm:$0xff]  ;;  %v1864_v29 = vunpack.c.h.s8.bf16 %v234_v25  ;;  %v1898_v32 = vunpack.c.l.s8.bf16 %v246_v19  ;;  %v241_v44 = vld [vmem:[%s2406_s5 + $0x48] sm:$0xff] }
  0x38   : >> { %v1888_v17 = vunpack.c.h.s8.bf16 %v243_v15  ;;  %1887 = vmatprep.subr.bf16.mxu1 %v1886_v13  ;;  %v1892_v22 = vunpack.c.l.s8.bf16 %v243_v15  ;;  %v1896_v30 = vunpack.c.h.s8.bf16 %v242_v26  ;;  %v2427_v33 = vrot.slane %v224_v27, %v2424_v28  ;;  %v236_v50 = vld [vmem:[%s2406_s5 + $0x20] sm:$0xff]  ;;  %v255_v63 = vld [vmem:[%s2406_s5 + $0xb8] sm:$0xff] }
  0x39   : >> { %1857 = vmatpush3.bf16.msra.mxu0 %v1856_v16  ;;  %v812_v34 = vcombine.high %v224_v27, %v224_v27  ;;  %v1868_v39 = vunpack.c.l.s8.bf16 %v234_v25  ;;  %v1900_v40 = vunpack.c.l.s8.bf16 %v242_v26  ;;  %v1870_v41 = vunpack.c.h.s8.bf16 %v237_v35  ;;  %v244_v51 = vld [vmem:[%s2406_s5 + $0x60] sm:$0xff]  ;;  %v263_v0 = vld [vmem:[%s2406_s5 + $0xf8] sm:$0xff]  ;;  %v254_v16 = vld [vmem:[%s2406_s5 + $0xb0] sm:$0xff] }
  0x3a   : >> { %1889 = vmatpush3.bf16.msra.mxu1 %v1888_v17  ;;  %1859 = vmatprep.subr.bf16.mxu0 %v1858_v12  ;;  %v827_v37 = vcombine.high %v2427_v33, %v2427_v33  ;;  %v1902_v42 = vunpack.c.h.s8.bf16 %v245_v36  ;;  %v1872_v46 = vunpack.c.h.s8.bf16 %v233_v43  ;;  %v1904_v47 = vunpack.c.h.s8.bf16 %v241_v44  ;;  %v232_v56 = vld [vmem:[%s2406_s5] sm:$0xff]  ;;  %v251_v8 = vld [vmem:[%s2406_s5 + $0x98] sm:$0xff]  ;;  %v262_v17 = vld [vmem:[%s2406_s5 + $0xf0] sm:$0xff] }
  0x3b   : >> { %1891 = vmatprep.subr.bf16.mxu1 %v1890_v14  ;;  %v2434_v38 = vrot.slane %v812_v34, %v2424_v28  ;;  %v1874_v48 = vunpack.c.l.s8.bf16 %v237_v35  ;;  %v1906_v49 = vunpack.c.l.s8.bf16 %v245_v36  ;;  %v1876_v52 = vunpack.c.l.s8.bf16 %v233_v43  ;;  %v240_v57 = vld [vmem:[%s2406_s5 + $0x40] sm:$0xff]  ;;  %v259_v9 = vld [vmem:[%s2406_s5 + $0xd8] sm:$0xff]  ;;  %v258_v25 = vld [vmem:[%s2406_s5 + $0xd0] sm:$0xff] }
  0x3c   : >> { %960 = vmatprep.mubr.f32.mxu0 %v827_v37  ;;  %v1908_v53 = vunpack.c.l.s8.bf16 %v241_v44  ;;  %v1878_v54 = vunpack.c.h.s8.bf16 %v236_v50  ;;  %v1910_v55 = vunpack.c.h.s8.bf16 %v244_v51  ;;  %v1880_v59 = vunpack.c.h.s8.bf16 %v232_v56  ;;  %v249_v37 = vld [vmem:[%s2406_s5 + $0x88] sm:$0xff]  ;;  %v252_v43 = vld [vmem:[%s2406_s5 + $0xa0] sm:$0xff] }
  0x3d   : >> { %1861 = vmatpush3.bf16.msra.mxu0 %v1860_v21  ;;  %v828_v45 = vcombine.high %v2434_v38, %v2434_v38  ;;  %v1912_v60 = vunpack.c.h.s8.bf16 %v240_v57  ;;  %v1882_v61 = vunpack.c.l.s8.bf16 %v236_v50  ;;  %v1914_v62 = vunpack.c.l.s8.bf16 %v244_v51  ;;  %v260_v44 = vld [vmem:[%s2406_s5 + $0xe0] sm:$0xff] }
  0x3e   : >> { %1893 = vmatpush3.bf16.msra.mxu1 %v1892_v22  ;;  %1863 = vmatprep.subr.bf16.mxu0 %v1862_v23  ;;  %v829_v3 = vcombine.high %v225_v58, %v225_v58  ;;  %v1884_v4 = vunpack.c.l.s8.bf16 %v232_v56  ;;  %v1916_v5 = vunpack.c.l.s8.bf16 %v240_v57  ;;  %v1918_v6 = vunpack.c.h.s8.bf16 %v255_v63  ;;  %v248_v50 = vld [vmem:[%s2406_s5 + $0x80] sm:$0xff]  ;;  %v271_v57 = vld [vmem:[%s2406_s5 + $0x138] sm:$0xff] }
  0x3f   : >> { %1895 = vmatprep.subr.bf16.mxu1 %v1894_v24  ;;  %1030 = vmatprep.mubr.f32.mxu1 %v828_v45  ;;  %v1950_v7 = vunpack.c.h.s8.bf16 %v263_v0  ;;  %v2449_v10 = vrot.slane %v225_v58, %v2424_v28  ;;  %v1920_v12 = vunpack.c.h.s8.bf16 %v251_v8  ;;  %v1952_v13 = vunpack.c.h.s8.bf16 %v259_v9  ;;  %v250_v24 = vld [vmem:[%s2406_s5 + $0x90] sm:$0xff]  ;;  %v2471_v45 = vld [vmem:[%s2413_s8 + $0x8] sm:$0xff]  ;;  %v256_v51 = vld [vmem:[%s2406_s5 + $0xc0] sm:$0xff] }
  0x40   : >> { %v2452_v11 = vrot.slane %v829_v3, %v2424_v28  ;;  %v1922_v14 = vunpack.c.l.s8.bf16 %v255_v63  ;;  %v1954_v15 = vunpack.c.l.s8.bf16 %v263_v0  ;;  %v1924_v20 = vunpack.c.l.s8.bf16 %v251_v8  ;;  %v279_v58 = vld [vmem:[%s2406_s5 + $0x178] sm:$0xff] }
  0x41   : >> { %1865 = vmatpush3.bf16.msra.mxu0 %v1864_v29  ;;  %v844_v18 = vcombine.high %v2449_v10, %v2449_v10  ;;  %v1956_v21 = vunpack.c.l.s8.bf16 %v259_v9  ;;  %v1926_v22 = vunpack.c.h.s8.bf16 %v254_v16  ;;  %v1958_v23 = vunpack.c.h.s8.bf16 %v262_v17  ;;  %v267_v0 = vld [vmem:[%s2406_s5 + $0x118] sm:$0xff] }
  0x42   : >> { %1897 = vmatpush3.bf16.msra.mxu1 %v1896_v30  ;;  %1867 = vmatprep.subr.bf16.mxu0 %v1866_v31  ;;  %v845_v19 = vcombine.high %v2452_v11, %v2452_v11  ;;  %v1928_v26 = vunpack.c.h.s8.bf16 %v250_v24  ;;  %v1960_v27 = vunpack.c.h.s8.bf16 %v258_v25  ;;  %v1930_v29 = vunpack.c.l.s8.bf16 %v254_v16  ;;  %v253_v31 = vld [vmem:[%s2406_s5 + $0xa8] sm:$0xff]  ;;  %v275_v3 = vld [vmem:[%s2406_s5 + $0x158] sm:$0xff] }
  0x43   : >> { %1899 = vmatprep.subr.bf16.mxu1 %v1898_v32  ;;  %v1962_v30 = vunpack.c.l.s8.bf16 %v262_v17  ;;  %v261_v32 = vld [vmem:[%s2406_s5 + $0xe8] sm:$0xff]  ;;  %v1964_v34 = vunpack.c.l.s8.bf16 %v258_v25  ;;  %v1934_v35 = vunpack.c.h.s8.bf16 %v253_v31  ;;  %v1978_v56 = vunpack.c.l.s8.bf16 %v260_v44 }
  0x44   : >> { %v1966_v36 = vunpack.c.h.s8.bf16 %v261_v32  ;;  %v2014_v63 = vunpack.c.h.s8.bf16 %v279_v58  ;;  %v1986_v8 = vunpack.c.l.s8.bf16 %v271_v57  ;;  %v2018_v9 = vunpack.c.l.s8.bf16 %v279_v58  ;;  %v277_v25 = vld [vmem:[%s2406_s5 + $0x168] sm:$0xff]  ;;  %v291_v58 = vld [vmem:[%s2406_s5 + $0x1d8] sm:$0xff] }
  0x45   : >> { %1869 = vmatpush3.bf16.msra.mxu0 %v1868_v39  ;;  %v1936_v39 = vunpack.c.h.s8.bf16 %v249_v37  ;;  %v1988_v16 = vunpack.c.l.s8.bf16 %v267_v0  ;;  %v2020_v17 = vunpack.c.l.s8.bf16 %v275_v3 }
  0x46   : >> { %1901 = vmatpush3.bf16.msra.mxu1 %v1900_v40  ;;  %1871 = vmatprep.subr.bf16.mxu0 %v1870_v41  ;;  %v1938_v41 = vunpack.c.l.s8.bf16 %v253_v31  ;;  %v265_v31 = vld [vmem:[%s2406_s5 + $0x108] sm:$0xff] }
  0x47   : >> { %1903 = vmatprep.subr.bf16.mxu1 %v1902_v42  ;;  %v1970_v42 = vunpack.c.l.s8.bf16 %v261_v32  ;;  %v273_v32 = vld [vmem:[%s2406_s5 + $0x148] sm:$0xff] }
  0x49   : >> { %1873 = vmatpush3.bf16.msra.mxu0 %v1872_v46  ;;  %v1940_v46 = vunpack.c.l.s8.bf16 %v249_v37  ;;  %v268_v37 = vld [vmem:[%s2406_s5 + $0x120] sm:$0xff] }
  0x4a   : >> { %1905 = vmatpush3.bf16.msra.mxu1 %v1904_v47  ;;  %1875 = vmatprep.subr.bf16.mxu0 %v1874_v48  ;;  %v1942_v48 = vunpack.c.h.s8.bf16 %v252_v43 }
  0x4b   : >> { %1907 = vmatprep.subr.bf16.mxu1 %v1906_v49  ;;  %v1974_v49 = vunpack.c.h.s8.bf16 %v260_v44  ;;  %v272_v44 = vld [vmem:[%s2406_s5 + $0x140] sm:$0xff] }
  0x4d   : >> { %1877 = vmatpush3.bf16.msra.mxu0 %v1876_v52  ;;  %v226_v52 = vunpack.c.l.bf16 %v2471_v45 }
  0x4e   : >> { %1909 = vmatpush3.bf16.msra.mxu1 %v1908_v53  ;;  %1879 = vmatprep.subr.bf16.mxu0 %v1878_v54  ;;  %v1944_v53 = vunpack.c.h.s8.bf16 %v248_v50  ;;  %v1976_v54 = vunpack.c.h.s8.bf16 %v256_v51 }
  0x4f   : >> { %1911 = vmatprep.subr.bf16.mxu1 %v1910_v55  ;;  %v1946_v55 = vunpack.c.l.s8.bf16 %v252_v43  ;;  %v264_v43 = vld [vmem:[%s2406_s5 + $0x100] sm:$0xff] }
  0x51   : >> { %1881 = vmatpush3.bf16.msra.mxu0 %v1880_v59  ;;  %v846_v59 = vcombine.high %v226_v52, %v226_v52 }
  0x52   : >> { %1913 = vmatpush3.bf16.msra.mxu1 %v1912_v60  ;;  %1883 = vmatprep.subr.bf16.mxu0 %v1882_v61  ;;  %v1948_v60 = vunpack.c.l.s8.bf16 %v248_v50  ;;  %v1980_v61 = vunpack.c.l.s8.bf16 %v256_v51  ;;  %v287_v51 = vld [vmem:[%s2406_s5 + $0x1b8] sm:$0xff] }
  0x53   : >> { %1915 = vmatprep.subr.bf16.mxu1 %v1914_v62  ;;  %v1982_v62 = vunpack.c.h.s8.bf16 %v271_v57  ;;  %v283_v57 = vld [vmem:[%s2406_s5 + $0x198] sm:$0xff] }
  0x55   : >> { %1885 = vmatpush3.bf16.msra.mxu0 %v1884_v4  ;;  %v2481_v4 = vrot.slane %v226_v52, %v2424_v28  ;;  %v295_v52 = vld [vmem:[%s2406_s5 + $0x1f8] sm:$0xff] }
  0x56   : >> { %1917 = vmatpush3.bf16.msra.mxu1 %v1916_v5  ;;  %1919 = vmatprep.subr.bf16.mxu0 %v1918_v6  ;;  %v2484_v5 = vrot.slane %v846_v59, %v2424_v28  ;;  %v1984_v6 = vunpack.c.h.s8.bf16 %v267_v0  ;;  %v2082_v0 = vunpack.c.l.s8.bf16 %v295_v52 }
  0x57   : >> { %1951 = vmatprep.subr.bf16.mxu1 %v1950_v7  ;;  %v2016_v7 = vunpack.c.h.s8.bf16 %v275_v3  ;;  %v286_v3 = vld [vmem:[%s2406_s5 + $0x1b0] sm:$0xff] }
  0x58   : >> { %961 = vmatmul.mubr.f32.vlgmr.msra.gmra.mxu0 %v2427_v33  ;;  %v1932_v33 = vunpack.c.l.s8.bf16 %v250_v24  ;;  %v269_v24 = vld [vmem:[%s2406_s5 + $0x128] sm:$0xff] }
  0x59   : >> { %1031 = vmatmul.mubr.f32.vlgmr.msra.gmra.mxu1 %v2434_v38  ;;  %1921 = vmatpush3.bf16.msra.mxu0 %v1920_v12  ;;  %v257_v38 = vld [vmem:[%s2406_s5 + $0xc8] sm:$0xff]  ;;  %v270_v12 = vld [vmem:[%s2406_s5 + $0x130] sm:$0xff] }
  0x5a   : >> { %1953 = vmatpush3.bf16.msra.mxu1 %v1952_v13  ;;  %1923 = vmatprep.subr.bf16.mxu0 %v1922_v14  ;;  %v1968_v40 = vunpack.c.h.s8.bf16 %v257_v38  ;;  %v1972_v47 = vunpack.c.l.s8.bf16 %v257_v38  ;;  %v278_v13 = vld [vmem:[%s2406_s5 + $0x170] sm:$0xff]  ;;  %v861_v14 = vcombine.high %v2481_v4, %v2481_v4  ;;  %v276_v38 = vld [vmem:[%s2406_s5 + $0x160] sm:$0xff] }
  0x5b   : >> { %1955 = vmatprep.subr.bf16.mxu1 %v1954_v15  ;;  %1100 = vmatprep.mubr.f32.mxu0 %v844_v18  ;;  %v862_v15 = vcombine.high %v2484_v5, %v2484_v5  ;;  %v1990_v18 = vunpack.c.h.s8.bf16 %v270_v12  ;;  %v2042_v50 = vunpack.c.l.s8.bf16 %v276_v38 }
  0x5c   : >> { %1170 = vmatprep.mubr.f32.mxu1 %v845_v19  ;;  %v2022_v19 = vunpack.c.h.s8.bf16 %v278_v13 }
  0x5d   : >> { %1925 = vmatpush3.bf16.msra.mxu0 %v1924_v20  ;;  %v266_v20 = vld [vmem:[%s2406_s5 + $0x110] sm:$0xff] }
  0x5e   : >> { %1957 = vmatpush3.bf16.msra.mxu1 %v1956_v21  ;;  %1927 = vmatprep.subr.bf16.mxu0 %v1926_v22  ;;  %v274_v21 = vld [vmem:[%s2406_s5 + $0x150] sm:$0xff]  ;;  %v1992_v22 = vunpack.c.h.s8.bf16 %v266_v20 }
  0x5f   : >> { %1959 = vmatprep.subr.bf16.mxu1 %v1958_v23  ;;  %v2026_v23 = vunpack.c.l.s8.bf16 %v278_v13 }
  0x61   : >> { %1929 = vmatpush3.bf16.msra.mxu0 %v1928_v26  ;;  %v1996_v26 = vunpack.c.l.s8.bf16 %v266_v20 }
  0x62   : >> { %1961 = vmatpush3.bf16.msra.mxu1 %v1960_v27  ;;  %1931 = vmatprep.subr.bf16.mxu0 %v1930_v29  ;;  %v2028_v27 = vunpack.c.l.s8.bf16 %v274_v21  ;;  %v1998_v29 = vunpack.c.h.s8.bf16 %v269_v24 }
  0x63   : >> { %1963 = vmatprep.subr.bf16.mxu1 %v1962_v30  ;;  %v2030_v30 = vunpack.c.h.s8.bf16 %v277_v25 }
  0x65   : >> { %1933 = vmatpush3.bf16.msra.mxu0 %v1932_v33  ;;  %v2000_v33 = vunpack.c.h.s8.bf16 %v265_v31 }
  0x66   : >> { %1965 = vmatpush3.bf16.msra.mxu1 %v1964_v34  ;;  %1935 = vmatprep.subr.bf16.mxu0 %v1934_v35  ;;  %v2032_v34 = vunpack.c.h.s8.bf16 %v273_v32  ;;  %v2002_v35 = vunpack.c.l.s8.bf16 %v269_v24 }
  0x67   : >> { %1967 = vmatprep.subr.bf16.mxu1 %v1966_v36  ;;  %v2034_v36 = vunpack.c.l.s8.bf16 %v277_v25 }
  0x69   : >> { %1937 = vmatpush3.bf16.msra.mxu0 %v1936_v39  ;;  %v2004_v39 = vunpack.c.l.s8.bf16 %v265_v31 }
  0x6a   : >> { %1969 = vmatpush3.bf16.msra.mxu1 %v1968_v40  ;;  %1939 = vmatprep.subr.bf16.mxu0 %v1938_v41  ;;  %v2036_v40 = vunpack.c.l.s8.bf16 %v273_v32  ;;  %v2006_v41 = vunpack.c.h.s8.bf16 %v268_v37 }
  0x6b   : >> { %1971 = vmatprep.subr.bf16.mxu1 %v1970_v42  ;;  %v2038_v42 = vunpack.c.h.s8.bf16 %v276_v38 }
  0x6d   : >> { %1941 = vmatpush3.bf16.msra.mxu0 %v1940_v46  ;;  %v227_v46 = vunpack.c.h.bf16 %v2471_v45  ;;  %v2046_v45 = vunpack.c.h.s8.bf16 %v287_v51 }
  0x6e   : >> { %1973 = vmatpush3.bf16.msra.mxu1 %v1972_v47  ;;  %1943 = vmatprep.subr.bf16.mxu0 %v1942_v48  ;;  %v2008_v47 = vunpack.c.h.s8.bf16 %v264_v43  ;;  %v2040_v48 = vunpack.c.h.s8.bf16 %v272_v44 }
  0x6f   : >> { %1975 = vmatprep.subr.bf16.mxu1 %v1974_v49  ;;  %v2010_v49 = vunpack.c.l.s8.bf16 %v268_v37  ;;  %v2510_v59 = vrot.slane %v227_v46, %v2424_v28 }
  0x71   : >> { %1945 = vmatpush3.bf16.msra.mxu0 %v1944_v53  ;;  %v863_v53 = vcombine.high %v227_v46, %v227_v46 }
  0x72   : >> { %1977 = vmatpush3.bf16.msra.mxu1 %v1976_v54  ;;  %1947 = vmatprep.subr.bf16.mxu0 %v1946_v55  ;;  %v2012_v54 = vunpack.c.l.s8.bf16 %v264_v43  ;;  %v2044_v55 = vunpack.c.l.s8.bf16 %v272_v44 }
  0x73   : >> { %1979 = vmatprep.subr.bf16.mxu1 %v1978_v56  ;;  %v2078_v56 = vunpack.c.h.s8.bf16 %v295_v52 }
  0x75   : >> { %1949 = vmatpush3.bf16.msra.mxu0 %v1948_v60  ;;  %v2513_v60 = vrot.slane %v863_v53, %v2424_v28  ;;  %v2052_v28 = vunpack.c.l.s8.bf16 %v283_v57 }
  0x76   : >> { %1981 = vmatpush3.bf16.msra.mxu1 %v1980_v61  ;;  %1983 = vmatprep.subr.bf16.mxu0 %v1982_v62  ;;  %v2048_v61 = vunpack.c.h.s8.bf16 %v283_v57  ;;  %v2080_v62 = vunpack.c.h.s8.bf16 %v291_v58 }
  0x77   : >> { %2015 = vmatprep.subr.bf16.mxu1 %v2014_v63  ;;  %v2050_v63 = vunpack.c.l.s8.bf16 %v287_v51 }
  0x78   : >> { %1101 = vmatmul.mubr.f32.vlgmr.msra.gmra.mxu0 %v2449_v10  ;;  %v2024_v10 = vunpack.c.h.s8.bf16 %v274_v21 }
  0x79   : >> { %1171 = vmatmul.mubr.f32.vlgmr.msra.gmra.mxu1 %v2452_v11  ;;  %1985 = vmatpush3.bf16.msra.mxu0 %v1984_v6  ;;  %v1994_v11 = vunpack.c.l.s8.bf16 %v270_v12  ;;  %v294_v6 = vld [vmem:[%s2406_s5 + $0x1f0] sm:$0xff]  ;;  %v2054_v12 = vunpack.c.h.s8.bf16 %v286_v3 }
  0x7a   : >> { %2017 = vmatpush3.bf16.msra.mxu1 %v2016_v7  ;;  %1987 = vmatprep.subr.bf16.mxu0 %v1986_v8  ;;  %v878_v7 = vcombine.high %v2510_v59, %v2510_v59  ;;  %v879_v8 = vcombine.high %v2513_v60, %v2513_v60  ;;  %v2086_v13 = vunpack.c.h.s8.bf16 %v294_v6 }
  0x7b   : >> { %2019 = vmatprep.subr.bf16.mxu1 %v2018_v9  ;;  %1240 = vmatprep.mubr.f32.mxu0 %v861_v14  ;;  %v2084_v9 = vunpack.c.l.s8.bf16 %v291_v58  ;;  %v282_v14 = vld [vmem:[%s2406_s5 + $0x190] sm:$0xff] }
  0x7c   : >> { %1310 = vmatprep.mubr.f32.mxu1 %v862_v15  ;;  %v290_v15 = vld [vmem:[%s2406_s5 + $0x1d0] sm:$0xff]  ;;  %v2060_v20 = vunpack.c.l.s8.bf16 %v282_v14 }
  0x7d   : >> { %1989 = vmatpush3.bf16.msra.mxu0 %v1988_v16  ;;  %v2056_v16 = vunpack.c.h.s8.bf16 %v282_v14  ;;  %v2092_v21 = vunpack.c.l.s8.bf16 %v290_v15 }
  0x7e   : >> { %2021 = vmatpush3.bf16.msra.mxu1 %v2020_v17  ;;  %1991 = vmatprep.subr.bf16.mxu0 %v1990_v18  ;;  %v2090_v17 = vunpack.c.l.s8.bf16 %v294_v6  ;;  %v285_v18 = vld [vmem:[%s2406_s5 + $0x1a8] sm:$0xff] }
  0x7f   : >> { %2023 = vmatprep.subr.bf16.mxu1 %v2022_v19  ;;  %v293_v19 = vld [vmem:[%s2406_s5 + $0x1e8] sm:$0xff] }
  0x81   : >> { %1993 = vmatpush3.bf16.msra.mxu0 %v1992_v22  ;;  %v2062_v22 = vunpack.c.h.s8.bf16 %v285_v18 }
  0x82   : >> { %2025 = vmatpush3.bf16.msra.mxu1 %v2024_v10  ;;  %1995 = vmatprep.subr.bf16.mxu0 %v1994_v11  ;;  %v2094_v10 = vunpack.c.h.s8.bf16 %v293_v19  ;;  %v281_v11 = vld [vmem:[%s2406_s5 + $0x188] sm:$0xff] }
  0x83   : >> { %2027 = vmatprep.subr.bf16.mxu1 %v2026_v23  ;;  %v289_v23 = vld [vmem:[%s2406_s5 + $0x1c8] sm:$0xff]  ;;  %v2064_v24 = vunpack.c.h.s8.bf16 %v281_v11  ;;  %v2068_v31 = vunpack.c.l.s8.bf16 %v281_v11 }
  0x84   : >> { %v2096_v25 = vunpack.c.h.s8.bf16 %v289_v23  ;;  %v2100_v32 = vunpack.c.l.s8.bf16 %v289_v23 }
  0x85   : >> { %1997 = vmatpush3.bf16.msra.mxu0 %v1996_v26  ;;  %v2066_v26 = vunpack.c.l.s8.bf16 %v285_v18 }
  0x86   : >> { %2029 = vmatpush3.bf16.msra.mxu1 %v2028_v27  ;;  %1999 = vmatprep.subr.bf16.mxu0 %v1998_v29  ;;  %v2098_v27 = vunpack.c.l.s8.bf16 %v293_v19  ;;  %v284_v29 = vld [vmem:[%s2406_s5 + $0x1a0] sm:$0xff] }
  0x87   : >> { %2031 = vmatprep.subr.bf16.mxu1 %v2030_v30  ;;  %v292_v30 = vld [vmem:[%s2406_s5 + $0x1e0] sm:$0xff] }
  0x89   : >> { %2001 = vmatpush3.bf16.msra.mxu0 %v2000_v33  ;;  %v2070_v33 = vunpack.c.h.s8.bf16 %v284_v29 }
  0x8a   : >> { %2033 = vmatpush3.bf16.msra.mxu1 %v2032_v34  ;;  %2003 = vmatprep.subr.bf16.mxu0 %v2002_v35  ;;  %v2102_v34 = vunpack.c.h.s8.bf16 %v292_v30  ;;  %v280_v35 = vld [vmem:[%s2406_s5 + $0x180] sm:$0xff] }
  0x8b   : >> { %2035 = vmatprep.subr.bf16.mxu1 %v2034_v36  ;;  %v288_v36 = vld [vmem:[%s2406_s5 + $0x1c0] sm:$0xff]  ;;  %v2072_v37 = vunpack.c.h.s8.bf16 %v280_v35 }
  0x8c   : >> { %v2104_v38 = vunpack.c.h.s8.bf16 %v288_v36 }
  0x8d   : >> { %2005 = vmatpush3.bf16.msra.mxu0 %v2004_v39  ;;  %v2074_v39 = vunpack.c.l.s8.bf16 %v284_v29 }
  0x8e   : >> { %2037 = vmatpush3.bf16.msra.mxu1 %v2036_v40  ;;  %2007 = vmatprep.subr.bf16.mxu0 %v2006_v41  ;;  %v2106_v40 = vunpack.c.l.s8.bf16 %v292_v30  ;;  %v2076_v41 = vunpack.c.l.s8.bf16 %v280_v35 }
  0x8f   : >> { %2039 = vmatprep.subr.bf16.mxu1 %v2038_v42  ;;  %v2108_v42 = vunpack.c.l.s8.bf16 %v288_v36 }
  0x91   : >> { %2009 = vmatpush3.bf16.msra.mxu0 %v2008_v47 }
  0x92   : >> { %2041 = vmatpush3.bf16.msra.mxu1 %v2040_v48  ;;  %2011 = vmatprep.subr.bf16.mxu0 %v2010_v49 }
  0x93   : >> { %2043 = vmatprep.subr.bf16.mxu1 %v2042_v50 }
  0x95   : >> { %2013 = vmatpush3.bf16.msra.mxu0 %v2012_v54 }
  0x96   : >> { %2045 = vmatpush3.bf16.msra.mxu1 %v2044_v55  ;;  %2047 = vmatprep.subr.bf16.mxu0 %v2046_v45 }
  0x97   : >> { %2079 = vmatprep.subr.bf16.mxu1 %v2078_v56 }
  0x98   : >> { %1241 = vmatmul.mubr.f32.vlgmr.msra.gmra.mxu0 %v2481_v4  ;;  %v2088_v4 = vunpack.c.h.s8.bf16 %v290_v15 }
  0x99   : >> { %1311 = vmatmul.mubr.f32.vlgmr.msra.gmra.mxu1 %v2484_v5  ;;  %2049 = vmatpush3.bf16.msra.mxu0 %v2048_v61  ;;  %v2058_v5 = vunpack.c.l.s8.bf16 %v286_v3 }
  0x9a   : >> { %2081 = vmatpush3.bf16.msra.mxu1 %v2080_v62  ;;  %2051 = vmatprep.subr.bf16.mxu0 %v2050_v63 }
  0x9b   : >> { %2083 = vmatprep.subr.bf16.mxu1 %v2082_v0  ;;  %1380 = vmatprep.mubr.f32.mxu0 %v878_v7 }
  0x9c   : >> { %1450 = vmatprep.mubr.f32.mxu1 %v879_v8 }
  0x9d   : >> { %2053 = vmatpush3.bf16.msra.mxu0 %v2052_v28 }
  0x9e   : >> { %2085 = vmatpush3.bf16.msra.mxu1 %v2084_v9  ;;  %2055 = vmatprep.subr.bf16.mxu0 %v2054_v12 }
  0x9f   : >> { %2087 = vmatprep.subr.bf16.mxu1 %v2086_v13 }
  0xa1   : >> { %2057 = vmatpush3.bf16.msra.mxu0 %v2056_v16 }
  0xa2   : >> { %2089 = vmatpush3.bf16.msra.mxu1 %v2088_v4  ;;  %2059 = vmatprep.subr.bf16.mxu0 %v2058_v5 }
  0xa3   : >> { %2091 = vmatprep.subr.bf16.mxu1 %v2090_v17 }
  0xa5   : >> { %2061 = vmatpush3.bf16.msra.mxu0 %v2060_v20 }
  0xa6   : >> { %2093 = vmatpush3.bf16.msra.mxu1 %v2092_v21  ;;  %2063 = vmatprep.subr.bf16.mxu0 %v2062_v22 }
  0xa7   : >> { %2095 = vmatprep.subr.bf16.mxu1 %v2094_v10 }
  0xa9   : >> { %2065 = vmatpush3.bf16.msra.mxu0 %v2064_v24 }
  0xaa   : >> { %2097 = vmatpush3.bf16.msra.mxu1 %v2096_v25  ;;  %2067 = vmatprep.subr.bf16.mxu0 %v2066_v26 }
  0xab   : >> { %2099 = vmatprep.subr.bf16.mxu1 %v2098_v27 }
  0xad   : >> { %2069 = vmatpush3.bf16.msra.mxu0 %v2068_v31 }
  0xae   : >> { %2101 = vmatpush3.bf16.msra.mxu1 %v2100_v32  ;;  %2071 = vmatprep.subr.bf16.mxu0 %v2070_v33 }
  0xaf   : >> { %2103 = vmatprep.subr.bf16.mxu1 %v2102_v34 }
  0xb1   : >> { %2073 = vmatpush3.bf16.msra.mxu0 %v2072_v37 }
  0xb2   : >> { %2105 = vmatpush3.bf16.msra.mxu1 %v2104_v38  ;;  %2075 = vmatprep.subr.bf16.mxu0 %v2074_v39 }
  0xb3   : >> { %2107 = vmatprep.subr.bf16.mxu1 %v2106_v40 }
  0xb5   : >> { %2077 = vmatpush3.bf16.msra.mxu0 %v2076_v41 }
  0xb6   : >> { %2109 = vmatpush3.bf16.msra.mxu1 %v2108_v42 }
  0xb8   : >> { %1381 = vmatmul.mubr.f32.vlgmr.msra.gmra.mxu0 %v2510_v59 }
  0xb9   : >> { %1451 = vmatmul.mubr.f32.vlgmr.msra.gmra.mxu1 %v2513_v60 }
 0x118   : >> { %v1606_v43 = vpop.f32.mrf.mxu0 }
 0x119   : >> { %v1641_v44 = vpop.f32.mrf.mxu1 }
 0x11a   : >> { %v1607_v46 = vpop.f32.mrf.mxu0 }
 0x11b   : >> { %v1642_v48 = vpop.f32.mrf.mxu1  ;;  %v1608_v51 = vadd.f32 %v1607_v46, %v1606_v43 }
 0x11c   : >> { %v1643_v52 = vadd.f32 %v1642_v48, %v1641_v44 }
 0x11e   : >> { %v1033_v45 = vadd.f32 %v1643_v52, %v1608_v51 }
 0x138   : >> { %v1676_v47 = vpop.f32.mrf.mxu0 }
 0x139   : >> { %v1711_v49 = vpop.f32.mrf.mxu1 }
 0x13a   : >> { %v1677_v50 = vpop.f32.mrf.mxu0 }
 0x13b   : >> { %v1678_v54 = vadd.f32 %v1677_v50, %v1676_v47  ;;  %v1712_v55 = vpop.f32.mrf.mxu1 }
 0x13c   : >> { %v1713_v61 = vadd.f32 %v1712_v55, %v1711_v49 }
 0x13d   : >> { %v1103_v58 = vadd.f32 %v1678_v54, %v1033_v45 }
 0x13f   : >> { %v1173_v60 = vadd.f32 %v1713_v61, %v1103_v58 }
 0x158   : >> { %v1746_v53 = vpop.f32.mrf.mxu0 }
 0x159   : >> { %v1781_v56 = vpop.f32.mrf.mxu1 }
 0x15a   : >> { %v1747_v57 = vpop.f32.mrf.mxu0 }
 0x15b   : >> { %v1748_v59 = vadd.f32 %v1747_v57, %v1746_v53  ;;  %v1782_v62 = vpop.f32.mrf.mxu1 }
 0x15c   : >> { %v1783_v0 = vadd.f32 %v1782_v62, %v1781_v56 }
 0x15d   : >> { %v1243_v63 = vadd.f32 %v1748_v59, %v1173_v60 }
 0x15f   : >> { %v1313_v28 = vadd.f32 %v1783_v0, %v1243_v63 }
 0x178   : >> { %v1816_v3 = vpop.f32.mrf.mxu0 }
 0x179   : >> { %v1851_v6 = vpop.f32.mrf.mxu1 }
 0x17a   : >> { %v1817_v7 = vpop.f32.mrf.mxu0 }
 0x17b   : >> { %v1852_v8 = vpop.f32.mrf.mxu1  ;;  %v1818_v9 = vadd.f32 %v1817_v7, %v1816_v3 }
 0x17c   : >> { %v1853_v13 = vadd.f32 %v1852_v8, %v1851_v6 }
 0x17d   : >> { %v1383_v12 = vadd.f32 %v1818_v9, %v1313_v28 }
 0x17f   : >> { %v1453_v14 = vadd.f32 %v1853_v13, %v1383_v12  ;;  %215 = sbr.rel (!%p213_p7) target bundleno = 48 (0x30), region = 88 }
 0x181   : >> { %v1456_v15 = vadd.f32 %v2275_v2, %v1453_v14  }
 0x183   : >> { %v2567_v2 = vmov %v1456_v15  ;;  %v1457_v16 = vadd.f32 (%p213_p7), %v1456_v15, %v2391_v1 }
 0x185   : > { %1458 = vst [vmem:[#allocation2] sm:$0x3] %v1457_v16 }
 0x18c   : > { %v1462_v4 = vld [vmem:[#allocation2] sm:$0x3] }
 0x18d   : > { %1463 = vst [vmem:[%s2389_s28] sm:$0x3] %v1462_v4 }
 0x18e PF: > { %s15_s14 = sadd.s32 1, %s2271_s14   ;;  %s2568_s9 = smov %s2255_s10 }
 0x18f   : > { %p12_p10 = scmp.ge.s32.totalorder %s15_s14, 4   ;;  %s2569_s10 = smov %s2259_s11 }
 0x190   : > { %s2570_s11 = smov %s2350_s21  ;;  %s2571_s12 = smov %s2267_s13 }
 0x191   : > { %s2572_s13 = smov %s2574_s16  ;;  %14 = sbr.rel (!%p12_p10) target bundleno = 4 (0x4), region = 99 }
 0x196   :  { %1483 = vsyncpa [#allocation4], 1 }
 0x197   :  { %1485 = vsyncpa [#allocation4 + $0x1], 1 }

// kernel: fbgnet_forward.2
= control target key start
LH: loop header
LB: loop body
LE: loop exit
PB: predicated region body
PF: predicated region fallthrough
CT: control target
= control target key end

     0   :  { %s10816_s18 = smov 0   ;;  %s16224_s0 = inlined_call_operand.vmem [shape: f32[2,4,640], index: 0, kind: input, shape index: {}]   ;;  %s16225_s1 = inlined_call_operand.vmem [shape: f32[32,5], index: 1, kind: input, shape index: {}]   ;;  %s16226_s2 = inlined_call_operand.vmem [shape: f32[32,1], index: 2, kind: input, shape index: {}]   ;;  %s16227_s3 = inlined_call_operand.vmem [shape: f32[5,64,32], index: 3, kind: input, shape index: {}]   ;;  %s16228_s4 = inlined_call_operand.vmem [shape: f32[64,1], index: 4, kind: input, shape index: {}]   ;;  %s16229_s5 = inlined_call_operand.vmem [shape: bf16[2,64,512], index: 5, kind: output, shape index: {}]  }
   0x1 LB: > { %s8883_s19 = sadd.s32 4294967295, %s10776_s18   ;;  %p8887_p0 = scmp.ge.s32.totalorder %s10776_s18, 1  ;;  %s10776_s18 = sphi %s10816_s18, %s15_s18  }
   0x2   : > { %p187_p1 = scmp.lt.s32.totalorder %s10776_s18, 3 }
   0x4   : > { %p188_p2 = pnand %p8887_p0, %p187_p1 }
   0x6   : > { %191 = sbr.rel (%p188_p2) target bundleno = 1613 (0x64d), region = 40 }
   0xb   : > { %v227_v0 = vld [vmem:[%s16225_s1 + $0x10] sm:$0xff]  ;;  %v225_v1 = vld [vmem:[%s16225_s1] sm:$0xff]  ;;  %v10778_v2 = vmov 1   ;;  %v10779_v3 = vmov 0   ;;  %v228_v4 = vld [vmem:[%s16225_s1 + $0x18] sm:$0xff]  ;;  %v10780_v6 = vmov 2   ;;  %v387_v17 = vlaneseq }
   0xc   : > { %10720 = vset.pattern.permute.xlu0 %v10778_v2  ;;  %10719 = vset.pattern.permute.xlu1 %v10779_v3  ;;  %v226_v5 = vld [vmem:[%s16225_s1 + $0x8] sm:$0xff]  ;;  %v10781_v7 = vmov 3   ;;  %v10782_v8 = vmov 4   ;;  %p215_p3 = scmp.lt.s32.totalorder %s8883_s19, 1  ;;  %s10783_s7 = smov 127   ;;  %vm2991_vm0 = vcmask 261120  }
   0xd   : > { %262 = vperm.xlu1 %10719, %v227_v0   ;;  %284 = vperm.xlu0 %10720, %v225_v1   ;;  %v388_v20 = vshrl.u32 %v387_v17, 7  ;;  %vm437_vm1 = vcmask 1039360   ;;  %s10784_s10 = smov 126   ;;  %vm3953_vm2 = vcmask 1031168  }
   0xe   : > { %s17249_s19 = smov (!%p215_p3, %s8883_s19), 1 }
   0xf   : > { %s10702_s28 = smul.u32 20, %s17249_s19  ;;  %v10872_v23 = vsub.s32 0, %v388_v20  ;;  %v10874_v24 = vsub.s32 4, %v388_v20  ;;  %s9389_s9 = sshll.u32 %s17249_s19, 7 }
  0x10   : > { %s15446_s12 = scalar_lea.vmem %s16229_s5, %s9389_s9 }
  0x11   : > { %267 = vperm.xlu1 %10719, %v228_v4   ;;  %296 = vperm.xlu0 %10720, %v228_v4   ;;  %s10870_s6 = scalar_lea.vmem %s16224_s0, %s10702_s28  ;;  %16477 = vst [vmem:[#allocation16_spill] sm:$0xff] %v10872_v23  ;;  %16478 = vst [vmem:[#allocation17_spill] sm:$0xff] %v10874_v24 }
  0x12   : > { %v369_v25 = vld [vmem:[%s10870_s6] sm:$0x11]  ;;  %v518_v48 = vld [vmem:[%s10870_s6 + $0x1] sm:$0x11] }
  0x13   : > { %v394_v27 = vrot.slane %v369_v25, %v10874_v24  ;;  %v390_v28 = vrot.slane %v369_v25, %v10872_v23  ;;  %v527_v51 = vrot.slane %v518_v48, %v10874_v24  ;;  %v523_v52 = vrot.slane %v518_v48, %v10872_v23 }
  0x15   : > { %10721 = vset.pattern.permute.xlu1 %v10778_v2  ;;  %10723 = vset.pattern.permute.xlu0 %v10780_v6  ;;  %v10884_v30 = vrot.slane %v394_v27, %v10872_v23  ;;  %v10887_v31 = vrot.slane %v390_v28, %v10872_v23  ;;  %v10949_v55 = vrot.slane %v527_v51, %v10872_v23 }
  0x16   : > { %288 = vperm.xlu1 %10721, %v226_v5   ;;  %317 = vperm.xlu0 %10723, %v226_v5   ;;  %v10952_v56 = vrot.slane %v523_v52, %v10872_v23 }
  0x1a   : > { %292 = vperm.xlu1 %10721, %v227_v0   ;;  %10724 = vset.pattern.permute.xlu0 %v10781_v7 }
  0x1b   : > { %342 = vperm.xlu0 %10724, %v225_v1  }
  0x1e   : > { %10722 = vset.pattern.permute.xlu1 %v10780_v6 }
  0x1f   : > { %313 = vperm.xlu1 %10722, %v225_v1   ;;  %354 = vperm.xlu0 %10724, %v228_v4  }
  0x23   : > { %321 = vperm.xlu1 %10722, %v227_v0   ;;  %10727 = vset.pattern.permute.xlu0 %v10782_v8 }
  0x24   : > { %375 = vperm.xlu0 %10727, %v226_v5  }
  0x27   : > { %325 = vperm.xlu1 %10722, %v228_v4  }
  0x28   : > { %10728 = vset.pattern.permute.xlu0 %v10779_v3 }
  0x29   : > { %252 = vperm.xlu0 %10728, %v225_v1  }
  0x2b   : > { %10725 = vset.pattern.permute.xlu1 %v10781_v7 }
  0x2c   : > { %346 = vperm.xlu1 %10725, %v226_v5  }
  0x2d   : > { %257 = vperm.xlu0 %10728, %v226_v5  }
  0x30   : > { %350 = vperm.xlu1 %10725, %v227_v0  }
  0x34   : > { %10726 = vset.pattern.permute.xlu1 %v10782_v8 }
  0x35   : > { %371 = vperm.xlu1 %10726, %v225_v1  }
  0x39   : > { %379 = vperm.xlu1 %10726, %v227_v0  }
  0x3d   : > { %383 = vperm.xlu1 %10726, %v228_v4  }
  0x41   : > { %10729 = vset.pattern.permute.xlu1 %v10779_v3 }
  0x88   : > { %v10836_v9 = vpop.permute.xlu1 %262  ;;  %v10844_v13 = vpop.permute.xlu0 %284 }
  0x89   : > { %16465 = vst [vmem:[#allocation4_spill] sm:$0xff] %v10836_v9  ;;  %16469 = vst [vmem:[#allocation8_spill] sm:$0xff] %v10844_v13 }
  0x8c   : > { %v10838_v10 = vpop.permute.xlu1 %267  ;;  %v10850_v15 = vpop.permute.xlu0 %296 }
  0x8d   : > { %16466 = vst [vmem:[#allocation5_spill] sm:$0xff] %v10838_v10  ;;  %16471 = vst [vmem:[#allocation10_spill] sm:$0xff] %v10850_v15 }
  0x91   : > { %v10840_v11 = vpop.permute.xlu1 %288  ;;  %v10858_v18 = vpop.permute.xlu0 %317 }
  0x92   : > { %16467 = vst [vmem:[#allocation6_spill] sm:$0xff] %v10840_v11  ;;  %16473 = vst [vmem:[#allocation12_spill] sm:$0xff] %v10858_v18  ;;  %v601_v3 = vmul.f32 %v10884_v30, %v10858_v18  ;;  %v600_v4 = vmul.f32 %v10887_v31, %v10858_v18 }
  0x95   : > { %v10842_v12 = vpop.permute.xlu1 %292 }
  0x96   : > { %16468 = vst [vmem:[#allocation7_spill] sm:$0xff] %v10842_v12  ;;  %v10863_v21 = vpop.permute.xlu0 %342 }
  0x97   : > { %16475 = vst [vmem:[#allocation14_spill] sm:$0xff] %v10863_v21  ;;  %v475_v44 = vmul.f32 %v10884_v30, %v10863_v21  ;;  %v474_v45 = vmul.f32 %v10887_v31, %v10863_v21  ;;  %v643_v20 = vmul.f32 %v10949_v55, %v10863_v21  ;;  %v642_v25 = vmul.f32 %v10952_v56, %v10863_v21 }
  0x9a   : > { %v10846_v14 = vpop.permute.xlu1 %313  ;;  %v10881_v29 = vpop.permute.xlu0 %354 }
  0x9b   : > { %16470 = vst [vmem:[#allocation9_spill] sm:$0xff] %v10846_v14  ;;  %16480 = vst [vmem:[#allocation19_spill] sm:$0xff] %v10881_v29  ;;  %v481_v53 = vmul.f32 %v10884_v30, %v10881_v29  ;;  %v480_v54 = vmul.f32 %v10887_v31, %v10881_v29  ;;  %v599_v1 = vmul.f32 %v10884_v30, %v10846_v14 }
  0x9c   : > { %v598_v2 = vmul.f32 %v10887_v31, %v10846_v14 }
  0x9e   : > { %v10852_v16 = vpop.permute.xlu1 %321 }
  0x9f   : > { %16472 = vst [vmem:[#allocation11_spill] sm:$0xff] %v10852_v16  ;;  %v10895_v35 = vpop.permute.xlu0 %375  ;;  %v603_v5 = vmul.f32 %v10884_v30, %v10852_v16  ;;  %v602_v6 = vmul.f32 %v10887_v31, %v10852_v16 }
  0xa0   : > { %16482 = vst [vmem:[#allocation21_spill] sm:$0xff] %v10895_v35  ;;  %v408_v36 = vmul.f32 %v10884_v30, %v10895_v35  ;;  %v407_v37 = vmul.f32 %v10887_v31, %v10895_v35  ;;  %v541_v59 = vmul.f32 %v10949_v55, %v10895_v35  ;;  %v540_v60 = vmul.f32 %v10952_v56, %v10895_v35 }
  0xa2   : > { %v10860_v19 = vpop.permute.xlu1 %325 }
  0xa3   : > { %16474 = vst [vmem:[#allocation13_spill] sm:$0xff] %v10860_v19  ;;  %v605_v7 = vmul.f32 %v10884_v30, %v10860_v19  ;;  %v604_v8 = vmul.f32 %v10887_v31, %v10860_v19 }
  0xa4   : > { %v11002_v17 = vpop.permute.xlu0 %252 }
  0xa5   : > { %16485 = vst [vmem:[#allocation24_spill] sm:$0xff] %v11002_v17 }
  0xa7   : > { %v10865_v22 = vpop.permute.xlu1 %346 }
  0xa8   : > { %16476 = vst [vmem:[#allocation15_spill] sm:$0xff] %v10865_v22  ;;  %v477_v46 = vmul.f32 %v10884_v30, %v10865_v22  ;;  %v476_v47 = vmul.f32 %v10887_v31, %v10865_v22  ;;  %v645_v27 = vmul.f32 %v10949_v55, %v10865_v22  ;;  %v644_v28 = vmul.f32 %v10952_v56, %v10865_v22 }
  0xab   : > { %v10877_v26 = vpop.permute.xlu1 %350 }
  0xac   : > { %16479 = vst [vmem:[#allocation18_spill] sm:$0xff] %v10877_v26  ;;  %v479_v49 = vmul.f32 %v10884_v30, %v10877_v26  ;;  %v478_v50 = vmul.f32 %v10887_v31, %v10877_v26 }
  0xb0   : > { %v10889_v32 = vpop.permute.xlu1 %371 }
  0xb1   : > { %16481 = vst [vmem:[#allocation20_spill] sm:$0xff] %v10889_v32  ;;  %v406_v33 = vmul.f32 %v10884_v30, %v10889_v32  ;;  %v405_v34 = vmul.f32 %v10887_v31, %v10889_v32  ;;  %v539_v57 = vmul.f32 %v10949_v55, %v10889_v32  ;;  %v538_v58 = vmul.f32 %v10952_v56, %v10889_v32 }
  0xb3   : > { %423 = vrot.lane.b32.xlu1 %v406_v33, %s10783_s7  ;;  %421 = vrot.lane.b32.xlu0 %v405_v34, %s10783_s7  ;;  %v11014_v33 = vpop.permute.xlu0 %257  ;;  %v686_v34 = vld [vmem:[%s10870_s6 + $0x2] sm:$0x11] }
  0xb4   : > { %v10903_v38 = vpop.permute.xlu1 %379  ;;  %16486 = vst [vmem:[#allocation25_spill] sm:$0xff] %v11014_v33 }
  0xb5   : > { %16483 = vst [vmem:[#allocation22_spill] sm:$0xff] %v10903_v38  ;;  %v410_v39 = vmul.f32 %v10884_v30, %v10903_v38  ;;  %v409_v40 = vmul.f32 %v10887_v31, %v10903_v38  ;;  %v543_v61 = vmul.f32 %v10949_v55, %v10903_v38  ;;  %v542_v62 = vmul.f32 %v10952_v56, %v10903_v38 }
  0xb7   : > { %427 = vrot.lane.b32.xlu1 %v408_v36, %s10783_s7  ;;  %425 = vrot.lane.b32.xlu0 %v407_v37, %s10783_s7  ;;  %v647_v36 = vmul.f32 %v10949_v55, %v10877_v26  ;;  %v646_v37 = vmul.f32 %v10952_v56, %v10877_v26 }
  0xb8   : > { %v10911_v41 = vpop.permute.xlu1 %383 }
  0xb9   : > { %16484 = vst [vmem:[#allocation23_spill] sm:$0xff] %v10911_v41  ;;  %v412_v42 = vmul.f32 %v10884_v30, %v10911_v41  ;;  %v411_v43 = vmul.f32 %v10887_v31, %v10911_v41  ;;  %v545_v63 = vmul.f32 %v10949_v55, %v10911_v41  ;;  %v544_v0 = vmul.f32 %v10952_v56, %v10911_v41 }
  0xbb   : > { %431 = vrot.lane.b32.xlu1 %v410_v39, %s10783_s7  ;;  %429 = vrot.lane.b32.xlu0 %v409_v40, %s10783_s7  ;;  %v8901_v39 = vld [vmem:[%s10870_s6 + $0xa] ss:$0 sm:$0xff]  ;;  %v8902_v40 = vld [vmem:[%s10870_s6 + $0xb] ss:$0 sm:$0xff] }
  0xbf   : > { %435 = vrot.lane.b32.xlu1 %v412_v42, %s10783_s7  ;;  %433 = vrot.lane.b32.xlu0 %v411_v43, %s10783_s7  ;;  %v1907_v42 = vmul.f32 %v8901_v39, %v11014_v33  ;;  %v695_v43 = vrot.slane %v686_v34, %v10874_v24 }
  0xc1   : > { %v11042_v51 = vrot.slane %v695_v43, %v10872_v23 }
  0xc3   : > { %492 = vrot.lane.b32.xlu1 %v475_v44, %s10783_s7  ;;  %490 = vrot.lane.b32.xlu0 %v474_v45, %s10783_s7  ;;  %v691_v44 = vrot.slane %v686_v34, %v10872_v23  ;;  %v1915_v45 = vmul.f32 %v8902_v40, %v10840_v11 }
  0xc5   : > { %v11035_v48 = vadd.f32 %v1915_v45, %v1907_v42  ;;  %v11045_v52 = vrot.slane %v691_v44, %v10872_v23  ;;  %v805_v45 = vmul.f32 %v10949_v55, %v10858_v18 }
  0xc7   : > { %496 = vrot.lane.b32.xlu1 %v477_v46, %s10783_s7  ;;  %494 = vrot.lane.b32.xlu0 %v476_v47, %s10783_s7  ;;  %v649_v46 = vmul.f32 %v10949_v55, %v10881_v29  ;;  %v648_v47 = vmul.f32 %v10952_v56, %v10881_v29  ;;  %16487 = vst [vmem:[#allocation26_spill] sm:$0xff] %v11035_v48 }
  0xcb   : > { %500 = vrot.lane.b32.xlu1 %v479_v49, %s10783_s7  ;;  %498 = vrot.lane.b32.xlu0 %v478_v50, %s10783_s7  ;;  %v1906_v49 = vmul.f32 %v8901_v39, %v11002_v17  ;;  %v1914_v50 = vmul.f32 %v8902_v40, %v10844_v13 }
  0xcf   : > { %504 = vrot.lane.b32.xlu1 %v481_v53, %s10783_s7  ;;  %502 = vrot.lane.b32.xlu0 %v480_v54, %s10783_s7  ;;  %v11047_v53 = vadd.f32 %v1914_v50, %v1906_v49  ;;  %v707_v54 = vmul.f32 %v11042_v51, %v10889_v32  ;;  %v807_v50 = vmul.f32 %v10949_v55, %v10852_v16 }
  0xd1   : > { %16488 = vst [vmem:[#allocation27_spill] sm:$0xff] %v11047_v53 }
  0xd3   : > { %556 = vrot.lane.b32.xlu1 %v539_v57, %s10783_s7  ;;  %554 = vrot.lane.b32.xlu0 %v538_v58, %s10783_s7  ;;  %v706_v57 = vmul.f32 %v11045_v52, %v10889_v32  ;;  %v709_v58 = vmul.f32 %v11042_v51, %v10895_v35 }
  0xd7   : > { %560 = vrot.lane.b32.xlu1 %v541_v59, %s10783_s7  ;;  %558 = vrot.lane.b32.xlu0 %v540_v60, %s10783_s7  ;;  %v708_v59 = vmul.f32 %v11045_v52, %v10895_v35  ;;  %v711_v60 = vmul.f32 %v11042_v51, %v10903_v38 }
  0xdb   : > { %564 = vrot.lane.b32.xlu1 %v543_v61, %s10783_s7  ;;  %562 = vrot.lane.b32.xlu0 %v542_v62, %s10783_s7  ;;  %v710_v61 = vmul.f32 %v11045_v52, %v10903_v38  ;;  %v713_v62 = vmul.f32 %v11042_v51, %v10911_v41 }
  0xdf   : > { %568 = vrot.lane.b32.xlu1 %v545_v63, %s10783_s7  ;;  %566 = vrot.lane.b32.xlu0 %v544_v0, %s10783_s7  ;;  %v712_v63 = vmul.f32 %v11045_v52, %v10911_v41  ;;  %v759_v0 = vmul.f32 %v10884_v30, %v10844_v13 }
  0xe3   : > { %616 = vrot.lane.b32.xlu1 %v599_v1, %s10783_s7  ;;  %614 = vrot.lane.b32.xlu0 %v598_v2, %s10783_s7  ;;  %v758_v1 = vmul.f32 %v10887_v31, %v10844_v13  ;;  %v761_v2 = vmul.f32 %v10884_v30, %v10840_v11 }
  0xe7   : > { %620 = vrot.lane.b32.xlu1 %v601_v3, %s10783_s7  ;;  %618 = vrot.lane.b32.xlu0 %v600_v4, %s10783_s7  ;;  %v760_v3 = vmul.f32 %v10887_v31, %v10840_v11  ;;  %v763_v4 = vmul.f32 %v10884_v30, %v10842_v12 }
  0xeb   : > { %624 = vrot.lane.b32.xlu1 %v603_v5, %s10783_s7  ;;  %622 = vrot.lane.b32.xlu0 %v602_v6, %s10783_s7  ;;  %v762_v5 = vmul.f32 %v10887_v31, %v10842_v12  ;;  %v765_v6 = vmul.f32 %v10884_v30, %v10850_v15  ;;  %v803_v30 = vmul.f32 %v10949_v55, %v10846_v14 }
  0xef   : > { %628 = vrot.lane.b32.xlu1 %v605_v7, %s10783_s7  ;;  %626 = vrot.lane.b32.xlu0 %v604_v8, %s10783_s7  ;;  %v764_v7 = vmul.f32 %v10887_v31, %v10850_v15  ;;  %v8905_v8 = vld [vmem:[%s10870_s6 + $0xe] ss:$0 sm:$0xff]  ;;  %v802_v31 = vmul.f32 %v10952_v56, %v10846_v14 }
  0xf3   : > { %660 = vrot.lane.b32.xlu1 %v643_v20, %s10783_s7  ;;  %658 = vrot.lane.b32.xlu0 %v642_v25, %s10783_s7  ;;  %v8906_v20 = vld [vmem:[%s10870_s6 + $0xf] ss:$0 sm:$0xff]  ;;  %v2560_v25 = vmul.f32 %v8905_v8, %v10836_v9 }
  0xf4   : > { %v2567_v34 = vmul.f32 %v8906_v20, %v10840_v11 }
  0xf7   : > { %664 = vrot.lane.b32.xlu1 %v645_v27, %s10783_s7  ;;  %662 = vrot.lane.b32.xlu0 %v644_v28, %s10783_s7  ;;  %v2568_v27 = vmul.f32 %v8906_v20, %v10842_v12  ;;  %v2559_v28 = vmul.f32 %v8905_v8, %v11014_v33 }
  0xf9   : > { %v11109_v39 = vadd.f32 %v2568_v27, %v2560_v25  ;;  %v11111_v40 = vadd.f32 %v2567_v34, %v2559_v28  ;;  %v853_v28 = vmul.f32 %v11042_v51, %v10881_v29  ;;  %v852_v34 = vmul.f32 %v11045_v52, %v10881_v29 }
  0xfb   : > { %668 = vrot.lane.b32.xlu1 %v647_v36, %s10783_s7  ;;  %666 = vrot.lane.b32.xlu0 %v646_v37, %s10783_s7  ;;  %v2558_v36 = vmul.f32 %v8905_v8, %v11002_v17  ;;  %v2566_v37 = vmul.f32 %v8906_v20, %v10844_v13  ;;  %16489 = vst [vmem:[#allocation28_spill] sm:$0xff] %v11109_v39  ;;  %16490 = vst [vmem:[#allocation29_spill] sm:$0xff] %v11111_v40 }
  0xfd   : > { %v11115_v42 = vadd.f32 %v2566_v37, %v2558_v36 }
  0xff   : > { %672 = vrot.lane.b32.xlu1 %v649_v46, %s10783_s7  ;;  %670 = vrot.lane.b32.xlu0 %v648_v47, %s10783_s7  ;;  %16491 = vst [vmem:[#allocation30_spill] sm:$0xff] %v11115_v42  ;;  %v804_v46 = vmul.f32 %v10952_v56, %v10858_v18 }
 0x103   : > { %724 = vrot.lane.b32.xlu1 %v707_v54, %s10783_s7  ;;  %722 = vrot.lane.b32.xlu0 %v706_v57, %s10783_s7  ;;  %v806_v54 = vmul.f32 %v10952_v56, %v10852_v16 }
 0x107   : > { %728 = vrot.lane.b32.xlu1 %v709_v58, %s10783_s7  ;;  %726 = vrot.lane.b32.xlu0 %v708_v59, %s10783_s7  ;;  %v809_v59 = vmul.f32 %v10949_v55, %v10860_v19 }
 0x10b   : > { %732 = vrot.lane.b32.xlu1 %v711_v60, %s10783_s7  ;;  %730 = vrot.lane.b32.xlu0 %v710_v61, %s10783_s7  ;;  %v808_v60 = vmul.f32 %v10952_v56, %v10860_v19 }
 0x10f   : > { %736 = vrot.lane.b32.xlu1 %v713_v62, %s10783_s7  ;;  %734 = vrot.lane.b32.xlu0 %v712_v63, %s10783_s7  ;;  %v847_v63 = vmul.f32 %v11042_v51, %v10863_v21 }
 0x113   : > { %776 = vrot.lane.b32.xlu1 %v759_v0, %s10783_s7  ;;  %774 = vrot.lane.b32.xlu0 %v758_v1, %s10783_s7  ;;  %v846_v0 = vmul.f32 %v11045_v52, %v10863_v21  ;;  %v849_v1 = vmul.f32 %v11042_v51, %v10865_v22 }
 0x117   : > { %780 = vrot.lane.b32.xlu1 %v761_v2, %s10783_s7  ;;  %778 = vrot.lane.b32.xlu0 %v760_v3, %s10783_s7  ;;  %v848_v2 = vmul.f32 %v11045_v52, %v10865_v22  ;;  %v890_v3 = vld [vmem:[%s10870_s6 + $0x3] sm:$0x11] }
 0x118   : > { %v899_v8 = vrot.slane %v890_v3, %v10874_v24  ;;  %v895_v20 = vrot.slane %v890_v3, %v10872_v23 }
 0x11b   : > { %784 = vrot.lane.b32.xlu1 %v763_v4, %s10783_s7  ;;  %782 = vrot.lane.b32.xlu0 %v762_v5, %s10783_s7 }
 0x11f   : > { %788 = vrot.lane.b32.xlu1 %v765_v6, %s10783_s7  ;;  %786 = vrot.lane.b32.xlu0 %v764_v7, %s10783_s7  ;;  %v851_v6 = vmul.f32 %v11042_v51, %v10877_v26  ;;  %v850_v7 = vmul.f32 %v11045_v52, %v10877_v26 }
 0x123   : > { %820 = vrot.lane.b32.xlu1 %v803_v30, %s10783_s7  ;;  %818 = vrot.lane.b32.xlu0 %v802_v31, %s10783_s7  ;;  %v909_v30 = vrot.slane %v899_v8, %v10872_v23  ;;  %v905_v31 = vrot.slane %v895_v20, %v10872_v23  ;;  %v229_v8 = vld [vmem:[%s16226_s2] sm:$0xff] }
 0x124   : > { %v1058_v20 = vld [vmem:[%s10870_s6 + $0x4] sm:$0x11] }
 0x125   : > { %v11117_v43 = vpop.permute.xlu1 %423  ;;  %v11119_v44 = vpop.permute.xlu0 %421  ;;  %v917_v3 = vmul.f32 %v909_v30, %v10911_v41 }
 0x127   : > { %824 = vrot.lane.b32.xlu1 %v805_v45, %s10783_s7  ;;  %822 = vrot.lane.b32.xlu0 %v804_v46, %s10783_s7  ;;  %v911_v45 = vmul.f32 %v909_v30, %v10889_v32  ;;  %v910_v46 = vmul.f32 %v905_v31, %v10889_v32 }
 0x129   : > { %v11127_v47 = vpop.permute.xlu1 %427  ;;  %v11129_v49 = vpop.permute.xlu0 %425 }
 0x12b   : > { %828 = vrot.lane.b32.xlu1 %v807_v50, %s10783_s7  ;;  %826 = vrot.lane.b32.xlu0 %v806_v54, %s10783_s7  ;;  %v913_v50 = vmul.f32 %v909_v30, %v10895_v35  ;;  %v912_v54 = vmul.f32 %v905_v31, %v10895_v35 }
 0x12d   : > { %v11137_v57 = vpop.permute.xlu1 %431  ;;  %v11139_v58 = vpop.permute.xlu0 %429 }
 0x12f   : > { %832 = vrot.lane.b32.xlu1 %v809_v59, %s10783_s7  ;;  %830 = vrot.lane.b32.xlu0 %v808_v60, %s10783_s7 }
 0x131   : > { %v11147_v61 = vpop.permute.xlu1 %435  ;;  %v11149_v62 = vpop.permute.xlu0 %433 }
 0x132   : > { %16492 = vst [vmem:[#allocation31_spill] sm:$0xff] %v11147_v61  ;;  %16493 = vst [vmem:[#allocation32_spill] sm:$0xff] %v11149_v62 }
 0x133   : > { %864 = vrot.lane.b32.xlu1 %v847_v63, %s10783_s7  ;;  %862 = vrot.lane.b32.xlu0 %v846_v0, %s10783_s7  ;;  %v915_v63 = vmul.f32 %v909_v30, %v10903_v38  ;;  %v914_v0 = vmul.f32 %v905_v31, %v10903_v38  ;;  %v1063_v30 = vrot.slane %v1058_v20, %v10872_v23 }
 0x135   : > { %v11157_v55 = vpop.permute.xlu1 %492  ;;  %v11159_v56 = vpop.permute.xlu0 %490 }
 0x137   : > { %868 = vrot.lane.b32.xlu1 %v849_v1, %s10783_s7  ;;  %866 = vrot.lane.b32.xlu0 %v848_v2, %s10783_s7 }
 0x139   : > { %v11168_v4 = vpop.permute.xlu1 %496  ;;  %v11170_v5 = vpop.permute.xlu0 %494 }
 0x13a   : > { %16494 = vst [vmem:[#allocation33_spill] sm:$0xff] %v11170_v5 }
 0x13b   : > { %872 = vrot.lane.b32.xlu1 %v851_v6, %s10783_s7  ;;  %870 = vrot.lane.b32.xlu0 %v850_v7, %s10783_s7  ;;  %v916_v6 = vmul.f32 %v905_v31, %v10911_v41  ;;  %v230_v7 = vld [vmem:[%s16226_s2 + $0x8] sm:$0xff]  ;;  %v1067_v31 = vrot.slane %v1058_v20, %v10874_v24 }
 0x13d   : > { %v11180_v25 = vpop.permute.xlu1 %500  ;;  %v11182_v27 = vpop.permute.xlu0 %498 }
 0x13f   : > { %876 = vrot.lane.b32.xlu1 %v853_v28, %s10783_s7  ;;  %874 = vrot.lane.b32.xlu0 %v852_v34, %s10783_s7 }
 0x141   : > { %v11192_v36 = vpop.permute.xlu1 %504  ;;  %v11194_v37 = vpop.permute.xlu0 %502 }
 0x142   : > { %16495 = vst [vmem:[#allocation34_spill] sm:$0xff] %v11192_v36  ;;  %16496 = vst [vmem:[#allocation35_spill] sm:$0xff] %v11194_v37 }
 0x143   : > { %928 = vrot.lane.b32.xlu1 %v911_v45, %s10783_s7  ;;  %926 = vrot.lane.b32.xlu0 %v910_v46, %s10783_s7  ;;  %v231_v45 = vld [vmem:[%s16226_s2 + $0x10] sm:$0xff]  ;;  %v232_v46 = vld [vmem:[%s16226_s2 + $0x18] sm:$0xff] }
 0x145   : > { %v11200_v51 = vpop.permute.xlu1 %556  ;;  %v11202_v52 = vpop.permute.xlu0 %554 }
 0x146   : > { %16497 = vst [vmem:[#allocation36_spill] sm:$0xff] %v11200_v51  ;;  %16498 = vst [vmem:[#allocation37_spill] sm:$0xff] %v11202_v52 }
 0x147   : > { %932 = vrot.lane.b32.xlu1 %v913_v50, %s10783_s7  ;;  %930 = vrot.lane.b32.xlu0 %v912_v54, %s10783_s7 }
 0x149   : > { %v11208_v59 = vpop.permute.xlu1 %560  ;;  %v11210_v60 = vpop.permute.xlu0 %558 }
 0x14a   : > { %16499 = vst [vmem:[#allocation38_spill] sm:$0xff] %v11208_v59  ;;  %16500 = vst [vmem:[#allocation39_spill] sm:$0xff] %v11210_v60 }
 0x14b   : > { %936 = vrot.lane.b32.xlu1 %v915_v63, %s10783_s7  ;;  %934 = vrot.lane.b32.xlu0 %v914_v0, %s10783_s7  ;;  %v11248_v63 = vrot.slane %v1063_v30, %v10872_v23  ;;  %v11251_v0 = vrot.slane %v1067_v31, %v10872_v23 }
 0x14d   : > { %v11216_v1 = vpop.permute.xlu1 %564  ;;  %v11218_v2 = vpop.permute.xlu0 %562  ;;  %v1080_v31 = vmul.f32 %v11248_v63, %v10895_v35  ;;  %v1082_v42 = vmul.f32 %v11248_v63, %v10903_v38  ;;  %v1083_v40 = vmul.f32 %v11251_v0, %v10903_v38  ;;  %v1084_v39 = vmul.f32 %v11248_v63, %v10911_v41 }
 0x14e   : > { %v1085_v53 = vmul.f32 %v11251_v0, %v10911_v41  ;;  %v1147_v48 = vmul.f32 %v11251_v0, %v10863_v21  ;;  %v11525_v61 = vmul.f32 %v11248_v63, %v10844_v13 }
 0x14f   : > { %940 = vrot.lane.b32.xlu1 %v917_v3, %s10783_s7  ;;  %938 = vrot.lane.b32.xlu0 %v916_v6, %s10783_s7 }
 0x151   : > { %v11231_v28 = vpop.permute.xlu1 %568  ;;  %v11233_v34 = vpop.permute.xlu0 %566 }
 0x152   : > { %16501 = vst [vmem:[#allocation40_spill] sm:$0xff] %v11231_v28  ;;  %16502 = vst [vmem:[#allocation41_spill] sm:$0xff] %v11233_v34 }
 0x153   : > { %965 = vperm.xlu1 %10729, %v230_v7   ;;  %960 = vperm.xlu0 %10728, %v229_v8   ;;  %v1078_v7 = vmul.f32 %v11248_v63, %v10889_v32  ;;  %v1079_v8 = vmul.f32 %v11251_v0, %v10889_v32 }
 0x155   : > { %v11243_v50 = vpop.permute.xlu1 %616  ;;  %v11245_v54 = vpop.permute.xlu0 %614 }
 0x156   : > { %16503 = vst [vmem:[#allocation42_spill] sm:$0xff] %v11243_v50  ;;  %16504 = vst [vmem:[#allocation43_spill] sm:$0xff] %v11245_v54 }
 0x157   : > { %970 = vperm.xlu1 %10729, %v231_v45   ;;  %975 = vperm.xlu0 %10728, %v232_v46   ;;  %v1081_v45 = vmul.f32 %v11251_v0, %v10895_v35  ;;  %v2962_v46 = vld [vmem:[%s16227_s3] sm:$0xff] }
 0x158   : > { %9930 = vmatprep.mubr.msk.f32.mxu1 %vm2991_vm0, %v2962_v46 }
 0x159   : > { %v11253_v3 = vpop.permute.xlu1 %620  ;;  %v11255_v6 = vpop.permute.xlu0 %618 }
 0x15a   : > { %16505 = vst [vmem:[#allocation44_spill] sm:$0xff] %v11253_v3  ;;  %16506 = vst [vmem:[#allocation45_spill] sm:$0xff] %v11255_v6 }
 0x15b   : > { %1094 = vrot.lane.b32.xlu1 %v1078_v7, %s10783_s7  ;;  %1096 = vrot.lane.b32.xlu0 %v1079_v8, %s10783_s7 }
 0x15d   : > { %v11263_v20 = vpop.permute.xlu1 %624  ;;  %v11265_v30 = vpop.permute.xlu0 %622 }
 0x15e   : > { %16507 = vst [vmem:[#allocation46_spill] sm:$0xff] %v11263_v20  ;;  %16508 = vst [vmem:[#allocation47_spill] sm:$0xff] %v11265_v30 }
 0x15f   : > { %1098 = vrot.lane.b32.xlu1 %v1080_v31, %s10783_s7  ;;  %1100 = vrot.lane.b32.xlu0 %v1081_v45, %s10783_s7 }
 0x161   : > { %v11276_v7 = vpop.permute.xlu1 %628  ;;  %v11278_v8 = vpop.permute.xlu0 %626 }
 0x162   : > { %16509 = vst [vmem:[#allocation48_spill] sm:$0xff] %v11276_v7  ;;  %16510 = vst [vmem:[#allocation49_spill] sm:$0xff] %v11278_v8  ;;  %v8891_v7 = vld [vmem:[%s10870_s6] ss:$0 sm:$0xff] }
 0x163   : > { %1102 = vrot.lane.b32.xlu1 %v1082_v42, %s10783_s7  ;;  %1104 = vrot.lane.b32.xlu0 %v1083_v40, %s10783_s7  ;;  %v1146_v40 = vmul.f32 %v11248_v63, %v10863_v21  ;;  %v277_v6 = vmul.f32 %v8891_v7, %v10838_v10 }
 0x165   : > { %v11287_v31 = vpop.permute.xlu1 %660  ;;  %v11289_v45 = vpop.permute.xlu0 %658 }
 0x166   : > { %16511 = vst [vmem:[#allocation50_spill] sm:$0xff] %v11287_v31  ;;  %16512 = vst [vmem:[#allocation51_spill] sm:$0xff] %v11289_v45 }
 0x167   : > { %1106 = vrot.lane.b32.xlu1 %v1084_v39, %s10783_s7  ;;  %1108 = vrot.lane.b32.xlu0 %v1085_v53, %s10783_s7  ;;  %v1148_v53 = vmul.f32 %v11248_v63, %v10865_v22  ;;  %v1149_v39 = vmul.f32 %v11251_v0, %v10865_v22 }
 0x169   : > { %v11297_v46 = vpop.permute.xlu1 %664  ;;  %v11299_v42 = vpop.permute.xlu0 %662 }
 0x16a   : > { %16513 = vst [vmem:[#allocation52_spill] sm:$0xff] %v11297_v46  ;;  %16514 = vst [vmem:[#allocation53_spill] sm:$0xff] %v11299_v42  ;;  %v1190_v42 = vld [vmem:[%s10870_s6 + $0x5] sm:$0x11] }
 0x16b   : > { %1162 = vrot.lane.b32.xlu1 %v1146_v40, %s10783_s7  ;;  %1164 = vrot.lane.b32.xlu0 %v1147_v48, %s10783_s7  ;;  %v1150_v48 = vmul.f32 %v11248_v63, %v10877_v26 }
 0x16d   : > { %v11307_v45 = vpop.permute.xlu1 %668  ;;  %v11309_v31 = vpop.permute.xlu0 %666 }
 0x16e   : > { %16515 = vst [vmem:[#allocation54_spill] sm:$0xff] %v11307_v45  ;;  %16516 = vst [vmem:[#allocation55_spill] sm:$0xff] %v11309_v31  ;;  %v1151_v31 = vmul.f32 %v11251_v0, %v10877_v26  ;;  %v1195_v45 = vrot.slane %v1190_v42, %v10872_v23 }
 0x16f   : > { %1166 = vrot.lane.b32.xlu1 %v1148_v53, %s10783_s7  ;;  %1168 = vrot.lane.b32.xlu0 %v1149_v39, %s10783_s7  ;;  %v1199_v53 = vrot.slane %v1190_v42, %v10874_v24 }
 0x171   : > { %v11318_v46 = vpop.permute.xlu1 %672  ;;  %v11320_v40 = vpop.permute.xlu0 %670 }
 0x172   : > { %16517 = vst [vmem:[#allocation56_spill] sm:$0xff] %v11318_v46  ;;  %16518 = vst [vmem:[#allocation57_spill] sm:$0xff] %v11320_v40  ;;  %v1152_v40 = vmul.f32 %v11248_v63, %v10881_v29  ;;  %v1153_v46 = vmul.f32 %v11251_v0, %v10881_v29 }
 0x173   : > { %1170 = vrot.lane.b32.xlu1 %v1150_v48, %s10783_s7  ;;  %1172 = vrot.lane.b32.xlu0 %v1151_v31, %s10783_s7  ;;  %v11341_v31 = vrot.slane %v1195_v45, %v10872_v23  ;;  %v11344_v48 = vrot.slane %v1199_v53, %v10872_v23 }
 0x175   : > { %v11330_v39 = vpop.permute.xlu1 %724  ;;  %v11332_v54 = vpop.permute.xlu0 %722  ;;  %v1211_v50 = vmul.f32 %v11344_v48, %v10889_v32  ;;  %v1213_v53 = vmul.f32 %v11344_v48, %v10895_v35 }
 0x176   : > { %16519 = vst [vmem:[#allocation58_spill] sm:$0xff] %v11330_v39  ;;  %16520 = vst [vmem:[#allocation59_spill] sm:$0xff] %v11332_v54  ;;  %v1210_v54 = vmul.f32 %v11341_v31, %v10889_v32 }
 0x177   : > { %1174 = vrot.lane.b32.xlu1 %v1152_v40, %s10783_s7  ;;  %1176 = vrot.lane.b32.xlu0 %v1153_v46, %s10783_s7  ;;  %v1212_v40 = vmul.f32 %v11341_v31, %v10895_v35 }
 0x179   : > { %v11346_v42 = vpop.permute.xlu1 %728  ;;  %v11348_v39 = vpop.permute.xlu0 %726 }
 0x17a   : > { %16521 = vst [vmem:[#allocation60_spill] sm:$0xff] %v11346_v42  ;;  %16522 = vst [vmem:[#allocation61_spill] sm:$0xff] %v11348_v39 }
 0x17b   : > { %1226 = vrot.lane.b32.xlu1 %v1210_v54, %s10783_s7  ;;  %1228 = vrot.lane.b32.xlu0 %v1211_v50, %s10783_s7  ;;  %v1214_v50 = vmul.f32 %v11341_v31, %v10903_v38  ;;  %v1215_v54 = vmul.f32 %v11344_v48, %v10903_v38 }
 0x17d   : > { %v11356_v46 = vpop.permute.xlu1 %732  ;;  %v11358_v45 = vpop.permute.xlu0 %730 }
 0x17e   : > { %16523 = vst [vmem:[#allocation62_spill] sm:$0xff] %v11356_v46  ;;  %16524 = vst [vmem:[#allocation63_spill] sm:$0xff] %v11358_v45 }
 0x17f   : > { %1230 = vrot.lane.b32.xlu1 %v1212_v40, %s10783_s7  ;;  %1232 = vrot.lane.b32.xlu0 %v1213_v53, %s10783_s7  ;;  %v1216_v40 = vmul.f32 %v11341_v31, %v10911_v41  ;;  %v1217_v53 = vmul.f32 %v11344_v48, %v10911_v41 }
 0x181   : > { %v11366_v39 = vpop.permute.xlu1 %736  ;;  %v11368_v42 = vpop.permute.xlu0 %734 }
 0x182   : > { %16525 = vst [vmem:[#allocation64_spill] sm:$0xff] %v11366_v39  ;;  %16526 = vst [vmem:[#allocation65_spill] sm:$0xff] %v11368_v42 }
 0x183   : > { %1234 = vrot.lane.b32.xlu1 %v1214_v50, %s10783_s7  ;;  %1236 = vrot.lane.b32.xlu0 %v1215_v54, %s10783_s7  ;;  %v1270_v50 = vmul.f32 %v11248_v63, %v10846_v14  ;;  %v1271_v54 = vmul.f32 %v11251_v0, %v10846_v14 }
 0x185   : > { %v11376_v45 = vpop.permute.xlu1 %776  ;;  %v11378_v46 = vpop.permute.xlu0 %774 }
 0x186   : > { %16527 = vst [vmem:[#allocation66_spill] sm:$0xff] %v11376_v45  ;;  %16528 = vst [vmem:[#allocation67_spill] sm:$0xff] %v11378_v46 }
 0x187   : > { %1238 = vrot.lane.b32.xlu1 %v1216_v40, %s10783_s7  ;;  %1240 = vrot.lane.b32.xlu0 %v1217_v53, %s10783_s7  ;;  %v1272_v40 = vmul.f32 %v11248_v63, %v10858_v18  ;;  %v1273_v53 = vmul.f32 %v11251_v0, %v10858_v18 }
 0x189   : > { %v11386_v42 = vpop.permute.xlu1 %780  ;;  %v11388_v39 = vpop.permute.xlu0 %778 }
 0x18a   : > { %16529 = vst [vmem:[#allocation68_spill] sm:$0xff] %v11386_v42  ;;  %16530 = vst [vmem:[#allocation69_spill] sm:$0xff] %v11388_v39 }
 0x18b   : > { %1286 = vrot.lane.b32.xlu1 %v1270_v50, %s10783_s7  ;;  %1288 = vrot.lane.b32.xlu0 %v1271_v54, %s10783_s7  ;;  %v1274_v50 = vmul.f32 %v11248_v63, %v10852_v16  ;;  %v1275_v54 = vmul.f32 %v11251_v0, %v10852_v16 }
 0x18d   : > { %v11396_v46 = vpop.permute.xlu1 %784  ;;  %v11398_v45 = vpop.permute.xlu0 %782 }
 0x18e   : > { %16531 = vst [vmem:[#allocation70_spill] sm:$0xff] %v11396_v46  ;;  %16532 = vst [vmem:[#allocation71_spill] sm:$0xff] %v11398_v45  ;;  %v1277_v46 = vmul.f32 %v11251_v0, %v10860_v19 }
 0x18f   : > { %1290 = vrot.lane.b32.xlu1 %v1272_v40, %s10783_s7  ;;  %1292 = vrot.lane.b32.xlu0 %v1273_v53, %s10783_s7  ;;  %v1276_v53 = vmul.f32 %v11248_v63, %v10860_v19 }
 0x191   : > { %v11406_v39 = vpop.permute.xlu1 %788  ;;  %v11408_v42 = vpop.permute.xlu0 %786 }
 0x192   : > { %16533 = vst [vmem:[#allocation72_spill] sm:$0xff] %v11406_v39  ;;  %16534 = vst [vmem:[#allocation73_spill] sm:$0xff] %v11408_v42  ;;  %v1319_v39 = vmul.f32 %v11344_v48, %v10877_v26 }
 0x193   : > { %1294 = vrot.lane.b32.xlu1 %v1274_v50, %s10783_s7  ;;  %1296 = vrot.lane.b32.xlu0 %v1275_v54, %s10783_s7  ;;  %v1314_v54 = vmul.f32 %v11341_v31, %v10863_v21 }
 0x195   : > { %v11416_v45 = vpop.permute.xlu1 %820  ;;  %v11418_v40 = vpop.permute.xlu0 %818 }
 0x196   : > { %16535 = vst [vmem:[#allocation74_spill] sm:$0xff] %v11416_v45  ;;  %16536 = vst [vmem:[#allocation75_spill] sm:$0xff] %v11418_v40  ;;  %v1315_v40 = vmul.f32 %v11344_v48, %v10863_v21 }
 0x197   : > { %1298 = vrot.lane.b32.xlu1 %v1276_v53, %s10783_s7  ;;  %1300 = vrot.lane.b32.xlu0 %v1277_v46, %s10783_s7  ;;  %v1316_v46 = vmul.f32 %v11341_v31, %v10865_v22 }
 0x199   : > { %v11426_v42 = vpop.permute.xlu1 %824  ;;  %v11428_v50 = vpop.permute.xlu0 %822 }
 0x19a   : > { %16537 = vst [vmem:[#allocation76_spill] sm:$0xff] %v11426_v42  ;;  %16538 = vst [vmem:[#allocation77_spill] sm:$0xff] %v11428_v50  ;;  %v1317_v50 = vmul.f32 %v11344_v48, %v10865_v22  ;;  %v1358_v42 = vld [vmem:[%s10870_s6 + $0x6] sm:$0x11] }
 0x19b   : > { %1330 = vrot.lane.b32.xlu1 %v1314_v54, %s10783_s7  ;;  %1332 = vrot.lane.b32.xlu0 %v1315_v40, %s10783_s7  ;;  %v1363_v54 = vrot.slane %v1358_v42, %v10872_v23  ;;  %v1367_v8 = vrot.slane %v1358_v42, %v10874_v24  ;;  %v1320_v42 = vmul.f32 %v11341_v31, %v10881_v29 }
 0x19c   : > { %v276_v24 = vmul.f32 %v8891_v7, %v10836_v9 }
 0x19d   : > { %v11436_v45 = vpop.permute.xlu1 %828  ;;  %v11438_v53 = vpop.permute.xlu0 %826 }
 0x19e   : > { %16539 = vst [vmem:[#allocation78_spill] sm:$0xff] %v11436_v45  ;;  %16540 = vst [vmem:[#allocation79_spill] sm:$0xff] %v11438_v53  ;;  %v1318_v53 = vmul.f32 %v11341_v31, %v10877_v26 }
 0x19f   : > { %1334 = vrot.lane.b32.xlu1 %v1316_v46, %s10783_s7  ;;  %1336 = vrot.lane.b32.xlu0 %v1317_v50, %s10783_s7  ;;  %v11461_v50 = vld [vmem:[%s10870_s6 + $0x1] ss:$0 sm:$0xff]  ;;  %v11464_v46 = vrot.slane %v1363_v54, %v10872_v23  ;;  %v11483_v54 = vld [vmem:[%s10870_s6 + $0x3] ss:$0 sm:$0xff] }
 0x1a0   : > { %v452_v28 = vmul.f32 %v11461_v50, %v10836_v9  ;;  %v11505_v60 = vmul.f32 %v11483_v54, %v10844_v13  ;;  %v11513_v52 = vmul.f32 %v11483_v54, %v10836_v9  ;;  %v11529_v36 = vmul.f32 %v11483_v54, %v10838_v10 }
 0x1a1   : > { %v11448_v40 = vpop.permute.xlu1 %832  ;;  %v11450_v45 = vpop.permute.xlu0 %830  ;;  %v1378_v51 = vmul.f32 %v11464_v46, %v10889_v32 }
 0x1a2   : > { %16541 = vst [vmem:[#allocation80_spill] sm:$0xff] %v11448_v40  ;;  %16542 = vst [vmem:[#allocation81_spill] sm:$0xff] %v11450_v45  ;;  %v303_v45 = vmul.f32 %v11461_v50, %v10844_v13  ;;  %v11469_v40 = vld [vmem:[%s10870_s6 + $0x2] ss:$0 sm:$0xff] }
 0x1a3   : > { %1338 = vrot.lane.b32.xlu1 %v1318_v53, %s10783_s7  ;;  %1340 = vrot.lane.b32.xlu0 %v1319_v39, %s10783_s7  ;;  %v1321_v39 = vmul.f32 %v11344_v48, %v10881_v29  ;;  %v11480_v53 = vrot.slane %v1367_v8, %v10872_v23  ;;  %v461_v3 = vmul.f32 %v11469_v40, %v10850_v15 }
 0x1a4   : > { %v585_v34 = vmul.f32 %v11469_v40, %v10838_v10  ;;  %v593_v8 = vmul.f32 %v11483_v54, %v10850_v15  ;;  %v458_v23 = vmul.f32 %v11469_v40, %v10844_v13  ;;  %v11509_v59 = vmul.f32 %v11469_v40, %v10836_v9  ;;  %16545 = vst [vmem:[#allocation84_spill] sm:$0xff] %v11513_v52 }
 0x1a5   : > { %v11471_v30 = vpop.permute.xlu1 %864  ;;  %v11473_v20 = vpop.permute.xlu0 %862  ;;  %v1379_v62 = vmul.f32 %v11480_v53, %v10889_v32  ;;  %16548 = vst [vmem:[#allocation87_spill] sm:$0xff] %v11529_v36  ;;  %v11533_v9 = vmul.f32 %v11251_v0, %v10844_v13  ;;  %v1381_v13 = vmul.f32 %v11480_v53, %v10895_v35  ;;  %v275_v52 = vmul.f32 %v8891_v7, %v11014_v33 }
 0x1a6   : > { %16543 = vst [vmem:[#allocation82_spill] sm:$0xff] %v11471_v30  ;;  %16544 = vst [vmem:[#allocation83_spill] sm:$0xff] %v11473_v20  ;;  %v306_v30 = vmul.f32 %v11461_v50, %v10850_v15  ;;  %v453_v20 = vmul.f32 %v11461_v50, %v10838_v10  ;;  %v11541_v32 = vadd.f32 %v593_v8, %v585_v34 }
 0x1a7   : > { %1342 = vrot.lane.b32.xlu1 %v1320_v42, %s10783_s7  ;;  %1344 = vrot.lane.b32.xlu0 %v1321_v39, %s10783_s7  ;;  %v333_v10 = vmul.f32 %v11469_v40, %v10858_v18  ;;  %v460_v34 = vmul.f32 %v11469_v40, %v10842_v12  ;;  %v11575_v36 = vmul.f32 %v11248_v63, %v10840_v11 }
 0x1a8   : > { %v310_v37 = vadd.f32 %v306_v30, %v277_v6  ;;  %16550 = vst [vmem:[#allocation89_spill] sm:$0xff] %v11541_v32  ;;  %v11547_v6 = vmul.f32 %v11251_v0, %v10850_v15  ;;  %v304_v30 = vmul.f32 %v11461_v50, %v10840_v11  ;;  %v335_v32 = vmul.f32 %v11469_v40, %v10860_v19 }
 0x1a9   : > { %v11515_v42 = vpop.permute.xlu1 %868  ;;  %v11517_v39 = vpop.permute.xlu0 %866  ;;  %16554 = vst [vmem:[#allocation93_spill] sm:$0xff] %v11575_v36  ;;  %v464_v36 = vadd.f32 %v460_v34, %v452_v28  ;;  %v451_v28 = vmul.f32 %v11461_v50, %v11014_v33  ;;  %v11611_v34 = vmul.f32 %v11251_v0, %v10842_v12 }
 0x1aa   : > { %16546 = vst [vmem:[#allocation85_spill] sm:$0xff] %v11515_v42  ;;  %16547 = vst [vmem:[#allocation86_spill] sm:$0xff] %v11517_v39  ;;  %v11537_v39 = vmul.f32 %v11248_v63, %v10850_v15  ;;  %v11539_v42 = vadd.f32 %v461_v3, %v453_v20  ;;  %v305_v3 = vmul.f32 %v11461_v50, %v10842_v12 }
 0x1ab   : > { %1394 = vrot.lane.b32.xlu1 %v1378_v51, %s10783_s7  ;;  %1396 = vrot.lane.b32.xlu0 %v1379_v62, %s10783_s7  ;;  %16551 = vst [vmem:[#allocation90_spill] sm:$0xff] %v11547_v6  ;;  %v274_v51 = vmul.f32 %v8891_v7, %v11002_v17  ;;  %v459_v62 = vmul.f32 %v11469_v40, %v10840_v11  ;;  %16559 = vst [vmem:[#allocation98_spill] sm:$0xff] %v11611_v34 }
 0x1ac   : > { %16549 = vst [vmem:[#allocation88_spill] sm:$0xff] %v11537_v39  ;;  %v1380_v15 = vmul.f32 %v11464_v46, %v10895_v35  ;;  %v467_v6 = vmul.f32 %v11483_v54, %v10858_v18  ;;  %v591_v39 = vmul.f32 %v11483_v54, %v10840_v11  ;;  %v11583_v7 = vmul.f32 %v11251_v0, %v10840_v11 }
 0x1ad   : > { %v11560_v20 = vpop.permute.xlu1 %872  ;;  %v11562_v8 = vpop.permute.xlu0 %870  ;;  %v11587_v35 = vmul.f32 %v11341_v31, %v10858_v18  ;;  %v307_v5 = vadd.f32 %v303_v45, %v274_v51  ;;  %v11607_v45 = vmul.f32 %v11248_v63, %v10842_v12  ;;  %v332_v51 = vmul.f32 %v11469_v40, %v10846_v14 }
 0x1ae   : > { %16552 = vst [vmem:[#allocation91_spill] sm:$0xff] %v11560_v20  ;;  %16553 = vst [vmem:[#allocation92_spill] sm:$0xff] %v11562_v8  ;;  %v361_v8 = vmul.f32 %v11483_v54, %v10863_v21  ;;  %v309_v20 = vadd.f32 %v305_v3, %v276_v24  ;;  %v592_v21 = vmul.f32 %v11483_v54, %v10842_v12 }
 0x1af   : > { %1398 = vrot.lane.b32.xlu1 %v1380_v15, %s10783_s7  ;;  %1400 = vrot.lane.b32.xlu0 %v1381_v13, %s10783_s7  ;;  %16555 = vst [vmem:[#allocation94_spill] sm:$0xff] %v11583_v7  ;;  %16556 = vst [vmem:[#allocation95_spill] sm:$0xff] %v11587_v35  ;;  %v450_v13 = vmul.f32 %v11461_v50, %v11002_v17  ;;  %v1382_v7 = vmul.f32 %v11464_v46, %v10903_v38 }
 0x1b0   : > { %v1383_v24 = vmul.f32 %v11480_v53, %v10903_v38  ;;  %v308_v3 = vadd.f32 %v304_v30, %v275_v52  ;;  %v334_v35 = vmul.f32 %v11469_v40, %v10852_v16  ;;  %v364_v52 = vmul.f32 %v11483_v54, %v10881_v29 }
 0x1b1   : > { %v11595_v15 = vpop.permute.xlu1 %876  ;;  %v11597_v11 = vpop.permute.xlu0 %874  ;;  %v339_v50 = vadd.f32 %v335_v32, %v310_v37  ;;  %v468_v63 = vmul.f32 %v11483_v54, %v10852_v16  ;;  %v469_v0 = vmul.f32 %v11483_v54, %v10860_v19  ;;  %v582_v30 = vmul.f32 %v11469_v40, %v11002_v17 }
 0x1b2   : > { %16557 = vst [vmem:[#allocation96_spill] sm:$0xff] %v11595_v15  ;;  %16558 = vst [vmem:[#allocation97_spill] sm:$0xff] %v11597_v11  ;;  %v336_v12 = vadd.f32 %v332_v51, %v307_v5  ;;  %v462_v38 = vadd.f32 %v458_v23, %v450_v13  ;;  %v1385_v32 = vmul.f32 %v11480_v53, %v10911_v41 }
 0x1b3   : > { %1402 = vrot.lane.b32.xlu1 %v1382_v7, %s10783_s7  ;;  %1404 = vrot.lane.b32.xlu0 %v1383_v24, %s10783_s7  ;;  %v1384_v7 = vmul.f32 %v11464_v46, %v10911_v41  ;;  %v337_v37 = vadd.f32 %v333_v10, %v308_v3  ;;  %v363_v24 = vmul.f32 %v11483_v54, %v10877_v26 }
 0x1b4   : > { %v463_v29 = vadd.f32 %v459_v62, %v451_v28  ;;  %v583_v34 = vmul.f32 %v11469_v40, %v11014_v33  ;;  %v338_v5 = vadd.f32 %v334_v35, %v309_v20  ;;  %v466_v23 = vmul.f32 %v11483_v54, %v10846_v14 }
 0x1b5   : > { %v11627_v11 = vpop.permute.xlu1 %928  ;;  %v11629_v15 = vpop.permute.xlu0 %926  ;;  %v11642_v13 = vadd.f32 %v592_v21, %v11509_v59  ;;  %v362_v10 = vmul.f32 %v11483_v54, %v10865_v22  ;;  %v472_v3 = vadd.f32 %v468_v63, %v464_v36  ;;  %v473_v62 = vadd.f32 %v469_v0, %v11539_v42  ;;  %v16568_v63 = vld [vmem:[#allocation37_spill] sm:$0xff] }
 0x1b6   : > { %v11649_v28 = vadd.f32 %v361_v8, %v336_v12  ;;  %v368_v35 = vadd.f32 %v364_v52, %v339_v50  ;;  %v470_v40 = vadd.f32 %v466_v23, %v462_v38  ;;  %v11652_v20 = vadd.f32 %v11505_v60, %v582_v30  ;;  %v16565_v52 = vld [vmem:[#allocation31_spill] sm:$0xff]  ;;  %v16566_v50 = vld [vmem:[#allocation32_spill] sm:$0xff] }
 0x1b7   : > { %1406 = vrot.lane.b32.xlu1 %v1384_v7, %s10783_s7  ;;  %1408 = vrot.lane.b32.xlu0 %v1385_v32, %s10783_s7  ;;  %v366_v21 = vadd.f32 %v362_v10, %v337_v37  ;;  %v367_v59 = vadd.f32 %v363_v24, %v338_v5  ;;  %v471_v51 = vadd.f32 %v467_v6, %v463_v29  ;;  %v16569_v24 = vld [vmem:[#allocation38_spill] sm:$0xff]  ;;  %v16570_v5 = vld [vmem:[#allocation39_spill] sm:$0xff]  ;;  %v16571_v10 = vld [vmem:[#allocation40_spill] sm:$0xff] }
 0x1b8   : > { %v595_v7 = vadd.f32 %v591_v39, %v583_v34  ;;  %v508_v32 = vsel %vm437_vm1, %v11182_v27, %v11180_v25  ;;  %v11659_v36 = vmul.f32 %v11483_v54, %v11002_v17  ;;  %v11663_v12 = vmul.f32 %v11483_v54, %v11014_v33  ;;  %v16561_v34 = vld [vmem:[#allocation34_spill] sm:$0xff]  ;;  %v16612_v17 = vld [vmem:[#allocation77_spill] sm:$0xff] }
 0x1b9   : > { %v11665_v38 = vpop.permute.xlu1 %932  ;;  %v11667_v60 = vpop.permute.xlu0 %930  ;;  %v11675_v29 = vmul.f32 %v11341_v31, %v10846_v14  ;;  %v11679_v25 = vmul.f32 %v11344_v48, %v10846_v14  ;;  %v11683_v27 = vmul.f32 %v11344_v48, %v10858_v18  ;;  %v11687_v54 = vmul.f32 %v11341_v31, %v10852_v16  ;;  %v16607_v18 = vld [vmem:[#allocation91_spill] sm:$0xff]  ;;  %v16609_v33 = vld [vmem:[#allocation66_spill] sm:$0xff] }
 0x1ba   : > { %v11697_v42 = vmul.f32 %v11344_v48, %v10852_v16  ;;  %v11701_v39 = vmul.f32 %v11341_v31, %v10860_v19  ;;  %v440_v6 = vsel %vm437_vm1, %v11139_v58, %v11137_v57  ;;  %v16560_v31 = vld [vmem:[#allocation33_spill] sm:$0xff]  ;;  %v16562_v57 = vld [vmem:[#allocation35_spill] sm:$0xff]  ;;  %v571_v23 = vsel %vm437_vm1, %v16570_v5, %v16569_v24  ;;  %v16584_v5 = vld [vmem:[#allocation70_spill] sm:$0xff] }
 0x1bb   : > { %1446 = vrot.lane.b32.xlu1 %v11525_v61, %s10783_s7  ;;  %1448 = vrot.lane.b32.xlu0 %v11533_v9, %s10783_s7  ;;  %v439_v9 = vsel %vm437_vm1, %v11129_v49, %v11127_v47  ;;  %v572_v61 = vsel %vm437_vm1, %v11218_v2, %v11216_v1  ;;  %v506_v47 = vsel %vm437_vm1, %v11159_v56, %v11157_v55  ;;  %v16563_v55 = vld [vmem:[#allocation93_spill] sm:$0xff]  ;;  %v16564_v56 = vld [vmem:[#allocation94_spill] sm:$0xff]  ;;  %v16608_v16 = vld [vmem:[#allocation92_spill] sm:$0xff] }
 0x1bc   : > { %v516_v49 = vadd.f32 %v508_v32, %v472_v3  ;;  %v11711_v1 = vmul.f32 %v11344_v48, %v10860_v19  ;;  %v11716_v2 = vsel %vm437_vm1, %v11119_v44, %v11117_v43  ;;  %v507_v8 = vsel %vm437_vm1, %v16560_v31, %v11168_v4  ;;  %v16567_v44 = vld [vmem:[#allocation36_spill] sm:$0xff]  ;;  %v16572_v3 = vld [vmem:[#allocation41_spill] sm:$0xff]  ;;  %v16610_v14 = vld [vmem:[#allocation67_spill] sm:$0xff] }
 0x1bd   : > { %v509_v58 = vsel %vm437_vm1, %v16562_v57, %v16561_v34  ;;  %v11728_v48 = vadd.f32 %v439_v9, %v366_v21  ;;  %v441_v43 = vsel %vm437_vm1, %v16566_v50, %v16565_v52  ;;  %v570_v4 = vsel %vm437_vm1, %v16568_v63, %v16567_v44  ;;  %v937_v32 = vpop.permute.xlu1 %936  ;;  %v935_v9 = vpop.permute.xlu0 %934  ;;  %v16573_v57 = vld [vmem:[#allocation44_spill] sm:$0xff]  ;;  %v16578_v52 = vld [vmem:[#allocation49_spill] sm:$0xff]  ;;  %v16582_v63 = vld [vmem:[#allocation42_spill] sm:$0xff] }
 0x1be   : > { %v11736_v0 = vadd.f32 %v572_v61, %v516_v49  ;;  %v11738_v30 = vadd.f32 %v440_v6, %v367_v59  ;;  %v514_v37 = vadd.f32 %v506_v47, %v470_v40  ;;  %v573_v21 = vsel %vm437_vm1, %v16572_v3, %v16571_v10  ;;  %v16575_v49 = vld [vmem:[#allocation46_spill] sm:$0xff]  ;;  %v16576_v59 = vld [vmem:[#allocation47_spill] sm:$0xff]  ;;  %v16586_v3 = vld [vmem:[#allocation89_spill] sm:$0xff] }
 0x1bf   : > { %1450 = vrot.lane.b32.xlu1 %v16563_v55, %s10783_s7  ;;  %1452 = vrot.lane.b32.xlu0 %v16564_v56, %s10783_s7  ;;  %v515_v31 = vadd.f32 %v507_v8, %v471_v51  ;;  %v517_v34 = vadd.f32 %v509_v58, %v473_v62  ;;  %v16574_v55 = vld [vmem:[#allocation45_spill] sm:$0xff]  ;;  %v632_v40 = vsel %vm437_vm1, %v16576_v59, %v16575_v49  ;;  %v16577_v56 = vld [vmem:[#allocation48_spill] sm:$0xff]  ;;  %v16579_v62 = vld [vmem:[#allocation98_spill] sm:$0xff] }
 0x1c0   : > { %v631_v61 = vsel %vm437_vm1, %v16574_v55, %v16573_v57  ;;  %v11752_v6 = vadd.f32 %v441_v43, %v368_v35  ;;  %v11754_v47 = vadd.f32 %v570_v4, %v514_v37  ;;  %v633_v50 = vsel %vm437_vm1, %v16578_v52, %v16577_v56  ;;  %v16580_v35 = vld [vmem:[#allocation72_spill] sm:$0xff]  ;;  %v16581_v43 = vld [vmem:[#allocation73_spill] sm:$0xff]  ;;  %v16583_v4 = vld [vmem:[#allocation43_spill] sm:$0xff] }
 0x1c1   : > { %v11763_v51 = vadd.f32 %v571_v23, %v515_v31  ;;  %v11767_v58 = vadd.f32 %v573_v21, %v517_v34  ;;  %v793_v44 = vsel %vm437_vm1, %v16581_v43, %v16580_v35  ;;  %v630_v37 = vsel %vm437_vm1, %v16583_v4, %v16582_v63  ;;  %v16585_v10 = vld [vmem:[#allocation71_spill] sm:$0xff]  ;;  %v16587_v57 = vld [vmem:[#allocation54_spill] sm:$0xff]  ;;  %v16589_v55 = vld [vmem:[#allocation56_spill] sm:$0xff]  ;;  %v941_v4 = vpop.permute.xlu1 %940 }
 0x1c2   : > { %v639_v24 = vadd.f32 %v631_v61, %v595_v7  ;;  %v792_v23 = vsel %vm437_vm1, %v16585_v10, %v16584_v5  ;;  %v641_v31 = vadd.f32 %v633_v50, %v16586_v3  ;;  %v16588_v21 = vld [vmem:[#allocation55_spill] sm:$0xff]  ;;  %v16590_v49 = vld [vmem:[#allocation57_spill] sm:$0xff]  ;;  %v16591_v56 = vld [vmem:[#allocation80_spill] sm:$0xff]  ;;  %v939_v5 = vpop.permute.xlu0 %938 }
 0x1c3   : > { %1454 = vrot.lane.b32.xlu1 %v11607_v45, %s10783_s7  ;;  %1456 = vrot.lane.b32.xlu0 %v16579_v62, %s10783_s7  ;;  %v640_v45 = vadd.f32 %v632_v40, %v11642_v13  ;;  %v676_v34 = vsel %vm437_vm1, %v16588_v21, %v16587_v57  ;;  %v677_v59 = vsel %vm437_vm1, %v16590_v49, %v16589_v55  ;;  %v16592_v52 = vld [vmem:[#allocation81_spill] sm:$0xff]  ;;  %v16593_v61 = vld [vmem:[#allocation50_spill] sm:$0xff]  ;;  %v16594_v13 = vld [vmem:[#allocation51_spill] sm:$0xff] }
 0x1c4   : > { %v837_v7 = vsel %vm437_vm1, %v16592_v52, %v16591_v56  ;;  %v674_v40 = vsel %vm437_vm1, %v16594_v13, %v16593_v61  ;;  %v16595_v62 = vld [vmem:[#allocation87_spill] sm:$0xff]  ;;  %v16596_v43 = vld [vmem:[#allocation78_spill] sm:$0xff]  ;;  %v16598_v10 = vld [vmem:[#allocation88_spill] sm:$0xff]  ;;  %v685_v8 = vadd.f32 %v677_v59, %v641_v31  ;;  %v944_v31 = vsel %vm437_vm1, %v935_v9, %v937_v32 }
 0x1c5   : > { %v801_v35 = vadd.f32 %v793_v44, %v16595_v62  ;;  %v16597_v50 = vld [vmem:[#allocation79_spill] sm:$0xff]  ;;  %v16599_v3 = vld [vmem:[#allocation90_spill] sm:$0xff]  ;;  %v16600_v57 = vld [vmem:[#allocation52_spill] sm:$0xff] }
 0x1c6   : > { %v836_v63 = vsel %vm437_vm1, %v16597_v50, %v16596_v43  ;;  %v16601_v21 = vld [vmem:[#allocation53_spill] sm:$0xff]  ;;  %v16602_v49 = vld [vmem:[#allocation68_spill] sm:$0xff]  ;;  %v684_v50 = vadd.f32 %v676_v34, %v640_v45  ;;  %v16619_v32 = vld [vmem:[#allocation62_spill] sm:$0xff] }
 0x1c7   : > { %1458 = vrot.lane.b32.xlu1 %v16598_v10, %s10783_s7  ;;  %1460 = vrot.lane.b32.xlu0 %v16599_v3, %s10783_s7  ;;  %v675_v55 = vsel %vm437_vm1, %v16601_v21, %v16600_v57  ;;  %v16603_v56 = vld [vmem:[#allocation69_spill] sm:$0xff]  ;;  %v16604_v52 = vld [vmem:[#allocation84_spill] sm:$0xff]  ;;  %v845_v10 = vadd.f32 %v837_v7, %v801_v35  ;;  %v880_v3 = vsel %vm437_vm1, %v16608_v16, %v16607_v18  ;;  %v16618_v7 = vld [vmem:[#allocation86_spill] sm:$0xff] }
 0x1c8   : > { %v791_v44 = vsel %vm437_vm1, %v16603_v56, %v16602_v49  ;;  %v800_v61 = vadd.f32 %v792_v23, %v16604_v52  ;;  %v16605_v13 = vld [vmem:[#allocation96_spill] sm:$0xff]  ;;  %v16606_v62 = vld [vmem:[#allocation97_spill] sm:$0xff]  ;;  %v790_v57 = vsel %vm437_vm1, %v16610_v14, %v16609_v33  ;;  %v945_v56 = vsel %vm437_vm1, %v939_v5, %v941_v4  ;;  %v16615_v33 = vld [vmem:[#allocation74_spill] sm:$0xff] }
 0x1c9   : > { %v881_v43 = vsel %vm437_vm1, %v16606_v62, %v16605_v13  ;;  %v16611_v21 = vld [vmem:[#allocation76_spill] sm:$0xff]  ;;  %v799_v52 = vadd.f32 %v791_v44, %v11663_v12  ;;  %v16614_v14 = vld [vmem:[#allocation65_spill] sm:$0xff]  ;;  %v16620_v9 = vld [vmem:[#allocation63_spill] sm:$0xff] }
 0x1ca   : > { %v835_v49 = vsel %vm437_vm1, %v16612_v17, %v16611_v21  ;;  %v844_v23 = vadd.f32 %v836_v63, %v800_v61  ;;  %v889_v45 = vadd.f32 %v881_v43, %v845_v10  ;;  %v16613_v16 = vld [vmem:[#allocation64_spill] sm:$0xff]  ;;  %v16616_v17 = vld [vmem:[#allocation75_spill] sm:$0xff]  ;;  %v16617_v59 = vld [vmem:[#allocation85_spill] sm:$0xff]  ;;  %v798_v63 = vadd.f32 %v790_v57, %v11659_v36 }
 0x1cb   : > { %1490 = vrot.lane.b32.xlu1 %v11675_v29, %s10783_s7  ;;  %1492 = vrot.lane.b32.xlu0 %v11679_v25, %s10783_s7  ;;  %v741_v18 = vsel %vm437_vm1, %v16614_v14, %v16613_v16  ;;  %v834_v34 = vsel %vm437_vm1, %v16616_v17, %v16615_v33  ;;  %v879_v12 = vsel %vm437_vm1, %v16618_v7, %v16617_v59  ;;  %v16621_v5 = vld [vmem:[#allocation60_spill] sm:$0xff]  ;;  %v16622_v44 = vld [vmem:[#allocation61_spill] sm:$0xff]  ;;  %v16623_v13 = vld [vmem:[#allocation82_spill] sm:$0xff] }
 0x1cc   : > { %v888_v35 = vadd.f32 %v880_v3, %v844_v23  ;;  %v740_v29 = vsel %vm437_vm1, %v16620_v9, %v16619_v32  ;;  %v843_v25 = vadd.f32 %v835_v49, %v799_v52  ;;  %v953_v4 = vadd.f32 %v945_v56, %v889_v45  ;;  %v16624_v62 = vld [vmem:[#allocation83_spill] sm:$0xff]  ;;  %v16628_v33 = vld [vmem:[#allocation58_spill] sm:$0xff] }
 0x1cd   : > { %v739_v61 = vsel %vm437_vm1, %v16622_v44, %v16621_v5  ;;  %v878_v43 = vsel %vm437_vm1, %v16624_v62, %v16623_v13  ;;  %v943_v10 = vsel %vm437_vm1, %v11667_v60, %v11665_v38  ;;  %v749_v36 = vadd.f32 %v741_v18, %v685_v8  ;;  %v16627_v56 = vld [vmem:[#allocation95_spill] sm:$0xff] }
 0x1ce   : > { %v952_v3 = vadd.f32 %v944_v31, %v888_v35  ;;  %v11848_v21 = vpop.permute.xlu1 %965  ;;  %v11850_v23 = vpop.permute.xlu0 %960  ;;  %v842_v57 = vadd.f32 %v834_v34, %v798_v63  ;;  %v887_v49 = vadd.f32 %v879_v12, %v843_v25  ;;  %v638_v52 = vadd.f32 %v630_v37, %v11652_v20  ;;  %v16629_v17 = vld [vmem:[#allocation59_spill] sm:$0xff] }
 0x1cf   : > { %16625 = vst [vmem:[#allocation33_spill] sm:$0xff] %v11848_v21  ;;  %16626 = vst [vmem:[#allocation34_spill] sm:$0xff] %v11850_v23  ;;  %1494 = vrot.lane.b32.xlu1 %v16627_v56, %s10783_s7  ;;  %1496 = vrot.lane.b32.xlu0 %v11683_v27, %s10783_s7  ;;  %v683_v45 = vadd.f32 %v675_v55, %v639_v24  ;;  %v748_v16 = vadd.f32 %v740_v29, %v684_v50  ;;  %v16639_v29 = vld [vmem:[#allocation14_spill] sm:$0xff] }
 0x1d0   : > { %v942_v38 = vsel %vm437_vm1, %v11629_v15, %v11627_v11  ;;  %v957_v60 = vmax.f32 %v11752_v6, %v11767_v58  ;;  %v886_v8 = vadd.f32 %v878_v43, %v842_v57  ;;  %v951_v31 = vadd.f32 %v943_v10, %v887_v49 }
 0x1d1   : > { %v993_v14 = vmax.f32 %v749_v36, %v953_v4  ;;  %v682_v18 = vadd.f32 %v674_v40, %v638_v52  ;;  %v738_v34 = vsel %vm437_vm1, %v16629_v17, %v16628_v33  ;;  %v747_v27 = vadd.f32 %v739_v61, %v683_v45  ;;  %v1562_v36 = vld [vmem:[%s10870_s6 + $0x7] sm:$0x11] }
 0x1d2   : > { %v992_v59 = vmax.f32 %v748_v16, %v952_v3  ;;  %v11865_v20 = vpop.permute.xlu1 %970  ;;  %v11867_v37 = vpop.permute.xlu0 %975  ;;  %v950_v24 = vadd.f32 %v942_v38, %v886_v8  ;;  %v446_v6 = vadd.f32 %v11716_v2, %v11649_v28  ;;  %v955_v58 = vmax.f32 %v11728_v48, %v11763_v51  ;;  %v11948_v3 = vld [vmem:[%s16227_s3 + $0x8] sm:$0xff]  ;;  %v16645_v52 = vld [vmem:[#allocation16_spill] sm:$0xff]  ;;  %v16647_v8 = vld [vmem:[#allocation19_spill] sm:$0xff] }
 0x1d3   : > { %16630 = vst [vmem:[#allocation35_spill] sm:$0xff] %v11865_v20  ;;  %16631 = vst [vmem:[#allocation93_spill] sm:$0xff] %v11867_v37  ;;  %1498 = vrot.lane.b32.xlu1 %v11687_v54, %s10783_s7  ;;  %1500 = vrot.lane.b32.xlu0 %v11697_v42, %s10783_s7  ;;  %v997_v11 = vadd.f32 %v993_v14, %v11867_v37  ;;  %v981_v15 = vadd.f32 %v11867_v37, %v957_v60  ;;  %v16648_v33 = vld [vmem:[#allocation17_spill] sm:$0xff] }
 0x1d4   : > { %v996_v40 = vadd.f32 %v992_v59, %v11865_v20  ;;  %v16632_v55 = vmax.f32 %v11738_v30, %v11736_v0  ;;  %v746_v50 = vadd.f32 %v738_v34, %v682_v18  ;;  %v991_v7 = vmax.f32 %v747_v27, %v951_v31  ;;  %16644 = vst [vmem:[#allocation45_spill] sm:$0xff] %v11948_v3 }
 0x1d5   : > { %v11884_v42 = vmax.f32 %v997_v11, 0.0  ;;  %v11886_v12 = vmax.f32 %v981_v15, 0.0  ;;  %v954_v35 = vmax.f32 %v446_v6, %v11754_v47  ;;  %v979_v0 = vadd.f32 %v11848_v21, %v955_v58  ;;  %v16650_v58 = vld [vmem:[#allocation22_spill] sm:$0xff] }
 0x1d6   : > { %v980_v54 = vadd.f32 %v11865_v20, %v16632_v55  ;;  %v11889_v32 = vpop.permute.xlu1 %1094  ;;  %v11891_v28 = vpop.permute.xlu0 %1096  ;;  %v990_v2 = vmax.f32 %v746_v50, %v950_v24  ;;  %v995_v48 = vadd.f32 %v991_v7, %v11848_v21  ;;  %v11901_v30 = vmax.f32 %v996_v40, 0.0  ;;  %v1710_v50 = vld [vmem:[%s10870_s6 + $0x8] sm:$0x11] }
 0x1d7   : > { %16633 = vst [vmem:[#allocation94_spill] sm:$0xff] %v11884_v42  ;;  %16634 = vst [vmem:[#allocation31_spill] sm:$0xff] %v11886_v12  ;;  %1502 = vrot.lane.b32.xlu1 %v11701_v39, %s10783_s7  ;;  %1504 = vrot.lane.b32.xlu0 %v11711_v1, %s10783_s7  ;;  %v978_v1 = vadd.f32 %v11850_v23, %v954_v35  ;;  %v1518_v63 = vmul.f32 %v11464_v46, %v16639_v29  ;;  %v11923_v5 = vmax.f32 %v979_v0, 0.0  ;;  %v16651_v35 = vld [vmem:[#allocation21_spill] sm:$0xff] }
 0x1d8   : > { %16635 = vst [vmem:[#allocation32_spill] sm:$0xff] %v11889_v32  ;;  %16636 = vst [vmem:[#allocation36_spill] sm:$0xff] %v11891_v28  ;;  %9902 = vmatprep.subr.mxu0 %v11884_v42  ;;  %9922 = vmatprep.subr.mxu1 %v11886_v12  ;;  %v11903_v47 = vmax.f32 %v980_v54, 0.0  ;;  %v994_v39 = vadd.f32 %v990_v2, %v11850_v23  ;;  %v1519_v25 = vmul.f32 %v11480_v53, %v16639_v29  ;;  %v16667_v21 = vld [vmem:[#allocation25_spill] sm:$0xff] }
 0x1d9   : > { %16637 = vst [vmem:[#allocation37_spill] sm:$0xff] %v11901_v30  ;;  %9903 = vmatpush3.msra.mxu0 %v11884_v42  ;;  %9923 = vmatpush3.msra.mxu1 %v11886_v12  ;;  %v11921_v4 = vmax.f32 %v995_v48, 0.0  ;;  %16641 = vst [vmem:[#allocation40_spill] sm:$0xff] %v11923_v5  ;;  %v11931_v61 = vmax.f32 %v978_v1, 0.0  ;;  %v1520_v43 = vmul.f32 %v11464_v46, %v10865_v22 }
 0x1da   : > { %16638 = vst [vmem:[#allocation38_spill] sm:$0xff] %v11903_v47  ;;  %9904 = vmatprep.subr.mxu0 %v11901_v30  ;;  %9924 = vmatprep.subr.mxu1 %v11903_v47  ;;  %v11911_v51 = vpop.permute.xlu1 %1098  ;;  %v11913_v9 = vpop.permute.xlu0 %1100  ;;  %v11929_v44 = vmax.f32 %v994_v39, 0.0  ;;  %v1521_v10 = vmul.f32 %v11480_v53, %v10865_v22  ;;  %v1522_v56 = vmul.f32 %v11464_v46, %v10877_v26 }
 0x1db   : > { %9905 = vmatpush3.msra.mxu0 %v11901_v30  ;;  %9925 = vmatpush3.msra.mxu1 %v11903_v47  ;;  %16640 = vst [vmem:[#allocation39_spill] sm:$0xff] %v11921_v4  ;;  %16643 = vst [vmem:[#allocation44_spill] sm:$0xff] %v11931_v61  ;;  %v1567_v45 = vrot.slane %v1562_v36, %v16645_v52  ;;  %v1523_v16 = vmul.f32 %v11480_v53, %v10877_v26 }
 0x1dc   : > { %1534 = vrot.lane.b32.xlu1 %v1518_v63, %s10783_s7  ;;  %1536 = vrot.lane.b32.xlu0 %v1519_v25, %s10783_s7  ;;  %16642 = vst [vmem:[#allocation41_spill] sm:$0xff] %v11929_v44  ;;  %v1524_v31 = vmul.f32 %v11464_v46, %v16647_v8  ;;  %v1525_v18 = vmul.f32 %v11480_v53, %v16647_v8  ;;  %v16649_v46 = vld [vmem:[#allocation20_spill] sm:$0xff] }
 0x1dd   : > { %9906 = vmatprep.subr.mxu0 %v11921_v4  ;;  %9926 = vmatprep.subr.mxu1 %v11923_v5  ;;  %v1577_v14 = vrot.slane %v1567_v45, %v16645_v52  ;;  %v1571_v17 = vrot.slane %v1562_v36, %v16648_v33  ;;  %v1715_v48 = vrot.slane %v1710_v50, %v16645_v52 }
 0x1de   : > { %9907 = vmatpush3.msra.mxu0 %v11921_v4  ;;  %9927 = vmatpush3.msra.mxu1 %v11923_v5  ;;  %v11935_v13 = vpop.permute.xlu1 %1102  ;;  %v11937_v62 = vpop.permute.xlu0 %1104  ;;  %v1719_v1 = vrot.slane %v1710_v50, %v16648_v33 }
 0x1df   : > { %9908 = vmatprep.subr.mxu0 %v11929_v44  ;;  %9928 = vmatprep.subr.mxu1 %v11931_v61  ;;  %v1582_v59 = vmul.f32 %v1577_v14, %v16649_v46  ;;  %v1588_v24 = vmul.f32 %v1577_v14, %v10911_v41  ;;  %v1581_v53 = vrot.slane %v1571_v17, %v16645_v52 }
 0x1e0   : > { %9909 = vmatpush3.msra.mxu0 %v11929_v44  ;;  %9929 = vmatpush3.msra.mxu1 %v11931_v61  ;;  %v1586_v40 = vmul.f32 %v1577_v14, %v16650_v58  ;;  %v1584_v2 = vmul.f32 %v1577_v14, %v16651_v35  ;;  %v12094_v61 = vld [vmem:[%s10870_s6 + $0x7] ss:$0 sm:$0xff] }
 0x1e1   : > { %1538 = vrot.lane.b32.xlu1 %v1520_v43, %s10783_s7  ;;  %1540 = vrot.lane.b32.xlu0 %v1521_v10, %s10783_s7  ;;  %v1589_v6 = vmul.f32 %v1581_v53, %v10911_v41  ;;  %v1587_v7 = vmul.f32 %v1581_v53, %v16650_v58  ;;  %v1585_v63 = vmul.f32 %v1581_v53, %v16651_v35 }
 0x1e2   : > { %9962 = vmatprep.subr.mxu1 %v11884_v42  ;;  %9931 = vmatmul.mubr.msk.f32.vlgmr.msra.gmra.mxu1 %vm2991_vm0, %v11948_v3  ;;  %v11958_v57 = vpop.permute.xlu1 %1106  ;;  %v11960_v49 = vpop.permute.xlu0 %1108  ;;  %v1583_v25 = vmul.f32 %v1581_v53, %v16649_v46  ;;  %v12024_v43 = vrot.slane %v1715_v48, %v16645_v52  ;;  %v12051_v53 = vld [vmem:[%s10870_s6 + $0x9] sm:$0x11]  ;;  %v8895_v48 = vld [vmem:[%s10870_s6 + $0x4] ss:$0 sm:$0xff]  ;;  %v16659_v3 = vld [vmem:[#allocation10_spill] sm:$0xff] }
 0x1e3   : > { %9963 = vmatpush3.msra.mxu1 %v11884_v42  ;;  %v1847_v50 = vrot.slane %v12051_v53, %v16645_v52  ;;  %v1012_v12 = vmul.f32 %v8895_v48, %v16667_v21 }
 0x1e4   : > { %9964 = vmatprep.subr.mxu1 %v11901_v30  ;;  %v1730_v45 = vmul.f32 %v12024_v43, %v16649_v46 }
 0x1e5   : > { %9965 = vmatpush3.msra.mxu1 %v11901_v30  ;;  %1542 = vrot.lane.b32.xlu1 %v1522_v56, %s10783_s7  ;;  %v12032_v56 = vrot.slane %v1719_v1, %v16645_v52  ;;  %v1736_v1 = vmul.f32 %v12024_v43, %v10911_v41  ;;  %v16662_v30 = vld [vmem:[#allocation7_spill] sm:$0xff] }
 0x1e6   : > { %1544 = vrot.lane.b32.xlu0 %v1523_v16, %s10783_s7  ;;  %9966 = vmatprep.subr.mxu1 %v11921_v4  ;;  %v11973_v38 = vpop.permute.xlu1 %1162  ;;  %v11975_v60 = vpop.permute.xlu0 %1164 }
 0x1e7   : > { %16646 = vst [vmem:[#allocation46_spill] sm:$0xff] %v11973_v38  ;;  %9967 = vmatpush3.msra.mxu1 %v11921_v4  ;;  %16654 = vst [vmem:[#allocation49_spill] sm:$0xff] %v12032_v56  ;;  %v1731_v16 = vmul.f32 %v12032_v56, %v16649_v46  ;;  %v1733_v17 = vmul.f32 %v12032_v56, %v16651_v35  ;;  %v1799_v47 = vmul.f32 %v12032_v56, %v16639_v29 }
 0x1e8   : > { %9968 = vmatprep.subr.mxu1 %v11929_v44 }
 0x1e9   : > { %9969 = vmatpush3.msra.mxu1 %v11929_v44  ;;  %1546 = vrot.lane.b32.xlu1 %v1524_v31, %s10783_s7  ;;  %v16661_v44 = vld [vmem:[#allocation4_spill] sm:$0xff] }
 0x1ea   : > { %1548 = vrot.lane.b32.xlu0 %v1525_v18, %s10783_s7  ;;  %v11988_v34 = vpop.permute.xlu1 %1166  ;;  %v11990_v27 = vpop.permute.xlu0 %1168  ;;  %v1732_v18 = vmul.f32 %v12024_v43, %v16651_v35  ;;  %v1013_v4 = vmul.f32 %v8895_v48, %v16661_v44 }
 0x1ed   : > { %1598 = vrot.lane.b32.xlu1 %v1582_v59, %s10783_s7 }
 0x1ee   : > { %1610 = vrot.lane.b32.xlu0 %v1588_v24, %s10783_s7  ;;  %v11997_v11 = vpop.permute.xlu1 %1170  ;;  %v11999_v15 = vpop.permute.xlu0 %1172 }
 0x1f1   : > { %1612 = vrot.lane.b32.xlu1 %v1589_v6, %s10783_s7  ;;  %v1734_v6 = vmul.f32 %v12024_v43, %v16650_v58 }
 0x1f2   : > { %1606 = vrot.lane.b32.xlu0 %v1586_v40, %s10783_s7  ;;  %v12005_v55 = vpop.permute.xlu1 %1174  ;;  %v12007_v54 = vpop.permute.xlu0 %1176  ;;  %v1735_v40 = vmul.f32 %v12032_v56, %v16650_v58 }
 0x1f5   : > { %1608 = vrot.lane.b32.xlu1 %v1587_v7, %s10783_s7 }
 0x1f6   : > { %1602 = vrot.lane.b32.xlu0 %v1584_v2, %s10783_s7  ;;  %v12015_v0 = vpop.permute.xlu1 %1226  ;;  %v12017_v39 = vpop.permute.xlu0 %1228 }
 0x1f7   : > { %16652 = vst [vmem:[#allocation47_spill] sm:$0xff] %v12015_v0  ;;  %16653 = vst [vmem:[#allocation48_spill] sm:$0xff] %v12017_v39  ;;  %v16670_v0 = vld [vmem:[#allocation12_spill] sm:$0xff] }
 0x1f9   : > { %1604 = vrot.lane.b32.xlu1 %v1585_v63, %s10783_s7  ;;  %v8896_v63 = vld [vmem:[%s10870_s6 + $0x5] ss:$0 sm:$0xff] }
 0x1fa   : > { %1600 = vrot.lane.b32.xlu0 %v1583_v25, %s10783_s7  ;;  %v12027_v10 = vpop.permute.xlu1 %1230  ;;  %v12029_v36 = vpop.permute.xlu0 %1232  ;;  %v1737_v25 = vmul.f32 %v12032_v56, %v10911_v41  ;;  %v1026_v35 = vmul.f32 %v8896_v63, %v16662_v30  ;;  %v1124_v5 = vmul.f32 %v8896_v63, %v16661_v44  ;;  %v16669_v44 = vld [vmem:[#allocation11_spill] sm:$0xff] }
 0x1fc   : > { %v1030_v37 = vadd.f32 %v1026_v35, %v1013_v4  ;;  %v1800_v4 = vmul.f32 %v12024_v43, %v10865_v22  ;;  %v1123_v35 = vmul.f32 %v8896_v63, %v16667_v21 }
 0x1fd   : > { %1746 = vrot.lane.b32.xlu1 %v1730_v45, %s10783_s7 }
 0x1fe   : > { %1748 = vrot.lane.b32.xlu0 %v1731_v16, %s10783_s7  ;;  %v12040_v31 = vpop.permute.xlu1 %1234  ;;  %v12042_v14 = vpop.permute.xlu0 %1236  ;;  %v16657_v16 = vld [vmem:[#allocation8_spill] sm:$0xff] }
 0x201   : > { %1750 = vrot.lane.b32.xlu1 %v1732_v18, %s10783_s7  ;;  %v1024_v18 = vmul.f32 %v8896_v63, %v16657_v16 }
 0x202   : > { %1752 = vrot.lane.b32.xlu0 %v1733_v17, %s10783_s7  ;;  %v1239_v59 = vpop.permute.xlu1 %1238  ;;  %v1241_v24 = vpop.permute.xlu0 %1240  ;;  %v12075_v17 = vld [vmem:[%s10870_s6 + $0x6] ss:$0 sm:$0xff] }
 0x203   : > { %v1133_v45 = vmul.f32 %v12075_v17, %v16659_v3  ;;  %v1039_v32 = vmul.f32 %v12075_v17, %v16669_v44  ;;  %v1038_v39 = vmul.f32 %v12075_v17, %v16670_v0 }
 0x205   : > { %1754 = vrot.lane.b32.xlu1 %v1734_v6, %s10783_s7  ;;  %v16658_v6 = vld [vmem:[#allocation5_spill] sm:$0xff] }
 0x206   : > { %1756 = vrot.lane.b32.xlu0 %v1735_v40, %s10783_s7  ;;  %v12061_v7 = vpop.permute.xlu1 %1286  ;;  %v12063_v2 = vpop.permute.xlu0 %1288  ;;  %v1014_v40 = vmul.f32 %v8895_v48, %v16658_v6  ;;  %v1125_v42 = vmul.f32 %v8896_v63, %v16658_v6  ;;  %v1798_v6 = vmul.f32 %v12024_v43, %v16639_v29 }
 0x207   : > { %16655 = vst [vmem:[#allocation98_spill] sm:$0xff] %v12061_v7  ;;  %16656 = vst [vmem:[#allocation72_spill] sm:$0xff] %v12063_v2  ;;  %v1027_v7 = vmul.f32 %v8896_v63, %v16659_v3  ;;  %v12081_v2 = vrot.slane %v1847_v50, %v16645_v52  ;;  %v1040_v50 = vmul.f32 %v12075_v17, %v10860_v19  ;;  %v16665_v3 = vld [vmem:[#allocation24_spill] sm:$0xff] }
 0x208   : > { %v1011_v23 = vmul.f32 %v8895_v48, %v16665_v3 }
 0x209   : > { %1758 = vrot.lane.b32.xlu1 %v1736_v1, %s10783_s7  ;;  %16660 = vst [vmem:[#allocation73_spill] sm:$0xff] %v12081_v2  ;;  %v1130_v1 = vmul.f32 %v12075_v17, %v16657_v16  ;;  %v16668_v16 = vld [vmem:[#allocation6_spill] sm:$0xff]  ;;  %v1031_v28 = vadd.f32 %v1027_v7, %v1014_v40  ;;  %v1137_v2 = vadd.f32 %v1133_v45, %v1125_v42 }
 0x20a   : > { %1760 = vrot.lane.b32.xlu0 %v1737_v25, %s10783_s7  ;;  %v12089_v58 = vpop.permute.xlu1 %1290  ;;  %v12091_v41 = vpop.permute.xlu0 %1292  ;;  %v16666_v25 = vld [vmem:[#allocation9_spill] sm:$0xff]  ;;  %v1025_v20 = vmul.f32 %v8896_v63, %v16668_v16  ;;  %v1053_v7 = vmul.f32 %v12094_v61, %v16647_v8  ;;  %v1140_v42 = vmul.f32 %v12094_v61, %v16669_v44  ;;  %v1801_v45 = vmul.f32 %v12032_v56, %v10865_v22 }
 0x20b   : > { %16663 = vst [vmem:[#allocation42_spill] sm:$0xff] %v12089_v58  ;;  %16664 = vst [vmem:[#allocation43_spill] sm:$0xff] %v12091_v41  ;;  %v12106_v58 = vmul.f32 %v12075_v17, %v16666_v25  ;;  %v1141_v41 = vmul.f32 %v12094_v61, %v10860_v19  ;;  %v1132_v19 = vmul.f32 %v12075_v17, %v16662_v30 }
 0x20c   : > { %v1044_v38 = vadd.f32 %v1040_v50, %v1031_v28  ;;  %v1029_v28 = vadd.f32 %v1025_v20, %v1012_v12  ;;  %v1043_v40 = vadd.f32 %v1039_v32, %v1030_v37  ;;  %v1052_v50 = vmul.f32 %v12094_v61, %v10877_v26 }
 0x20d   : > { %1814 = vrot.lane.b32.xlu1 %v1798_v6, %s10783_s7  ;;  %v1181_v6 = vsel %vm437_vm1, %v12005_v55, %v12007_v54  ;;  %v1122_v55 = vmul.f32 %v8896_v63, %v16665_v3  ;;  %v1131_v54 = vmul.f32 %v12075_v17, %v16668_v16  ;;  %v1113_v12 = vsel %vm437_vm1, %v11958_v57, %v11960_v49 }
 0x20e   : > { %1816 = vrot.lane.b32.xlu0 %v1799_v47, %s10783_s7  ;;  %v12122_v46 = vpop.permute.xlu1 %1294  ;;  %v12124_v48 = vpop.permute.xlu0 %1296  ;;  %v1145_v47 = vadd.f32 %v1141_v41, %v1137_v2  ;;  %v1057_v37 = vadd.f32 %v1053_v7, %v1044_v38  ;;  %v1180_v32 = vsel %vm437_vm1, %v11997_v11, %v11999_v15  ;;  %v1803_v2 = vmul.f32 %v12032_v56, %v10877_v26 }
 0x20f   : > { %16671 = vst [vmem:[#allocation70_spill] sm:$0xff] %v12122_v46  ;;  %16672 = vst [vmem:[#allocation71_spill] sm:$0xff] %v12124_v48  ;;  %v1245_v46 = vsel %vm437_vm1, %v1239_v59, %v1241_v24  ;;  %v1136_v48 = vadd.f32 %v1132_v19, %v1124_v5  ;;  %v1802_v59 = vmul.f32 %v12024_v43, %v10877_v26 }
 0x210   : > { %v1189_v21 = vadd.f32 %v1181_v6, %v1145_v47  ;;  %v1135_v19 = vadd.f32 %v1131_v54, %v1123_v35  ;;  %v1028_v63 = vadd.f32 %v1024_v18, %v1011_v23  ;;  %v1042_v6 = vadd.f32 %v1038_v39, %v1029_v28  ;;  %v16678_v54 = vld [vmem:[#allocation20_spill] sm:$0xff] }
 0x211   : > { %1818 = vrot.lane.b32.xlu1 %v1800_v4, %s10783_s7  ;;  %v1144_v5 = vadd.f32 %v1140_v42, %v1136_v48  ;;  %v1051_v38 = vmul.f32 %v12094_v61, %v10865_v22  ;;  %v1244_v57 = vsel %vm437_vm1, %v12040_v31, %v12042_v14  ;;  %v1056_v49 = vadd.f32 %v1052_v50, %v1043_v40 }
 0x212   : > { %1820 = vrot.lane.b32.xlu0 %v1801_v45, %s10783_s7  ;;  %v12146_v41 = vpop.permute.xlu1 %1298  ;;  %v12148_v20 = vpop.permute.xlu0 %1300  ;;  %v1253_v24 = vadd.f32 %v1245_v46, %v1189_v21  ;;  %v1121_v11 = vadd.f32 %v1113_v12, %v1057_v37  ;;  %v1139_v15 = vmul.f32 %v12094_v61, %v16670_v0  ;;  %v1112_v39 = vsel %vm437_vm1, %v11935_v13, %v11937_v62 }
 0x213   : > { %v1188_v21 = vadd.f32 %v1180_v32, %v1144_v5  ;;  %v1134_v18 = vadd.f32 %v1130_v1, %v1122_v55  ;;  %v1179_v31 = vsel %vm437_vm1, %v11988_v34, %v11990_v27  ;;  %v1804_v14 = vmul.f32 %v12024_v43, %v16647_v8 }
 0x214   : > { %v1143_v48 = vadd.f32 %v1139_v15, %v1135_v19  ;;  %v1629_v4 = vmax.f32 %v1121_v11, %v1253_v24  ;;  %v1805_v35 = vmul.f32 %v12032_v56, %v16647_v8  ;;  %v1050_v42 = vmul.f32 %v12094_v61, %v16639_v29  ;;  %v16681_v24 = vld [vmem:[#allocation48_spill] sm:$0xff] }
 0x215   : > { %1822 = vrot.lane.b32.xlu1 %v1802_v59, %s10783_s7  ;;  %v1252_v7 = vadd.f32 %v1244_v57, %v1188_v21  ;;  %v1138_v13 = vmul.f32 %v12094_v61, %v16666_v25  ;;  %v1243_v62 = vsel %vm437_vm1, %v12027_v10, %v12029_v36  ;;  %v16675_v34 = vrot.slane %v12051_v53, %v16648_v33  ;;  %v16677_v53 = vld [vmem:[#allocation46_spill] sm:$0xff]  ;;  %v16680_v59 = vld [vmem:[#allocation93_spill] sm:$0xff]  ;;  %v16685_v15 = vld [vmem:[#allocation36_spill] sm:$0xff] }
 0x216   : > { %1824 = vrot.lane.b32.xlu0 %v1803_v2, %s10783_s7  ;;  %v12169_v46 = vpop.permute.xlu1 %1330  ;;  %v12171_v23 = vpop.permute.xlu0 %1332  ;;  %v1041_v1 = vadd.f32 %v12106_v58, %v1028_v63  ;;  %v1055_v47 = vadd.f32 %v1051_v38, %v1042_v6  ;;  %v1120_v45 = vadd.f32 %v1112_v39, %v1056_v49  ;;  %v1187_v28 = vadd.f32 %v1179_v31, %v1143_v48  ;;  %v16679_v58 = vld [vmem:[#allocation73_spill] sm:$0xff]  ;;  %v16682_v2 = vld [vmem:[#allocation47_spill] sm:$0xff]  ;;  %v8907_v38 = vld [vmem:[%s16227_s3 + $0x40] sm:$0xff] }
 0x217   : > { %16673 = vst [vmem:[#allocation89_spill] sm:$0xff] %v12169_v46  ;;  %16674 = vst [vmem:[#allocation54_spill] sm:$0xff] %v12171_v23  ;;  %v12195_v27 = vrot.slane %v16675_v34, %v16645_v52  ;;  %v1111_v10 = vsel %vm437_vm1, %v11911_v51, %v11913_v9  ;;  %v1142_v36 = vadd.f32 %v1138_v13, %v1134_v18  ;;  %v12229_v57 = vld [vmem:[%s16227_s3 + $0x48] sm:$0xff]  ;;  %v12234_v49 = vld [vmem:[%s16227_s3 + $0x50] sm:$0xff]  ;;  %9910 = vmatprep.mubr.msk.f32.mxu0 %vm2991_vm0, %v8907_v38 }
 0x218   : > { %v1178_v55 = vsel %vm437_vm1, %v16677_v53, %v11975_v60  ;;  %v1862_v37 = vmul.f32 %v16679_v58, %v16678_v54  ;;  %v1251_v12 = vadd.f32 %v1243_v62, %v1187_v28  ;;  %v1628_v32 = vmax.f32 %v1120_v45, %v1252_v7  ;;  %16683 = vst [vmem:[#allocation56_spill] sm:$0xff] %v12229_v57  ;;  %v16686_v21 = vld [vmem:[#allocation32_spill] sm:$0xff]  ;;  %v12397_v25 = vld [vmem:[%s10870_s6 + $0xa] sm:$0x11] }
 0x219   : > { %1826 = vrot.lane.b32.xlu1 %v1804_v14, %s10783_s7  ;;  %16676 = vst [vmem:[#allocation55_spill] sm:$0xff] %v12195_v27  ;;  %v1633_v19 = vadd.f32 %v1629_v4, %v16680_v59  ;;  %v1863_v5 = vmul.f32 %v12195_v27, %v16678_v54  ;;  %v1242_v63 = vsel %vm437_vm1, %v16682_v2, %v16681_v24  ;;  %16684 = vst [vmem:[#allocation57_spill] sm:$0xff] %v12234_v49  ;;  %v16687_v14 = vld [vmem:[#allocation35_spill] sm:$0xff]  ;;  %v12263_v34 = vld [vmem:[%s16227_s3 + $0x60] sm:$0xff] }
 0x21a   : > { %1828 = vrot.lane.b32.xlu0 %v1805_v35, %s10783_s7  ;;  %v12199_v40 = vpop.permute.xlu1 %1334  ;;  %v12201_v50 = vpop.permute.xlu0 %1336  ;;  %v1119_v51 = vadd.f32 %v1111_v10, %v1055_v47  ;;  %v1186_v9 = vadd.f32 %v1178_v55, %v1142_v36  ;;  %v1054_v11 = vadd.f32 %v1050_v42, %v1041_v1  ;;  %v1110_v39 = vsel %vm437_vm1, %v16686_v21, %v16685_v15  ;;  %v16689_v4 = vld [vmem:[#allocation31_spill] sm:$0xff]  ;;  %v16692_v47 = vld [vmem:[#allocation33_spill] sm:$0xff]  ;;  %v16694_v10 = vld [vmem:[#allocation38_spill] sm:$0xff] }
 0x21b   : > { %v1632_v48 = vadd.f32 %v1628_v32, %v16687_v14  ;;  %v12241_v7 = vmax.f32 %v1633_v19, 0.0  ;;  %9911 = vmatmul.mubr.msk.f32.vlgmr.msra.gmra.mxu0 %vm2991_vm0, %v12229_v57  ;;  %v12252_v35 = vld [vmem:[%s16227_s3 + $0x58] sm:$0xff]  ;;  %16691 = vst [vmem:[#allocation50_spill] sm:$0xff] %v12263_v34  ;;  %v12277_v36 = vld [vmem:[%s16227_s3 + $0x68] sm:$0xff]  ;;  %v2086_v29 = vmul.f32 %v12024_v43, %v16662_v30  ;;  %16720 = vst [vmem:[#allocation92_spill] sm:$0xff] %v12397_v25 }
 0x21c   : > { %v1250_v18 = vadd.f32 %v1242_v63, %v1186_v9  ;;  %v1627_v31 = vmax.f32 %v1119_v51, %v1251_v12  ;;  %9913 = vmatprep.mubr.msk.f32.mxu0 %vm2991_vm0, %v12234_v49  ;;  %16690 = vst [vmem:[#allocation81_spill] sm:$0xff] %v12252_v35  ;;  %v1118_v42 = vadd.f32 %v1110_v39, %v1054_v11  ;;  %16695 = vst [vmem:[#allocation87_spill] sm:$0xff] %v12277_v36  ;;  %v16699_v12 = vld [vmem:[#allocation34_spill] sm:$0xff]  ;;  %v12302_v24 = vld [vmem:[%s16227_s3 + $0x78] sm:$0xff] }
 0x21d   : > { %1878 = vrot.lane.b32.xlu1 %v1862_v37, %s10783_s7  ;;  %16688 = vst [vmem:[#allocation80_spill] sm:$0xff] %v12241_v7  ;;  %v12266_v28 = vmax.f32 %v1632_v48, 0.0  ;;  %v12288_v37 = vld [vmem:[%s16227_s3 + $0x70] sm:$0xff]  ;;  %16702 = vst [vmem:[#allocation52_spill] sm:$0xff] %v12302_v24  ;;  %v16706_v9 = vld [vmem:[#allocation44_spill] sm:$0xff]  ;;  %v1263_v26 = vmul.f32 %v12094_v61, %v16668_v16 }
 0x21e   : > { %1880 = vrot.lane.b32.xlu0 %v1863_v5, %s10783_s7  ;;  %v12219_v60 = vpop.permute.xlu1 %1338  ;;  %v12221_v6 = vpop.permute.xlu0 %1340  ;;  %v1626_v1 = vmax.f32 %v1118_v42, %v1250_v18  ;;  %v1631_v45 = vadd.f32 %v1627_v31, %v16692_v47  ;;  %16698 = vst [vmem:[#allocation88_spill] sm:$0xff] %v12288_v37  ;;  %v16701_v5 = vld [vmem:[#allocation40_spill] sm:$0xff]  ;;  %v16707_v21 = vld [vmem:[#allocation23_spill] sm:$0xff]  ;;  %v16708_v48 = vld [vmem:[#allocation22_spill] sm:$0xff]  ;;  %v1254_v47 = vmul.f32 %v12075_v17, %v16665_v3 }
 0x21f   : > { %16693 = vst [vmem:[#allocation51_spill] sm:$0xff] %v12266_v28  ;;  %9914 = vmatmul.mubr.msk.f32.gmra.mxu0 %vm2991_vm0, %v12252_v35  ;;  %v1868_v39 = vmul.f32 %v16679_v58, %v16707_v21  ;;  %v1869_v18 = vmul.f32 %v12195_v27, %v16707_v21  ;;  %v1866_v42 = vmul.f32 %v16679_v58, %v16708_v48  ;;  %v16715_v35 = vld [vmem:[#allocation13_spill] sm:$0xff]  ;;  %v16724_v23 = vld [vmem:[#allocation8_spill] sm:$0xff] }
 0x220   : > { %9916 = vmatprep.mubr.msk.f32.mxu0 %vm2991_vm0, %v12263_v34  ;;  %v1630_v32 = vadd.f32 %v1626_v1, %v16699_v12  ;;  %v12291_v19 = vmax.f32 %v1631_v45, 0.0  ;;  %v1867_v1 = vmul.f32 %v12195_v27, %v16708_v48  ;;  %v1928_v49 = vmul.f32 %v12024_v43, %v16715_v35  ;;  %v16722_v21 = vld [vmem:[#allocation25_spill] sm:$0xff] }
 0x221   : > { %3270 = vrot.lane.b32.xlu1 %v16689_v4, %s10783_s7  ;;  %v2132_v33 = vmul.f32 %v16679_v58, %v16715_v35  ;;  %v2015_v12 = vrot.slane %v12397_v25, %v16645_v52  ;;  %v1255_v14 = vmul.f32 %v12075_v17, %v16722_v21  ;;  %v1264_v27 = vmul.f32 %v12094_v61, %v16662_v30  ;;  %v12436_v25 = vld [vmem:[%s16227_s3 + $0x20] sm:$0xff]  ;;  %v12441_v46 = vld [vmem:[%s16227_s3 + $0x28] sm:$0xff] }
 0x222   : > { %3272 = vrot.lane.b32.xlu0 %v12241_v7, %s10783_s7  ;;  %v12256_v13 = vpop.permute.xlu1 %1342  ;;  %v12258_v62 = vpop.permute.xlu0 %1344  ;;  %16700 = vst [vmem:[#allocation90_spill] sm:$0xff] %v12291_v19  ;;  %v12310_v51 = vmax.f32 %v1630_v32, 0.0  ;;  %v1262_v30 = vmul.f32 %v12094_v61, %v16724_v23 }
 0x223   : > { %9917 = vmatmul.mubr.msk.f32.gmra.mxu0 %vm2991_vm0, %v12277_v36  ;;  %v16714_v36 = vld [vmem:[#allocation10_spill] sm:$0xff]  ;;  %v12455_v59 = vrot.slane %v2015_v12, %v16645_v52 }
 0x224   : > { %9919 = vmatprep.mubr.msk.f32.mxu0 %vm2991_vm0, %v12288_v37  ;;  %16705 = vst [vmem:[#allocation69_spill] sm:$0xff] %v12310_v51  ;;  %v2088_v34 = vmul.f32 %v12024_v43, %v16714_v36  ;;  %v12459_v23 = vadd.f32 %v1262_v30, %v1254_v47  ;;  %v12478_v30 = vld [vmem:[%s16227_s3 + $0x38] sm:$0xff]  ;;  %v1924_v47 = vmul.f32 %v12024_v43, %v16670_v0 }
 0x225   : > { %3266 = vrot.lane.b32.xlu1 %v16694_v10, %s10783_s7 }
 0x226   : > { %3268 = vrot.lane.b32.xlu0 %v12266_v28, %s10783_s7  ;;  %v12281_v53 = vpop.permute.xlu1 %1394  ;;  %v12283_v55 = vpop.permute.xlu0 %1396 }
 0x227   : > { %16696 = vst [vmem:[#allocation78_spill] sm:$0xff] %v12281_v53  ;;  %16697 = vst [vmem:[#allocation79_spill] sm:$0xff] %v12283_v55  ;;  %9920 = vmatmul.mubr.msk.f32.gmra.mxu0 %vm2991_vm0, %v12302_v24  ;;  %v16713_v24 = vld [vmem:[#allocation41_spill] sm:$0xff]  ;;  %v1265_v55 = vmul.f32 %v12094_v61, %v16714_v36 }
 0x228   : > { %9950 = vmatprep.mubr.msk.f32.mxu0 %vm2991_vm0, %v8907_v38 }
 0x229   : > { %3262 = vrot.lane.b32.xlu1 %v16701_v5, %s10783_s7 }
 0x22a   : > { %3264 = vrot.lane.b32.xlu0 %v12291_v19, %s10783_s7  ;;  %v12306_v2 = vpop.permute.xlu1 %1398  ;;  %v12308_v63 = vpop.permute.xlu0 %1400  ;;  %v16710_v19 = vld [vmem:[#allocation21_spill] sm:$0xff] }
 0x22b   : > { %16703 = vst [vmem:[#allocation53_spill] sm:$0xff] %v12306_v2  ;;  %16704 = vst [vmem:[#allocation68_spill] sm:$0xff] %v12308_v63  ;;  %v1864_v28 = vmul.f32 %v16679_v58, %v16710_v19  ;;  %v16723_v19 = vld [vmem:[#allocation5_spill] sm:$0xff]  ;;  %v2084_v63 = vmul.f32 %v12024_v43, %v16668_v16 }
 0x22c   : > { %v1257_v53 = vmul.f32 %v12075_v17, %v16723_v19 }
 0x22d   : > { %3258 = vrot.lane.b32.xlu1 %v16706_v9, %s10783_s7 }
 0x22e   : > { %3260 = vrot.lane.b32.xlu0 %v12310_v51, %s10783_s7  ;;  %v12319_v11 = vpop.permute.xlu1 %1402  ;;  %v12321_v15 = vpop.permute.xlu0 %1404 }
 0x231   : > { %1890 = vrot.lane.b32.xlu1 %v1868_v39, %s10783_s7  ;;  %v16709_v39 = vld [vmem:[#allocation94_spill] sm:$0xff] }
 0x232   : > { %1892 = vrot.lane.b32.xlu0 %v1869_v18, %s10783_s7  ;;  %v12329_v31 = vpop.permute.xlu1 %1406  ;;  %v12331_v38 = vpop.permute.xlu0 %1408 }
 0x235   : > { %1886 = vrot.lane.b32.xlu1 %v1866_v42, %s10783_s7 }
 0x236   : > { %1888 = vrot.lane.b32.xlu0 %v1867_v1, %s10783_s7  ;;  %v12339_v45 = vpop.permute.xlu1 %1446  ;;  %v12341_v32 = vpop.permute.xlu0 %1448  ;;  %v16711_v1 = vld [vmem:[#allocation37_spill] sm:$0xff] }
 0x239   : > { %3666 = vrot.lane.b32.xlu1 %v16709_v39, %s10783_s7  ;;  %v16712_v39 = vld [vmem:[#allocation39_spill] sm:$0xff] }
 0x23a   : > { %v12345_v18 = vpop.permute.xlu1 %1450  ;;  %v12347_v51 = vpop.permute.xlu0 %1452 }
 0x23d   : > { %1882 = vrot.lane.b32.xlu1 %v1864_v28, %s10783_s7 }
 0x23e   : > { %v12352_v7 = vpop.permute.xlu1 %1454  ;;  %v12354_v42 = vpop.permute.xlu0 %1456 }
 0x241   : > { %3662 = vrot.lane.b32.xlu1 %v16711_v1, %s10783_s7 }
 0x242   : > { %v1459_v9 = vpop.permute.xlu1 %1458  ;;  %v1461_v5 = vpop.permute.xlu0 %1460 }
 0x243   : > { %v1465_v2 = vsel %vm437_vm1, %v1459_v9, %v1461_v5  ;;  %v1305_v5 = vsel %vm437_vm1, %v12146_v41, %v12148_v20  ;;  %v2130_v20 = vmul.f32 %v16679_v58, %v16669_v44 }
 0x245   : > { %3658 = vrot.lane.b32.xlu1 %v16712_v39, %s10783_s7 }
 0x246   : > { %v12360_v54 = vpop.permute.xlu1 %1490  ;;  %v12362_v10 = vpop.permute.xlu0 %1492 }
 0x249   : > { %3654 = vrot.lane.b32.xlu1 %v16713_v24, %s10783_s7 }
 0x24a   : > { %v12366_v28 = vpop.permute.xlu1 %1494  ;;  %v12368_v37 = vpop.permute.xlu0 %1496 }
 0x24d   : > { %2110 = vrot.lane.b32.xlu1 %v2088_v34, %s10783_s7 }
 0x24e   : > { %v12373_v1 = vpop.permute.xlu1 %1498  ;;  %v12375_v39 = vpop.permute.xlu0 %1500 }
 0x251   : > { %1950 = vrot.lane.b32.xlu1 %v1928_v49, %s10783_s7  ;;  %v1926_v49 = vmul.f32 %v12024_v43, %v16669_v44 }
 0x252   : > { %v1503_v24 = vpop.permute.xlu1 %1502  ;;  %v1505_v57 = vpop.permute.xlu0 %1504 }
 0x253   : > { %v1509_v12 = vsel %vm437_vm1, %v1503_v24, %v1505_v57  ;;  %v2176_v57 = vmul.f32 %v12455_v59, %v16647_v8 }
 0x255   : > { %2106 = vrot.lane.b32.xlu1 %v2086_v29, %s10783_s7  ;;  %v12403_v29 = vld [vmem:[%s16227_s3 + $0x10] sm:$0xff] }
 0x256   : > { %v12383_v4 = vpop.permute.xlu1 %1534  ;;  %v12385_v34 = vpop.permute.xlu0 %1536  ;;  %9933 = vmatprep.mubr.msk.f32.mxu1 %vm2991_vm0, %v12403_v29 }
 0x257   : > { %16716 = vst [vmem:[#allocation84_spill] sm:$0xff] %v12383_v4  ;;  %16717 = vst [vmem:[#allocation96_spill] sm:$0xff] %v12385_v34  ;;  %v16725_v4 = vld [vmem:[#allocation4_spill] sm:$0xff] }
 0x258   : > { %v1256_v36 = vmul.f32 %v12075_v17, %v16725_v4  ;;  %v1424_v9 = vmul.f32 %v12094_v61, %v16725_v4  ;;  %v10750_v4 = vld [vmem:[%s16227_s3] sm:$0xff] }
 0x259   : > { %2154 = vrot.lane.b32.xlu1 %v2132_v33, %s10783_s7  ;;  %v12408_v33 = vld [vmem:[%s16227_s3 + $0x18] sm:$0xff] }
 0x25a   : > { %v12390_v48 = vpop.permute.xlu1 %1538  ;;  %v12392_v22 = vpop.permute.xlu0 %1540  ;;  %16721 = vst [vmem:[#allocation66_spill] sm:$0xff] %v12408_v33  ;;  %9934 = vmatmul.mubr.msk.f32.gmra.mxu1 %vm2991_vm0, %v12408_v33  ;;  %v1267_v33 = vadd.f32 %v1263_v26, %v1255_v14  ;;  %v1268_v17 = vadd.f32 %v1264_v27, %v1256_v36  ;;  %v12473_v26 = vld [vmem:[%s16227_s3 + $0x30] sm:$0xff]  ;;  %v1349_v36 = vsel %vm437_vm1, %v12256_v13, %v12258_v62 }
 0x25b   : > { %16718 = vst [vmem:[#allocation97_spill] sm:$0xff] %v12390_v48  ;;  %16719 = vst [vmem:[#allocation91_spill] sm:$0xff] %v12392_v22  ;;  %9936 = vmatprep.mubr.msk.f32.mxu1 %vm2991_vm0, %v12436_v25  ;;  %v1425_v48 = vmul.f32 %v12094_v61, %v16723_v19  ;;  %v1269_v22 = vadd.f32 %v1265_v55, %v1257_v53  ;;  %v1422_v53 = vmul.f32 %v12094_v61, %v16665_v3  ;;  %v16731_v3 = vld [vmem:[#allocation42_spill] sm:$0xff] }
 0x25c   : > { %v1464_v55 = vsel %vm437_vm1, %v12352_v7, %v12354_v42  ;;  %v1423_v13 = vmul.f32 %v12094_v61, %v16722_v21  ;;  %v16728_v7 = vld [vmem:[#allocation72_spill] sm:$0xff]  ;;  %v16729_v42 = vld [vmem:[#allocation98_spill] sm:$0xff]  ;;  %v1508_v61 = vsel %vm437_vm1, %v12373_v1, %v12375_v39  ;;  %v16732_v1 = vld [vmem:[#allocation45_spill] sm:$0xff] }
 0x25d   : > { %1946 = vrot.lane.b32.xlu1 %v1926_v49, %s10783_s7  ;;  %v1972_v49 = vmul.f32 %v16679_v58, %v16647_v8  ;;  %v1473_v27 = vadd.f32 %v1465_v2, %v1425_v48  ;;  %v16726_v2 = vld [vmem:[#allocation71_spill] sm:$0xff]  ;;  %v1313_v19 = vadd.f32 %v1305_v5, %v1269_v22  ;;  %v1413_v22 = vsel %vm437_vm1, %v12329_v31, %v12331_v38 }
 0x25e   : > { %v12410_v35 = vpop.permute.xlu1 %1542  ;;  %v12412_v56 = vpop.permute.xlu0 %1544  ;;  %9937 = vmatmul.mubr.msk.f32.gmra.mxu1 %vm2991_vm0, %v12441_v46  ;;  %v1463_v31 = vsel %vm437_vm1, %v12345_v18, %v12347_v51 }
 0x25f   : > { %9939 = vmatprep.mubr.msk.f32.mxu1 %vm2991_vm0, %v12473_v26  ;;  %v1517_v62 = vadd.f32 %v1509_v12, %v1473_v27  ;;  %v1357_v5 = vadd.f32 %v1349_v36, %v1313_v19  ;;  %v1472_v12 = vadd.f32 %v1464_v55, %v1424_v9  ;;  %v1552_v38 = vsel %vm437_vm1, %v12410_v35, %v12412_v56  ;;  %v16736_v36 = vld [vmem:[#allocation93_spill] sm:$0xff] }
 0x260   : > { %v1462_v56 = vsel %vm437_vm1, %v12339_v45, %v12341_v32  ;;  %v1507_v35 = vsel %vm437_vm1, %v12366_v28, %v12368_v37  ;;  %v1506_v45 = vsel %vm437_vm1, %v12360_v54, %v12362_v10  ;;  %v16738_v54 = vld [vmem:[#allocation53_spill] sm:$0xff] }
 0x261   : > { %1994 = vrot.lane.b32.xlu1 %v1972_v49, %s10783_s7  ;;  %v1516_v19 = vadd.f32 %v1508_v61, %v1472_v12 }
 0x262   : > { %v1547_v49 = vpop.permute.xlu1 %1546  ;;  %v1549_v34 = vpop.permute.xlu0 %1548  ;;  %9940 = vmatmul.mubr.msk.f32.gmra.mxu1 %vm2991_vm0, %v12478_v30  ;;  %v16733_v32 = vld [vmem:[#allocation91_spill] sm:$0xff] }
 0x263   : > { %v1553_v24 = vsel %vm437_vm1, %v1547_v49, %v1549_v34  ;;  %9970 = vmatprep.mubr.msk.f32.mxu1 %vm2991_vm0, %v10750_v4  ;;  %v1302_v34 = vsel %vm437_vm1, %v16729_v42, %v16728_v7  ;;  %v16730_v49 = vld [vmem:[#allocation43_spill] sm:$0xff]  ;;  %v1348_v4 = vsel %vm437_vm1, %v12219_v60, %v12221_v6  ;;  %v1412_v60 = vsel %vm437_vm1, %v12319_v11, %v12321_v15  ;;  %v16740_v7 = vld [vmem:[#allocation84_spill] sm:$0xff] }
 0x264   : > { %v1303_v16 = vsel %vm437_vm1, %v16731_v3, %v16730_v49  ;;  %v1561_v27 = vadd.f32 %v1553_v24, %v1517_v62  ;;  %v1421_v6 = vadd.f32 %v1413_v22, %v1357_v5  ;;  %v1347_v11 = vsel %vm437_vm1, %v12199_v40, %v12201_v50  ;;  %v16739_v62 = vld [vmem:[#allocation96_spill] sm:$0xff]  ;;  %v16741_v49 = vld [vmem:[#allocation18_spill] sm:$0xff] }
 0x265   : > { %2102 = vrot.lane.b32.xlu1 %v2084_v63, %s10783_s7  ;;  %v16727_v63 = vld [vmem:[#allocation70_spill] sm:$0xff]  ;;  %v1311_v51 = vadd.f32 %v1303_v16, %v1267_v33  ;;  %v1471_v15 = vadd.f32 %v1463_v31, %v1423_v13  ;;  %v1560_v9 = vadd.f32 %v1552_v38, %v1516_v19  ;;  %v1470_v40 = vadd.f32 %v1462_v56, %v1422_v53  ;;  %v16737_v13 = vld [vmem:[#allocation68_spill] sm:$0xff] }
 0x266   : > { %v12480_v14 = vpop.permute.xlu1 %1598  ;;  %v1611_v41 = vpop.permute.xlu0 %1610  ;;  %v1304_v48 = vsel %vm437_vm1, %v16727_v63, %v16726_v2  ;;  %9971 = vmatmul.mubr.msk.f32.vlgmr.msra.gmra.mxu1 %vm2991_vm0, %v16732_v1  ;;  %v1411_v10 = vsel %vm437_vm1, %v16738_v54, %v16737_v13  ;;  %v1550_v42 = vsel %vm437_vm1, %v16740_v7, %v16739_v62  ;;  %v1970_v53 = vmul.f32 %v16679_v58, %v16741_v49 }
 0x267   : > { %v1312_v3 = vadd.f32 %v1304_v48, %v1268_v17  ;;  %9973 = vmatprep.mubr.msk.f32.mxu1 %vm2991_vm0, %v12403_v29  ;;  %v1515_v50 = vadd.f32 %v1507_v35, %v1471_v15  ;;  %v1355_v48 = vadd.f32 %v1347_v11, %v1311_v51  ;;  %v1514_v22 = vadd.f32 %v1506_v45, %v1470_v40  ;;  %v16752_v15 = vld [vmem:[#allocation23_spill] sm:$0xff] }
 0x268   : > { %v2174_v7 = vmul.f32 %v12455_v59, %v16741_v49 }
 0x269   : > { %2150 = vrot.lane.b32.xlu1 %v2130_v20, %s10783_s7  ;;  %v1356_v18 = vadd.f32 %v1348_v4, %v1312_v3  ;;  %v16734_v20 = vld [vmem:[#allocation97_spill] sm:$0xff]  ;;  %v1419_v38 = vadd.f32 %v1411_v10, %v1355_v48  ;;  %v2128_v48 = vmul.f32 %v16679_v58, %v16670_v0 }
 0x26a   : > { %v1613_v2 = vpop.permute.xlu1 %1612  ;;  %v1607_v63 = vpop.permute.xlu0 %1606  ;;  %v1551_v37 = vsel %vm437_vm1, %v16734_v20, %v16733_v32 }
 0x26b   : > { %v1617_v39 = vsel %vm437_vm1, %v1611_v41, %v1613_v2  ;;  %v1420_v33 = vadd.f32 %v1412_v60, %v1356_v18  ;;  %v1559_v61 = vadd.f32 %v1551_v37, %v1515_v50  ;;  %v16743_v2 = vld [vmem:[#allocation54_spill] sm:$0xff]  ;;  %v16757_v37 = vld [vmem:[#allocation8_spill] sm:$0xff] }
 0x26c   : > { %v1625_v17 = vadd.f32 %v1617_v39, %v1561_v27  ;;  %v1310_v27 = vadd.f32 %v1302_v34, %v12459_v23  ;;  %v1558_v39 = vadd.f32 %v1550_v42, %v1514_v22  ;;  %v16745_v23 = vld [vmem:[#allocation79_spill] sm:$0xff]  ;;  %v16746_v34 = vld [vmem:[#allocation78_spill] sm:$0xff] }
 0x26d   : > { %2198 = vrot.lane.b32.xlu1 %v2176_v57, %s10783_s7  ;;  %v16735_v57 = vld [vmem:[#allocation66_spill] sm:$0xff]  ;;  %v1410_v60 = vsel %vm437_vm1, %v16746_v34, %v16745_v23  ;;  %v16768_v34 = vld [vmem:[#allocation15_spill] sm:$0xff] }
 0x26e   : > { %v1645_v41 = vmax.f32 %v1421_v6, %v1625_v17  ;;  %v1609_v29 = vpop.permute.xlu1 %1608  ;;  %v1603_v16 = vpop.permute.xlu0 %1602  ;;  %9974 = vmatmul.mubr.msk.f32.gmra.mxu1 %vm2991_vm0, %v16735_v57  ;;  %v16747_v6 = vld [vmem:[#allocation21_spill] sm:$0xff]  ;;  %v16759_v57 = vld [vmem:[#allocation34_spill] sm:$0xff] }
 0x26f   : > { %v1616_v28 = vsel %vm437_vm1, %v1607_v63, %v1609_v29  ;;  %9976 = vmatprep.mubr.msk.f32.mxu1 %vm2991_vm0, %v12436_v25  ;;  %v16744_v63 = vld [vmem:[#allocation89_spill] sm:$0xff] }
 0x270   : > { %v1649_v55 = vadd.f32 %v1645_v41, %v16736_v36  ;;  %v1624_v24 = vadd.f32 %v1616_v28, %v1560_v9  ;;  %v1346_v3 = vsel %vm437_vm1, %v16744_v63, %v16743_v2  ;;  %v12602_v9 = vld [vmem:[%s16227_s3 + $0x80] sm:$0xff]  ;;  %v16765_v63 = vld [vmem:[#allocation13_spill] sm:$0xff] }
 0x271   : > { %1942 = vrot.lane.b32.xlu1 %v1924_v47, %s10783_s7  ;;  %v1354_v17 = vadd.f32 %v1346_v3, %v1310_v27 }
 0x272   : > { %v12571_v4 = vmax.f32 %v1649_v55, 0.0  ;;  %v1644_v5 = vmax.f32 %v1420_v33, %v1624_v24  ;;  %v1605_v25 = vpop.permute.xlu1 %1604  ;;  %v1601_v12 = vpop.permute.xlu0 %1600  ;;  %9977 = vmatmul.mubr.msk.f32.gmra.mxu1 %vm2991_vm0, %v12441_v46  ;;  %v16749_v46 = vld [vmem:[#allocation35_spill] sm:$0xff]  ;;  %v12630_v24 = vld [vmem:[%s10870_s6 + $0xb] sm:$0x11] }
 0x273   : > { %v1615_v31 = vsel %vm437_vm1, %v1603_v16, %v1605_v25  ;;  %v1614_v47 = vsel %vm437_vm1, %v12480_v14, %v1601_v12  ;;  %9979 = vmatprep.mubr.msk.f32.mxu1 %vm2991_vm0, %v12473_v26  ;;  %v16748_v14 = vld [vmem:[#allocation55_spill] sm:$0xff]  ;;  %v2036_v26 = vmul.f32 %v12455_v59, %v16752_v15  ;;  %v1418_v41 = vadd.f32 %v1410_v60, %v1354_v17  ;;  %v16754_v16 = vld [vmem:[#allocation33_spill] sm:$0xff] }
 0x274   : > { %16742 = vst [vmem:[#allocation67_spill] sm:$0xff] %v12571_v4  ;;  %v1623_v1 = vadd.f32 %v1615_v31, %v1559_v61  ;;  %3668 = vrot.lane.b32.xlu0 %v12571_v4, %s10783_s7  ;;  %v1865_v19 = vmul.f32 %v16748_v14, %v16747_v6  ;;  %v1648_v51 = vadd.f32 %v1644_v5, %v16749_v46  ;;  %v16763_v61 = vld [vmem:[#allocation10_spill] sm:$0xff]  ;;  %v16764_v5 = vld [vmem:[#allocation49_spill] sm:$0xff] }
 0x275   : > { %1990 = vrot.lane.b32.xlu1 %v1970_v53, %s10783_s7  ;;  %v1622_v56 = vadd.f32 %v1614_v47, %v1558_v39  ;;  %v2219_v13 = vrot.slane %v12630_v24, %v16645_v52  ;;  %v2089_v25 = vmul.f32 %v16764_v5, %v16763_v61  ;;  %v1929_v3 = vmul.f32 %v16764_v5, %v16765_v63  ;;  %v16766_v31 = vld [vmem:[#allocation9_spill] sm:$0xff] }
 0x276   : > { %v1643_v18 = vmax.f32 %v1419_v38, %v1623_v1  ;;  %v12593_v35 = vpop.permute.xlu1 %1746  ;;  %v12595_v11 = vpop.permute.xlu0 %1748  ;;  %9980 = vmatmul.mubr.msk.f32.gmra.mxu1 %vm2991_vm0, %v12478_v30  ;;  %v12610_v29 = vmax.f32 %v1648_v51, 0.0  ;;  %v2082_v30 = vmul.f32 %v12024_v43, %v16757_v37  ;;  %v1922_v47 = vmul.f32 %v12024_v43, %v16766_v31  ;;  %v16767_v1 = vld [vmem:[#allocation7_spill] sm:$0xff]  ;;  %v16769_v51 = vld [vmem:[#allocation22_spill] sm:$0xff] }
 0x277   : > { %16750 = vst [vmem:[#allocation76_spill] sm:$0xff] %v12593_v35  ;;  %16751 = vst [vmem:[#allocation77_spill] sm:$0xff] %v12595_v11  ;;  %10010 = vmatprep.mubr.msk.f32.mxu1 %vm2991_vm0, %v12602_v9  ;;  %v1642_v45 = vmax.f32 %v1418_v41, %v1622_v56  ;;  %v12651_v42 = vrot.slane %v2219_v13, %v16645_v52  ;;  %v2087_v23 = vmul.f32 %v16764_v5, %v16767_v1 }
 0x278   : > { %1884 = vrot.lane.b32.xlu0 %v1865_v19, %s10783_s7  ;;  %16753 = vst [vmem:[#allocation64_spill] sm:$0xff] %v12610_v29  ;;  %v1647_v33 = vadd.f32 %v1643_v18, %v16754_v16  ;;  %v1968_v60 = vmul.f32 %v16679_v58, %v16768_v34  ;;  %v2133_v17 = vmul.f32 %v16748_v14, %v16765_v63 }
 0x279   : > { %2058 = vrot.lane.b32.xlu1 %v2036_v26, %s10783_s7  ;;  %v1646_v40 = vadd.f32 %v1642_v45, %v16759_v57  ;;  %v2240_v12 = vmul.f32 %v12651_v42, %v16752_v15  ;;  %v2034_v18 = vmul.f32 %v12455_v59, %v16769_v51  ;;  %v1927_v41 = vmul.f32 %v16764_v5, %v16669_v44 }
 0x27a   : > { %v12613_v32 = vpop.permute.xlu1 %1750  ;;  %v12615_v20 = vpop.permute.xlu0 %1752  ;;  %v12622_v28 = vmax.f32 %v1647_v33, 0.0  ;;  %v2126_v33 = vmul.f32 %v16679_v58, %v16766_v31  ;;  %v2172_v13 = vmul.f32 %v12455_v59, %v16768_v34 }
 0x27b   : > { %16755 = vst [vmem:[#allocation65_spill] sm:$0xff] %v12613_v32  ;;  %16756 = vst [vmem:[#allocation74_spill] sm:$0xff] %v12615_v20  ;;  %v12639_v54 = vmax.f32 %v1646_v40, 0.0  ;;  %v1973_v40 = vmul.f32 %v16748_v14, %v16647_v8 }
 0x27c   : > { %3664 = vrot.lane.b32.xlu0 %v12610_v29, %s10783_s7  ;;  %16758 = vst [vmem:[#allocation75_spill] sm:$0xff] %v12622_v28 }
 0x27d   : > { %2098 = vrot.lane.b32.xlu1 %v2082_v30, %s10783_s7  ;;  %16760 = vst [vmem:[#allocation85_spill] sm:$0xff] %v12639_v54 }
 0x27e   : > { %v12625_v50 = vpop.permute.xlu1 %1754  ;;  %v12627_v55 = vpop.permute.xlu0 %1756 }
 0x280   : > { %3660 = vrot.lane.b32.xlu0 %v12622_v28, %s10783_s7 }
 0x281   : > { %2146 = vrot.lane.b32.xlu1 %v2128_v48, %s10783_s7 }
 0x282   : > { %v12641_v10 = vpop.permute.xlu1 %1758  ;;  %v12643_v62 = vpop.permute.xlu0 %1760 }
 0x284   : > { %3656 = vrot.lane.b32.xlu0 %v12639_v54, %s10783_s7 }
 0x285   : > { %2194 = vrot.lane.b32.xlu1 %v2174_v7, %s10783_s7 }
 0x286   : > { %v12653_v53 = vpop.permute.xlu1 %1814  ;;  %v12655_v22 = vpop.permute.xlu0 %1816 }
 0x287   : > { %16761 = vst [vmem:[#allocation86_spill] sm:$0xff] %v12653_v53  ;;  %16762 = vst [vmem:[#allocation62_spill] sm:$0xff] %v12655_v22 }
 0x288   : > { %2112 = vrot.lane.b32.xlu0 %v2089_v25, %s10783_s7 }
 0x289   : > { %2262 = vrot.lane.b32.xlu1 %v2240_v12, %s10783_s7  ;;  %v16772_v12 = vld [vmem:[#allocation6_spill] sm:$0xff] }
 0x28a   : > { %v12663_v27 = vpop.permute.xlu1 %1818  ;;  %v12665_v2 = vpop.permute.xlu0 %1820 }
 0x28c   : > { %1952 = vrot.lane.b32.xlu0 %v1929_v3, %s10783_s7  ;;  %v2085_v3 = vmul.f32 %v16764_v5, %v16772_v12 }
 0x28d   : > { %1938 = vrot.lane.b32.xlu1 %v1922_v47, %s10783_s7 }
 0x28e   : > { %v12673_v38 = vpop.permute.xlu1 %1822  ;;  %v12675_v39 = vpop.permute.xlu0 %1824 }
 0x290   : > { %2108 = vrot.lane.b32.xlu0 %v2087_v23, %s10783_s7  ;;  %v2238_v23 = vmul.f32 %v12651_v42, %v16769_v51 }
 0x291   : > { %1986 = vrot.lane.b32.xlu1 %v1968_v60, %s10783_s7  ;;  %v16773_v60 = vld [vmem:[#allocation17_spill] sm:$0xff] }
 0x292   : > { %v12683_v19 = vpop.permute.xlu1 %1826  ;;  %v12685_v43 = vpop.permute.xlu0 %1828 }
 0x294   : > { %2156 = vrot.lane.b32.xlu0 %v2133_v17, %s10783_s7  ;;  %v16774_v17 = vld [vmem:[#allocation92_spill] sm:$0xff] }
 0x295   : > { %2054 = vrot.lane.b32.xlu1 %v2034_v18, %s10783_s7  ;;  %v2019_v18 = vrot.slane %v16774_v17, %v16773_v60  ;;  %v16776_v17 = vld [vmem:[#allocation14_spill] sm:$0xff] }
 0x296   : > { %v12693_v56 = vpop.permute.xlu1 %1878  ;;  %v12695_v26 = vpop.permute.xlu0 %1880 }
 0x297   : > { %16770 = vst [vmem:[#allocation63_spill] sm:$0xff] %v12693_v56  ;;  %16771 = vst [vmem:[#allocation60_spill] sm:$0xff] %v12695_v26  ;;  %v1967_v56 = vmul.f32 %v16748_v14, %v16776_v17  ;;  %v12923_v26 = vld [vmem:[%s10870_s6 + $0xc] sm:$0x11] }
 0x298   : > { %1948 = vrot.lane.b32.xlu0 %v1927_v41, %s10783_s7  ;;  %16801 = vst [vmem:[#allocation11_spill] sm:$0xff] %v12923_v26 }
 0x299   : > { %2142 = vrot.lane.b32.xlu1 %v2126_v33, %s10783_s7 }
 0x29a   : > { %v3273_v45 = vpop.permute.xlu0 %3272  ;;  %v3271_v30 = vpop.permute.xlu1 %3270 }
 0x29b   : > { %v3277_v48 = vsel %vm437_vm1, %v3271_v30, %v3273_v45  ;;  %v2131_v45 = vmul.f32 %v16748_v14, %v16669_v44 }
 0x29c   : > { %1996 = vrot.lane.b32.xlu0 %v1973_v40, %s10783_s7  ;;  %9942 = vmatprep.subr.mxu0 %v3277_v48  ;;  %v12724_v40 = vrot.slane %v2019_v18, %v16645_v52 }
 0x29d   : > { %2190 = vrot.lane.b32.xlu1 %v2172_v13, %s10783_s7  ;;  %9943 = vmatpush3.msra.mxu0 %v3277_v48  ;;  %v16775_v13 = vld [vmem:[#allocation31_spill] sm:$0xff] }
 0x29e   : > { %v3269_v7 = vpop.permute.xlu0 %3268  ;;  %v3267_v25 = vpop.permute.xlu1 %3266  ;;  %v2173_v16 = vmul.f32 %v12724_v40, %v16768_v34  ;;  %v2033_v53 = vmul.f32 %v12724_v40, %v16747_v6 }
 0x29f   : > { %v3276_v47 = vsel %vm437_vm1, %v3267_v25, %v3269_v7 }
 0x2a0   : > { %2104 = vrot.lane.b32.xlu0 %v2085_v3, %s10783_s7  ;;  %9944 = vmatprep.subr.mxu0 %v3276_v47  ;;  %v2177_v3 = vmul.f32 %v12724_v40, %v16647_v8 }
 0x2a1   : > { %2258 = vrot.lane.b32.xlu1 %v2238_v23, %s10783_s7  ;;  %9945 = vmatpush3.msra.mxu0 %v3276_v47 }
 0x2a2   : > { %v3265_v41 = vpop.permute.xlu0 %3264  ;;  %v3263_v33 = vpop.permute.xlu1 %3262 }
 0x2a3   : > { %v3275_v30 = vsel %vm437_vm1, %v3263_v33, %v3265_v41  ;;  %v1966_v41 = vmul.f32 %v16679_v58, %v16776_v17  ;;  %v16777_v33 = vld [vmem:[#allocation56_spill] sm:$0xff]  ;;  %v16778_v58 = vld [vmem:[#allocation57_spill] sm:$0xff] }
 0x2a4   : > { %2152 = vrot.lane.b32.xlu0 %v2131_v45, %s10783_s7  ;;  %9946 = vmatprep.subr.mxu0 %v3275_v30  ;;  %v1925_v45 = vmul.f32 %v16764_v5, %v16670_v0 }
 0x2a5   : > { %3949 = vrot.lane.b32.xlu1 %v16775_v13, %s10784_s10  ;;  %9947 = vmatpush3.msra.mxu0 %v3275_v30  ;;  %v2032_v13 = vmul.f32 %v12455_v59, %v16747_v6 }
 0x2a6   : > { %v3261_v7 = vpop.permute.xlu0 %3260  ;;  %v3259_v25 = vpop.permute.xlu1 %3258 }
 0x2a7   : > { %v3274_v23 = vsel %vm437_vm1, %v3259_v25, %v3261_v7  ;;  %v1971_v25 = vmul.f32 %v16748_v14, %v16741_v49 }
 0x2a8   : > { %2200 = vrot.lane.b32.xlu0 %v2177_v3, %s10783_s7  ;;  %9948 = vmatprep.subr.mxu0 %v3274_v23  ;;  %v16779_v3 = vld [vmem:[#allocation81_spill] sm:$0xff] }
 0x2a9   : > { %1982 = vrot.lane.b32.xlu1 %v1966_v41, %s10783_s7  ;;  %9949 = vmatpush3.msra.mxu0 %v3274_v23  ;;  %v16780_v41 = vld [vmem:[#allocation50_spill] sm:$0xff] }
 0x2aa   : > { %9982 = vmatprep.subr.mxu0 %v3277_v48  ;;  %v12735_v18 = vpop.permute.xlu1 %1890  ;;  %9951 = vmatmul.mubr.msk.f32.vlgmr.msra.gmra.mxu0 %vm2991_vm0, %v16777_v33  ;;  %v2037_v33 = vmul.f32 %v12724_v40, %v16752_v15  ;;  %v12905_v35 = vpop.permute.xlu0 %1892 }
 0x2ab   : > { %9983 = vmatpush3.msra.mxu0 %v3277_v48  ;;  %9953 = vmatprep.mubr.msk.f32.mxu0 %vm2991_vm0, %v16778_v58  ;;  %v2170_v48 = vmul.f32 %v12455_v59, %v16776_v17 }
 0x2ac   : > { %1944 = vrot.lane.b32.xlu0 %v1925_v45, %s10783_s7  ;;  %9984 = vmatprep.subr.mxu0 %v3276_v47  ;;  %v16781_v45 = vld [vmem:[#allocation87_spill] sm:$0xff] }
 0x2ad   : > { %2050 = vrot.lane.b32.xlu1 %v2032_v13, %s10783_s7  ;;  %9985 = vmatpush3.msra.mxu0 %v3276_v47  ;;  %v16782_v13 = vld [vmem:[#allocation88_spill] sm:$0xff] }
 0x2ae   : > { %9986 = vmatprep.subr.mxu0 %v3275_v30  ;;  %v12747_v7 = vpop.permute.xlu1 %1886  ;;  %9954 = vmatmul.mubr.msk.f32.gmra.mxu0 %vm2991_vm0, %v16779_v3  ;;  %v12782_v3 = vld [vmem:[%s16227_s3 + $0x88] sm:$0xff]  ;;  %v12916_v54 = vpop.permute.xlu0 %1888 }
 0x2af   : > { %9987 = vmatpush3.msra.mxu0 %v3275_v30  ;;  %9956 = vmatprep.mubr.msk.f32.mxu0 %vm2991_vm0, %v16780_v41  ;;  %v2236_v30 = vmul.f32 %v12651_v42, %v16747_v6 }
 0x2b0   : > { %1992 = vrot.lane.b32.xlu0 %v1971_v25, %s10783_s7  ;;  %9988 = vmatprep.subr.mxu0 %v3274_v23  ;;  %v16783_v25 = vld [vmem:[#allocation52_spill] sm:$0xff] }
 0x2b1   : > { %2186 = vrot.lane.b32.xlu1 %v2170_v48, %s10783_s7  ;;  %9989 = vmatpush3.msra.mxu0 %v3274_v23  ;;  %v2083_v23 = vmul.f32 %v16764_v5, %v16757_v37  ;;  %v16784_v48 = vld [vmem:[#allocation38_spill] sm:$0xff] }
 0x2b2   : > { %v12759_v47 = vpop.permute.xlu1 %3666  ;;  %9957 = vmatmul.mubr.msk.f32.gmra.mxu0 %vm2991_vm0, %v16781_v45  ;;  %v16785_v45 = vld [vmem:[#allocation20_spill] sm:$0xff] }
 0x2b3   : > { %9959 = vmatprep.mubr.msk.f32.mxu0 %vm2991_vm0, %v16782_v13 }
 0x2b4   : > { %2060 = vrot.lane.b32.xlu0 %v2037_v33, %s10783_s7  ;;  %v2129_v33 = vmul.f32 %v16748_v14, %v16670_v0 }
 0x2b5   : > { %2254 = vrot.lane.b32.xlu1 %v2236_v30, %s10783_s7  ;;  %v2223_v30 = vrot.slane %v12630_v24, %v16773_v60  ;;  %v2127_v60 = vmul.f32 %v16748_v14, %v16766_v31 }
 0x2b6   : > { %v12771_v58 = vpop.permute.xlu1 %1882  ;;  %9960 = vmatmul.mubr.msk.f32.gmra.mxu0 %vm2991_vm0, %v16783_v25  ;;  %v2234_v25 = vmul.f32 %v12651_v42, %v16785_v45  ;;  %v1923_v42 = vmul.f32 %v16764_v5, %v16766_v31  ;;  %v1969_v5 = vmul.f32 %v16748_v14, %v16768_v34  ;;  %v16804_v14 = vld [vmem:[#allocation69_spill] sm:$0xff] }
 0x2b7   : > { %9990 = vmatprep.mubr.msk.f32.mxu0 %vm2991_vm0, %v12602_v9  ;;  %v2030_v9 = vmul.f32 %v12455_v59, %v16785_v45 }
 0x2b8   : > { %2100 = vrot.lane.b32.xlu0 %v2083_v23, %s10783_s7  ;;  %v2175_v23 = vmul.f32 %v12724_v40, %v16741_v49 }
 0x2b9   : > { %3945 = vrot.lane.b32.xlu1 %v16784_v48, %s10784_s10  ;;  %v12807_v48 = vrot.slane %v2223_v30, %v16645_v52  ;;  %v16788_v30 = vld [vmem:[#allocation44_spill] sm:$0xff] }
 0x2ba   : > { %v12787_v41 = vpop.permute.xlu1 %3662  ;;  %9991 = vmatmul.mubr.msk.f32.vlgmr.msra.gmra.mxu0 %vm2991_vm0, %v12782_v3 }
 0x2bb   : > { %v2241_v24 = vmul.f32 %v12807_v48, %v16752_v15  ;;  %v2239_v46 = vmul.f32 %v12807_v48, %v16769_v51 }
 0x2bc   : > { %2148 = vrot.lane.b32.xlu0 %v2129_v33, %s10783_s7  ;;  %v16786_v33 = vld [vmem:[#allocation40_spill] sm:$0xff] }
 0x2bd   : > { %2046 = vrot.lane.b32.xlu1 %v2030_v9, %s10783_s7 }
 0x2be   : > { %v12799_v13 = vpop.permute.xlu1 %3658 }
 0x2c0   : > { %2196 = vrot.lane.b32.xlu0 %v2175_v23, %s10783_s7  ;;  %v12827_v23 = vld [vmem:[%s16227_s3 + $0x90] sm:$0xff] }
 0x2c1   : > { %2250 = vrot.lane.b32.xlu1 %v2234_v25, %s10783_s7  ;;  %v12832_v25 = vld [vmem:[%s16227_s3 + $0x98] sm:$0xff]  ;;  %9993 = vmatprep.mubr.msk.f32.mxu0 %vm2991_vm0, %v12827_v23 }
 0x2c2   : > { %v12810_v59 = vpop.permute.xlu1 %3654  ;;  %9994 = vmatmul.mubr.msk.f32.gmra.mxu0 %vm2991_vm0, %v12832_v25 }
 0x2c4   : > { %2264 = vrot.lane.b32.xlu0 %v2241_v24, %s10783_s7 }
 0x2c5   : > { %3941 = vrot.lane.b32.xlu1 %v16786_v33, %s10784_s10  ;;  %v16790_v33 = vld [vmem:[#allocation94_spill] sm:$0xff] }
 0x2c6   : > { %v12817_v9 = vpop.permute.xlu1 %2110 }
 0x2c7   : > { %16787 = vst [vmem:[#allocation61_spill] sm:$0xff] %v12817_v9  ;;  %v2035_v9 = vmul.f32 %v12724_v40, %v16769_v51 }
 0x2c8   : > { %1940 = vrot.lane.b32.xlu0 %v1923_v42, %s10783_s7  ;;  %v12848_v42 = vld [vmem:[%s16227_s3 + $0xa0] sm:$0xff] }
 0x2c9   : > { %3937 = vrot.lane.b32.xlu1 %v16788_v30, %s10784_s10  ;;  %v12853_v30 = vld [vmem:[%s16227_s3 + $0xa8] sm:$0xff]  ;;  %9996 = vmatprep.mubr.msk.f32.mxu0 %vm2991_vm0, %v12848_v42 }
 0x2ca   : > { %v12834_v24 = vpop.permute.xlu1 %1950  ;;  %9997 = vmatmul.mubr.msk.f32.gmra.mxu0 %vm2991_vm0, %v12853_v30 }
 0x2cb   : > { %16789 = vst [vmem:[#allocation82_spill] sm:$0xff] %v12834_v24 }
 0x2cc   : > { %1988 = vrot.lane.b32.xlu0 %v1969_v5, %s10783_s7  ;;  %v16792_v5 = vld [vmem:[#allocation37_spill] sm:$0xff] }
 0x2cd   : > { %4233 = vrot.lane.b32.xlu1 %v16790_v33, %s10784_s10 }
 0x2ce   : > { %v12855_v24 = vpop.permute.xlu1 %2106 }
 0x2cf   : > { %16791 = vst [vmem:[#allocation83_spill] sm:$0xff] %v12855_v24  ;;  %v16794_v24 = vld [vmem:[#allocation39_spill] sm:$0xff] }
 0x2d0   : > { %2056 = vrot.lane.b32.xlu0 %v2035_v9, %s10783_s7  ;;  %v12880_v9 = vld [vmem:[%s16227_s3 + $0xb0] sm:$0xff] }
 0x2d1   : > { %4229 = vrot.lane.b32.xlu1 %v16792_v5, %s10784_s10  ;;  %v12885_v5 = vld [vmem:[%s16227_s3 + $0xb8] sm:$0xff]  ;;  %9999 = vmatprep.mubr.msk.f32.mxu0 %vm2991_vm0, %v12880_v9 }
 0x2d2   : > { %v12866_v33 = vpop.permute.xlu1 %2154  ;;  %10000 = vmatmul.mubr.msk.f32.gmra.mxu0 %vm2991_vm0, %v12885_v5 }
 0x2d3   : > { %16793 = vst [vmem:[#allocation95_spill] sm:$0xff] %v12866_v33 }
 0x2d4   : > { %2144 = vrot.lane.b32.xlu0 %v2127_v60, %s10783_s7  ;;  %v12890_v60 = vld [vmem:[%s16227_s3 + $0xc0] sm:$0xff] }
 0x2d5   : > { %4225 = vrot.lane.b32.xlu1 %v16794_v24, %s10784_s10  ;;  %v16795_v24 = vld [vmem:[#allocation41_spill] sm:$0xff]  ;;  %10030 = vmatprep.mubr.msk.f32.mxu0 %vm2991_vm0, %v12890_v60 }
 0x2d6   : > { %v12873_v57 = vpop.permute.xlu1 %1946 }
 0x2d8   : > { %2192 = vrot.lane.b32.xlu0 %v2173_v16, %s10783_s7  ;;  %v16797_v16 = vld [vmem:[#allocation80_spill] sm:$0xff] }
 0x2d9   : > { %4221 = vrot.lane.b32.xlu1 %v16795_v24, %s10784_s10  ;;  %v16799_v24 = vld [vmem:[#allocation51_spill] sm:$0xff] }
 0x2da   : > { %v12901_v33 = vpop.permute.xlu1 %1994 }
 0x2db   : > { %16796 = vst [vmem:[#allocation58_spill] sm:$0xff] %v12901_v33 }
 0x2dc   : > { %2260 = vrot.lane.b32.xlu0 %v2239_v46, %s10783_s7  ;;  %v16802_v46 = vld [vmem:[#allocation90_spill] sm:$0xff] }
 0x2dd   : > { %4768 = vrot.lane.b32.xlu1 %v16797_v16, %s10783_s7 }
 0x2de   : > { %v12910_v11 = vpop.permute.xlu1 %2102 }
 0x2df   : > { %16798 = vst [vmem:[#allocation59_spill] sm:$0xff] %v12910_v11 }
 0x2e0   : > { %3951 = vrot.lane.b32.xlu0 %v16797_v16, %s10784_s10  ;;  %v2367_v16 = vrot.slane %v12923_v26, %v16645_v52 }
 0x2e1   : > { %4764 = vrot.lane.b32.xlu1 %v16799_v24, %s10783_s7 }
 0x2e2   : > { %v12918_v33 = vpop.permute.xlu1 %2150 }
 0x2e3   : > { %16800 = vst [vmem:[#allocation19_spill] sm:$0xff] %v12918_v33 }
 0x2e4   : > { %1984 = vrot.lane.b32.xlu0 %v1967_v56, %s10783_s7  ;;  %v12940_v56 = vrot.slane %v2367_v16, %v16645_v52  ;;  %v12957_v16 = vld [vmem:[%s10870_s6 + $0xd] sm:$0x11] }
 0x2e5   : > { %4760 = vrot.lane.b32.xlu1 %v16802_v46, %s10783_s7  ;;  %16807 = vst [vmem:[#allocation48_spill] sm:$0xff] %v12957_v16 }
 0x2e6   : > { %v3669_v11 = vpop.permute.xlu0 %3668  ;;  %v12930_v36 = vpop.permute.xlu1 %2198  ;;  %v2388_v32 = vmul.f32 %v12940_v56, %v16752_v15 }
 0x2e7   : > { %16803 = vst [vmem:[#allocation12_spill] sm:$0xff] %v12930_v36  ;;  %v3673_v33 = vsel %vm437_vm1, %v12759_v47, %v3669_v11  ;;  %v2171_v11 = vmul.f32 %v12724_v40, %v16776_v17 }
 0x2e8   : > { %2052 = vrot.lane.b32.xlu0 %v2033_v53, %s10783_s7  ;;  %10002 = vmatprep.subr.mxu1 %v3673_v33  ;;  %v2456_v53 = vmul.f32 %v12940_v56, %v16647_v8 }
 0x2e9   : > { %4756 = vrot.lane.b32.xlu1 %v16804_v14, %s10783_s7  ;;  %10022 = vmatprep.subr.mxu0 %v3673_v33 }
 0x2ea   : > { %10003 = vmatpush3.msra.mxu1 %v3673_v33  ;;  %10023 = vmatpush3.msra.mxu0 %v3673_v33  ;;  %v12942_v36 = vpop.permute.xlu0 %1884  ;;  %v12944_v26 = vpop.permute.xlu1 %1942  ;;  %v2237_v33 = vmul.f32 %v12807_v48, %v16747_v6 }
 0x2eb   : > { %16805 = vst [vmem:[#allocation46_spill] sm:$0xff] %v12944_v26 }
 0x2ec   : > { %2188 = vrot.lane.b32.xlu0 %v2171_v11, %s10783_s7  ;;  %v2499_v11 = vrot.slane %v12957_v16, %v16645_v52 }
 0x2ed   : > { %2478 = vrot.lane.b32.xlu1 %v2456_v53, %s10783_s7 }
 0x2ee   : > { %v3665_v47 = vpop.permute.xlu0 %3664  ;;  %v12952_v22 = vpop.permute.xlu1 %1990 }
 0x2ef   : > { %16806 = vst [vmem:[#allocation73_spill] sm:$0xff] %v12952_v22  ;;  %v3672_v26 = vsel %vm437_vm1, %v12787_v41, %v3665_v47  ;;  %v2454_v47 = vmul.f32 %v12940_v56, %v16741_v49 }
 0x2f0   : > { %2256 = vrot.lane.b32.xlu0 %v2237_v33, %s10783_s7  ;;  %10004 = vmatprep.subr.mxu1 %v3672_v26 }
 0x2f1   : > { %2410 = vrot.lane.b32.xlu1 %v2388_v32, %s10783_s7  ;;  %10024 = vmatprep.subr.mxu0 %v3672_v26  ;;  %v12977_v32 = vrot.slane %v2499_v11, %v16645_v52  ;;  %v12991_v11 = vld [vmem:[%s16227_s3 + $0xc8] sm:$0xff] }
 0x2f2   : > { %10005 = vmatpush3.msra.mxu1 %v3672_v26  ;;  %10025 = vmatpush3.msra.mxu0 %v3672_v26  ;;  %v3661_v53 = vpop.permute.xlu0 %3660  ;;  %v12967_v22 = vpop.permute.xlu1 %2058  ;;  %16810 = vst [vmem:[#allocation32_spill] sm:$0xff] %v12991_v11 }
 0x2f3   : > { %16808 = vst [vmem:[#allocation47_spill] sm:$0xff] %v12967_v22  ;;  %v3671_v41 = vsel %vm437_vm1, %v12799_v13, %v3661_v53  ;;  %v2031_v13 = vmul.f32 %v12724_v40, %v16785_v45 }
 0x2f4   : > { %3947 = vrot.lane.b32.xlu0 %v16799_v24, %s10784_s10  ;;  %10006 = vmatprep.subr.mxu1 %v3671_v41  ;;  %v2520_v24 = vmul.f32 %v12977_v32, %v16752_v15 }
 0x2f5   : > { %2474 = vrot.lane.b32.xlu1 %v2454_v47, %s10783_s7  ;;  %10026 = vmatprep.subr.mxu0 %v3671_v41  ;;  %v13003_v47 = vld [vmem:[%s16227_s3 + $0xd0] sm:$0xff] }
 0x2f6   : > { %10007 = vmatpush3.msra.mxu1 %v3671_v41  ;;  %10027 = vmatpush3.msra.mxu0 %v3671_v41  ;;  %v3657_v26 = vpop.permute.xlu0 %3656  ;;  %v12979_v33 = vpop.permute.xlu1 %2098  ;;  %v2235_v41 = vmul.f32 %v12807_v48, %v16785_v45  ;;  %16813 = vst [vmem:[#allocation70_spill] sm:$0xff] %v13003_v47  ;;  %v13021_v48 = vld [vmem:[%s16227_s3 + $0xd8] sm:$0xff]  ;;  %v2452_v45 = vmul.f32 %v12940_v56, %v16768_v34 }
 0x2f7   : > { %16809 = vst [vmem:[#allocation36_spill] sm:$0xff] %v12979_v33  ;;  %v3670_v53 = vsel %vm437_vm1, %v12810_v59, %v3657_v26  ;;  %v8899_v26 = vld [vmem:[%s10870_s6 + $0x8] ss:$0 sm:$0xff]  ;;  %16814 = vst [vmem:[#allocation72_spill] sm:$0xff] %v13021_v48 }
 0x2f8   : > { %2048 = vrot.lane.b32.xlu0 %v2031_v13, %s10783_s7  ;;  %10008 = vmatprep.subr.mxu1 %v3670_v53  ;;  %v2386_v13 = vmul.f32 %v12940_v56, %v16769_v51 }
 0x2f9   : > { %2542 = vrot.lane.b32.xlu1 %v2520_v24, %s10783_s7  ;;  %10028 = vmatprep.subr.mxu0 %v3670_v53  ;;  %v13013_v24 = vld [vmem:[%s10870_s6 + $0x9] ss:$0 sm:$0xff] }
 0x2fa   : > { %10009 = vmatpush3.msra.mxu1 %v3670_v53  ;;  %10029 = vmatpush3.msra.mxu0 %v3670_v53  ;;  %v12994_v40 = vpop.permute.xlu0 %2112  ;;  %v12996_v59 = vpop.permute.xlu1 %2146  ;;  %v16815_v53 = vld [vmem:[#allocation24_spill] sm:$0xff]  ;;  %v1678_v22 = vmul.f32 %v13013_v24, %v16767_v1  ;;  %v1679_v52 = vmul.f32 %v13013_v24, %v16763_v61 }
 0x2fb   : > { %16811 = vst [vmem:[#allocation25_spill] sm:$0xff] %v12994_v40  ;;  %16812 = vst [vmem:[#allocation71_spill] sm:$0xff] %v12996_v59  ;;  %10011 = vmatmul.mubr.msk.f32.vlgmr.msra.gmra.mxu1 %vm2991_vm0, %v12782_v3  ;;  %10031 = vmatmul.mubr.msk.f32.vlgmr.msra.gmra.mxu0 %vm2991_vm0, %v12991_v11  ;;  %v1663_v33 = vmul.f32 %v8899_v26, %v16815_v53  ;;  %v1676_v3 = vmul.f32 %v13013_v24, %v16757_v37  ;;  %v16816_v11 = vld [vmem:[#allocation4_spill] sm:$0xff] }
 0x2fc   : > { %2252 = vrot.lane.b32.xlu0 %v2235_v41, %s10783_s7  ;;  %10013 = vmatprep.mubr.msk.f32.mxu1 %vm2991_vm0, %v12827_v23  ;;  %v1664_v41 = vmul.f32 %v8899_v26, %v16722_v21  ;;  %v1677_v23 = vmul.f32 %v13013_v24, %v16772_v12  ;;  %v1665_v59 = vmul.f32 %v8899_v26, %v16816_v11 }
 0x2fd   : > { %2406 = vrot.lane.b32.xlu1 %v2386_v13, %s10783_s7  ;;  %10033 = vmatprep.mubr.msk.f32.mxu0 %vm2991_vm0, %v13003_v47  ;;  %v13042_v13 = vld [vmem:[%s16227_s3 + $0xe0] sm:$0xff]  ;;  %v16820_v47 = vld [vmem:[#allocation5_spill] sm:$0xff] }
 0x2fe   : > { %v13035_v40 = vpop.permute.xlu0 %1952  ;;  %v13037_v16 = vpop.permute.xlu1 %2194  ;;  %16819 = vst [vmem:[#allocation42_spill] sm:$0xff] %v13042_v13  ;;  %v1666_v15 = vmul.f32 %v8899_v26, %v16820_v47  ;;  %v1777_v26 = vmul.f32 %v13013_v24, %v16820_v47 }
 0x2ff   : > { %16817 = vst [vmem:[#allocation98_spill] sm:$0xff] %v13035_v40  ;;  %16818 = vst [vmem:[#allocation43_spill] sm:$0xff] %v13037_v16  ;;  %10014 = vmatmul.mubr.msk.f32.gmra.mxu1 %vm2991_vm0, %v12832_v25  ;;  %10034 = vmatmul.mubr.msk.f32.gmra.mxu0 %vm2991_vm0, %v13021_v48  ;;  %v13054_v16 = vld [vmem:[%s10870_s6 + $0xa] ss:$0 sm:$0xff]  ;;  %v13071_v48 = vadd.f32 %v1676_v3, %v1663_v33 }
 0x300   : > { %v1691_v40 = vmul.f32 %v13054_v16, %v16669_v44  ;;  %v1785_v20 = vmul.f32 %v13054_v16, %v16763_v61  ;;  %3943 = vrot.lane.b32.xlu0 %v16802_v46, %s10784_s10  ;;  %10016 = vmatprep.mubr.msk.f32.mxu1 %vm2991_vm0, %v12848_v42  ;;  %v13069_v25 = vld [vmem:[%s16227_s3 + $0xe8] sm:$0xff]  ;;  %v13075_v28 = vmul.f32 %v13054_v16, %v16670_v0 }
 0x301   : > { %16821 = vst [vmem:[#allocation45_spill] sm:$0xff] %v13069_v25  ;;  %16822 = vst [vmem:[#allocation91_spill] sm:$0xff] %v13071_v48  ;;  %v1692_v47 = vmul.f32 %v13054_v16, %v16765_v63  ;;  %2470 = vrot.lane.b32.xlu1 %v2452_v45, %s10783_s7  ;;  %10036 = vmatprep.mubr.msk.f32.mxu0 %vm2991_vm0, %v13042_v13  ;;  %v1681_v42 = vadd.f32 %v1677_v23, %v1664_v41  ;;  %v13083_v61 = vld [vmem:[%s10870_s6 + $0xb] ss:$0 sm:$0xff]  ;;  %v13096_v45 = vld [vmem:[%s16227_s3 + $0xf0] sm:$0xff] }
 0x302   : > { %v1682_v46 = vadd.f32 %v1678_v22, %v1665_v59  ;;  %v1704_v33 = vmul.f32 %v13083_v61, %v16741_v49  ;;  %v1793_v3 = vmul.f32 %v13083_v61, %v16765_v63  ;;  %v13089_v48 = vpop.permute.xlu0 %2108  ;;  %v13091_v17 = vpop.permute.xlu1 %2262  ;;  %16824 = vst [vmem:[#allocation66_spill] sm:$0xff] %v13096_v45  ;;  %v1683_v13 = vadd.f32 %v1679_v52, %v1666_v15  ;;  %v13115_v52 = vld [vmem:[%s16227_s3 + $0xf8] sm:$0xff] }
 0x303   : > { %16823 = vst [vmem:[#allocation97_spill] sm:$0xff] %v13089_v48  ;;  %v1705_v22 = vmul.f32 %v13083_v61, %v16647_v8  ;;  %v2518_v59 = vmul.f32 %v12977_v32, %v16769_v51  ;;  %10017 = vmatmul.mubr.msk.f32.gmra.mxu1 %vm2991_vm0, %v12853_v30  ;;  %10037 = vmatmul.mubr.msk.f32.gmra.mxu0 %vm2991_vm0, %v13069_v25  ;;  %16825 = vst [vmem:[#allocation68_spill] sm:$0xff] %v13115_v52 }
 0x304   : > { %v1695_v41 = vadd.f32 %v1691_v40, %v1682_v46  ;;  %v1784_v23 = vmul.f32 %v13054_v16, %v16767_v1  ;;  %v1789_v48 = vadd.f32 %v1785_v20, %v1777_v26  ;;  %3939 = vrot.lane.b32.xlu0 %v16804_v14, %s10784_s10  ;;  %10019 = vmatprep.mubr.msk.f32.mxu1 %vm2991_vm0, %v12880_v9 }
 0x305   : > { %v1696_v15 = vadd.f32 %v1692_v47, %v1683_v13  ;;  %v1775_v30 = vmul.f32 %v13013_v24, %v16722_v21  ;;  %v1833_v46 = vsel %vm437_vm1, %v12683_v19, %v12685_v43  ;;  %2538 = vrot.lane.b32.xlu1 %v2518_v59, %s10783_s7  ;;  %10039 = vmatprep.mubr.msk.f32.mxu0 %vm2991_vm0, %v13096_v45  ;;  %v13138_v19 = vld [vmem:[%s16227_s3 + $0x100] sm:$0xff] }
 0x306   : > { %v1776_v20 = vmul.f32 %v13013_v24, %v16816_v11  ;;  %v1792_v9 = vmul.f32 %v13083_v61, %v16669_v44  ;;  %v1797_v40 = vadd.f32 %v1793_v3, %v1789_v48  ;;  %v13129_v47 = vpop.permute.xlu0 %2156  ;;  %v13131_v13 = vpop.permute.xlu1 %1938  ;;  %v1916_v26 = vmul.f32 %v13083_v61, %v16767_v1  ;;  %16827 = vst [vmem:[#allocation96_spill] sm:$0xff] %v13138_v19 }
 0x307   : > { %16826 = vst [vmem:[#allocation53_spill] sm:$0xff] %v13131_v13  ;;  %v1774_v43 = vmul.f32 %v13013_v24, %v16815_v53  ;;  %v1783_v59 = vmul.f32 %v13054_v16, %v16772_v12  ;;  %v1897_v48 = vsel %vm437_vm1, %v12735_v18, %v12905_v35  ;;  %10020 = vmatmul.mubr.msk.f32.gmra.mxu1 %vm2991_vm0, %v12885_v5 }
 0x308   : > { %10040 = vmatmul.mubr.msk.f32.gmra.mxu0 %vm2991_vm0, %v13115_v52  ;;  %v1788_v3 = vadd.f32 %v1784_v23, %v1776_v20  ;;  %v1841_v14 = vadd.f32 %v1833_v46, %v1797_v40  ;;  %4235 = vrot.lane.b32.xlu0 %v12571_v4, %s10784_s10  ;;  %v1908_v24 = vmul.f32 %v13054_v16, %v16816_v11 }
 0x309   : > { %10050 = vmatprep.mubr.msk.f32.mxu1 %vm2991_vm0, %v12890_v60  ;;  %v1709_v45 = vadd.f32 %v1705_v22, %v1696_v15  ;;  %v1765_v35 = vsel %vm437_vm1, %v12641_v10, %v12643_v62  ;;  %v1832_v18 = vsel %vm437_vm1, %v12673_v38, %v12675_v39  ;;  %5163 = vrot.lane.b32.xlu1 %v12571_v4, %s10783_s7  ;;  %v16864_v4 = vld [vmem:[#allocation82_spill] sm:$0xff] }
 0x30a   : > { %10070 = vmatprep.mubr.msk.f32.mxu0 %vm2991_vm0, %v13138_v19  ;;  %v1787_v5 = vadd.f32 %v1783_v59, %v1775_v30  ;;  %v1796_v23 = vadd.f32 %v1792_v9, %v1788_v3  ;;  %v1905_v46 = vadd.f32 %v1897_v48, %v1841_v14  ;;  %v1920_v20 = vadd.f32 %v1916_v26, %v1908_v24  ;;  %v1949_v60 = vpop.permute.xlu0 %1948  ;;  %v13167_v22 = vpop.permute.xlu1 %1986 }
 0x30b   : > { %v1782_v10 = vmul.f32 %v13054_v16, %v16757_v37  ;;  %v1896_v62 = vsel %vm437_vm1, %v12747_v7, %v12916_v54  ;;  %v1956_v38 = vsel %vm437_vm1, %v12873_v57, %v1949_v60  ;;  %v2384_v39 = vmul.f32 %v12940_v56, %v16747_v6  ;;  %v16834_v60 = vld [vmem:[#allocation86_spill] sm:$0xff] }
 0x30c   : > { %v1773_v15 = vadd.f32 %v1765_v35, %v1709_v45  ;;  %v1791_v14 = vmul.f32 %v13083_v61, %v16670_v0  ;;  %v1840_v30 = vadd.f32 %v1832_v18, %v1796_v23  ;;  %v13180_v9 = vadd.f32 %v1956_v38, %v1920_v20  ;;  %4231 = vrot.lane.b32.xlu0 %v12610_v29, %s10784_s10  ;;  %v16829_v35 = vld [vmem:[#allocation75_spill] sm:$0xff]  ;;  %v16832_v20 = vld [vmem:[#allocation65_spill] sm:$0xff] }
 0x30d   : > { %v1694_v40 = vadd.f32 %v13075_v28, %v1681_v42  ;;  %v1708_v26 = vadd.f32 %v1704_v33, %v1695_v41  ;;  %v1764_v57 = vsel %vm437_vm1, %v12625_v50, %v12627_v55  ;;  %v1831_v54 = vsel %vm437_vm1, %v12663_v27, %v12665_v2  ;;  %2402 = vrot.lane.b32.xlu1 %v2384_v39, %s10783_s7  ;;  %v16828_v27 = vld [vmem:[#allocation14_spill] sm:$0xff]  ;;  %v16830_v18 = vld [vmem:[#allocation91_spill] sm:$0xff]  ;;  %v16835_v38 = vld [vmem:[#allocation93_spill] sm:$0xff] }
 0x30e   : > { %v1786_v7 = vadd.f32 %v1782_v10, %v1774_v43  ;;  %v1795_v45 = vadd.f32 %v1791_v14, %v1787_v5  ;;  %v2281_v59 = vmax.f32 %v1773_v15, %v1905_v46  ;;  %v1904_v48 = vadd.f32 %v1896_v62, %v1840_v30  ;;  %v13192_v3 = vpop.permute.xlu0 %1996  ;;  %v13194_v24 = vpop.permute.xlu1 %2054  ;;  %v16831_v46 = vld [vmem:[#allocation74_spill] sm:$0xff] }
 0x30f   : > { %v1689_v28 = vmul.f32 %v13054_v16, %v16766_v31  ;;  %v1703_v50 = vmul.f32 %v13083_v61, %v16768_v34  ;;  %v1895_v55 = vsel %vm437_vm1, %v12771_v58, %v12942_v36  ;;  %v2450_v2 = vmul.f32 %v12940_v56, %v16828_v27  ;;  %v16833_v58 = vld [vmem:[#allocation62_spill] sm:$0xff] }
 0x310   : > { %v1702_v42 = vmul.f32 %v13083_v61, %v16828_v27  ;;  %v1772_v33 = vadd.f32 %v1764_v57, %v1708_v26  ;;  %v1790_v41 = vmul.f32 %v13083_v61, %v16766_v31  ;;  %v1839_v43 = vadd.f32 %v1831_v54, %v1795_v45  ;;  %4227 = vrot.lane.b32.xlu0 %v16829_v35, %s10784_s10  ;;  %v16838_v57 = vld [vmem:[#allocation63_spill] sm:$0xff] }
 0x311   : > { %v1693_v5 = vadd.f32 %v1689_v28, %v16830_v18  ;;  %v1707_v23 = vadd.f32 %v1703_v50, %v1694_v40  ;;  %v1763_v36 = vsel %vm437_vm1, %v16832_v20, %v16831_v46  ;;  %v1830_v10 = vsel %vm437_vm1, %v16834_v60, %v16833_v58  ;;  %2466 = vrot.lane.b32.xlu1 %v2450_v2, %s10783_s7  ;;  %v16837_v40 = vld [vmem:[#allocation60_spill] sm:$0xff]  ;;  %v16839_v2 = vld [vmem:[#allocation85_spill] sm:$0xff] }
 0x312   : > { %v1794_v62 = vadd.f32 %v1790_v41, %v1786_v7  ;;  %v2285_v39 = vadd.f32 %v2281_v59, %v16835_v38  ;;  %v2280_v15 = vmax.f32 %v1772_v33, %v1904_v48  ;;  %v1903_v14 = vadd.f32 %v1895_v55, %v1839_v43  ;;  %v13220_v30 = vpop.permute.xlu0 %2104  ;;  %v13222_v26 = vpop.permute.xlu1 %2142  ;;  %v16840_v59 = vld [vmem:[#allocation77_spill] sm:$0xff]  ;;  %v16841_v48 = vld [vmem:[#allocation76_spill] sm:$0xff]  ;;  %v16843_v43 = vld [vmem:[#allocation35_spill] sm:$0xff] }
 0x313   : > { %16836 = vst [vmem:[#allocation84_spill] sm:$0xff] %v13222_v26  ;;  %v1894_v54 = vsel %vm437_vm1, %v16838_v57, %v16837_v40  ;;  %v2516_v45 = vmul.f32 %v12977_v32, %v16747_v6  ;;  %v1771_v28 = vadd.f32 %v1763_v36, %v1707_v23  ;;  %v1706_v7 = vadd.f32 %v1702_v42, %v1693_v5  ;;  %v16845_v58 = vld [vmem:[#allocation33_spill] sm:$0xff]  ;;  %v16867_v26 = vld [vmem:[#allocation12_spill] sm:$0xff] }
 0x314   : > { %v1838_v50 = vadd.f32 %v1830_v10, %v1794_v62  ;;  %4223 = vrot.lane.b32.xlu0 %v16839_v2, %s10784_s10  ;;  %v1762_v55 = vsel %vm437_vm1, %v16841_v48, %v16840_v59  ;;  %v13235_v41 = vmax.f32 %v2285_v39, 0.0  ;;  %v2284_v18 = vadd.f32 %v2280_v15, %v16843_v43  ;;  %v16846_v39 = vld [vmem:[#allocation20_spill] sm:$0xff]  ;;  %v16850_v59 = vld [vmem:[#allocation26_spill] sm:$0xff] }
 0x315   : > { %2534 = vrot.lane.b32.xlu1 %v2516_v45, %s10783_s7  ;;  %v2279_v46 = vmax.f32 %v1771_v28, %v1903_v14  ;;  %v1770_v36 = vadd.f32 %v1762_v55, %v1706_v7  ;;  %v2382_v15 = vmul.f32 %v12940_v56, %v16846_v39  ;;  %v16847_v14 = vld [vmem:[#allocation34_spill] sm:$0xff]  ;;  %v2514_v7 = vmul.f32 %v12977_v32, %v16846_v39  ;;  %v16851_v55 = vld [vmem:[#allocation17_spill] sm:$0xff] }
 0x316   : > { %v1902_v33 = vadd.f32 %v1894_v54, %v1838_v50  ;;  %16842 = vst [vmem:[#allocation18_spill] sm:$0xff] %v13235_v41  ;;  %v13238_v20 = vpop.permute.xlu0 %2152  ;;  %v13240_v23 = vpop.permute.xlu1 %2190  ;;  %v13246_v5 = vmax.f32 %v2284_v18, 0.0  ;;  %v16849_v28 = vld [vmem:[#allocation46_spill] sm:$0xff] }
 0x317   : > { %v2283_v60 = vadd.f32 %v2279_v46, %v16845_v58 }
 0x318   : > { %4770 = vrot.lane.b32.xlu0 %v13235_v41, %s10783_s7  ;;  %v2278_v42 = vmax.f32 %v1770_v36, %v1902_v33  ;;  %16844 = vst [vmem:[#allocation54_spill] sm:$0xff] %v13246_v5  ;;  %v16852_v33 = vld [vmem:[#allocation11_spill] sm:$0xff] }
 0x319   : > { %5159 = vrot.lane.b32.xlu1 %v12610_v29, %s10783_s7  ;;  %v13257_v57 = vmax.f32 %v2283_v60, 0.0  ;;  %v2371_v18 = vrot.slane %v16852_v33, %v16851_v55  ;;  %v16855_v60 = vld [vmem:[#allocation16_spill] sm:$0xff] }
 0x31a   : > { %v2201_v10 = vpop.permute.xlu0 %2200  ;;  %v13249_v62 = vpop.permute.xlu1 %2258  ;;  %v2282_v40 = vadd.f32 %v2278_v42, %v16847_v14  ;;  %v16865_v14 = vld [vmem:[#allocation95_spill] sm:$0xff] }
 0x31b   : > { %16848 = vst [vmem:[#allocation89_spill] sm:$0xff] %v13257_v57  ;;  %v2161_v31 = vsel %vm437_vm1, %v16865_v14, %v13129_v47  ;;  %v2738_v47 = vmul.f32 %v12940_v56, %v16767_v1 }
 0x31c   : > { %4766 = vrot.lane.b32.xlu0 %v13246_v5, %s10783_s7  ;;  %v13273_v46 = vmax.f32 %v2282_v40, 0.0 }
 0x31d   : > { %2398 = vrot.lane.b32.xlu1 %v2382_v15, %s10783_s7  ;;  %v13282_v15 = vrot.slane %v2371_v18, %v16855_v60  ;;  %v16858_v18 = vld [vmem:[#allocation10_spill] sm:$0xff] }
 0x31e   : > { %v1945_v54 = vpop.permute.xlu0 %1944  ;;  %v13259_v45 = vpop.permute.xlu1 %3949  ;;  %16853 = vst [vmem:[#allocation79_spill] sm:$0xff] %v13273_v46  ;;  %v1917_v19 = vmul.f32 %v13083_v61, %v16858_v18 }
 0x31f   : > { %v1955_v50 = vsel %vm437_vm1, %v16849_v28, %v1945_v54  ;;  %v2457_v40 = vmul.f32 %v13282_v15, %v16647_v8 }
 0x320   : > { %v13266_v48 = vadd.f32 %v1955_v50, %v16850_v59  ;;  %4762 = vrot.lane.b32.xlu0 %v13257_v57, %s10783_s7  ;;  %v16857_v59 = vld [vmem:[#allocation23_spill] sm:$0xff]  ;;  %v16859_v57 = vld [vmem:[#allocation48_spill] sm:$0xff] }
 0x321   : > { %2530 = vrot.lane.b32.xlu1 %v2514_v7, %s10783_s7  ;;  %v2389_v33 = vmul.f32 %v13282_v15, %v16857_v59  ;;  %v2503_v5 = vrot.slane %v16859_v57, %v16851_v55  ;;  %v2580_v57 = vmul.f32 %v12940_v56, %v16765_v63  ;;  %v16863_v55 = vld [vmem:[#allocation98_spill] sm:$0xff] }
 0x322   : > { %v13275_v36 = vpop.permute.xlu0 %1992  ;;  %v13277_v42 = vpop.permute.xlu1 %1982 }
 0x323   : > { %16854 = vst [vmem:[#allocation78_spill] sm:$0xff] %v13277_v42 }
 0x324   : > { %4758 = vrot.lane.b32.xlu0 %v13273_v46, %s10783_s7  ;;  %v2740_v46 = vmul.f32 %v12940_v56, %v16858_v18  ;;  %v1957_v18 = vsel %vm437_vm1, %v16864_v4, %v16863_v55  ;;  %v2205_v4 = vsel %vm437_vm1, %v16867_v26, %v2201_v10 }
 0x325   : > { %5155 = vrot.lane.b32.xlu1 %v16829_v35, %s10783_s7  ;;  %v16861_v35 = vld [vmem:[#allocation25_spill] sm:$0xff] }
 0x326   : > { %v2061_v54 = vpop.permute.xlu0 %2060  ;;  %v13286_v28 = vpop.permute.xlu1 %2050 }
 0x328   : > { %2480 = vrot.lane.b32.xlu0 %v2457_v40, %s10783_s7  ;;  %v16860_v40 = vld [vmem:[#allocation5_spill] sm:$0xff] }
 0x329   : > { %5151 = vrot.lane.b32.xlu1 %v16839_v2, %s10783_s7  ;;  %v1909_v41 = vmul.f32 %v13054_v16, %v16860_v40  ;;  %v2455_v2 = vmul.f32 %v13282_v15, %v16741_v49  ;;  %v2077_v16 = vmul.f32 %v13083_v61, %v16860_v40 }
 0x32a   : > { %v13293_v50 = vpop.permute.xlu0 %2100  ;;  %v13295_v7 = vpop.permute.xlu1 %2186 }
 0x32b   : > { %16856 = vst [vmem:[#allocation21_spill] sm:$0xff] %v13295_v7 }
 0x32c   : > { %2412 = vrot.lane.b32.xlu0 %v2389_v33, %s10783_s7  ;;  %v16862_v33 = vld [vmem:[#allocation61_spill] sm:$0xff] }
 0x32d   : > { %2762 = vrot.lane.b32.xlu1 %v2740_v46, %s10783_s7  ;;  %v2117_v29 = vsel %vm437_vm1, %v16862_v33, %v16861_v35  ;;  %v13324_v46 = vrot.slane %v2503_v5, %v16855_v60  ;;  %v1921_v33 = vadd.f32 %v1917_v19, %v1909_v41  ;;  %v16866_v5 = vld [vmem:[#allocation58_spill] sm:$0xff] }
 0x32e   : > { %v13309_v52 = vpop.permute.xlu0 %2148  ;;  %v13311_v25 = vpop.permute.xlu1 %2254  ;;  %v2125_v35 = vadd.f32 %v2117_v29, %v2077_v16  ;;  %v2001_v40 = vsel %vm437_vm1, %v16866_v5, %v13192_v3  ;;  %v16868_v29 = vld [vmem:[#allocation47_spill] sm:$0xff]  ;;  %v2387_v3 = vmul.f32 %v13282_v15, %v16769_v51 }
 0x32f   : > { %v1965_v14 = vadd.f32 %v1957_v18, %v1921_v33  ;;  %v2065_v19 = vsel %vm437_vm1, %v16868_v29, %v2061_v54  ;;  %v2453_v33 = vmul.f32 %v13282_v15, %v16768_v34 }
 0x330   : > { %2476 = vrot.lane.b32.xlu0 %v2455_v2, %s10783_s7  ;;  %v2521_v2 = vmul.f32 %v13324_v46, %v16857_v59  ;;  %v2169_v55 = vadd.f32 %v2161_v31, %v2125_v35  ;;  %v2784_v31 = vmul.f32 %v12977_v32, %v16765_v63 }
 0x331   : > { %2602 = vrot.lane.b32.xlu1 %v2580_v57, %s10783_s7  ;;  %v2009_v41 = vadd.f32 %v2001_v40, %v1965_v14  ;;  %v2624_v14 = vmul.f32 %v12977_v32, %v16647_v8 }
 0x332   : > { %v2197_v7 = vpop.permute.xlu0 %2196  ;;  %v13333_v42 = vpop.permute.xlu1 %3945  ;;  %v2213_v57 = vadd.f32 %v2205_v4, %v2169_v55 }
 0x333   : > { %v2073_v10 = vadd.f32 %v2065_v19, %v2009_v41  ;;  %v13384_v41 = vld [vmem:[%s10870_s6 + $0xe] sm:$0x11] }
 0x334   : > { %2544 = vrot.lane.b32.xlu0 %v2521_v2, %s10783_s7  ;;  %16870 = vst [vmem:[#allocation8_spill] sm:$0xff] %v13384_v41 }
 0x335   : > { %2758 = vrot.lane.b32.xlu1 %v2738_v47, %s10783_s7  ;;  %v2519_v47 = vmul.f32 %v13324_v46, %v16769_v51 }
 0x336   : > { %v2265_v16 = vpop.permute.xlu0 %2264  ;;  %v13348_v13 = vpop.permute.xlu1 %2046 }
 0x337   : > { %v2269_v26 = vsel %vm437_vm1, %v13091_v17, %v2265_v16  ;;  %v2578_v17 = vmul.f32 %v12940_v56, %v16669_v44  ;;  %v2667_v16 = vrot.slane %v13384_v41, %v16855_v60 }
 0x338   : > { %v2277_v18 = vadd.f32 %v2269_v26, %v2213_v57  ;;  %2408 = vrot.lane.b32.xlu0 %v2387_v3, %s10783_s7  ;;  %v2736_v57 = vmul.f32 %v12940_v56, %v16772_v12 }
 0x339   : > { %2806 = vrot.lane.b32.xlu1 %v2784_v31, %s10783_s7  ;;  %v2385_v31 = vmul.f32 %v13282_v15, %v16747_v6 }
 0x33a   : > { %v2297_v54 = vmax.f32 %v2073_v10, %v2277_v18  ;;  %v13358_v40 = vpop.permute.xlu0 %1940  ;;  %v13360_v35 = vpop.permute.xlu1 %2250  ;;  %v16871_v10 = vld [vmem:[#allocation97_spill] sm:$0xff]  ;;  %v16872_v18 = vld [vmem:[#allocation83_spill] sm:$0xff] }
 0x33c   : > { %2472 = vrot.lane.b32.xlu0 %v2453_v33, %s10783_s7  ;;  %v2301_v2 = vadd.f32 %v2297_v54, %v16835_v38  ;;  %v2116_v54 = vsel %vm437_vm1, %v16872_v18, %v16871_v10  ;;  %v2782_v33 = vmul.f32 %v12977_v32, %v16669_v44  ;;  %v2451_v18 = vmul.f32 %v13282_v15, %v16828_v27 }
 0x33d   : > { %2598 = vrot.lane.b32.xlu1 %v2578_v17, %s10783_s7  ;;  %v2076_v17 = vmul.f32 %v13083_v61, %v16816_v11  ;;  %v16874_v11 = vld [vmem:[#allocation73_spill] sm:$0xff] }
 0x33e   : > { %v13369_v5 = vpop.permute.xlu0 %1988  ;;  %v13371_v4 = vpop.permute.xlu1 %3941  ;;  %v13379_v55 = vmax.f32 %v2301_v2, 0.0  ;;  %v16873_v2 = vld [vmem:[#allocation19_spill] sm:$0xff] }
 0x340   : > { %2540 = vrot.lane.b32.xlu0 %v2519_v47, %s10783_s7  ;;  %16869 = vst [vmem:[#allocation55_spill] sm:$0xff] %v13379_v55  ;;  %v2160_v47 = vsel %vm437_vm1, %v16873_v2, %v13238_v20 }
 0x341   : > { %2646 = vrot.lane.b32.xlu1 %v2624_v14, %s10783_s7  ;;  %v13412_v14 = vrot.slane %v2667_v16, %v16855_v60 }
 0x342   : > { %v2057_v29 = vpop.permute.xlu0 %2056  ;;  %v13381_v19 = vpop.permute.xlu1 %3937 }
 0x343   : > { %v2828_v20 = vmul.f32 %v13412_v14, %v16647_v8  ;;  %v2064_v16 = vsel %vm437_vm1, %v13194_v24, %v2057_v29 }
 0x344   : > { %5165 = vrot.lane.b32.xlu0 %v13379_v55, %s10783_s7  ;;  %v16875_v55 = vld [vmem:[#allocation43_spill] sm:$0xff] }
 0x345   : > { %2754 = vrot.lane.b32.xlu1 %v2736_v57, %s10783_s7  ;;  %v2124_v57 = vadd.f32 %v2116_v54, %v2076_v17  ;;  %v2204_v41 = vsel %vm437_vm1, %v16875_v55, %v2197_v7  ;;  %v2576_v7 = vmul.f32 %v12940_v56, %v16670_v0 }
 0x346   : > { %v13393_v3 = vpop.permute.xlu0 %2144  ;;  %v13395_v26 = vpop.permute.xlu1 %4233 }
 0x348   : > { %2404 = vrot.lane.b32.xlu0 %v2385_v31, %s10783_s7  ;;  %v2000_v31 = vsel %vm437_vm1, %v16874_v11, %v13275_v36  ;;  %v2517_v11 = vmul.f32 %v13324_v46, %v16747_v6 }
 0x349   : > { %2802 = vrot.lane.b32.xlu1 %v2782_v33, %s10783_s7  ;;  %v2168_v33 = vadd.f32 %v2160_v47, %v2124_v57  ;;  %v2008_v54 = vadd.f32 %v2000_v31, %v13180_v9 }
 0x34a   : > { %v2193_v38 = vpop.permute.xlu0 %2192  ;;  %v13414_v10 = vpop.permute.xlu1 %4229 }
 0x34b   : > { %v2212_v17 = vadd.f32 %v2204_v41, %v2168_v33  ;;  %v2072_v55 = vadd.f32 %v2064_v16, %v2008_v54  ;;  %v2688_v33 = vmul.f32 %v13412_v14, %v16857_v59  ;;  %v2383_v54 = vmul.f32 %v13282_v15, %v16846_v39 }
 0x34c   : > { %2468 = vrot.lane.b32.xlu0 %v2451_v18, %s10783_s7 }
 0x34d   : > { %2850 = vrot.lane.b32.xlu1 %v2828_v20, %s10783_s7 }
 0x34e   : > { %v2261_v2 = vpop.permute.xlu0 %2260  ;;  %v13430_v12 = vpop.permute.xlu1 %4225 }
 0x34f   : > { %v2268_v36 = vsel %vm437_vm1, %v13249_v62, %v2261_v2  ;;  %v2622_v62 = vmul.f32 %v12977_v32, %v16741_v49 }
 0x350   : > { %v2276_v47 = vadd.f32 %v2268_v36, %v2212_v17  ;;  %2536 = vrot.lane.b32.xlu0 %v2517_v11, %s10783_s7  ;;  %v16876_v17 = vld [vmem:[#allocation59_spill] sm:$0xff]  ;;  %v2734_v11 = vmul.f32 %v12940_v56, %v16757_v37  ;;  %v2075_v36 = vmul.f32 %v13083_v61, %v16722_v21 }
 0x351   : > { %2594 = vrot.lane.b32.xlu1 %v2576_v7, %s10783_s7  ;;  %v2115_v2 = vsel %vm437_vm1, %v16876_v17, %v13220_v30  ;;  %v16877_v7 = vld [vmem:[#allocation71_spill] sm:$0xff]  ;;  %v2515_v30 = vmul.f32 %v13324_v46, %v16846_v39 }
 0x352   : > { %v2296_v9 = vmax.f32 %v2072_v55, %v2276_v47  ;;  %v3952_v24 = vpop.permute.xlu0 %3951  ;;  %v13440_v29 = vpop.permute.xlu1 %4221  ;;  %v2159_v55 = vsel %vm437_vm1, %v16877_v7, %v13309_v52  ;;  %v2123_v47 = vadd.f32 %v2115_v2, %v2075_v36  ;;  %v2780_v52 = vmul.f32 %v12977_v32, %v16670_v0 }
 0x353   : > { %v3957_v41 = vsel %vm3953_vm2, %v13259_v45, %v3952_v24 }
 0x354   : > { %v2300_v57 = vadd.f32 %v2296_v9, %v16843_v43  ;;  %10042 = vmatprep.subr.mxu1 %v3957_v41  ;;  %10062 = vmatprep.subr.mxu0 %v3957_v41 }
 0x355   : > { %2642 = vrot.lane.b32.xlu1 %v2622_v62, %s10783_s7  ;;  %10043 = vmatpush3.msra.mxu1 %v3957_v41  ;;  %v1999_v62 = vsel %vm437_vm1, %v13167_v22, %v13369_v5 }
 0x356   : > { %v13448_v18 = vmax.f32 %v2300_v57, 0.0  ;;  %10063 = vmatpush3.msra.mxu0 %v3957_v41  ;;  %v1985_v31 = vpop.permute.xlu0 %1984  ;;  %v13450_v20 = vpop.permute.xlu1 %4768  ;;  %v13478_v41 = vld [vmem:[%s10870_s6 + $0xf] sm:$0x11]  ;;  %v2203_v57 = vsel %vm437_vm1, %v13240_v23, %v2193_v38  ;;  %v2007_v2 = vadd.f32 %v1999_v62, %v13266_v48  ;;  %v2826_v23 = vmul.f32 %v13412_v14, %v16741_v49 }
 0x357   : > { %v2871_v17 = vrot.slane %v13478_v41, %v16855_v60 }
 0x358   : > { %5161 = vrot.lane.b32.xlu0 %v13448_v18, %s10783_s7 }
 0x359   : > { %2710 = vrot.lane.b32.xlu1 %v2688_v33, %s10783_s7  ;;  %v2167_v33 = vadd.f32 %v2159_v55, %v2123_v47  ;;  %v16878_v47 = vld [vmem:[#allocation36_spill] sm:$0xff] }
 0x35a   : > { %v2053_v45 = vpop.permute.xlu0 %2052  ;;  %v13457_v16 = vpop.permute.xlu1 %4764 }
 0x35b   : > { %v2211_v22 = vadd.f32 %v2203_v57, %v2167_v33  ;;  %v2074_v57 = vmul.f32 %v13083_v61, %v16815_v53  ;;  %v16879_v33 = vld [vmem:[#allocation53_spill] sm:$0xff] }
 0x35c   : > { %2400 = vrot.lane.b32.xlu0 %v2383_v54, %s10783_s7  ;;  %v2063_v54 = vsel %vm437_vm1, %v13286_v28, %v2053_v45  ;;  %v13502_v28 = vrot.slane %v2871_v17, %v16855_v60  ;;  %v16880_v17 = vld [vmem:[#allocation84_spill] sm:$0xff] }
 0x35d   : > { %2750 = vrot.lane.b32.xlu1 %v2734_v11, %s10783_s7  ;;  %v2071_v36 = vadd.f32 %v2063_v54, %v2007_v2  ;;  %v1954_v54 = vsel %vm437_vm1, %v16879_v33, %v13358_v40 }
 0x35e   : > { %v2189_v9 = vpop.permute.xlu0 %2188  ;;  %v13473_v24 = vpop.permute.xlu1 %4760  ;;  %v2892_v62 = vmul.f32 %v13502_v28, %v16857_v59 }
 0x360   : > { %2532 = vrot.lane.b32.xlu0 %v2515_v30, %s10783_s7  ;;  %v2114_v30 = vsel %vm437_vm1, %v16878_v47, %v13293_v50  ;;  %v2158_v50 = vsel %vm437_vm1, %v16880_v17, %v13393_v3  ;;  %v16884_v3 = vld [vmem:[#allocation27_spill] sm:$0xff] }
 0x361   : > { %2798 = vrot.lane.b32.xlu1 %v2780_v52, %s10783_s7 }
 0x362   : > { %v2257_v5 = vpop.permute.xlu0 %2256  ;;  %v13494_v11 = vpop.permute.xlu1 %4756 }
 0x363   : > { %v2267_v38 = vsel %vm437_vm1, %v13311_v25, %v2257_v5  ;;  %v16881_v5 = vld [vmem:[#allocation78_spill] sm:$0xff] }
 0x364   : > { %v2275_v7 = vadd.f32 %v2267_v38, %v2211_v22  ;;  %v1998_v38 = vsel %vm437_vm1, %v16881_v5, %v1985_v31 }
 0x365   : > { %2846 = vrot.lane.b32.xlu1 %v2826_v23, %s10783_s7  ;;  %v16882_v23 = vld [vmem:[#allocation21_spill] sm:$0xff] }
 0x366   : > { %v2295_v45 = vmax.f32 %v2071_v36, %v2275_v7  ;;  %v3948_v55 = vpop.permute.xlu0 %3947  ;;  %v13504_v48 = vpop.permute.xlu1 %2478  ;;  %v2202_v40 = vsel %vm437_vm1, %v16882_v23, %v2189_v9  ;;  %v16883_v36 = vld [vmem:[#allocation9_spill] sm:$0xff] }
 0x367   : > { %v3956_v25 = vsel %vm3953_vm2, %v13333_v42, %v3948_v55  ;;  %v2122_v42 = vadd.f32 %v2114_v30, %v2074_v57  ;;  %v2574_v7 = vmul.f32 %v12940_v56, %v16883_v36  ;;  %v2620_v56 = vmul.f32 %v12977_v32, %v16768_v34 }
 0x368   : > { %v2299_v52 = vadd.f32 %v2295_v45, %v16845_v58  ;;  %10044 = vmatprep.subr.mxu1 %v3956_v25  ;;  %10064 = vmatprep.subr.mxu0 %v3956_v25  ;;  %v1962_v45 = vadd.f32 %v1954_v54, %v16884_v3 }
 0x369   : > { %2914 = vrot.lane.b32.xlu1 %v2892_v62, %s10783_s7  ;;  %10045 = vmatpush3.msra.mxu1 %v3956_v25  ;;  %v2166_v55 = vadd.f32 %v2158_v50, %v2122_v42  ;;  %v2686_v50 = vmul.f32 %v13412_v14, %v16769_v51  ;;  %v16885_v42 = vld [vmem:[#allocation34_spill] sm:$0xff] }
 0x36a   : > { %v13523_v2 = vmax.f32 %v2299_v52, 0.0  ;;  %10065 = vmatpush3.msra.mxu0 %v3956_v25  ;;  %v2049_v61 = vpop.permute.xlu0 %2048  ;;  %v13525_v22 = vpop.permute.xlu1 %2410  ;;  %v2006_v30 = vadd.f32 %v1998_v38, %v1962_v45 }
 0x36b   : > { %v2062_v47 = vsel %vm437_vm1, %v13348_v13, %v2049_v61  ;;  %v2210_v25 = vadd.f32 %v2202_v40, %v2166_v55  ;;  %v13568_v40 = vld [vmem:[%s16227_s3 + $0x108] sm:$0xff]  ;;  %v16888_v55 = vld [vmem:[#allocation67_spill] sm:$0xff] }
 0x36c   : > { %5157 = vrot.lane.b32.xlu0 %v13523_v2, %s10783_s7  ;;  %v2070_v57 = vadd.f32 %v2062_v47, %v2006_v30  ;;  %v16889_v47 = vld [vmem:[#allocation32_spill] sm:$0xff]  ;;  %v2824_v30 = vmul.f32 %v13412_v14, %v16768_v34 }
 0x36d   : > { %2590 = vrot.lane.b32.xlu1 %v2574_v7, %s10783_s7 }
 0x36e   : > { %v2253_v31 = vpop.permute.xlu0 %2252  ;;  %v13539_v62 = vpop.permute.xlu1 %2474 }
 0x36f   : > { %v2266_v9 = vsel %vm437_vm1, %v13360_v35, %v2253_v31  ;;  %v13589_v31 = vld [vmem:[%s16227_s3 + $0x110] sm:$0xff] }
 0x370   : > { %v2274_v52 = vadd.f32 %v2266_v9, %v2210_v25  ;;  %v16890_v9 = vld [vmem:[#allocation64_spill] sm:$0xff] }
 0x371   : > { %2638 = vrot.lane.b32.xlu1 %v2620_v56, %s10783_s7 }
 0x372   : > { %v2294_v33 = vmax.f32 %v2070_v57, %v2274_v52  ;;  %v3944_v54 = vpop.permute.xlu0 %3943  ;;  %v13546_v13 = vpop.permute.xlu1 %2542  ;;  %v13599_v52 = vld [vmem:[%s16227_s3 + $0x118] sm:$0xff] }
 0x373   : > { %v3955_v17 = vsel %vm3953_vm2, %v13371_v4, %v3944_v54  ;;  %v2778_v4 = vmul.f32 %v12977_v32, %v16883_v36  ;;  %v16892_v54 = vld [vmem:[#allocation75_spill] sm:$0xff] }
 0x374   : > { %v2298_v61 = vadd.f32 %v2294_v33, %v16885_v42  ;;  %10046 = vmatprep.subr.mxu1 %v3955_v17  ;;  %10066 = vmatprep.subr.mxu0 %v3955_v17  ;;  %v2890_v33 = vmul.f32 %v13502_v28, %v16769_v51  ;;  %v2625_v42 = vmul.f32 %v13324_v46, %v16647_v8 }
 0x375   : > { %2706 = vrot.lane.b32.xlu1 %v2686_v50, %s10783_s7  ;;  %10047 = vmatpush3.msra.mxu1 %v3955_v17  ;;  %v2581_v50 = vmul.f32 %v13282_v15, %v16765_v63 }
 0x376   : > { %v13554_v35 = vmax.f32 %v2298_v61, 0.0  ;;  %10067 = vmatpush3.msra.mxu0 %v3955_v17  ;;  %v3940_v5 = vpop.permute.xlu0 %3939  ;;  %v13556_v38 = vpop.permute.xlu1 %2406  ;;  %v16893_v17 = vld [vmem:[#allocation72_spill] sm:$0xff] }
 0x377   : > { %v3954_v23 = vsel %vm3953_vm2, %v13381_v19, %v3940_v5  ;;  %v16887_v19 = vld [vmem:[#allocation10_spill] sm:$0xff] }
 0x378   : > { %5153 = vrot.lane.b32.xlu0 %v13554_v35, %s10783_s7  ;;  %10048 = vmatprep.subr.mxu1 %v3954_v23  ;;  %v2741_v45 = vmul.f32 %v13282_v15, %v16887_v19 }
 0x379   : > { %2794 = vrot.lane.b32.xlu1 %v2778_v4, %s10783_s7  ;;  %10068 = vmatprep.subr.mxu0 %v3954_v23  ;;  %v13623_v4 = vld [vmem:[%s16227_s3 + $0x120] sm:$0xff] }
 0x37a   : > { %10049 = vmatpush3.msra.mxu1 %v3954_v23  ;;  %10069 = vmatpush3.msra.mxu0 %v3954_v23  ;;  %v4236_v7 = vpop.permute.xlu0 %4235  ;;  %v13570_v3 = vpop.permute.xlu1 %2470 }
 0x37b   : > { %16886 = vst [vmem:[#allocation49_spill] sm:$0xff] %v13570_v3  ;;  %10102 = vmatprep.subr.mxu0 %v16888_v55  ;;  %10051 = vmatmul.mubr.msk.f32.vlgmr.msra.gmra.mxu1 %vm2991_vm0, %v16889_v47  ;;  %v4240_v25 = vsel %vm3953_vm2, %v13395_v26, %v4236_v7  ;;  %v16891_v26 = vld [vmem:[#allocation70_spill] sm:$0xff]  ;;  %v16894_v7 = vld [vmem:[#allocation85_spill] sm:$0xff]  ;;  %v2739_v47 = vmul.f32 %v13282_v15, %v16767_v1 }
 0x37c   : > { %10071 = vmatmul.mubr.msk.f32.vlgmr.msra.gmra.mxu0 %vm2991_vm0, %v13568_v40  ;;  %2764 = vrot.lane.b32.xlu0 %v2741_v45, %s10783_s7  ;;  %v13631_v45 = vld [vmem:[%s16227_s3 + $0x128] sm:$0xff] }
 0x37d   : > { %2842 = vrot.lane.b32.xlu1 %v2824_v30, %s10783_s7  ;;  %10103 = vmatpush3.msra.mxu0 %v16888_v55  ;;  %v16910_v3 = vld [vmem:[#allocation17_spill] sm:$0xff] }
 0x37e   : > { %10082 = vmatprep.subr.mxu1 %v4240_v25  ;;  %10104 = vmatprep.subr.mxu0 %v16890_v9  ;;  %v4232_v56 = vpop.permute.xlu0 %4231  ;;  %v13592_v57 = vpop.permute.xlu1 %2538 }
 0x37f   : > { %10053 = vmatprep.mubr.msk.f32.mxu1 %vm2991_vm0, %v16891_v26  ;;  %10083 = vmatpush3.msra.mxu1 %v4240_v25  ;;  %v4239_v61 = vsel %vm3953_vm2, %v13414_v10, %v4232_v56  ;;  %v16895_v10 = vld [vmem:[#allocation42_spill] sm:$0xff]  ;;  %v16897_v26 = vld [vmem:[#allocation45_spill] sm:$0xff] }
 0x380   : > { %10105 = vmatpush3.msra.mxu0 %v16890_v9  ;;  %10073 = vmatprep.mubr.msk.f32.mxu0 %vm2991_vm0, %v13589_v31 }
 0x381   : > { %10106 = vmatprep.subr.mxu0 %v16892_v54  ;;  %10054 = vmatmul.mubr.msk.f32.gmra.mxu1 %vm2991_vm0, %v16893_v17  ;;  %v13649_v17 = vld [vmem:[%s16227_s3 + $0x130] sm:$0xff] }
 0x382   : > { %2910 = vrot.lane.b32.xlu1 %v2890_v33, %s10783_s7  ;;  %10074 = vmatmul.mubr.msk.f32.gmra.mxu0 %vm2991_vm0, %v13599_v52  ;;  %v4228_v5 = vpop.permute.xlu0 %4227  ;;  %v13616_v23 = vpop.permute.xlu1 %5163  ;;  %v16898_v33 = vld [vmem:[#allocation80_spill] sm:$0xff] }
 0x383   : > { %10107 = vmatpush3.msra.mxu0 %v16892_v54  ;;  %2604 = vrot.lane.b32.xlu0 %v2581_v50, %s10783_s7  ;;  %v4238_v30 = vsel %vm3953_vm2, %v13430_v12, %v4228_v5  ;;  %v16899_v12 = vld [vmem:[#allocation66_spill] sm:$0xff]  ;;  %v2618_v50 = vmul.f32 %v12977_v32, %v16828_v27  ;;  %v2785_v5 = vmul.f32 %v13324_v46, %v16765_v63  ;;  %v13677_v32 = vld [vmem:[%s16227_s3 + $0x40] sm:$0xff] }
 0x384   : > { %10084 = vmatprep.subr.mxu1 %v4239_v61  ;;  %10108 = vmatprep.subr.mxu0 %v16894_v7 }
 0x385   : > { %10056 = vmatprep.mubr.msk.f32.mxu1 %vm2991_vm0, %v16895_v10  ;;  %10085 = vmatpush3.msra.mxu1 %v4239_v61  ;;  %v13661_v61 = vld [vmem:[%s16227_s3 + $0x138] sm:$0xff] }
 0x386   : > { %10109 = vmatpush3.msra.mxu0 %v16894_v7  ;;  %10076 = vmatprep.mubr.msk.f32.mxu0 %vm2991_vm0, %v13623_v4  ;;  %v4224_v25 = vpop.permute.xlu0 %4223  ;;  %v13640_v56 = vpop.permute.xlu1 %2402 }
 0x387   : > { %16896 = vst [vmem:[#allocation13_spill] sm:$0xff] %v13640_v56  ;;  %10057 = vmatmul.mubr.msk.f32.gmra.mxu1 %vm2991_vm0, %v16897_v26  ;;  %5445 = vrot.lane.b32.xlu1 %v16898_v33, %s10784_s10  ;;  %v4237_v10 = vsel %vm3953_vm2, %v13440_v29, %v4224_v25  ;;  %v16902_v29 = vld [vmem:[#allocation96_spill] sm:$0xff]  ;;  %v2684_v25 = vmul.f32 %v13412_v14, %v16747_v6  ;;  %v16909_v56 = vld [vmem:[#allocation6_spill] sm:$0xff] }
 0x388   : > { %10077 = vmatmul.mubr.msk.f32.gmra.mxu0 %vm2991_vm0, %v13631_v45  ;;  %2760 = vrot.lane.b32.xlu0 %v2739_v47, %s10783_s7 }
 0x389   : > { %10086 = vmatprep.subr.mxu1 %v4238_v30  ;;  %10059 = vmatprep.mubr.msk.f32.mxu1 %vm2991_vm0, %v16899_v12  ;;  %v16901_v12 = vld [vmem:[#allocation68_spill] sm:$0xff] }
 0x38a   : > { %10087 = vmatpush3.msra.mxu1 %v4238_v30  ;;  %10079 = vmatprep.mubr.msk.f32.mxu0 %vm2991_vm0, %v13649_v17  ;;  %v4771_v47 = vpop.permute.xlu0 %4770  ;;  %v13669_v26 = vpop.permute.xlu1 %2466  ;;  %v13687_v30 = vld [vmem:[%s16227_s3 + $0x48] sm:$0xff] }
 0x38b   : > { %16900 = vst [vmem:[#allocation7_spill] sm:$0xff] %v13669_v26  ;;  %10060 = vmatmul.mubr.msk.f32.gmra.mxu1 %vm2991_vm0, %v16901_v12  ;;  %2634 = vrot.lane.b32.xlu1 %v2618_v50, %s10783_s7 }
 0x38c   : > { %10080 = vmatmul.mubr.msk.f32.gmra.mxu0 %vm2991_vm0, %v13661_v61  ;;  %2808 = vrot.lane.b32.xlu0 %v2785_v5, %s10783_s7  ;;  %v13697_v5 = vsel %vm437_vm1, %v13450_v20, %v4771_v47  ;;  %v13712_v20 = vld [vmem:[%s16227_s3 + $0x50] sm:$0xff] }
 0x38d   : > { %10088 = vmatprep.subr.mxu1 %v4237_v10  ;;  %10090 = vmatprep.mubr.msk.f32.mxu1 %vm2991_vm0, %v16902_v29 }
 0x38e   : > { %10089 = vmatpush3.msra.mxu1 %v4237_v10  ;;  %10110 = vmatprep.mubr.msk.f32.mxu0 %vm2991_vm0, %v13677_v32  ;;  %v4767_v50 = vpop.permute.xlu0 %4766  ;;  %v13693_v12 = vpop.permute.xlu1 %2534  ;;  %v2579_v10 = vmul.f32 %v13282_v15, %v16669_v44 }
 0x38f   : > { %16903 = vst [vmem:[#allocation15_spill] sm:$0xff] %v13693_v12  ;;  %10091 = vmatmul.mubr.msk.f32.vlgmr.msra.gmra.mxu1 %vm2991_vm0, %v13568_v40  ;;  %10122 = vmatprep.subr.mxu1 %v16898_v33  ;;  %v16904_v40 = vld [vmem:[#allocation51_spill] sm:$0xff]  ;;  %v2737_v12 = vmul.f32 %v13282_v15, %v16909_v56 }
 0x390   : > { %10111 = vmatmul.mubr.msk.f32.vlgmr.msra.gmra.mxu0 %vm2991_vm0, %v13687_v30  ;;  %2702 = vrot.lane.b32.xlu1 %v2684_v25, %s10783_s7  ;;  %v2822_v25 = vmul.f32 %v13412_v14, %v16828_v27 }
 0x391   : > { %10123 = vmatpush3.msra.mxu1 %v16898_v33  ;;  %2600 = vrot.lane.b32.xlu0 %v2579_v10, %s10783_s7  ;;  %v13724_v33 = vld [vmem:[%s16227_s3 + $0x58] sm:$0xff]  ;;  %v13733_v10 = vsel %vm437_vm1, %v13457_v16, %v4767_v50  ;;  %v13750_v16 = vld [vmem:[%s16227_s3 + $0x60] sm:$0xff]  ;;  %v13760_v50 = vld [vmem:[%s16227_s3 + $0x68] sm:$0xff] }
 0x392   : > { %10124 = vmatprep.subr.mxu1 %v16904_v40  ;;  %10142 = vmatprep.subr.mxu0 %v13697_v5  ;;  %v4763_v47 = vpop.permute.xlu0 %4762  ;;  %v13716_v29 = vpop.permute.xlu1 %5159 }
 0x393   : > { %10093 = vmatprep.mubr.msk.f32.mxu1 %vm2991_vm0, %v13589_v31  ;;  %10125 = vmatpush3.msra.mxu1 %v16904_v40  ;;  %v16905_v31 = vld [vmem:[#allocation90_spill] sm:$0xff] }
 0x394   : > { %10143 = vmatpush3.msra.mxu0 %v13697_v5  ;;  %10113 = vmatprep.mubr.msk.f32.mxu0 %vm2991_vm0, %v13712_v20 }
 0x395   : > { %10094 = vmatmul.mubr.msk.f32.gmra.mxu1 %vm2991_vm0, %v13599_v52  ;;  %10126 = vmatprep.subr.mxu1 %v16905_v31  ;;  %v16907_v52 = vld [vmem:[#allocation69_spill] sm:$0xff] }
 0x396   : > { %10114 = vmatmul.mubr.msk.f32.gmra.mxu0 %vm2991_vm0, %v13724_v33  ;;  %2838 = vrot.lane.b32.xlu1 %v2822_v25, %s10783_s7  ;;  %v4759_v58 = vpop.permute.xlu0 %4758  ;;  %v13743_v26 = vpop.permute.xlu1 %2398  ;;  %v2888_v25 = vmul.f32 %v13502_v28, %v16747_v6 }
 0x397   : > { %16906 = vst [vmem:[#allocation22_spill] sm:$0xff] %v13743_v26  ;;  %10127 = vmatpush3.msra.mxu1 %v16905_v31  ;;  %2648 = vrot.lane.b32.xlu0 %v2625_v42, %s10783_s7  ;;  %v4773_v42 = vsel %vm437_vm1, %v13473_v24, %v4763_v47  ;;  %v13784_v24 = vld [vmem:[%s16227_s3 + $0x70] sm:$0xff]  ;;  %v4772_v47 = vsel %vm437_vm1, %v13494_v11, %v4759_v58  ;;  %v16911_v58 = vld [vmem:[#allocation8_spill] sm:$0xff] }
 0x398   : > { %10128 = vmatprep.subr.mxu1 %v16907_v52  ;;  %10144 = vmatprep.subr.mxu0 %v13733_v10  ;;  %v2671_v11 = vrot.slane %v16911_v58, %v16910_v3  ;;  %v2682_v58 = vmul.f32 %v13412_v14, %v16846_v39 }
 0x399   : > { %10096 = vmatprep.mubr.msk.f32.mxu1 %vm2991_vm0, %v13623_v4  ;;  %10129 = vmatpush3.msra.mxu1 %v16907_v52 }
 0x39a   : > { %10145 = vmatpush3.msra.mxu0 %v13733_v10  ;;  %10116 = vmatprep.mubr.msk.f32.mxu0 %vm2991_vm0, %v13750_v16  ;;  %v13769_v26 = vpop.permute.xlu0 %2480  ;;  %v13771_v4 = vpop.permute.xlu1 %2530 }
 0x39b   : > { %16908 = vst [vmem:[#allocation92_spill] sm:$0xff] %v13771_v4  ;;  %10097 = vmatmul.mubr.msk.f32.gmra.mxu1 %vm2991_vm0, %v13631_v45  ;;  %10162 = vmatprep.subr.mxu1 %v16888_v55  ;;  %v13790_v45 = vld [vmem:[%s16227_s3 + $0x78] sm:$0xff] }
 0x39c   : > { %10117 = vmatmul.mubr.msk.f32.gmra.mxu0 %vm2991_vm0, %v13760_v50  ;;  %2906 = vrot.lane.b32.xlu1 %v2888_v25, %s10783_s7 }
 0x39d   : > { %2756 = vrot.lane.b32.xlu0 %v2737_v12, %s10783_s7  ;;  %10146 = vmatprep.subr.mxu0 %v4773_v42  ;;  %v2783_v12 = vmul.f32 %v13324_v46, %v16669_v44 }
 0x39e   : > { %10099 = vmatprep.mubr.msk.f32.mxu1 %vm2991_vm0, %v13649_v17  ;;  %10147 = vmatpush3.msra.mxu0 %v4773_v42  ;;  %v13796_v25 = vpop.permute.xlu0 %2412  ;;  %v13798_v4 = vpop.permute.xlu1 %5155  ;;  %v13809_v17 = vld [vmem:[%s16227_s3] sm:$0xff] }
 0x39f   : > { %10119 = vmatprep.mubr.msk.f32.mxu0 %vm2991_vm0, %v13784_v24  ;;  %10100 = vmatmul.mubr.msk.f32.gmra.mxu1 %vm2991_vm0, %v13661_v61  ;;  %v13821_v61 = vld [vmem:[%s16227_s3 + $0x8] sm:$0xff] }
 0x3a0   : > { %10120 = vmatmul.mubr.msk.f32.gmra.mxu0 %vm2991_vm0, %v13790_v45  ;;  %5441 = vrot.lane.b32.xlu1 %v16904_v40, %s10784_s10  ;;  %v13835_v40 = vrot.slane %v2671_v11, %v16855_v60 }
 0x3a1   : > { %2804 = vrot.lane.b32.xlu0 %v2783_v12, %s10783_s7  ;;  %10148 = vmatprep.subr.mxu0 %v4772_v47 }
 0x3a2   : > { %10130 = vmatprep.mubr.msk.f32.mxu1 %vm2991_vm0, %v13809_v17  ;;  %10149 = vmatpush3.msra.mxu0 %v4772_v47  ;;  %v13827_v53 = vpop.permute.xlu0 %2476  ;;  %v13829_v56 = vpop.permute.xlu1 %5151  ;;  %v2829_v14 = vmul.f32 %v13835_v40, %v16647_v8 }
 0x3a3   : > { %10150 = vmatprep.mubr.msk.f32.mxu0 %vm2991_vm0, %v13677_v32  ;;  %10182 = vmatprep.subr.mxu0 %v13697_v5 }
 0x3a4   : > { %10131 = vmatmul.mubr.msk.f32.vlgmr.msra.gmra.mxu1 %vm2991_vm0, %v13821_v61  ;;  %2698 = vrot.lane.b32.xlu1 %v2682_v58, %s10783_s7 }
 0x3a5   : > { %10163 = vmatpush3.msra.mxu1 %v16888_v55  ;;  %10151 = vmatmul.mubr.msk.f32.vlgmr.msra.gmra.mxu0 %vm2991_vm0, %v13687_v30  ;;  %v2886_v30 = vmul.f32 %v13502_v28, %v16846_v39  ;;  %v4465_v28 = vld [vmem:[%s16227_s3 + $0x18] sm:$0xff] }
 0x3a6   : > { %10164 = vmatprep.subr.mxu1 %v16890_v9  ;;  %10183 = vmatpush3.msra.mxu0 %v13697_v5  ;;  %v13847_v32 = vpop.permute.xlu0 %2544  ;;  %v13849_v12 = vpop.permute.xlu1 %2762  ;;  %v2577_v5 = vmul.f32 %v13282_v15, %v16670_v0 }
 0x3a7   : > { %16912 = vst [vmem:[#allocation31_spill] sm:$0xff] %v13849_v12  ;;  %2852 = vrot.lane.b32.xlu0 %v2829_v14, %s10783_s7  ;;  %10165 = vmatpush3.msra.mxu1 %v16890_v9  ;;  %v4464_v14 = vld [vmem:[%s16227_s3 + $0x10] sm:$0xff] }
 0x3a8   : > { %10184 = vmatprep.subr.mxu0 %v13733_v10  ;;  %10166 = vmatprep.subr.mxu1 %v16892_v54 }
 0x3a9   : > { %10185 = vmatpush3.msra.mxu0 %v13733_v10  ;;  %10167 = vmatpush3.msra.mxu1 %v16892_v54  ;;  %v2623_v10 = vmul.f32 %v13324_v46, %v16741_v49 }
 0x3aa   : > { %10186 = vmatprep.subr.mxu0 %v4773_v42  ;;  %2902 = vrot.lane.b32.xlu1 %v2886_v30, %s10783_s7  ;;  %v13862_v11 = vpop.permute.xlu0 %2408  ;;  %v13864_v58 = vpop.permute.xlu1 %2602 }
 0x3ab   : > { %16913 = vst [vmem:[#allocation56_spill] sm:$0xff] %v13864_v58  ;;  %10168 = vmatprep.subr.mxu1 %v16894_v7  ;;  %10187 = vmatpush3.msra.mxu0 %v4773_v42 }
 0x3ac   : > { %2596 = vrot.lane.b32.xlu0 %v2577_v5, %s10783_s7  ;;  %10169 = vmatpush3.msra.mxu1 %v16894_v7  ;;  %v4466_v5 = vld [vmem:[%s16227_s3 + $0x20] sm:$0xff] }
 0x3ad   : > { %10188 = vmatprep.subr.mxu0 %v4772_v47  ;;  %10133 = vmatprep.mubr.msk.f32.mxu1 %vm2991_vm0, %v4464_v14 }
 0x3ae   : > { %10189 = vmatpush3.msra.mxu0 %v4772_v47  ;;  %5437 = vrot.lane.b32.xlu1 %v16905_v31, %s10784_s10  ;;  %v13880_v30 = vpop.permute.xlu0 %2472  ;;  %v13882_v42 = vpop.permute.xlu1 %2758  ;;  %v4467_v31 = vld [vmem:[%s16227_s3 + $0x28] sm:$0xff] }
 0x3af   : > { %16914 = vst [vmem:[#allocation57_spill] sm:$0xff] %v13882_v42  ;;  %10153 = vmatprep.mubr.msk.f32.mxu0 %vm2991_vm0, %v13712_v20  ;;  %10134 = vmatmul.mubr.msk.f32.gmra.mxu1 %vm2991_vm0, %v4465_v28  ;;  %v2689_v20 = vmul.f32 %v13835_v40, %v16857_v59 }
 0x3b0   : > { %2644 = vrot.lane.b32.xlu0 %v2623_v10, %s10783_s7  ;;  %10154 = vmatmul.mubr.msk.f32.gmra.mxu0 %vm2991_vm0, %v13724_v33  ;;  %v4468_v33 = vld [vmem:[%s16227_s3 + $0x30] sm:$0xff] }
 0x3b1   : > { %10136 = vmatprep.mubr.msk.f32.mxu1 %vm2991_vm0, %v4466_v5  ;;  %10156 = vmatprep.mubr.msk.f32.mxu0 %vm2991_vm0, %v13750_v16  ;;  %v4469_v16 = vld [vmem:[%s16227_s3 + $0x38] sm:$0xff] }
 0x3b2   : > { %5433 = vrot.lane.b32.xlu1 %v16907_v52, %s10784_s10  ;;  %v13903_v47 = vpop.permute.xlu0 %2540  ;;  %v13905_v10 = vpop.permute.xlu1 %2806  ;;  %v2735_v52 = vmul.f32 %v13282_v15, %v16757_v37 }
 0x3b3   : > { %16915 = vst [vmem:[#allocation81_spill] sm:$0xff] %v13905_v10  ;;  %10137 = vmatmul.mubr.msk.f32.gmra.mxu1 %vm2991_vm0, %v4467_v31 }
 0x3b4   : > { %2712 = vrot.lane.b32.xlu0 %v2689_v20, %s10783_s7  ;;  %10157 = vmatmul.mubr.msk.f32.gmra.mxu0 %vm2991_vm0, %v13760_v50  ;;  %v9067_v50 = vld [vmem:[%s16227_s3 + $0x80] sm:$0xff] }
 0x3b5   : > { %10139 = vmatprep.mubr.msk.f32.mxu1 %vm2991_vm0, %v4468_v33  ;;  %10159 = vmatprep.mubr.msk.f32.mxu0 %vm2991_vm0, %v13784_v24 }
 0x3b6   : > { %5727 = vrot.lane.b32.xlu1 %v16888_v55, %s10784_s10  ;;  %v5166_v42 = vpop.permute.xlu0 %5165  ;;  %v13924_v20 = vpop.permute.xlu1 %2598  ;;  %v13941_v55 = vld [vmem:[%s16227_s3 + $0x88] sm:$0xff] }
 0x3b7   : > { %16916 = vst [vmem:[#allocation50_spill] sm:$0xff] %v13924_v20  ;;  %10140 = vmatmul.mubr.msk.f32.gmra.mxu1 %vm2991_vm0, %v4469_v16  ;;  %v5170_v10 = vsel %vm437_vm1, %v13616_v23, %v5166_v42  ;;  %v2781_v23 = vmul.f32 %v13324_v46, %v16670_v0 }
 0x3b8   : > { %2752 = vrot.lane.b32.xlu0 %v2735_v52, %s10783_s7  ;;  %10160 = vmatmul.mubr.msk.f32.gmra.mxu0 %vm2991_vm0, %v13790_v45  ;;  %v14019_v52 = vld [vmem:[%s16227_s3 + $0xa0] sm:$0xff] }
 0x3b9   : > { %10170 = vmatprep.mubr.msk.f32.mxu1 %vm2991_vm0, %v13809_v17  ;;  %10190 = vmatprep.mubr.msk.f32.mxu0 %vm2991_vm0, %v9067_v50  ;;  %v2875_v17 = vrot.slane %v13478_v41, %v16910_v3 }
 0x3ba   : > { %5723 = vrot.lane.b32.xlu1 %v16890_v9, %s10784_s10  ;;  %10202 = vmatprep.subr.mxu1 %v5170_v10  ;;  %v13947_v24 = vpop.permute.xlu0 %2404  ;;  %v13949_v45 = vpop.permute.xlu1 %2646  ;;  %v2827_v9 = vmul.f32 %v13835_v40, %v16741_v49 }
 0x3bb   : > { %16917 = vst [vmem:[#allocation87_spill] sm:$0xff] %v13949_v45  ;;  %10222 = vmatprep.subr.mxu0 %v5170_v10  ;;  %10171 = vmatmul.mubr.msk.f32.vlgmr.msra.gmra.mxu1 %vm2991_vm0, %v13821_v61  ;;  %v13968_v41 = vrot.slane %v2875_v17, %v16855_v60  ;;  %v16920_v60 = vld [vmem:[#allocation18_spill] sm:$0xff] }
 0x3bc   : > { %2800 = vrot.lane.b32.xlu0 %v2781_v23, %s10783_s7  ;;  %10191 = vmatmul.mubr.msk.f32.vlgmr.msra.gmra.mxu0 %vm2991_vm0, %v13941_v55  ;;  %v16924_v23 = vld [vmem:[#allocation89_spill] sm:$0xff] }
 0x3bd   : > { %10203 = vmatpush3.msra.mxu1 %v5170_v10  ;;  %10223 = vmatpush3.msra.mxu0 %v5170_v10 }
 0x3be   : > { %5719 = vrot.lane.b32.xlu1 %v16892_v54, %s10784_s10  ;;  %v13962_v42 = vpop.permute.xlu1 %2754  ;;  %10173 = vmatprep.mubr.msk.f32.mxu1 %vm2991_vm0, %v4464_v14  ;;  %v13970_v3 = vpop.permute.xlu0 %2468  ;;  %v2893_v54 = vmul.f32 %v13968_v41, %v16857_v59  ;;  %v2575_v14 = vmul.f32 %v13282_v15, %v16883_v36  ;;  %v13995_v59 = vld [vmem:[%s16227_s3 + $0x90] sm:$0xff] }
 0x3bf   : > { %16918 = vst [vmem:[#allocation88_spill] sm:$0xff] %v13962_v42  ;;  %10174 = vmatmul.mubr.msk.f32.gmra.mxu1 %vm2991_vm0, %v4465_v28  ;;  %10193 = vmatprep.mubr.msk.f32.mxu0 %vm2991_vm0, %v13995_v59  ;;  %v16922_v15 = vld [vmem:[#allocation54_spill] sm:$0xff]  ;;  %v2891_v42 = vmul.f32 %v13968_v41, %v16769_v51 }
 0x3c0   : > { %2848 = vrot.lane.b32.xlu0 %v2827_v9, %s10783_s7  ;;  %10176 = vmatprep.mubr.msk.f32.mxu1 %vm2991_vm0, %v4466_v5  ;;  %v14000_v5 = vld [vmem:[%s16227_s3 + $0x98] sm:$0xff] }
 0x3c1   : > { %10194 = vmatmul.mubr.msk.f32.gmra.mxu0 %vm2991_vm0, %v14000_v5  ;;  %v16926_v9 = vld [vmem:[#allocation79_spill] sm:$0xff] }
 0x3c2   : > { %5715 = vrot.lane.b32.xlu1 %v16894_v7, %s10784_s10  ;;  %v13977_v61 = vpop.permute.xlu1 %2802  ;;  %v13986_v28 = vpop.permute.xlu0 %2536  ;;  %10196 = vmatprep.mubr.msk.f32.mxu0 %vm2991_vm0, %v14019_v52 }
 0x3c3   : > { %16919 = vst [vmem:[#allocation52_spill] sm:$0xff] %v13977_v61  ;;  %10177 = vmatmul.mubr.msk.f32.gmra.mxu1 %vm2991_vm0, %v4467_v31  ;;  %v2621_v31 = vmul.f32 %v13324_v46, %v16768_v34 }
 0x3c4   : > { %2916 = vrot.lane.b32.xlu0 %v2893_v54, %s10783_s7  ;;  %10179 = vmatprep.mubr.msk.f32.mxu1 %vm2991_vm0, %v4468_v33  ;;  %v2779_v54 = vmul.f32 %v13324_v46, %v16883_v36 }
 0x3c6   : > { %6222 = vrot.lane.b32.xlu1 %v16920_v60, %s10783_s7  ;;  %v13988_v7 = vpop.permute.xlu1 %2850 }
 0x3c7   : > { %16921 = vst [vmem:[#allocation38_spill] sm:$0xff] %v13988_v7  ;;  %10180 = vmatmul.mubr.msk.f32.gmra.mxu1 %vm2991_vm0, %v4469_v16  ;;  %v2889_v7 = vmul.f32 %v13968_v41, %v16747_v6 }
 0x3c8   : > { %2592 = vrot.lane.b32.xlu0 %v2575_v14, %s10783_s7  ;;  %10210 = vmatprep.mubr.msk.f32.mxu1 %vm2991_vm0, %v9067_v50  ;;  %v14024_v50 = vld [vmem:[%s16227_s3 + $0xa8] sm:$0xff] }
 0x3c9   : > { %10197 = vmatmul.mubr.msk.f32.gmra.mxu0 %vm2991_vm0, %v14024_v50 }
 0x3ca   : > { %6218 = vrot.lane.b32.xlu1 %v16922_v15, %s10783_s7  ;;  %v5162_v10 = vpop.permute.xlu0 %5161  ;;  %v14013_v16 = vpop.permute.xlu1 %2594 }
 0x3cb   : > { %v5169_v33 = vsel %vm437_vm1, %v13716_v29, %v5162_v10  ;;  %16923 = vst [vmem:[#allocation40_spill] sm:$0xff] %v14013_v16  ;;  %v2687_v29 = vmul.f32 %v13835_v40, %v16769_v51  ;;  %v2825_v10 = vmul.f32 %v13835_v40, %v16768_v34  ;;  %v2619_v51 = vmul.f32 %v13324_v46, %v16828_v27 }
 0x3cc   : > { %2640 = vrot.lane.b32.xlu0 %v2621_v31, %s10783_s7  ;;  %10204 = vmatprep.subr.mxu1 %v5169_v33  ;;  %v16927_v31 = vld [vmem:[#allocation55_spill] sm:$0xff]  ;;  %v2823_v46 = vmul.f32 %v13835_v40, %v16828_v27 }
 0x3cd   : > { %10224 = vmatprep.subr.mxu0 %v5169_v33  ;;  %10205 = vmatpush3.msra.mxu1 %v5169_v33 }
 0x3ce   : > { %6214 = vrot.lane.b32.xlu1 %v16924_v23, %s10783_s7  ;;  %10225 = vmatpush3.msra.mxu0 %v5169_v33  ;;  %v14035_v17 = vpop.permute.xlu1 %2642  ;;  %v14042_v14 = vpop.permute.xlu0 %2400  ;;  %v14051_v33 = vld [vmem:[%s16227_s3 + $0xb0] sm:$0xff] }
 0x3cf   : > { %16925 = vst [vmem:[#allocation44_spill] sm:$0xff] %v14035_v17  ;;  %10199 = vmatprep.mubr.msk.f32.mxu0 %vm2991_vm0, %v14051_v33 }
 0x3d0   : > { %2708 = vrot.lane.b32.xlu0 %v2687_v29, %s10783_s7  ;;  %v14056_v29 = vld [vmem:[%s16227_s3 + $0xb8] sm:$0xff] }
 0x3d1   : > { %10200 = vmatmul.mubr.msk.f32.gmra.mxu0 %vm2991_vm0, %v14056_v29 }
 0x3d2   : > { %6210 = vrot.lane.b32.xlu1 %v16926_v9, %s10783_s7  ;;  %v14063_v16 = vpop.permute.xlu1 %2710  ;;  %v14076_v17 = vpop.permute.xlu0 %2532 }
 0x3d3   : > { %16928 = vst [vmem:[#allocation94_spill] sm:$0xff] %v14063_v16 }
 0x3d4   : > { %2796 = vrot.lane.b32.xlu0 %v2779_v54, %s10783_s7  ;;  %v14061_v54 = vld [vmem:[%s16227_s3 + $0xc0] sm:$0xff] }
 0x3d5   : > { %10230 = vmatprep.mubr.msk.f32.mxu0 %vm2991_vm0, %v14061_v54 }
 0x3d6   : > { %6617 = vrot.lane.b32.xlu1 %v16927_v31, %s10783_s7  ;;  %v14079_v61 = vpop.permute.xlu1 %2750 }
 0x3d7   : > { %16929 = vst [vmem:[#allocation37_spill] sm:$0xff] %v14079_v61  ;;  %v14108_v61 = vld [vmem:[%s10870_s6 + $0xd] ss:$0 sm:$0xff] }
 0x3d8   : > { %2844 = vrot.lane.b32.xlu0 %v2825_v10, %s10783_s7  ;;  %v2331_v16 = vmul.f32 %v14108_v61, %v16887_v19 }
 0x3da   : > { %6613 = vrot.lane.b32.xlu1 %v13448_v18, %s10783_s7 }
 0x3dc   : > { %2912 = vrot.lane.b32.xlu0 %v2891_v42, %s10783_s7  ;;  %v14091_v42 = vpop.permute.xlu1 %2798 }
 0x3dd   : > { %16930 = vst [vmem:[#allocation39_spill] sm:$0xff] %v14091_v42  ;;  %v16933_v42 = vld [vmem:[#allocation5_spill] sm:$0xff] }
 0x3de   : > { %6609 = vrot.lane.b32.xlu1 %v13523_v2, %s10783_s7  ;;  %v5158_v10 = vpop.permute.xlu0 %5157 }
 0x3df   : > { %v5168_v20 = vsel %vm437_vm1, %v13798_v4, %v5158_v10  ;;  %v2685_v4 = vmul.f32 %v13835_v40, %v16747_v6 }
 0x3e0   : > { %5447 = vrot.lane.b32.xlu0 %v16920_v60, %s10784_s10  ;;  %10206 = vmatprep.subr.mxu1 %v5168_v20  ;;  %v14099_v10 = vpop.permute.xlu1 %2846 }
 0x3e1   : > { %10226 = vmatprep.subr.mxu0 %v5168_v20  ;;  %10207 = vmatpush3.msra.mxu1 %v5168_v20  ;;  %16931 = vst [vmem:[#allocation41_spill] sm:$0xff] %v14099_v10 }
 0x3e2   : > { %6605 = vrot.lane.b32.xlu1 %v13554_v35, %s10783_s7  ;;  %10227 = vmatpush3.msra.mxu0 %v5168_v20 }
 0x3e4   : > { %2636 = vrot.lane.b32.xlu0 %v2619_v51, %s10783_s7  ;;  %v14136_v58 = vpop.permute.xlu1 %2914 }
 0x3e5   : > { %16934 = vst [vmem:[#allocation91_spill] sm:$0xff] %v14136_v58 }
 0x3e6   : > { %6899 = vrot.lane.b32.xlu1 %v16920_v60, %s10784_s10  ;;  %v14111_v60 = vld [vmem:[%s10870_s6 + $0xc] ss:$0 sm:$0xff] }
 0x3e7   : > { %v2318_v10 = vmul.f32 %v14111_v60, %v16933_v42 }
 0x3e8   : > { %2704 = vrot.lane.b32.xlu0 %v2685_v4, %s10783_s7  ;;  %v14117_v4 = vld [vmem:[%s16227_s3 + $0xc8] sm:$0xff] }
 0x3e9   : > { %16932 = vst [vmem:[#allocation14_spill] sm:$0xff] %v14117_v4  ;;  %v2335_v6 = vadd.f32 %v2331_v16, %v2318_v10  ;;  %v2330_v10 = vmul.f32 %v14108_v61, %v16767_v1 }
 0x3ea   : > { %6895 = vrot.lane.b32.xlu1 %v16922_v15, %s10784_s10  ;;  %v5154_v20 = vpop.permute.xlu0 %5153 }
 0x3eb   : > { %v5167_v51 = vsel %vm437_vm1, %v13829_v56, %v5154_v20  ;;  %v2429_v56 = vmul.f32 %v14108_v61, %v16933_v42  ;;  %v14126_v20 = vld [vmem:[%s10870_s6 + $0xe] ss:$0 sm:$0xff] }
 0x3ec   : > { %2840 = vrot.lane.b32.xlu0 %v2823_v46, %s10783_s7  ;;  %10208 = vmatprep.subr.mxu1 %v5167_v51  ;;  %v2437_v46 = vmul.f32 %v14126_v20, %v16887_v19  ;;  %v2344_v45 = vmul.f32 %v14126_v20, %v16765_v63  ;;  %v14145_v19 = vld [vmem:[%s10870_s6 + $0xf] ss:$0 sm:$0xff] }
 0x3ed   : > { %10228 = vmatprep.subr.mxu0 %v5167_v51  ;;  %10209 = vmatpush3.msra.mxu1 %v5167_v51  ;;  %v2445_v42 = vmul.f32 %v14145_v19, %v16765_v63  ;;  %v2357_v63 = vmul.f32 %v14145_v19, %v16647_v8  ;;  %v2444_v16 = vmul.f32 %v14145_v19, %v16669_v44 }
 0x3ee   : > { %6891 = vrot.lane.b32.xlu1 %v16924_v23, %s10784_s10  ;;  %10229 = vmatpush3.msra.mxu0 %v5167_v51  ;;  %v14138_v12 = vpop.permute.xlu0 %2764  ;;  %v2436_v51 = vmul.f32 %v14126_v20, %v16767_v1  ;;  %v2441_v58 = vadd.f32 %v2437_v46, %v2429_v56  ;;  %v2343_v1 = vmul.f32 %v14126_v20, %v16669_v44  ;;  %v14203_v44 = vld [vmem:[%s16227_s3 + $0xe0] sm:$0xff] }
 0x3ef   : > { %16935 = vst [vmem:[#allocation74_spill] sm:$0xff] %v14138_v12  ;;  %10211 = vmatmul.mubr.msk.f32.vlgmr.msra.gmra.mxu1 %vm2991_vm0, %v13941_v55  ;;  %10231 = vmatmul.mubr.msk.f32.vlgmr.msra.gmra.mxu0 %vm2991_vm0, %v14117_v4  ;;  %v2485_v55 = vsel %vm437_vm1, %v13504_v48, %v13769_v26  ;;  %v2348_v4 = vadd.f32 %v2344_v45, %v2335_v6 }
 0x3f0   : > { %2908 = vrot.lane.b32.xlu0 %v2889_v7, %s10783_s7  ;;  %10213 = vmatprep.mubr.msk.f32.mxu1 %vm2991_vm0, %v13995_v59  ;;  %v16936_v7 = vld [vmem:[#allocation4_spill] sm:$0xff]  ;;  %v2449_v59 = vadd.f32 %v2445_v42, %v2441_v58  ;;  %v2549_v48 = vsel %vm437_vm1, %v13546_v13, %v13847_v32  ;;  %v14178_v58 = vpop.permute.xlu1 %2590  ;;  %v2356_v42 = vmul.f32 %v14145_v19, %v16741_v49  ;;  %v14193_v32 = vld [vmem:[%s16227_s3 + $0xd0] sm:$0xff] }
 0x3f1   : > { %v2428_v12 = vmul.f32 %v14108_v61, %v16936_v7  ;;  %v2317_v26 = vmul.f32 %v14111_v60, %v16936_v7  ;;  %v2683_v13 = vmul.f32 %v13835_v40, %v16846_v39  ;;  %v2361_v49 = vadd.f32 %v2357_v63, %v2348_v4  ;;  %10233 = vmatprep.mubr.msk.f32.mxu0 %vm2991_vm0, %v14193_v32  ;;  %v14239_v4 = vld [vmem:[%s16227_s3 + $0xf0] sm:$0xff] }
 0x3f2   : > { %6887 = vrot.lane.b32.xlu1 %v16926_v9, %s10784_s10  ;;  %v2417_v40 = vsel %vm437_vm1, %v13525_v22, %v13796_v25  ;;  %v2548_v22 = vsel %vm437_vm1, %v13592_v57, %v13903_v47  ;;  %v2887_v57 = vmul.f32 %v13968_v41, %v16846_v39  ;;  %16937 = vst [vmem:[#allocation65_spill] sm:$0xff] %v14239_v4  ;;  %v14256_v39 = vld [vmem:[%s16227_s3 + $0xf8] sm:$0xff]  ;;  %v14267_v41 = vld [vmem:[%s16227_s3 + $0x100] sm:$0xff] }
 0x3f3   : > { %10214 = vmatmul.mubr.msk.f32.gmra.mxu1 %vm2991_vm0, %v14000_v5  ;;  %v2440_v8 = vadd.f32 %v2436_v51, %v2428_v12  ;;  %v2493_v5 = vadd.f32 %v2485_v55, %v2449_v59  ;;  %v14198_v12 = vld [vmem:[%s16227_s3 + $0xd8] sm:$0xff]  ;;  %v2334_v6 = vadd.f32 %v2330_v10, %v2317_v26  ;;  %16938 = vst [vmem:[#allocation62_spill] sm:$0xff] %v14256_v39  ;;  %16939 = vst [vmem:[#allocation86_spill] sm:$0xff] %v14267_v41 }
 0x3f4   : > { %5443 = vrot.lane.b32.xlu0 %v16922_v15, %s10784_s10  ;;  %10216 = vmatprep.mubr.msk.f32.mxu1 %vm2991_vm0, %v14019_v52  ;;  %v2484_v52 = vsel %vm437_vm1, %v13539_v62, %v13827_v53  ;;  %v14226_v53 = vld [vmem:[%s16227_s3 + $0xe8] sm:$0xff]  ;;  %v2425_v62 = vadd.f32 %v2417_v40, %v2361_v49  ;;  %v14244_v51 = vpop.permute.xlu1 %2638 }
 0x3f5   : > { %v14180_v45 = vpop.permute.xlu0 %2604  ;;  %v2448_v56 = vadd.f32 %v2444_v16, %v2440_v8  ;;  %v2557_v46 = vadd.f32 %v2549_v48, %v2493_v5  ;;  %10234 = vmatmul.mubr.msk.f32.gmra.mxu0 %vm2991_vm0, %v14198_v12  ;;  %v2316_v5 = vmul.f32 %v14111_v60, %v16722_v21 }
 0x3f6   : > { %7181 = vrot.lane.b32.xlu1 %v16927_v31, %s10784_s10  ;;  %10236 = vmatprep.mubr.msk.f32.mxu0 %vm2991_vm0, %v14203_v44 }
 0x3f7   : > { %10217 = vmatmul.mubr.msk.f32.gmra.mxu1 %vm2991_vm0, %v14024_v50  ;;  %v2492_v25 = vadd.f32 %v2484_v52, %v2448_v56  ;;  %v2347_v50 = vadd.f32 %v2343_v1, %v2334_v6  ;;  %v2933_v55 = vmax.f32 %v2425_v62, %v2557_v46  ;;  %v2427_v1 = vmul.f32 %v14108_v61, %v16722_v21 }
 0x3f8   : > { %2700 = vrot.lane.b32.xlu0 %v2683_v13, %s10783_s7  ;;  %10219 = vmatprep.mubr.msk.f32.mxu1 %vm2991_vm0, %v14051_v33  ;;  %v2416_v33 = vsel %vm437_vm1, %v13556_v38, %v13862_v11 }
 0x3f9   : > { %v2360_v63 = vadd.f32 %v2356_v42, %v2347_v50  ;;  %v2556_v59 = vadd.f32 %v2548_v22, %v2492_v25  ;;  %10237 = vmatmul.mubr.msk.f32.gmra.mxu0 %vm2991_vm0, %v14226_v53  ;;  %v16941_v42 = vld [vmem:[#allocation6_spill] sm:$0xff]  ;;  %v16942_v22 = vld [vmem:[#allocation24_spill] sm:$0xff]  ;;  %v2342_v50 = vmul.f32 %v14126_v20, %v16670_v0 }
 0x3fa   : > { %7177 = vrot.lane.b32.xlu1 %v13448_v18, %s10784_s10  ;;  %v14234_v47 = vpop.permute.xlu0 %2760  ;;  %10239 = vmatprep.mubr.msk.f32.mxu0 %vm2991_vm0, %v14239_v4  ;;  %v2329_v13 = vmul.f32 %v14108_v61, %v16941_v42  ;;  %v2435_v40 = vmul.f32 %v14126_v20, %v16941_v42  ;;  %v2426_v62 = vmul.f32 %v14108_v61, %v16942_v22 }
 0x3fb   : > { %10220 = vmatmul.mubr.msk.f32.gmra.mxu1 %vm2991_vm0, %v14056_v29  ;;  %v2424_v38 = vadd.f32 %v2416_v33, %v2360_v63  ;;  %v16940_v29 = vld [vmem:[#allocation93_spill] sm:$0xff]  ;;  %v2315_v25 = vmul.f32 %v14111_v60, %v16942_v22  ;;  %v2434_v33 = vmul.f32 %v14126_v20, %v16757_v37  ;;  %v2442_v42 = vmul.f32 %v14145_v19, %v16883_v36 }
 0x3fc   : > { %2904 = vrot.lane.b32.xlu0 %v2887_v57, %s10783_s7  ;;  %10250 = vmatprep.mubr.msk.f32.mxu1 %vm2991_vm0, %v14061_v54  ;;  %v2937_v16 = vadd.f32 %v2933_v55, %v16940_v29  ;;  %v14274_v54 = vpop.permute.xlu1 %2706  ;;  %v2333_v56 = vadd.f32 %v2329_v13, %v2316_v5  ;;  %v2439_v6 = vadd.f32 %v2435_v40, %v2427_v1  ;;  %v16943_v60 = vld [vmem:[#allocation49_spill] sm:$0xff] }
 0x3fd   : > { %v2932_v10 = vmax.f32 %v2424_v38, %v2556_v59  ;;  %10240 = vmatmul.mubr.msk.f32.gmra.mxu0 %vm2991_vm0, %v14256_v39  ;;  %v2443_v57 = vmul.f32 %v14145_v19, %v16670_v0  ;;  %v2328_v55 = vmul.f32 %v14108_v61, %v16757_v37  ;;  %v2483_v63 = vsel %vm437_vm1, %v16943_v60, %v13880_v30  ;;  %v16944_v61 = vld [vmem:[#allocation15_spill] sm:$0xff] }
 0x3fe   : > { %7173 = vrot.lane.b32.xlu1 %v13523_v2, %s10784_s10  ;;  %v14262_v11 = vpop.permute.xlu0 %2808  ;;  %10270 = vmatprep.mubr.msk.f32.mxu0 %vm2991_vm0, %v14267_v41  ;;  %v14282_v48 = vmax.f32 %v2937_v16, 0.0  ;;  %v2346_v59 = vadd.f32 %v2342_v50, %v2333_v56  ;;  %v16397_v0 = vmov 0.0   ;;  %v2355_v37 = vmul.f32 %v14145_v19, %v16768_v34  ;;  %v16945_v56 = vld [vmem:[#allocation13_spill] sm:$0xff]  ;;  %v16961_v41 = vld [vmem:[#allocation94_spill] sm:$0xff] }
 0x3ff   : > { %v2936_v26 = vadd.f32 %v2932_v10, %v16843_v43  ;;  %v2447_v16 = vadd.f32 %v2443_v57, %v2439_v6  ;;  %v2438_v10 = vadd.f32 %v2434_v33, %v2426_v62  ;;  %v2547_v5 = vsel %vm437_vm1, %v16944_v61, %v13986_v28  ;;  %v16946_v6 = vld [vmem:[#allocation7_spill] sm:$0xff]  ;;  %v16949_v61 = vld [vmem:[#allocation33_spill] sm:$0xff] }
 0x400   : > { %5439 = vrot.lane.b32.xlu0 %v16924_v23, %s10784_s10  ;;  %v14295_v49 = vpop.permute.xlu1 %2794  ;;  %v2341_v13 = vmul.f32 %v14126_v20, %v16883_v36  ;;  %v2359_v40 = vadd.f32 %v2355_v37, %v2346_v59  ;;  %v2415_v34 = vsel %vm437_vm1, %v16945_v56, %v13947_v24  ;;  %v2482_v28 = vsel %vm437_vm1, %v16946_v6, %v13970_v3  ;;  %v16947_v36 = vld [vmem:[#allocation92_spill] sm:$0xff] }
 0x401   : > { %v14299_v52 = vmax.f32 %v2936_v26, 0.0  ;;  %v2332_v26 = vadd.f32 %v2328_v55, %v2315_v25  ;;  %v2491_v30 = vadd.f32 %v2483_v63, %v2447_v16  ;;  %v2354_v62 = vmul.f32 %v14145_v19, %v16828_v27  ;;  %v16948_v27 = vld [vmem:[#allocation22_spill] sm:$0xff] }
 0x402   : > { %7169 = vrot.lane.b32.xlu1 %v13554_v35, %s10784_s10  ;;  %v2446_v25 = vadd.f32 %v2442_v42, %v2438_v10  ;;  %v2546_v33 = vsel %vm437_vm1, %v16947_v36, %v14076_v17  ;;  %v2423_v60 = vadd.f32 %v2415_v34, %v2359_v40  ;;  %v2414_v3 = vsel %vm437_vm1, %v16948_v27, %v14042_v14  ;;  %v16951_v42 = vld [vmem:[#allocation34_spill] sm:$0xff] }
 0x403   : > { %v14280_v8 = vpop.permute.xlu0 %2600  ;;  %v2555_v50 = vadd.f32 %v2547_v5, %v2491_v30  ;;  %v2345_v57 = vadd.f32 %v2341_v13, %v2332_v26  ;;  %v16955_v27 = vld [vmem:[#allocation74_spill] sm:$0xff] }
 0x404   : > { %5435 = vrot.lane.b32.xlu0 %v16926_v9, %s10784_s10  ;;  %v14324_v38 = vpop.permute.xlu1 %2842  ;;  %v2490_v63 = vadd.f32 %v2482_v28, %v2446_v25  ;;  %v16959_v9 = vld [vmem:[#allocation87_spill] sm:$0xff] }
 0x405   : > { %v2931_v59 = vmax.f32 %v2423_v60, %v2555_v50  ;;  %v2358_v16 = vadd.f32 %v2354_v62, %v2345_v57  ;;  %v16953_v57 = vld [vmem:[#allocation5_spill] sm:$0xff] }
 0x406   : > { %7680 = vrot.lane.b32.xlu1 %v14282_v48, %s10783_s7  ;;  %v2554_v10 = vadd.f32 %v2546_v33, %v2490_v63  ;;  %v2561_v36 = vmul.f32 %v14126_v20, %v16953_v57  ;;  %v16954_v33 = vld [vmem:[#allocation10_spill] sm:$0xff] }
 0x407   : > { %v2422_v17 = vadd.f32 %v2414_v3, %v2358_v16  ;;  %v2935_v5 = vadd.f32 %v2931_v59, %v16949_v61  ;;  %v2569_v60 = vmul.f32 %v14145_v19, %v16954_v33  ;;  %v16956_v3 = vld [vmem:[#allocation31_spill] sm:$0xff]  ;;  %v2729_v16 = vmul.f32 %v14145_v19, %v16953_v57 }
 0x408   : > { %5729 = vrot.lane.b32.xlu0 %v16927_v31, %s10784_s10  ;;  %v14354_v55 = vpop.permute.xlu1 %2910  ;;  %v2769_v59 = vsel %vm437_vm1, %v16956_v3, %v16955_v27  ;;  %v16960_v3 = vld [vmem:[#allocation38_spill] sm:$0xff] }
 0x409   : > { %v14303_v46 = vpop.permute.xlu0 %2648  ;;  %v2930_v30 = vmax.f32 %v2422_v17, %v2554_v10  ;;  %v14372_v14 = vmax.f32 %v2935_v5, 0.0  ;;  %v16957_v10 = vld [vmem:[#allocation56_spill] sm:$0xff]  ;;  %v16958_v5 = vld [vmem:[#allocation81_spill] sm:$0xff]  ;;  %v2573_v33 = vadd.f32 %v2569_v60, %v2561_v36 }
 0x40a   : > { %7676 = vrot.lane.b32.xlu1 %v14299_v52, %s10783_s7  ;;  %v2609_v17 = vsel %vm437_vm1, %v16957_v10, %v14180_v45  ;;  %v2813_v20 = vsel %vm437_vm1, %v16958_v5, %v14262_v11  ;;  %v2653_v27 = vsel %vm437_vm1, %v16959_v9, %v14303_v46 }
 0x40b   : > { %16950 = vst [vmem:[#allocation60_spill] sm:$0xff] %v14372_v14  ;;  %v2934_v13 = vadd.f32 %v2930_v30, %v16951_v42  ;;  %v2617_v23 = vadd.f32 %v2609_v17, %v2573_v33 }
 0x40c   : > { %5725 = vrot.lane.b32.xlu0 %v13448_v18, %s10784_s10  ;;  %v14367_v26 = vpop.permute.xlu1 %5445 }
 0x40d   : > { %v14381_v34 = vmax.f32 %v2934_v13, 0.0  ;;  %v2777_v13 = vadd.f32 %v2769_v59, %v2729_v16  ;;  %v2661_v10 = vadd.f32 %v2653_v27, %v2617_v23  ;;  %v16962_v59 = vld [vmem:[#allocation91_spill] sm:$0xff]  ;;  %v9932_v23 = vpop.f32.mrf.mxu1 }
 0x40e   : > { %7674 = vrot.lane.b32.xlu1 %v16397_v0, %s10783_s7 }
 0x40f   : > { %v14333_v1 = vpop.permute.xlu0 %2756  ;;  %16952 = vst [vmem:[#allocation63_spill] sm:$0xff] %v14381_v34  ;;  %v2821_v15 = vadd.f32 %v2813_v20, %v2777_v13  ;;  %v14438_v33 = vpop.f32.mrf.mxu1 }
 0x410   : > { %5721 = vrot.lane.b32.xlu0 %v13523_v2, %s10784_s10  ;;  %v14377_v56 = vpop.permute.xlu1 %2634  ;;  %16965 = vst [vmem:[#allocation35_spill] sm:$0xff] %v14438_v33  ;;  %v16973_v33 = vld [vmem:[#allocation41_spill] sm:$0xff] }
 0x412   : > { %7670 = vrot.lane.b32.xlu1 %v16397_v0, %s10783_s7 }
 0x413   : > { %v14356_v24 = vpop.permute.xlu0 %2804 }
 0x414   : > { %5717 = vrot.lane.b32.xlu0 %v13554_v35, %s10784_s10  ;;  %v14385_v28 = vpop.permute.xlu1 %2702 }
 0x416   : > { %10736 = vrot.lane.b32.xlu1 %v16397_v0, %s10783_s7 }
 0x418   : > { %6224 = vrot.lane.b32.xlu0 %v14282_v48, %s10783_s7  ;;  %v14389_v50 = vpop.permute.xlu1 %2838 }
 0x419   : > { %v2853_v37 = vpop.permute.xlu0 %2852 }
 0x41a   : > { %v2857_v57 = vsel %vm437_vm1, %v16960_v3, %v2853_v37 }
 0x41c   : > { %6220 = vrot.lane.b32.xlu0 %v14299_v52, %s10783_s7  ;;  %v14408_v30 = vpop.permute.xlu1 %2906 }
 0x41e   : > { %v14375_v40 = vpop.permute.xlu0 %2596 }
 0x420   : > { %6216 = vrot.lane.b32.xlu0 %v14372_v14, %s10783_s7  ;;  %v14417_v5 = vpop.permute.xlu1 %5441 }
 0x422   : > { %v2645_v6 = vpop.permute.xlu0 %2644 }
 0x424   : > { %6212 = vrot.lane.b32.xlu0 %v14381_v34, %s10783_s7  ;;  %v2865_v34 = vadd.f32 %v2857_v57, %v2821_v15  ;;  %v14424_v37 = vpop.permute.xlu1 %2698  ;;  %v9912_v15 = vpop.f32.mrf.mxu0 }
 0x425   : > { %v14432_v20 = vadd.f32 %v9932_v23, %v9912_v15 }
 0x426   : > { %v2713_v62 = vpop.permute.xlu0 %2712 }
 0x427   : > { %v2717_v45 = vsel %vm437_vm1, %v16961_v41, %v2713_v62 }
 0x428   : > { %v2725_v60 = vadd.f32 %v2717_v45, %v2661_v10  ;;  %v14436_v13 = vpop.permute.xlu1 %2902  ;;  %v16967_v45 = vld [vmem:[#allocation57_spill] sm:$0xff] }
 0x429   : > { %v2768_v10 = vsel %vm437_vm1, %v16967_v45, %v14234_v47 }
 0x42a   : > { %v14387_v25 = vpop.permute.xlu0 %2752 }
 0x42c   : > { %v14459_v23 = vpop.permute.xlu1 %5437 }
 0x42e   : > { %v14395_v63 = vpop.permute.xlu0 %2800 }
 0x432   : > { %v2849_v0 = vpop.permute.xlu0 %2848 }
 0x436   : > { %v2917_v11 = vpop.permute.xlu0 %2916 }
 0x437   : > { %v2921_v36 = vsel %vm437_vm1, %v16962_v59, %v2917_v11  ;;  %v2728_v59 = vmul.f32 %v14145_v19, %v16936_v7 }
 0x438   : > { %v2929_v16 = vadd.f32 %v2921_v36, %v2865_v34  ;;  %v14434_v34 = vpop.f32.mrf.mxu0 }
 0x439   : > { %16964 = vst [vmem:[#allocation76_spill] sm:$0xff] %v14434_v34  ;;  %v2856_v34 = vsel %vm437_vm1, %v16973_v33, %v2849_v0 }
 0x43a   : > { %v2949_v39 = vmax.f32 %v2725_v60, %v2929_v16  ;;  %v14421_v9 = vpop.permute.xlu0 %2592  ;;  %v16969_v60 = vld [vmem:[#allocation50_spill] sm:$0xff] }
 0x43b   : > { %v2608_v16 = vsel %vm437_vm1, %v16969_v60, %v14280_v8  ;;  %v16975_v60 = vld [vmem:[#allocation28_spill] sm:$0xff] }
 0x43c   : > { %v2953_v46 = vadd.f32 %v2949_v39, %v16940_v29  ;;  %v9915_v39 = vpop.f32.mrf.mxu0  ;;  %v9935_v29 = vpop.f32.mrf.mxu1 }
 0x43d   : > { %v14442_v3 = vadd.f32 %v9935_v29, %v9915_v39  ;;  %v2776_v29 = vadd.f32 %v2768_v10, %v2728_v59 }
 0x43e   : > { %v14426_v17 = vmax.f32 %v2953_v46, 0.0  ;;  %v14428_v41 = vpop.permute.xlu0 %2640  ;;  %v14444_v57 = vpop.f32.mrf.mxu0  ;;  %v16970_v46 = vld [vmem:[#allocation52_spill] sm:$0xff] }
 0x43f   : > { %16966 = vst [vmem:[#allocation20_spill] sm:$0xff] %v14444_v57  ;;  %v14449_v11 = vpop.f32.mrf.mxu1  ;;  %v2812_v15 = vsel %vm437_vm1, %v16970_v46, %v14356_v24 }
 0x440   : > { %16963 = vst [vmem:[#allocation77_spill] sm:$0xff] %v14426_v17  ;;  %6619 = vrot.lane.b32.xlu0 %v14426_v17, %s10783_s7  ;;  %16968 = vst [vmem:[#allocation46_spill] sm:$0xff] %v14449_v11  ;;  %v9918_v36 = vpop.f32.mrf.mxu0  ;;  %v16972_v11 = vld [vmem:[#allocation44_spill] sm:$0xff]  ;;  %v2616_v17 = vadd.f32 %v2608_v16, %v16975_v60  ;;  %v2820_v24 = vadd.f32 %v2812_v15, %v2776_v29 }
 0x441   : > { %v9938_v39 = vpop.f32.mrf.mxu1  ;;  %v2652_v7 = vsel %vm437_vm1, %v16972_v11, %v2645_v6  ;;  %v14478_v6 = vpop.permute.xlu1 %5433 }
 0x442   : > { %v2709_v62 = vpop.permute.xlu0 %2708  ;;  %v14461_v47 = vadd.f32 %v9938_v39, %v9918_v36  ;;  %v14463_v45 = vpop.f32.mrf.mxu0  ;;  %v2660_v36 = vadd.f32 %v2652_v7, %v2616_v17  ;;  %v2864_v39 = vadd.f32 %v2856_v34, %v2820_v24 }
 0x443   : > { %16971 = vst [vmem:[#allocation26_spill] sm:$0xff] %v14463_v45  ;;  %v14469_v8 = vpop.f32.mrf.mxu1  ;;  %v2716_v10 = vsel %vm437_vm1, %v14274_v54, %v2709_v62 }
 0x444   : > { %16974 = vst [vmem:[#allocation11_spill] sm:$0xff] %v14469_v8  ;;  %v9921_v46 = vpop.f32.mrf.mxu0  ;;  %v2724_v11 = vadd.f32 %v2716_v10, %v2660_v36 }
 0x445   : > { %v9941_v59 = vpop.f32.mrf.mxu1 }
 0x446   : > { %v14440_v27 = vpop.permute.xlu0 %2796  ;;  %v14474_v45 = vadd.f32 %v9941_v59, %v9921_v46  ;;  %v14476_v14 = vpop.f32.mrf.mxu0 }
 0x447   : > { %16976 = vst [vmem:[#allocation16_spill] sm:$0xff] %v14476_v14  ;;  %v14482_v33 = vpop.f32.mrf.mxu1 }
 0x448   : > { %16977 = vst [vmem:[#allocation23_spill] sm:$0xff] %v14482_v33  ;;  %v9952_v15 = vpop.f32.mrf.mxu0 }
 0x449   : > { %v9972_v29 = vpop.f32.mrf.mxu1 }
 0x44a   : > { %v2845_v57 = vpop.permute.xlu0 %2844  ;;  %v3459_v17 = vadd.f32 %v9972_v29, %v9952_v15  ;;  %v14484_v34 = vpop.f32.mrf.mxu0  ;;  %v16982_v29 = vld [vmem:[#allocation88_spill] sm:$0xff] }
 0x44b   : > { %v14488_v60 = vpop.f32.mrf.mxu1 }
 0x44c   : > { %16978 = vst [vmem:[#allocation48_spill] sm:$0xff] %v14488_v60 }
 0x44d   : > { %v9975_v46 = vpop.f32.mrf.mxu1 }
 0x44e   : > { %v2913_v4 = vpop.permute.xlu0 %2912 }
 0x44f   : > { %v2920_v0 = vsel %vm437_vm1, %v14354_v55, %v2913_v4  ;;  %v9955_v4 = vpop.f32.mrf.mxu0  ;;  %v14491_v55 = vpop.permute.xlu1 %5727 }
 0x450   : > { %v2928_v16 = vadd.f32 %v2920_v0, %v2864_v39  ;;  %v3469_v36 = vadd.f32 %v9975_v46, %v9955_v4  ;;  %v16984_v46 = vld [vmem:[#allocation40_spill] sm:$0xff] }
 0x451   : > { %v14497_v39 = vpop.f32.mrf.mxu0  ;;  %v2607_v33 = vsel %vm437_vm1, %v16984_v46, %v14375_v40  ;;  %v16987_v40 = vld [vmem:[#allocation29_spill] sm:$0xff] }
 0x452   : > { %v2948_v54 = vmax.f32 %v2724_v11, %v2928_v16  ;;  %v5448_v62 = vpop.permute.xlu0 %5447  ;;  %16979 = vst [vmem:[#allocation25_spill] sm:$0xff] %v14497_v39  ;;  %v2615_v46 = vadd.f32 %v2607_v33, %v16987_v40 }
 0x453   : > { %v5452_v7 = vsel %vm3953_vm2, %v14367_v26, %v5448_v62  ;;  %v14499_v26 = vpop.f32.mrf.mxu1  ;;  %v14508_v62 = vpop.permute.xlu1 %5723 }
 0x454   : > { %v2952_v24 = vadd.f32 %v2948_v54, %v16843_v43  ;;  %10242 = vmatprep.subr.mxu1 %v5452_v7  ;;  %10262 = vmatprep.subr.mxu0 %v5452_v7  ;;  %16980 = vst [vmem:[#allocation61_spill] sm:$0xff] %v14499_v26  ;;  %v9958_v43 = vpop.f32.mrf.mxu0  ;;  %v2767_v54 = vsel %vm437_vm1, %v16982_v29, %v14333_v1 }
 0x455   : > { %10243 = vmatpush3.msra.mxu1 %v5452_v7  ;;  %10263 = vmatpush3.msra.mxu0 %v5452_v7  ;;  %v9978_v0 = vpop.f32.mrf.mxu1 }
 0x456   : > { %v14493_v10 = vmax.f32 %v2952_v24, 0.0  ;;  %v14495_v59 = vpop.permute.xlu0 %2636  ;;  %v3479_v16 = vadd.f32 %v9978_v0, %v9958_v43  ;;  %v14503_v15 = vpop.f32.mrf.mxu0  ;;  %v2727_v24 = vmul.f32 %v14145_v19, %v16722_v21  ;;  %v16985_v43 = vld [vmem:[#allocation39_spill] sm:$0xff]  ;;  %v2651_v21 = vsel %vm437_vm1, %v14244_v51, %v14428_v41 }
 0x457   : > { %16981 = vst [vmem:[#allocation98_spill] sm:$0xff] %v14503_v15  ;;  %v14510_v7 = vpop.f32.mrf.mxu1  ;;  %v2811_v0 = vsel %vm437_vm1, %v16985_v43, %v14395_v63  ;;  %v14532_v43 = vpop.permute.xlu1 %5719 }
 0x458   : > { %6615 = vrot.lane.b32.xlu0 %v14493_v10, %s10783_s7  ;;  %16983 = vst [vmem:[#allocation82_spill] sm:$0xff] %v14510_v7  ;;  %v9961_v4 = vpop.f32.mrf.mxu0  ;;  %v2775_v15 = vadd.f32 %v2767_v54, %v2727_v24  ;;  %v2855_v7 = vsel %vm437_vm1, %v14324_v38, %v2845_v57 }
 0x459   : > { %v9981_v14 = vpop.f32.mrf.mxu1 }
 0x45a   : > { %v2705_v11 = vpop.permute.xlu0 %2704  ;;  %v14520_v1 = vadd.f32 %v9981_v14, %v9961_v4  ;;  %v14522_v29 = vpop.f32.mrf.mxu0  ;;  %v2819_v39 = vadd.f32 %v2811_v0, %v2775_v15  ;;  %v2659_v4 = vadd.f32 %v2651_v21, %v2615_v46 }
 0x45b   : > { %16986 = vst [vmem:[#allocation95_spill] sm:$0xff] %v14522_v29  ;;  %v14529_v26 = vpop.f32.mrf.mxu1  ;;  %v2715_v14 = vsel %vm437_vm1, %v14385_v28, %v2705_v11 }
 0x45c   : > { %v9992_v63 = vpop.f32.mrf.mxu0  ;;  %v2863_v29 = vadd.f32 %v2855_v7, %v2819_v39  ;;  %v2723_v33 = vadd.f32 %v2715_v14, %v2659_v4  ;;  %v2606_v14 = vsel %vm437_vm1, %v14178_v58, %v14421_v9  ;;  %v2650_v58 = vsel %vm437_vm1, %v14377_v56, %v14495_v59 }
 0x45d   : > { %v3639_v54 = vadd.f32 %v9992_v63, %v14432_v20  ;;  %v10012_v24 = vpop.f32.mrf.mxu1 }
 0x45e   : > { %v2841_v8 = vpop.permute.xlu0 %2840  ;;  %v3784_v41 = vadd.f32 %v10012_v24, %v3459_v17  ;;  %v14537_v60 = vpop.f32.mrf.mxu0  ;;  %v16988_v17 = vld [vmem:[#allocation37_spill] sm:$0xff] }
 0x45f   : > { %v14541_v57 = vpop.f32.mrf.mxu1  ;;  %v2766_v7 = vsel %vm437_vm1, %v16988_v17, %v14387_v25  ;;  %v2810_v25 = vsel %vm437_vm1, %v14295_v49, %v14440_v27  ;;  %v2854_v9 = vsel %vm437_vm1, %v14389_v50, %v2841_v8  ;;  %v16989_v27 = vld [vmem:[#allocation30_spill] sm:$0xff] }
 0x460   : > { %v9995_v0 = vpop.f32.mrf.mxu0 }
 0x461   : > { %v14544_v40 = vadd.f32 %v9995_v0, %v14442_v3  ;;  %v10015_v28 = vpop.f32.mrf.mxu1  ;;  %v2726_v3 = vmul.f32 %v14145_v19, %v16942_v22 }
 0x462   : > { %v2909_v51 = vpop.permute.xlu0 %2908  ;;  %v14546_v21 = vadd.f32 %v10015_v28, %v3469_v36  ;;  %v14548_v39 = vpop.f32.mrf.mxu0 }
 0x463   : > { %v2919_v38 = vsel %vm437_vm1, %v14408_v30, %v2909_v51  ;;  %v14553_v30 = vpop.permute.xlu1 %5715  ;;  %v14557_v46 = vpop.f32.mrf.mxu1  ;;  %v2774_v4 = vadd.f32 %v2766_v7, %v2726_v3 }
 0x464   : > { %v2927_v15 = vadd.f32 %v2919_v38, %v2863_v29  ;;  %v9998_v36 = vpop.f32.mrf.mxu0  ;;  %v2614_v38 = vadd.f32 %v2606_v14, %v16989_v27 }
 0x465   : > { %v10018_v24 = vpop.f32.mrf.mxu1 }
 0x466   : > { %v2947_v20 = vmax.f32 %v2723_v33, %v2927_v15  ;;  %v5444_v11 = vpop.permute.xlu0 %5443  ;;  %v14571_v51 = vpop.f32.mrf.mxu0  ;;  %v2658_v8 = vadd.f32 %v2650_v58, %v2614_v38 }
 0x467   : > { %v5451_v29 = vsel %vm3953_vm2, %v14417_v5, %v5444_v11  ;;  %v3643_v5 = vadd.f32 %v9998_v36, %v14461_v47  ;;  %v14578_v49 = vpop.f32.mrf.mxu1  ;;  %v2818_v47 = vadd.f32 %v2810_v25, %v2774_v4  ;;  %v14585_v33 = vpop.permute.xlu1 %6222 }
 0x468   : > { %v2951_v63 = vadd.f32 %v2947_v20, %v16949_v61  ;;  %10244 = vmatprep.subr.mxu1 %v5451_v29  ;;  %10264 = vmatprep.subr.mxu0 %v5451_v29  ;;  %v3788_v61 = vadd.f32 %v10018_v24, %v3479_v16  ;;  %v10001_v16 = vpop.f32.mrf.mxu0 }
 0x469   : > { %10245 = vmatpush3.msra.mxu1 %v5451_v29  ;;  %10265 = vmatpush3.msra.mxu0 %v5451_v29  ;;  %v3645_v59 = vadd.f32 %v10001_v16, %v14474_v45  ;;  %v10021_v50 = vpop.f32.mrf.mxu1  ;;  %v2862_v15 = vadd.f32 %v2854_v9, %v2818_v47 }
 0x46a   : > { %v14569_v19 = vmax.f32 %v2951_v63, 0.0  ;;  %v2701_v22 = vpop.permute.xlu0 %2700  ;;  %v3790_v28 = vadd.f32 %v10021_v50, %v14520_v1  ;;  %v14591_v20 = vpop.f32.mrf.mxu0 }
 0x46b   : > { %v2714_v56 = vsel %vm437_vm1, %v14424_v37, %v2701_v22  ;;  %v14595_v17 = vpop.f32.mrf.mxu1  ;;  %v14603_v1 = vpop.permute.xlu1 %6218 }
 0x46c   : > { %8067 = vrot.lane.b32.xlu1 %v14569_v19, %s10783_s7  ;;  %6611 = vrot.lane.b32.xlu0 %v14569_v19, %s10783_s7  ;;  %v2722_v7 = vadd.f32 %v2714_v56, %v2658_v8  ;;  %v10032_v3 = vpop.f32.mrf.mxu0 }
 0x46d   : > { %v14597_v63 = vadd.f32 %v10032_v3, %v3639_v54  ;;  %v10052_v37 = vpop.f32.mrf.mxu1 }
 0x46e   : > { %v2905_v0 = vpop.permute.xlu0 %2904  ;;  %v14599_v14 = vadd.f32 %v10052_v37, %v3784_v41  ;;  %v14601_v25 = vpop.f32.mrf.mxu0 }
 0x46f   : > { %v2918_v11 = vsel %vm437_vm1, %v14436_v13, %v2905_v0  ;;  %v14607_v13 = vpop.f32.mrf.mxu1  ;;  %v14628_v47 = vpop.permute.xlu1 %6214 }
 0x470   : > { %v2926_v29 = vadd.f32 %v2918_v11, %v2862_v15  ;;  %v10035_v54 = vpop.f32.mrf.mxu0  ;;  %v16991_v15 = vld [vmem:[#allocation14_spill] sm:$0xff] }
 0x471   : > { %v14611_v22 = vadd.f32 %v10035_v54, %v14544_v40  ;;  %v10055_v41 = vpop.f32.mrf.mxu1 }
 0x472   : > { %v2946_v45 = vmax.f32 %v2722_v7, %v2926_v29  ;;  %v5440_v36 = vpop.permute.xlu0 %5439  ;;  %v14616_v27 = vadd.f32 %v10055_v41, %v14546_v21  ;;  %v14633_v21 = vld [vmem:[%s16227_s3 + $0x108] sm:$0xff] }
 0x473   : > { %v5450_v24 = vsel %vm3953_vm2, %v14459_v23, %v5440_v36  ;;  %v14618_v23 = vpop.f32.mrf.mxu0  ;;  %v14622_v38 = vpop.f32.mrf.mxu1 }
 0x474   : > { %v2950_v4 = vadd.f32 %v2946_v45, %v16951_v42  ;;  %10246 = vmatprep.subr.mxu1 %v5450_v24  ;;  %10266 = vmatprep.subr.mxu0 %v5450_v24  ;;  %v14667_v45 = vpop.permute.xlu1 %6210 }
 0x475   : > { %10247 = vmatpush3.msra.mxu1 %v5450_v24  ;;  %10267 = vmatpush3.msra.mxu0 %v5450_v24  ;;  %v10038_v40 = vpop.f32.mrf.mxu0 }
 0x476   : > { %v14613_v58 = vmax.f32 %v2950_v4, 0.0  ;;  %v5436_v9 = vpop.permute.xlu0 %5435  ;;  %v14635_v16 = vadd.f32 %v10038_v40, %v3643_v5 }
 0x477   : > { %v5449_v42 = vsel %vm3953_vm2, %v14478_v6, %v5436_v9  ;;  %v10058_v6 = vpop.f32.mrf.mxu1  ;;  %v14639_v8 = vpop.f32.mrf.mxu0 }
 0x478   : > { %8063 = vrot.lane.b32.xlu1 %v14613_v58, %s10783_s7  ;;  %6607 = vrot.lane.b32.xlu0 %v14613_v58, %s10783_s7  ;;  %v14637_v50 = vadd.f32 %v10058_v6, %v3788_v61  ;;  %16990 = vst [vmem:[#allocation58_spill] sm:$0xff] %v14639_v8  ;;  %v14658_v61 = vld [vmem:[%s16227_s3 + $0x110] sm:$0xff]  ;;  %v14716_v40 = vpop.permute.xlu1 %6617 }
 0x479   : > { %10248 = vmatprep.subr.mxu1 %v5449_v42  ;;  %10268 = vmatprep.subr.mxu0 %v5449_v42  ;;  %v14646_v11 = vpop.f32.mrf.mxu1  ;;  %v10041_v5 = vpop.f32.mrf.mxu0 }
 0x47a   : > { %10249 = vmatpush3.msra.mxu1 %v5449_v42  ;;  %10269 = vmatpush3.msra.mxu0 %v5449_v42  ;;  %v5730_v56 = vpop.permute.xlu0 %5729  ;;  %16992 = vst [vmem:[#allocation12_spill] sm:$0xff] %v14646_v11 }
 0x47b   : > { %10302 = vmatprep.subr.mxu0 %v16927_v31  ;;  %10251 = vmatmul.mubr.msk.f32.vlgmr.msra.gmra.mxu1 %vm2991_vm0, %v16991_v15  ;;  %v5734_v0 = vsel %vm3953_vm2, %v14491_v55, %v5730_v56  ;;  %v14660_v55 = vadd.f32 %v10041_v5, %v3645_v59  ;;  %v10061_v7 = vpop.f32.mrf.mxu1  ;;  %v14665_v37 = vpop.f32.mrf.mxu0  ;;  %v14674_v59 = vld [vmem:[%s16227_s3 + $0x118] sm:$0xff] }
 0x47c   : > { %10271 = vmatmul.mubr.msk.f32.vlgmr.msra.gmra.mxu0 %vm2991_vm0, %v14633_v21  ;;  %8357 = vrot.lane.b32.xlu1 %v14282_v48, %s10784_s10  ;;  %v14663_v3 = vadd.f32 %v10061_v7, %v3790_v28  ;;  %16993 = vst [vmem:[#allocation47_spill] sm:$0xff] %v14665_v37 }
 0x47d   : > { %10303 = vmatpush3.msra.mxu0 %v16927_v31  ;;  %6901 = vrot.lane.b32.xlu0 %v14282_v48, %s10784_s10  ;;  %v14676_v36 = vpop.f32.mrf.mxu1  ;;  %v10072_v28 = vpop.f32.mrf.mxu0 }
 0x47e   : > { %10282 = vmatprep.subr.mxu1 %v5734_v0  ;;  %10304 = vmatprep.subr.mxu0 %v13448_v18  ;;  %v5726_v29 = vpop.permute.xlu0 %5725  ;;  %16994 = vst [vmem:[#allocation97_spill] sm:$0xff] %v14676_v36  ;;  %v14687_v24 = vadd.f32 %v10072_v28, %v14597_v63  ;;  %v14712_v63 = vld [vmem:[%s16227_s3 + $0x128] sm:$0xff] }
 0x47f   : > { %10253 = vmatprep.mubr.msk.f32.mxu1 %vm2991_vm0, %v14193_v32  ;;  %10283 = vmatpush3.msra.mxu1 %v5734_v0  ;;  %v5733_v32 = vsel %vm3953_vm2, %v14508_v62, %v5726_v29  ;;  %v10092_v4 = vpop.f32.mrf.mxu1  ;;  %v14696_v9 = vpop.f32.mrf.mxu0 }
 0x480   : > { %10305 = vmatpush3.msra.mxu0 %v13448_v18  ;;  %10273 = vmatprep.mubr.msk.f32.mxu0 %vm2991_vm0, %v14658_v61  ;;  %16995 = vst [vmem:[#allocation83_spill] sm:$0xff] %v14687_v24  ;;  %v14694_v41 = vadd.f32 %v10092_v4, %v14599_v14 }
 0x481   : > { %10306 = vmatprep.subr.mxu0 %v13523_v2  ;;  %10254 = vmatmul.mubr.msk.f32.gmra.mxu1 %vm2991_vm0, %v14198_v12  ;;  %v14704_v12 = vld [vmem:[%s16227_s3 + $0x120] sm:$0xff]  ;;  %v14706_v62 = vpop.f32.mrf.mxu1  ;;  %v10075_v42 = vpop.f32.mrf.mxu0 }
 0x482   : > { %10274 = vmatmul.mubr.msk.f32.gmra.mxu0 %vm2991_vm0, %v14674_v59  ;;  %8353 = vrot.lane.b32.xlu1 %v14299_v52, %s10784_s10  ;;  %v5722_v54 = vpop.permute.xlu0 %5721  ;;  %16996 = vst [vmem:[#allocation19_spill] sm:$0xff] %v14694_v41  ;;  %v14721_v6 = vadd.f32 %v10075_v42, %v14611_v22 }
 0x483   : > { %10307 = vmatpush3.msra.mxu0 %v13523_v2  ;;  %6897 = vrot.lane.b32.xlu0 %v14299_v52, %s10784_s10  ;;  %v10095_v56 = vpop.f32.mrf.mxu1  ;;  %v5732_v15 = vsel %vm3953_vm2, %v14532_v43, %v5722_v54  ;;  %v14731_v7 = vpop.f32.mrf.mxu0  ;;  %v16999_v43 = vmov 0.0  }
 0x484   : > { %10284 = vmatprep.subr.mxu1 %v5733_v32  ;;  %10308 = vmatprep.subr.mxu0 %v13554_v35  ;;  %16997 = vst [vmem:[#allocation73_spill] sm:$0xff] %v14721_v6  ;;  %v14729_v5 = vadd.f32 %v10095_v56, %v14616_v27  ;;  %v17000_v27 = vld [vmem:[#allocation60_spill] sm:$0xff] }
 0x485   : > { %10256 = vmatprep.mubr.msk.f32.mxu1 %vm2991_vm0, %v14203_v44  ;;  %10285 = vmatpush3.msra.mxu1 %v5733_v32  ;;  %v14740_v44 = vld [vmem:[%s16227_s3 + $0x130] sm:$0xff]  ;;  %v14742_v22 = vpop.f32.mrf.mxu1  ;;  %v10078_v28 = vpop.f32.mrf.mxu0  ;;  %v17001_v32 = vld [vmem:[#allocation65_spill] sm:$0xff] }
 0x486   : > { %10309 = vmatpush3.msra.mxu0 %v13554_v35  ;;  %10276 = vmatprep.mubr.msk.f32.mxu0 %vm2991_vm0, %v14704_v12  ;;  %v5718_v0 = vpop.permute.xlu0 %5717  ;;  %16998 = vst [vmem:[#allocation43_spill] sm:$0xff] %v14729_v5  ;;  %v14758_v4 = vadd.f32 %v10078_v28, %v14635_v16  ;;  %v14769_v5 = vpop.permute.xlu1 %6613  ;;  %v14778_v16 = vld [vmem:[%s16227_s3 + $0x40] sm:$0xff]  ;;  %v17008_v28 = vld [vmem:[#allocation86_spill] sm:$0xff] }
 0x487   : > { %10257 = vmatmul.mubr.msk.f32.gmra.mxu1 %vm2991_vm0, %v14226_v53  ;;  %10277 = vmatmul.mubr.msk.f32.gmra.mxu0 %vm2991_vm0, %v14712_v63  ;;  %v14751_v53 = vld [vmem:[%s16227_s3 + $0x138] sm:$0xff]  ;;  %v10098_v54 = vpop.f32.mrf.mxu1  ;;  %v5731_v42 = vsel %vm3953_vm2, %v14553_v30, %v5718_v0  ;;  %v14767_v29 = vpop.f32.mrf.mxu0 }
 0x488   : > { %8351 = vrot.lane.b32.xlu1 %v16999_v43, %s10784_s10  ;;  %6893 = vrot.lane.b32.xlu0 %v17000_v27, %s10784_s10  ;;  %17002 = vst [vmem:[#allocation59_spill] sm:$0xff] %v14758_v4  ;;  %v14765_v14 = vadd.f32 %v10098_v54, %v14637_v50  ;;  %17004 = vst [vmem:[#allocation36_spill] sm:$0xff] %v14767_v29  ;;  %v17007_v50 = vld [vmem:[#allocation63_spill] sm:$0xff]  ;;  %v14793_v54 = vld [vmem:[%s16227_s3 + $0x48] sm:$0xff] }
 0x489   : > { %10286 = vmatprep.subr.mxu1 %v5732_v15  ;;  %10259 = vmatprep.mubr.msk.f32.mxu1 %vm2991_vm0, %v17001_v32  ;;  %v17005_v32 = vld [vmem:[#allocation62_spill] sm:$0xff]  ;;  %v14780_v30 = vpop.f32.mrf.mxu1  ;;  %v10081_v0 = vpop.f32.mrf.mxu0 }
 0x48a   : > { %10287 = vmatpush3.msra.mxu1 %v5732_v15  ;;  %10279 = vmatprep.mubr.msk.f32.mxu0 %vm2991_vm0, %v14740_v44  ;;  %v6225_v56 = vpop.permute.xlu0 %6224  ;;  %17003 = vst [vmem:[#allocation71_spill] sm:$0xff] %v14765_v14  ;;  %17006 = vst [vmem:[#allocation53_spill] sm:$0xff] %v14780_v30  ;;  %v17012_v4 = vld [vmem:[#allocation18_spill] sm:$0xff] }
 0x48b   : > { %10260 = vmatmul.mubr.msk.f32.gmra.mxu1 %vm2991_vm0, %v17005_v32  ;;  %10280 = vmatmul.mubr.msk.f32.gmra.mxu0 %vm2991_vm0, %v14751_v53  ;;  %v14796_v32 = vadd.f32 %v10081_v0, %v14660_v55  ;;  %v10101_v6 = vpop.f32.mrf.mxu1  ;;  %v14803_v14 = vpop.f32.mrf.mxu0  ;;  %v17015_v0 = vld [vmem:[#allocation54_spill] sm:$0xff] }
 0x48c   : > { %8347 = vrot.lane.b32.xlu1 %v16999_v43, %s10784_s10  ;;  %6889 = vrot.lane.b32.xlu0 %v17007_v50, %s10784_s10  ;;  %v14801_v15 = vadd.f32 %v10101_v6, %v14663_v3  ;;  %17011 = vst [vmem:[#allocation21_spill] sm:$0xff] %v14803_v14 }
 0x48d   : > { %10288 = vmatprep.subr.mxu1 %v5731_v42  ;;  %10290 = vmatprep.mubr.msk.f32.mxu1 %vm2991_vm0, %v17008_v28  ;;  %17009 = vst [vmem:[#allocation84_spill] sm:$0xff] %v14796_v32  ;;  %v14807_v28 = vsel %vm437_vm1, %v14585_v33, %v6225_v56  ;;  %v10112_v6 = vpop.f32.mrf.mxu0  ;;  %v17013_v33 = vld [vmem:[#allocation77_spill] sm:$0xff]  ;;  %v14823_v56 = vpop.f32.mrf.mxu1 }
 0x48e   : > { %10289 = vmatpush3.msra.mxu1 %v5731_v42  ;;  %10310 = vmatprep.mubr.msk.f32.mxu0 %vm2991_vm0, %v14778_v16  ;;  %17010 = vst [vmem:[#allocation78_spill] sm:$0xff] %v14801_v15  ;;  %v6221_v55 = vpop.permute.xlu0 %6220  ;;  %v14817_v42 = vpop.permute.xlu1 %6609  ;;  %17014 = vst [vmem:[#allocation9_spill] sm:$0xff] %v14823_v56  ;;  %v14840_v15 = vld [vmem:[%s16227_s3 + $0x58] sm:$0xff] }
 0x48f   : > { %10291 = vmatmul.mubr.msk.f32.vlgmr.msra.gmra.mxu1 %vm2991_vm0, %v14633_v21  ;;  %10322 = vmatprep.subr.mxu1 %v17012_v4  ;;  %v14832_v3 = vpop.f32.mrf.mxu0  ;;  %v10132_v32 = vpop.f32.mrf.mxu1 }
 0x490   : > { %10311 = vmatmul.mubr.msk.f32.vlgmr.msra.gmra.mxu0 %vm2991_vm0, %v14793_v54  ;;  %10323 = vmatpush3.msra.mxu1 %v17012_v4  ;;  %v14830_v4 = vld [vmem:[%s16227_s3 + $0x50] sm:$0xff]  ;;  %17016 = vst [vmem:[#allocation27_spill] sm:$0xff] %v14832_v3  ;;  %v14845_v24 = vadd.f32 %v10132_v32, %v10112_v6  ;;  %v14849_v3 = vsel %vm437_vm1, %v14603_v1, %v6221_v55  ;;  %v17020_v1 = vld [vmem:[#allocation79_spill] sm:$0xff]  ;;  %v14870_v32 = vld [vmem:[%s16227_s3 + $0x60] sm:$0xff] }
 0x491   : > { %10746 = vrot.lane.b32.xlu1 %v16999_v43, %s10784_s10  ;;  %7183 = vrot.lane.b32.xlu0 %v17013_v33, %s10784_s10  ;;  %v10115_v41 = vpop.f32.mrf.mxu0  ;;  %v14857_v14 = vpop.f32.mrf.mxu1  ;;  %v14880_v6 = vld [vmem:[%s16227_s3 + $0x68] sm:$0xff] }
 0x492   : > { %10324 = vmatprep.subr.mxu1 %v17015_v0  ;;  %10342 = vmatprep.subr.mxu0 %v14807_v28  ;;  %17017 = vst [vmem:[#allocation67_spill] sm:$0xff] %v14845_v24  ;;  %v6217_v56 = vpop.permute.xlu0 %6216  ;;  %17019 = vst [vmem:[#allocation32_spill] sm:$0xff] %v14857_v14  ;;  %v14859_v30 = vpop.permute.xlu1 %6605 }
 0x493   : > { %10293 = vmatprep.mubr.msk.f32.mxu1 %vm2991_vm0, %v14658_v61  ;;  %10325 = vmatpush3.msra.mxu1 %v17015_v0  ;;  %v17018_v0 = vld [vmem:[#allocation89_spill] sm:$0xff]  ;;  %v14872_v55 = vpop.f32.mrf.mxu0  ;;  %17022 = vst [vmem:[#allocation70_spill] sm:$0xff] %v14880_v6  ;;  %v10135_v24 = vpop.f32.mrf.mxu1 }
 0x494   : > { %10343 = vmatpush3.msra.mxu0 %v14807_v28  ;;  %10294 = vmatmul.mubr.msk.f32.gmra.mxu1 %vm2991_vm0, %v14674_v59  ;;  %17021 = vst [vmem:[#allocation64_spill] sm:$0xff] %v14872_v55  ;;  %v14890_v55 = vadd.f32 %v10135_v24, %v10115_v41  ;;  %v14910_v24 = vld [vmem:[%s16227_s3 + $0x78] sm:$0xff]  ;;  %v233_v41 = vld [vmem:[%s16228_s4] sm:$0xff] }
 0x495   : > { %10313 = vmatprep.mubr.msk.f32.mxu0 %vm2991_vm0, %v14830_v4  ;;  %10326 = vmatprep.subr.mxu1 %v17018_v0  ;;  %v14901_v14 = vpop.f32.mrf.mxu1  ;;  %17026 = vst [vmem:[#allocation42_spill] sm:$0xff] %v14910_v24 }
 0x496   : > { %10314 = vmatmul.mubr.msk.f32.gmra.mxu0 %vm2991_vm0, %v14840_v15  ;;  %10327 = vmatpush3.msra.mxu1 %v17018_v0  ;;  %v6227_v0 = vsel %vm437_vm1, %v14628_v47, %v6217_v56  ;;  %17023 = vst [vmem:[#allocation75_spill] sm:$0xff] %v14890_v55  ;;  %v14899_v47 = vld [vmem:[%s16227_s3 + $0x70] sm:$0xff]  ;;  %v10118_v56 = vpop.f32.mrf.mxu0  ;;  %17025 = vst [vmem:[#allocation85_spill] sm:$0xff] %v14901_v14  ;;  %v14903_v29 = vpop.permute.xlu1 %6899  ;;  %v14926_v14 = vld [vmem:[%s16227_s3] sm:$0xff] }
 0x497   : > { %8631 = vrot.lane.b32.xlu1 %v14569_v19, %s10784_s10  ;;  %7179 = vrot.lane.b32.xlu0 %v14493_v10, %s10784_s10  ;;  %17024 = vst [vmem:[#allocation72_spill] sm:$0xff] %v14899_v47  ;;  %17027 = vst [vmem:[#allocation45_spill] sm:$0xff] %v14926_v14  ;;  %v10138_v36 = vpop.f32.mrf.mxu1 }
 0x498   : > { %10328 = vmatprep.subr.mxu1 %v17020_v1  ;;  %10344 = vmatprep.subr.mxu0 %v14849_v3  ;;  %v14937_v37 = vadd.f32 %v10138_v36, %v10118_v56  ;;  %v235_v36 = vld [vmem:[%s16228_s4 + $0x10] sm:$0xff] }
 0x499   : > { %10296 = vmatprep.mubr.msk.f32.mxu1 %vm2991_vm0, %v14704_v12  ;;  %10329 = vmatpush3.msra.mxu1 %v17020_v1  ;;  %v6213_v1 = vpop.permute.xlu0 %6212  ;;  %v14943_v11 = vpop.f32.mrf.mxu1 }
 0x49a   : > { %10345 = vmatpush3.msra.mxu0 %v14849_v3  ;;  %10297 = vmatmul.mubr.msk.f32.gmra.mxu1 %vm2991_vm0, %v14712_v63  ;;  %v6226_v55 = vsel %vm437_vm1, %v14667_v45, %v6213_v1  ;;  %v14933_v45 = vld [vmem:[%s16227_s3 + $0x8] sm:$0xff]  ;;  %v14935_v1 = vpop.f32.mrf.mxu0  ;;  %17030 = vst [vmem:[#allocation68_spill] sm:$0xff] %v14937_v37  ;;  %17031 = vst [vmem:[#allocation96_spill] sm:$0xff] %v14943_v11 }
 0x49b   : > { %10316 = vmatprep.mubr.msk.f32.mxu0 %vm2991_vm0, %v14870_v32  ;;  %10362 = vmatprep.subr.mxu1 %v16927_v31  ;;  %17028 = vst [vmem:[#allocation80_spill] sm:$0xff] %v14933_v45  ;;  %17029 = vst [vmem:[#allocation66_spill] sm:$0xff] %v14935_v1  ;;  %v10141_v37 = vpop.f32.mrf.mxu1 }
 0x49c   : > { %10317 = vmatmul.mubr.msk.f32.gmra.mxu0 %vm2991_vm0, %v14880_v6  ;;  %8627 = vrot.lane.b32.xlu1 %v14613_v58, %s10784_s10  ;;  %v10121_v56 = vpop.f32.mrf.mxu0 }
 0x49d   : > { %7175 = vrot.lane.b32.xlu0 %v14569_v19, %s10784_s10  ;;  %10346 = vmatprep.subr.mxu0 %v6227_v0  ;;  %v14959_v11 = vadd.f32 %v10141_v37, %v10121_v56  ;;  %v239_v37 = vld [vmem:[%s16228_s4 + $0x30] sm:$0xff]  ;;  %v15033_v56 = vld [vmem:[%s16227_s3 + $0x38] sm:$0xff] }
 0x49e   : > { %10299 = vmatprep.mubr.msk.f32.mxu1 %vm2991_vm0, %v14740_v44  ;;  %10347 = vmatpush3.msra.mxu0 %v6227_v0  ;;  %17038 = vst [vmem:[#allocation4_spill] sm:$0xff] %v15033_v56 }
 0x49f   : > { %10300 = vmatmul.mubr.msk.f32.gmra.mxu1 %vm2991_vm0, %v14751_v53  ;;  %10319 = vmatprep.mubr.msk.f32.mxu0 %vm2991_vm0, %v14899_v47  ;;  %17032 = vst [vmem:[#allocation51_spill] sm:$0xff] %v14959_v11  ;;  %v15072_v11 = vld [vmem:[%s16227_s3 + $0x90] sm:$0xff] }
 0x4a0   : > { %10320 = vmatmul.mubr.msk.f32.gmra.mxu0 %vm2991_vm0, %v14910_v24  ;;  %4368 = vperm.xlu1 %10729, %v233_v41   ;;  %v14945_v41 = vpop.permute.xlu1 %6895 }
 0x4a1   : > { %7171 = vrot.lane.b32.xlu0 %v14613_v58, %s10784_s10  ;;  %10348 = vmatprep.subr.mxu0 %v6226_v55 }
 0x4a2   : > { %10330 = vmatprep.mubr.msk.f32.mxu1 %vm2991_vm0, %v14926_v14  ;;  %10349 = vmatpush3.msra.mxu0 %v6226_v55 }
 0x4a3   : > { %10331 = vmatmul.mubr.msk.f32.vlgmr.msra.gmra.mxu1 %vm2991_vm0, %v14933_v45  ;;  %10350 = vmatprep.mubr.msk.f32.mxu0 %vm2991_vm0, %v14778_v16 }
 0x4a4   : > { %10363 = vmatpush3.msra.mxu1 %v16927_v31  ;;  %10382 = vmatprep.subr.mxu0 %v14807_v28  ;;  %v237_v31 = vld [vmem:[%s16228_s4 + $0x20] sm:$0xff]  ;;  %v14970_v1 = vpop.permute.xlu1 %6891 }
 0x4a5   : > { %10351 = vmatmul.mubr.msk.f32.vlgmr.msra.gmra.mxu0 %vm2991_vm0, %v14793_v54  ;;  %10364 = vmatprep.subr.mxu1 %v13448_v18 }
 0x4a6   : > { %10383 = vmatpush3.msra.mxu0 %v14807_v28  ;;  %4378 = vperm.xlu1 %10729, %v235_v36  }
 0x4a7   : > { %10731 = vrot.lane.b32.xlu0 %v16999_v43, %s10783_s7  ;;  %10365 = vmatpush3.msra.mxu1 %v13448_v18  ;;  %v14978_v18 = vld [vmem:[%s16227_s3 + $0x10] sm:$0xff] }
 0x4a8   : > { %10384 = vmatprep.subr.mxu0 %v14849_v3  ;;  %10366 = vmatprep.subr.mxu1 %v13523_v2  ;;  %17033 = vst [vmem:[#allocation90_spill] sm:$0xff] %v14978_v18  ;;  %v15000_v28 = vpop.permute.xlu1 %6887 }
 0x4a9   : > { %10385 = vmatpush3.msra.mxu0 %v14849_v3  ;;  %10367 = vmatpush3.msra.mxu1 %v13523_v2  ;;  %v14989_v2 = vld [vmem:[%s16227_s3 + $0x18] sm:$0xff]  ;;  %v15011_v3 = vld [vmem:[%s16227_s3 + $0x28] sm:$0xff] }
 0x4aa   : > { %10386 = vmatprep.subr.mxu0 %v6227_v0  ;;  %10368 = vmatprep.subr.mxu1 %v13554_v35  ;;  %17034 = vst [vmem:[#allocation69_spill] sm:$0xff] %v14989_v2  ;;  %17036 = vst [vmem:[#allocation8_spill] sm:$0xff] %v15011_v3 }
 0x4ab   : > { %10387 = vmatpush3.msra.mxu0 %v6227_v0  ;;  %4388 = vperm.xlu1 %10729, %v237_v31  }
 0x4ac   : > { %7672 = vrot.lane.b32.xlu0 %v17000_v27, %s10783_s7  ;;  %10369 = vmatpush3.msra.mxu1 %v13554_v35  ;;  %v14998_v35 = vld [vmem:[%s16227_s3 + $0x20] sm:$0xff]  ;;  %v15035_v31 = vpop.permute.xlu1 %7181 }
 0x4ad   : > { %10388 = vmatprep.subr.mxu0 %v6226_v55  ;;  %10333 = vmatprep.mubr.msk.f32.mxu1 %vm2991_vm0, %v14978_v18  ;;  %17035 = vst [vmem:[#allocation17_spill] sm:$0xff] %v14998_v35 }
 0x4ae   : > { %10389 = vmatpush3.msra.mxu0 %v6226_v55  ;;  %10353 = vmatprep.mubr.msk.f32.mxu0 %vm2991_vm0, %v14830_v4  ;;  %v15020_v55 = vld [vmem:[%s16227_s3 + $0x30] sm:$0xff] }
 0x4af   : > { %4398 = vperm.xlu1 %10729, %v239_v37   ;;  %10334 = vmatmul.mubr.msk.f32.gmra.mxu1 %vm2991_vm0, %v14989_v2  ;;  %17037 = vst [vmem:[#allocation55_spill] sm:$0xff] %v15020_v55  ;;  %v15059_v37 = vld [vmem:[%s16227_s3 + $0x88] sm:$0xff] }
 0x4b0   : > { %7668 = vrot.lane.b32.xlu0 %v17007_v50, %s10783_s7  ;;  %10354 = vmatmul.mubr.msk.f32.gmra.mxu0 %vm2991_vm0, %v14840_v15 }
 0x4b1   : > { %10336 = vmatprep.mubr.msk.f32.mxu1 %vm2991_vm0, %v14998_v35  ;;  %10356 = vmatprep.mubr.msk.f32.mxu0 %vm2991_vm0, %v14870_v32 }
 0x4b2   : > { %v6620_v0 = vpop.permute.xlu0 %6619 }
 0x4b3   : > { %10337 = vmatmul.mubr.msk.f32.gmra.mxu1 %vm2991_vm0, %v15011_v3  ;;  %v6624_v36 = vsel %vm437_vm1, %v14716_v40, %v6620_v0  ;;  %v15044_v40 = vld [vmem:[%s16227_s3 + $0x80] sm:$0xff]  ;;  %v15061_v0 = vpop.permute.xlu1 %7177 }
 0x4b4   : > { %8075 = vrot.lane.b32.xlu0 %v17013_v33, %s10783_s7  ;;  %10357 = vmatmul.mubr.msk.f32.gmra.mxu0 %vm2991_vm0, %v14880_v6  ;;  %17039 = vst [vmem:[#allocation93_spill] sm:$0xff] %v15044_v40 }
 0x4b5   : > { %10339 = vmatprep.mubr.msk.f32.mxu1 %vm2991_vm0, %v15020_v55  ;;  %10359 = vmatprep.mubr.msk.f32.mxu0 %vm2991_vm0, %v14899_v47 }
 0x4b6   : > { %10402 = vmatprep.subr.mxu1 %v6624_v36  ;;  %10422 = vmatprep.subr.mxu0 %v6624_v36 }
 0x4b7   : > { %10340 = vmatmul.mubr.msk.f32.gmra.mxu1 %vm2991_vm0, %v15033_v56 }
 0x4b8   : > { %8071 = vrot.lane.b32.xlu0 %v14493_v10, %s10783_s7  ;;  %10360 = vmatmul.mubr.msk.f32.gmra.mxu0 %vm2991_vm0, %v14910_v24  ;;  %v15114_v24 = vld [vmem:[%s16227_s3 + $0xb0] sm:$0xff] }
 0x4b9   : > { %10370 = vmatprep.mubr.msk.f32.mxu1 %vm2991_vm0, %v14926_v14  ;;  %10390 = vmatprep.mubr.msk.f32.mxu0 %vm2991_vm0, %v15044_v40 }
 0x4bb   : > { %10371 = vmatmul.mubr.msk.f32.vlgmr.msra.gmra.mxu1 %vm2991_vm0, %v14933_v45  ;;  %v15089_v45 = vpop.permute.xlu1 %7173 }
 0x4bc   : > { %8069 = vrot.lane.b32.xlu0 %v16999_v43, %s10783_s7  ;;  %10391 = vmatmul.mubr.msk.f32.vlgmr.msra.gmra.mxu0 %vm2991_vm0, %v15059_v37 }
 0x4bd   : > { %10403 = vmatpush3.msra.mxu1 %v6624_v36  ;;  %10423 = vmatpush3.msra.mxu0 %v6624_v36  ;;  %v15085_v36 = vld [vmem:[%s16227_s3 + $0x98] sm:$0xff] }
 0x4be   : > { %10393 = vmatprep.mubr.msk.f32.mxu0 %vm2991_vm0, %v15072_v11  ;;  %10373 = vmatprep.mubr.msk.f32.mxu1 %vm2991_vm0, %v14978_v18  ;;  %v15094_v18 = vld [vmem:[%s16227_s3 + $0xa0] sm:$0xff] }
 0x4bf   : > { %10374 = vmatmul.mubr.msk.f32.gmra.mxu1 %vm2991_vm0, %v14989_v2  ;;  %v15107_v2 = vld [vmem:[%s16227_s3 + $0xa8] sm:$0xff] }
 0x4c0   : > { %8065 = vrot.lane.b32.xlu0 %v16999_v43, %s10783_s7  ;;  %10394 = vmatmul.mubr.msk.f32.gmra.mxu0 %vm2991_vm0, %v15085_v36 }
 0x4c1   : > { %10396 = vmatprep.mubr.msk.f32.mxu0 %vm2991_vm0, %v15094_v18  ;;  %10376 = vmatprep.mubr.msk.f32.mxu1 %vm2991_vm0, %v14998_v35  ;;  %v15129_v35 = vld [vmem:[%s16227_s3 + $0xb8] sm:$0xff] }
 0x4c3   : > { %10377 = vmatmul.mubr.msk.f32.gmra.mxu1 %vm2991_vm0, %v15011_v3  ;;  %v15120_v3 = vpop.permute.xlu1 %7169 }
 0x4c4   : > { %10741 = vrot.lane.b32.xlu0 %v16999_v43, %s10784_s10  ;;  %10397 = vmatmul.mubr.msk.f32.gmra.mxu0 %vm2991_vm0, %v15107_v2 }
 0x4c5   : > { %10399 = vmatprep.mubr.msk.f32.mxu0 %vm2991_vm0, %v15114_v24  ;;  %10379 = vmatprep.mubr.msk.f32.mxu1 %vm2991_vm0, %v15020_v55  ;;  %v15138_v55 = vld [vmem:[%s16227_s3 + $0xc0] sm:$0xff] }
 0x4c7   : > { %10380 = vmatmul.mubr.msk.f32.gmra.mxu1 %vm2991_vm0, %v15033_v56  ;;  %v15146_v47 = vpop.permute.xlu1 %7680 }
 0x4c8   : > { %8349 = vrot.lane.b32.xlu0 %v17000_v27, %s10784_s10  ;;  %10400 = vmatmul.mubr.msk.f32.gmra.mxu0 %vm2991_vm0, %v15129_v35 }
 0x4c9   : > { %10410 = vmatprep.mubr.msk.f32.mxu1 %vm2991_vm0, %v15044_v40  ;;  %10430 = vmatprep.mubr.msk.f32.mxu0 %vm2991_vm0, %v15138_v55 }
 0x4ca   : > { %v6616_v56 = vpop.permute.xlu0 %6615 }
 0x4cb   : > { %v6623_v14 = vsel %vm437_vm1, %v14769_v5, %v6616_v56  ;;  %v15150_v40 = vpop.permute.xlu1 %7676  ;;  %v15158_v5 = vpop.f32.mrf.mxu0 }
 0x4cc   : > { %8345 = vrot.lane.b32.xlu0 %v17007_v50, %s10784_s10  ;;  %10404 = vmatprep.subr.mxu1 %v6623_v14  ;;  %17040 = vst [vmem:[#allocation6_spill] sm:$0xff] %v15150_v40  ;;  %17042 = vst [vmem:[#allocation49_spill] sm:$0xff] %v15158_v5 }
 0x4cd   : > { %10424 = vmatprep.subr.mxu0 %v6623_v14  ;;  %10405 = vmatpush3.msra.mxu1 %v6623_v14  ;;  %v15162_v56 = vpop.f32.mrf.mxu0 }
 0x4ce   : > { %10425 = vmatpush3.msra.mxu0 %v6623_v14  ;;  %17043 = vst [vmem:[#allocation15_spill] sm:$0xff] %v15162_v56  ;;  %v234_v14 = vld [vmem:[%s16228_s4 + $0x8] sm:$0xff] }
 0x4cf   : > { %v15154_v6 = vpop.permute.xlu1 %7674  ;;  %v15171_v8 = vpop.f32.mrf.mxu0 }
 0x4d0   : > { %8639 = vrot.lane.b32.xlu0 %v17013_v33, %s10784_s10  ;;  %17041 = vst [vmem:[#allocation24_spill] sm:$0xff] %v15154_v6  ;;  %17045 = vst [vmem:[#allocation7_spill] sm:$0xff] %v15171_v8  ;;  %v240_v8 = vld [vmem:[%s16228_s4 + $0x38] sm:$0xff] }
 0x4d1   : > { %v15178_v56 = vpop.f32.mrf.mxu0 }
 0x4d2   : > { %17046 = vst [vmem:[#allocation92_spill] sm:$0xff] %v15178_v56 }
 0x4d3   : > { %v15167_v40 = vpop.permute.xlu1 %7670 }
 0x4d4   : > { %8635 = vrot.lane.b32.xlu0 %v14493_v10, %s10784_s10  ;;  %17044 = vst [vmem:[#allocation13_spill] sm:$0xff] %v15167_v40 }
 0x4d7   : > { %v15176_v5 = vpop.permute.xlu1 %10736 }
 0x4d8   : > { %8633 = vrot.lane.b32.xlu0 %v16999_v43, %s10784_s10 }
 0x4dc   : > { %8629 = vrot.lane.b32.xlu0 %v16999_v43, %s10784_s10  ;;  %v236_v43 = vld [vmem:[%s16228_s4 + $0x18] sm:$0xff] }
 0x4de   : > { %v6612_v50 = vpop.permute.xlu0 %6611 }
 0x4df   : > { %v6622_v6 = vsel %vm437_vm1, %v14817_v42, %v6612_v50  ;;  %v238_v50 = vld [vmem:[%s16228_s4 + $0x28] sm:$0xff]  ;;  %v15183_v42 = vpop.f32.mrf.mxu0 }
 0x4e0   : > { %4373 = vperm.xlu0 %10728, %v234_v14   ;;  %10406 = vmatprep.subr.mxu1 %v6622_v6  ;;  %17047 = vst [vmem:[#allocation22_spill] sm:$0xff] %v15183_v42  ;;  %v15185_v14 = vpop.permute.xlu1 %8067  ;;  %v10762_v42 = vld [vmem:[%s16227_s3 + $0xc8] sm:$0xff] }
 0x4e1   : > { %10426 = vmatprep.subr.mxu0 %v6622_v6  ;;  %10407 = vmatpush3.msra.mxu1 %v6622_v6 }
 0x4e2   : > { %10427 = vmatpush3.msra.mxu0 %v6622_v6 }
 0x4e4   : > { %4383 = vperm.xlu0 %10728, %v236_v43   ;;  %v15192_v43 = vpop.f32.mrf.mxu0 }
 0x4e5   : > { %17048 = vst [vmem:[#allocation33_spill] sm:$0xff] %v15192_v43 }
 0x4e8   : > { %4393 = vperm.xlu0 %10728, %v238_v50  }
 0x4ea   : > { %v6608_v40 = vpop.permute.xlu0 %6607  ;;  %v15194_v56 = vpop.permute.xlu1 %8063 }
 0x4eb   : > { %v6621_v6 = vsel %vm437_vm1, %v14859_v30, %v6608_v40  ;;  %v10763_v30 = vld [vmem:[%s16227_s3 + $0xd0] sm:$0xff]  ;;  %v15210_v40 = vpop.f32.mrf.mxu0 }
 0x4ec   : > { %4403 = vperm.xlu0 %10728, %v240_v8   ;;  %10408 = vmatprep.subr.mxu1 %v6621_v6  ;;  %17049 = vst [vmem:[#allocation34_spill] sm:$0xff] %v15210_v40 }
 0x4ed   : > { %10428 = vmatprep.subr.mxu0 %v6621_v6  ;;  %10409 = vmatpush3.msra.mxu1 %v6621_v6 }
 0x4ee   : > { %10429 = vmatpush3.msra.mxu0 %v6621_v6  ;;  %10411 = vmatmul.mubr.msk.f32.vlgmr.msra.gmra.mxu1 %vm2991_vm0, %v15059_v37  ;;  %v15212_v6 = vpop.permute.xlu1 %8357 }
 0x4ef   : > { %v6902_v50 = vpop.permute.xlu0 %6901  ;;  %10431 = vmatmul.mubr.msk.f32.vlgmr.msra.gmra.mxu0 %vm2991_vm0, %v10762_v42  ;;  %10413 = vmatprep.mubr.msk.f32.mxu1 %vm2991_vm0, %v15072_v11  ;;  %17050 = vst [vmem:[#allocation5_spill] sm:$0xff] %v15212_v6  ;;  %v15217_v11 = vld [vmem:[%s16227_s3 + $0xd8] sm:$0xff]  ;;  %v15245_v6 = vld [vmem:[%s16227_s3 + $0xe8] sm:$0xff] }
 0x4f0   : > { %v6906_v8 = vsel %vm3953_vm2, %v14903_v29, %v6902_v50  ;;  %10433 = vmatprep.mubr.msk.f32.mxu0 %vm2991_vm0, %v10763_v30  ;;  %v15228_v29 = vld [vmem:[%s16227_s3 + $0xe0] sm:$0xff]  ;;  %v15232_v50 = vpop.f32.mrf.mxu0 }
 0x4f1   : > { %10442 = vmatprep.subr.mxu1 %v6906_v8  ;;  %10462 = vmatprep.subr.mxu0 %v6906_v8  ;;  %17051 = vst [vmem:[#allocation10_spill] sm:$0xff] %v15232_v50 }
 0x4f2   : > { %10443 = vmatpush3.msra.mxu1 %v6906_v8  ;;  %10463 = vmatpush3.msra.mxu0 %v6906_v8 }
 0x4f3   : > { %10434 = vmatmul.mubr.msk.f32.gmra.mxu0 %vm2991_vm0, %v15217_v11  ;;  %10414 = vmatmul.mubr.msk.f32.gmra.mxu1 %vm2991_vm0, %v15085_v36  ;;  %v15236_v36 = vpop.f32.mrf.mxu1 }
 0x4f4   : > { %10416 = vmatprep.mubr.msk.f32.mxu1 %vm2991_vm0, %v15094_v18  ;;  %10436 = vmatprep.mubr.msk.f32.mxu0 %vm2991_vm0, %v15228_v29  ;;  %v15238_v18 = vpop.f32.mrf.mxu0  ;;  %v15240_v43 = vpop.permute.xlu1 %8353 }
 0x4f5   : > { %v6898_v8 = vpop.permute.xlu0 %6897  ;;  %17052 = vst [vmem:[#allocation74_spill] sm:$0xff] %v15238_v18  ;;  %17053 = vst [vmem:[#allocation31_spill] sm:$0xff] %v15240_v43  ;;  %v15262_v43 = vpop.f32.mrf.mxu1  ;;  %v15269_v18 = vld [vmem:[%s16227_s3 + $0xf8] sm:$0xff] }
 0x4f6   : > { %v6905_v40 = vsel %vm3953_vm2, %v14945_v41, %v6898_v8 }
 0x4f7   : > { %10444 = vmatprep.subr.mxu1 %v6905_v40  ;;  %10464 = vmatprep.subr.mxu0 %v6905_v40  ;;  %v15285_v50 = vpop.f32.mrf.mxu1 }
 0x4f8   : > { %10445 = vmatpush3.msra.mxu1 %v6905_v40  ;;  %10465 = vmatpush3.msra.mxu0 %v6905_v40  ;;  %v15256_v40 = vld [vmem:[%s16227_s3 + $0xf0] sm:$0xff] }
 0x4f9   : > { %10437 = vmatmul.mubr.msk.f32.gmra.mxu0 %vm2991_vm0, %v15245_v6  ;;  %10417 = vmatmul.mubr.msk.f32.gmra.mxu1 %vm2991_vm0, %v15107_v2  ;;  %v15264_v2 = vpop.f32.mrf.mxu0 }
 0x4fa   : > { %v6894_v41 = vpop.permute.xlu0 %6893  ;;  %10419 = vmatprep.mubr.msk.f32.mxu1 %vm2991_vm0, %v15114_v24  ;;  %10439 = vmatprep.mubr.msk.f32.mxu0 %vm2991_vm0, %v15256_v40  ;;  %17054 = vst [vmem:[#allocation56_spill] sm:$0xff] %v15264_v2 }
 0x4fb   : > { %v6904_v8 = vsel %vm3953_vm2, %v14970_v1, %v6894_v41  ;;  %v15275_v1 = vpop.permute.xlu1 %8351  ;;  %v15287_v2 = vpop.f32.mrf.mxu0 }
 0x4fc   : > { %10446 = vmatprep.subr.mxu1 %v6904_v8  ;;  %10466 = vmatprep.subr.mxu0 %v6904_v8  ;;  %17055 = vst [vmem:[#allocation81_spill] sm:$0xff] %v15275_v1  ;;  %v17062_v1 = vld [vmem:[#allocation48_spill] sm:$0xff] }
 0x4fd   : > { %10447 = vmatpush3.msra.mxu1 %v6904_v8  ;;  %10467 = vmatpush3.msra.mxu0 %v6904_v8  ;;  %v10769_v8 = vld [vmem:[%s16227_s3 + $0x100] sm:$0xff] }
 0x4fe   : > { %v6890_v24 = vpop.permute.xlu0 %6889  ;;  %10440 = vmatmul.mubr.msk.f32.gmra.mxu0 %vm2991_vm0, %v15269_v18  ;;  %10420 = vmatmul.mubr.msk.f32.gmra.mxu1 %vm2991_vm0, %v15129_v35 }
 0x4ff   : > { %v6903_v41 = vsel %vm3953_vm2, %v15000_v28, %v6890_v24  ;;  %10450 = vmatprep.mubr.msk.f32.mxu1 %vm2991_vm0, %v15138_v55  ;;  %10470 = vmatprep.mubr.msk.f32.mxu0 %vm2991_vm0, %v10769_v8  ;;  %v15294_v28 = vpop.f32.mrf.mxu1  ;;  %v15300_v24 = vpop.f32.mrf.mxu0 }
 0x500   : > { %10448 = vmatprep.subr.mxu1 %v6903_v41  ;;  %10468 = vmatprep.subr.mxu0 %v6903_v41  ;;  %17056 = vst [vmem:[#allocation87_spill] sm:$0xff] %v15300_v24  ;;  %v3454_v24 = vadd.f32 %v17062_v1, %v14484_v34 }
 0x501   : > { %10449 = vmatpush3.msra.mxu1 %v6903_v41  ;;  %10469 = vmatpush3.msra.mxu0 %v6903_v41  ;;  %v15302_v41 = vpop.permute.xlu1 %8347 }
 0x502   : > { %10471 = vmatmul.mubr.msk.f32.vlgmr.msra.gmra.mxu0 %vm2991_vm0, %v14633_v21  ;;  %10502 = vmatprep.subr.mxu0 %v17013_v33  ;;  %17057 = vst [vmem:[#allocation38_spill] sm:$0xff] %v15302_v41  ;;  %v3783_v1 = vadd.f32 %v14541_v57, %v3454_v24 }
 0x503   : > { %v7184_v35 = vpop.permute.xlu0 %7183  ;;  %10451 = vmatmul.mubr.msk.f32.vlgmr.msra.gmra.mxu1 %vm2991_vm0, %v10762_v42  ;;  %10503 = vmatpush3.msra.mxu0 %v17013_v33  ;;  %v15315_v42 = vpop.f32.mrf.mxu0 }
 0x504   : > { %v7188_v55 = vsel %vm3953_vm2, %v15035_v31, %v7184_v35  ;;  %10504 = vmatprep.subr.mxu0 %v14493_v10  ;;  %10453 = vmatprep.mubr.msk.f32.mxu1 %vm2991_vm0, %v10763_v30  ;;  %v15310_v31 = vpop.f32.mrf.mxu1  ;;  %17059 = vst [vmem:[#allocation91_spill] sm:$0xff] %v15315_v42  ;;  %v17060_v35 = vld [vmem:[#allocation76_spill] sm:$0xff]  ;;  %v17069_v42 = vld [vmem:[#allocation61_spill] sm:$0xff]  ;;  %v4067_v24 = vadd.f32 %v14607_v13, %v3783_v1  ;;  %v17071_v13 = vld [vmem:[#allocation26_spill] sm:$0xff] }
 0x505   : > { %10482 = vmatprep.subr.mxu1 %v7188_v55  ;;  %10473 = vmatprep.mubr.msk.f32.mxu0 %vm2991_vm0, %v14658_v61  ;;  %17058 = vst [vmem:[#allocation94_spill] sm:$0xff] %v15310_v31  ;;  %v15337_v34 = vpop.f32.mrf.mxu0 }
 0x506   : > { %10483 = vmatpush3.msra.mxu1 %v7188_v55  ;;  %10505 = vmatpush3.msra.mxu0 %v14493_v10  ;;  %v17061_v55 = vld [vmem:[#allocation35_spill] sm:$0xff]  ;;  %17065 = vst [vmem:[#allocation52_spill] sm:$0xff] %v15337_v34  ;;  %v17068_v34 = vld [vmem:[#allocation25_spill] sm:$0xff] }
 0x507   : > { %10474 = vmatmul.mubr.msk.f32.gmra.mxu0 %vm2991_vm0, %v14674_v59  ;;  %10506 = vmatprep.subr.mxu0 %v14569_v19  ;;  %v3212_v41 = vadd.f32 %v17061_v55, %v17060_v35  ;;  %v17067_v35 = vld [vmem:[#allocation46_spill] sm:$0xff]  ;;  %v15357_v57 = vpop.f32.mrf.mxu0 }
 0x508   : > { %10454 = vmatmul.mubr.msk.f32.gmra.mxu1 %vm2991_vm0, %v15217_v11  ;;  %10507 = vmatpush3.msra.mxu0 %v14569_v19  ;;  %v15329_v11 = vpop.permute.xlu1 %10746 }
 0x509   : > { %v7180_v30 = vpop.permute.xlu0 %7179  ;;  %10508 = vmatprep.subr.mxu0 %v14613_v58  ;;  %10456 = vmatprep.mubr.msk.f32.mxu1 %vm2991_vm0, %v15228_v29  ;;  %17063 = vst [vmem:[#allocation57_spill] sm:$0xff] %v15329_v11  ;;  %v15333_v29 = vpop.f32.mrf.mxu1 }
 0x50a   : > { %v7187_v31 = vsel %vm3953_vm2, %v15061_v0, %v7180_v30  ;;  %10476 = vmatprep.mubr.msk.f32.mxu0 %vm2991_vm0, %v14704_v12  ;;  %10509 = vmatpush3.msra.mxu0 %v14613_v58  ;;  %17064 = vst [vmem:[#allocation50_spill] sm:$0xff] %v15333_v29  ;;  %v3638_v0 = vadd.f32 %v14537_v60, %v3212_v41  ;;  %v17066_v30 = vld [vmem:[#allocation20_spill] sm:$0xff] }
 0x50b   : > { %10484 = vmatprep.subr.mxu1 %v7187_v31  ;;  %10477 = vmatmul.mubr.msk.f32.gmra.mxu0 %vm2991_vm0, %v14712_v63  ;;  %v3222_v55 = vadd.f32 %v17067_v35, %v17066_v30  ;;  %v3464_v29 = vadd.f32 %v17069_v42, %v17068_v34  ;;  %v4350_v35 = vadd.f32 %v14706_v62, %v4067_v24  ;;  %v17078_v62 = vld [vmem:[#allocation95_spill] sm:$0xff] }
 0x50c   : > { %10485 = vmatpush3.msra.mxu1 %v7187_v31  ;;  %10479 = vmatprep.mubr.msk.f32.mxu0 %vm2991_vm0, %v14740_v44  ;;  %v15349_v31 = vpop.f32.mrf.mxu1 }
 0x50d   : > { %10457 = vmatmul.mubr.msk.f32.gmra.mxu1 %vm2991_vm0, %v15245_v6  ;;  %v15359_v6 = vpop.permute.xlu1 %8631 }
 0x50e   : > { %10459 = vmatprep.mubr.msk.f32.mxu1 %vm2991_vm0, %v15256_v40  ;;  %17070 = vst [vmem:[#allocation44_spill] sm:$0xff] %v15359_v6  ;;  %v3929_v40 = vadd.f32 %v14601_v25, %v3638_v0  ;;  %v15369_v42 = vpop.f32.mrf.mxu1  ;;  %v15376_v25 = vpop.f32.mrf.mxu0  ;;  %v17074_v0 = vld [vmem:[#allocation82_spill] sm:$0xff] }
 0x50f   : > { %v7176_v11 = vpop.permute.xlu0 %7175  ;;  %10480 = vmatmul.mubr.msk.f32.gmra.mxu0 %vm2991_vm0, %v14751_v53 }
 0x510   : > { %v7186_v60 = vsel %vm3953_vm2, %v15089_v45, %v7176_v11  ;;  %10510 = vmatprep.mubr.msk.f32.mxu0 %vm2991_vm0, %v14778_v16  ;;  %v3640_v45 = vadd.f32 %v14548_v39, %v3222_v55  ;;  %v3785_v11 = vadd.f32 %v14557_v46, %v3464_v29  ;;  %v17073_v39 = vld [vmem:[#allocation98_spill] sm:$0xff]  ;;  %v4213_v30 = vadd.f32 %v14696_v9, %v3929_v40  ;;  %v17075_v46 = vld [vmem:[#allocation16_spill] sm:$0xff]  ;;  %v17076_v29 = vld [vmem:[#allocation23_spill] sm:$0xff]  ;;  %v15398_v9 = vpop.f32.mrf.mxu0 }
 0x511   : > { %10486 = vmatprep.subr.mxu1 %v7186_v60  ;;  %10460 = vmatmul.mubr.msk.f32.gmra.mxu1 %vm2991_vm0, %v15269_v18  ;;  %v3474_v1 = vadd.f32 %v17074_v0, %v17073_v39 }
 0x512   : > { %10487 = vmatpush3.msra.mxu1 %v7186_v60  ;;  %10490 = vmatprep.mubr.msk.f32.mxu1 %vm2991_vm0, %v10769_v8  ;;  %v17072_v8 = vld [vmem:[#allocation11_spill] sm:$0xff]  ;;  %v3931_v55 = vadd.f32 %v14618_v23, %v3640_v45  ;;  %v15387_v60 = vpop.permute.xlu1 %8627  ;;  %v3484_v23 = vadd.f32 %v14529_v26, %v17078_v62 }
 0x513   : > { %v7172_v41 = vpop.permute.xlu0 %7171  ;;  %10511 = vmatmul.mubr.msk.f32.vlgmr.msra.gmra.mxu0 %vm2991_vm0, %v14793_v54  ;;  %v3232_v34 = vadd.f32 %v17072_v8, %v17071_v13  ;;  %17077 = vst [vmem:[#allocation41_spill] sm:$0xff] %v15387_v60  ;;  %v4069_v13 = vadd.f32 %v14622_v38, %v3785_v11  ;;  %v17124_v60 = vld [vmem:[#allocation96_spill] sm:$0xff] }
 0x514   : > { %v7185_v18 = vsel %vm3953_vm2, %v15120_v3, %v7172_v41  ;;  %10513 = vmatprep.mubr.msk.f32.mxu0 %vm2991_vm0, %v14830_v4  ;;  %v3242_v3 = vadd.f32 %v17076_v29, %v17075_v46  ;;  %v15392_v41 = vpop.f32.mrf.mxu1  ;;  %v17085_v46 = vld [vmem:[#allocation24_spill] sm:$0xff] }
 0x515   : > { %10488 = vmatprep.subr.mxu1 %v7185_v18  ;;  %v3642_v40 = vadd.f32 %v14571_v51, %v3232_v34  ;;  %v4215_v51 = vadd.f32 %v14731_v7, %v3931_v55  ;;  %v4352_v11 = vadd.f32 %v14742_v22, %v4069_v13  ;;  %v3789_v7 = vadd.f32 %v14595_v17, %v3484_v23  ;;  %v17081_v34 = vld [vmem:[#allocation12_spill] sm:$0xff]  ;;  %v17086_v13 = vld [vmem:[#allocation97_spill] sm:$0xff] }
 0x516   : > { %10489 = vmatpush3.msra.mxu1 %v7185_v18  ;;  %v3644_v26 = vadd.f32 %v14591_v20, %v3242_v3  ;;  %v17080_v18 = vld [vmem:[#allocation58_spill] sm:$0xff]  ;;  %v17087_v23 = vld [vmem:[#allocation36_spill] sm:$0xff] }
 0x517   : > { %10491 = vmatmul.mubr.msk.f32.vlgmr.msra.gmra.mxu1 %vm2991_vm0, %v14633_v21  ;;  %10522 = vmatprep.subr.mxu1 %v14282_v48  ;;  %v3787_v21 = vadd.f32 %v14578_v49, %v3474_v1  ;;  %v3933_v8 = vadd.f32 %v17080_v18, %v3642_v40  ;;  %v4073_v62 = vadd.f32 %v17086_v13, %v3789_v7  ;;  %v17093_v18 = vld [vmem:[#allocation45_spill] sm:$0xff] }
 0x518   : > { %10523 = vmatpush3.msra.mxu1 %v14282_v48  ;;  %10493 = vmatprep.mubr.msk.f32.mxu1 %vm2991_vm0, %v14658_v61  ;;  %v4358_v48 = vmax.f32 %v4213_v30, %v4350_v35  ;;  %v15417_v61 = vpop.f32.mrf.mxu1  ;;  %v4360_v35 = vmax.f32 %v4215_v51, %v4352_v11  ;;  %v17092_v11 = vld [vmem:[#allocation72_spill] sm:$0xff] }
 0x519   : > { %v10732_v24 = vpop.permute.xlu0 %10731  ;;  %10524 = vmatprep.subr.mxu1 %v14299_v52  ;;  %10514 = vmatmul.mubr.msk.f32.gmra.mxu0 %vm2991_vm0, %v14840_v15  ;;  %v4071_v22 = vadd.f32 %v17081_v34, %v3787_v21  ;;  %v4217_v40 = vadd.f32 %v17087_v23, %v3933_v8  ;;  %v17088_v21 = vld [vmem:[#allocation53_spill] sm:$0xff] }
 0x51a   : > { %v10734_v38 = vunpack.i.h.bf16 %v10732_v24  ;;  %v10733_v45 = vunpack.i.l.bf16 %v10732_v24  ;;  %10525 = vmatpush3.msra.mxu1 %v14299_v52  ;;  %10516 = vmatprep.mubr.msk.f32.mxu0 %vm2991_vm0, %v14870_v32  ;;  %v15451_v30 = vpop.f32.mrf.mxu1  ;;  %v17089_v24 = vld [vmem:[#allocation70_spill] sm:$0xff]  ;;  %v17094_v34 = vld [vmem:[#allocation21_spill] sm:$0xff] }
 0x51b   : > { %10494 = vmatmul.mubr.msk.f32.gmra.mxu1 %vm2991_vm0, %v14674_v59  ;;  %10526 = vmatprep.subr.mxu1 %v17000_v27  ;;  %v15415_v49 = vpop.permute.xlu1 %4368  ;;  %v15429_v59 = vpop.f32.mrf.mxu0 }
 0x51c   : > { %17079 = vst [vmem:[#allocation28_spill] sm:$0xff] %v15415_v49  ;;  %v15422_v52 = vsel %vm437_vm1, %v15146_v47, %v10733_v45  ;;  %v4406_v20 = vadd.f32 %v15415_v49, %v4358_v48  ;;  %10527 = vmatpush3.msra.mxu1 %v17000_v27  ;;  %10496 = vmatprep.mubr.msk.f32.mxu1 %vm2991_vm0, %v14704_v12  ;;  %v17082_v47 = vld [vmem:[#allocation63_spill] sm:$0xff]  ;;  %v17083_v27 = vld [vmem:[#allocation6_spill] sm:$0xff] }
 0x51d   : > { %10542 = vmatprep.subr.mxu0 %v15422_v52  ;;  %10528 = vmatprep.subr.mxu1 %v17082_v47  ;;  %v15439_v1 = vsel %vm437_vm1, %v17083_v27, %v10734_v38  ;;  %v17084_v12 = vld [vmem:[#allocation47_spill] sm:$0xff]  ;;  %v15459_v55 = vpop.f32.mrf.mxu0 }
 0x51e   : > { %v7673_v39 = vpop.permute.xlu0 %7672  ;;  %10543 = vmatpush3.msra.mxu0 %v15422_v52  ;;  %v4414_v0 = vmax.f32 %v4406_v20, 0.0  ;;  %10529 = vmatpush3.msra.mxu1 %v17082_v47  ;;  %v3935_v17 = vadd.f32 %v17084_v12, %v3644_v26  ;;  %v17091_v26 = vld [vmem:[#allocation13_spill] sm:$0xff]  ;;  %v15480_v20 = vpop.f32.mrf.mxu1  ;;  %v17096_v12 = vld [vmem:[#allocation42_spill] sm:$0xff] }
 0x51f   : > { %10544 = vmatprep.subr.mxu0 %v15439_v1  ;;  %10497 = vmatmul.mubr.msk.f32.gmra.mxu1 %vm2991_vm0, %v14712_v63  ;;  %v15455_v29 = vsel %vm437_vm1, %v7673_v39, %v17085_v46  ;;  %v4354_v63 = vadd.f32 %v17088_v21, %v4071_v22  ;;  %v15484_v8 = vpop.f32.mrf.mxu0  ;;  %v17095_v47 = vld [vmem:[#allocation9_spill] sm:$0xff]  ;;  %v17098_v46 = vld [vmem:[#allocation80_spill] sm:$0xff] }
 0x520   : > { %v9390_v3 = vpack.c.bf16 %v4414_v0, %v4414_v0  ;;  %10545 = vmatpush3.msra.mxu0 %v15439_v1  ;;  %10562 = vmatprep.subr.mxu1 %v17013_v33  ;;  %v4219_v22 = vadd.f32 %v17094_v34, %v3935_v17  ;;  %v4356_v39 = vadd.f32 %v17095_v47, %v4073_v62  ;;  %v15498_v17 = vpop.f32.mrf.mxu1 }
 0x521   : > { %10517 = vmatmul.mubr.msk.f32.gmra.mxu0 %vm2991_vm0, %v17089_v24  ;;  %10546 = vmatprep.subr.mxu0 %v15455_v29  ;;  %v15467_v48 = vpop.permute.xlu1 %4378  ;;  %v15504_v13 = vpop.f32.mrf.mxu0 }
 0x522   : > { %17090 = vst [vmem:[#allocation88_spill] sm:$0xff] %v15467_v48  ;;  %4454 = vst [vmem:[%s15446_s12] sm:$0xf] %v9390_v3  ;;  %v7669_v38 = vpop.permute.xlu0 %7668  ;;  %10547 = vmatpush3.msra.mxu0 %v15455_v29  ;;  %v4408_v45 = vadd.f32 %v15467_v48, %v4360_v35  ;;  %10499 = vmatprep.mubr.msk.f32.mxu1 %vm2991_vm0, %v14740_v44  ;;  %v4362_v44 = vmax.f32 %v4217_v40, %v4354_v63  ;;  %v17099_v3 = vld [vmem:[#allocation90_spill] sm:$0xff]  ;;  %v15516_v63 = vpop.f32.mrf.mxu1  ;;  %v17127_v48 = vld [vmem:[#allocation49_spill] sm:$0xff] }
 0x523   : > { %v7684_v51 = vsel %vm437_vm1, %v7669_v38, %v17091_v26  ;;  %10519 = vmatprep.mubr.msk.f32.mxu0 %vm2991_vm0, %v17092_v11  ;;  %10500 = vmatmul.mubr.msk.f32.gmra.mxu1 %vm2991_vm0, %v14751_v53  ;;  %v4364_v62 = vmax.f32 %v4219_v22, %v4356_v39  ;;  %v15520_v38 = vpop.f32.mrf.mxu0  ;;  %v17105_v22 = vld [vmem:[#allocation4_spill] sm:$0xff]  ;;  %v17107_v39 = vld [vmem:[#allocation93_spill] sm:$0xff] }
 0x524   : > { %v4416_v7 = vmax.f32 %v4408_v45, 0.0  ;;  %10548 = vmatprep.subr.mxu0 %v7684_v51  ;;  %10530 = vmatprep.mubr.msk.f32.mxu1 %vm2991_vm0, %v17093_v18  ;;  %v15532_v26 = vpop.f32.mrf.mxu1 }
 0x525   : > { %10549 = vmatpush3.msra.mxu0 %v7684_v51 }
 0x526   : > { %v9392_v0 = vpack.c.bf16 %v4416_v7, %v4416_v7  ;;  %v8076_v27 = vpop.permute.xlu0 %8075  ;;  %10520 = vmatmul.mubr.msk.f32.gmra.mxu0 %vm2991_vm0, %v17096_v12  ;;  %10582 = vmatprep.subr.mxu0 %v15422_v52  ;;  %v15491_v53 = vpop.permute.xlu1 %4388 }
 0x527   : > { %17097 = vst [vmem:[#allocation40_spill] sm:$0xff] %v15491_v53  ;;  %v4410_v35 = vadd.f32 %v15491_v53, %v4362_v44  ;;  %10550 = vmatprep.mubr.msk.f32.mxu0 %vm2991_vm0, %v14778_v16  ;;  %10531 = vmatmul.mubr.msk.f32.vlgmr.msra.gmra.mxu1 %vm2991_vm0, %v17098_v46  ;;  %v17102_v44 = vld [vmem:[#allocation17_spill] sm:$0xff] }
 0x528   : > { %4456 = vst [vmem:[%s15446_s12 + $0x20] sm:$0xf] %v9392_v0  ;;  %10563 = vmatpush3.msra.mxu1 %v17013_v33  ;;  %10533 = vmatprep.mubr.msk.f32.mxu1 %vm2991_vm0, %v17099_v3 }
 0x529   : > { %v4418_v23 = vmax.f32 %v4410_v35, 0.0  ;;  %10564 = vmatprep.subr.mxu1 %v14493_v10 }
 0x52a   : > { %v8072_v40 = vpop.permute.xlu0 %8071  ;;  %10551 = vmatmul.mubr.msk.f32.vlgmr.msra.gmra.mxu0 %vm2991_vm0, %v14793_v54  ;;  %v15509_v16 = vpop.permute.xlu1 %4398  ;;  %10565 = vmatpush3.msra.mxu1 %v14493_v10  ;;  %v17101_v10 = vld [vmem:[#allocation69_spill] sm:$0xff] }
 0x52b   : > { %17100 = vst [vmem:[#allocation39_spill] sm:$0xff] %v15509_v16  ;;  %v9394_v21 = vpack.c.bf16 %v4418_v23, %v4418_v23  ;;  %10583 = vmatpush3.msra.mxu0 %v15422_v52  ;;  %v4412_v33 = vadd.f32 %v15509_v16, %v4364_v62  ;;  %10553 = vmatprep.mubr.msk.f32.mxu0 %vm2991_vm0, %v14830_v4  ;;  %v10738_v52 = vunpack.i.l.bf16 %v15176_v5  ;;  %v15596_v62 = vld [vmem:[%s16227_s3 + $0x98] sm:$0xff]  ;;  %v17123_v16 = vld [vmem:[#allocation66_spill] sm:$0xff] }
 0x52c   : > { %10584 = vmatprep.subr.mxu0 %v15439_v1  ;;  %10566 = vmatprep.subr.mxu1 %v14569_v19  ;;  %v4730_v6 = vadd.f32 %v17124_v60, %v17123_v16  ;;  %v17131_v16 = vld [vmem:[#allocation33_spill] sm:$0xff] }
 0x52d   : > { %4458 = vst [vmem:[%s15446_s12 + $0x40] sm:$0xf] %v9394_v21  ;;  %v4420_v54 = vmax.f32 %v4412_v33, 0.0  ;;  %10585 = vmatpush3.msra.mxu0 %v15439_v1  ;;  %10534 = vmatmul.mubr.msk.f32.gmra.mxu1 %vm2991_vm0, %v17101_v10  ;;  %v15535_v1 = vpop.f32.mrf.mxu0  ;;  %v8082_v7 = vsel %vm437_vm1, %v8076_v27, %v10738_v52 }
 0x52e   : > { %10586 = vmatprep.subr.mxu0 %v15455_v29  ;;  %v8070_v4 = vpop.permute.xlu0 %8069  ;;  %10554 = vmatmul.mubr.msk.f32.gmra.mxu0 %vm2991_vm0, %v14840_v15  ;;  %v15544_v15 = vpop.f32.mrf.mxu1 }
 0x52f   : > { %v9396_v45 = vpack.c.bf16 %v4420_v54, %v4420_v54  ;;  %10567 = vmatpush3.msra.mxu1 %v14569_v19  ;;  %10587 = vmatpush3.msra.mxu0 %v15455_v29  ;;  %v17103_v29 = vld [vmem:[#allocation8_spill] sm:$0xff]  ;;  %v8080_v23 = vsel %vm437_vm1, %v15185_v14, %v8070_v4  ;;  %v17112_v4 = vld [vmem:[#allocation27_spill] sm:$0xff] }
 0x530   : > { %10568 = vmatprep.subr.mxu1 %v14613_v58  ;;  %10588 = vmatprep.subr.mxu0 %v7684_v51  ;;  %v15558_v34 = vpop.f32.mrf.mxu1 }
 0x531   : > { %4460 = vst [vmem:[%s15446_s12 + $0x60] sm:$0xf] %v9396_v45  ;;  %10569 = vmatpush3.msra.mxu1 %v14613_v58  ;;  %10589 = vmatpush3.msra.mxu0 %v7684_v51  ;;  %v15550_v58 = vpop.f32.mrf.mxu0  ;;  %v17104_v51 = vld [vmem:[#allocation55_spill] sm:$0xff]  ;;  %v17113_v45 = vld [vmem:[#allocation32_spill] sm:$0xff] }
 0x532   : > { %10536 = vmatprep.mubr.msk.f32.mxu1 %vm2991_vm0, %v17102_v44  ;;  %10556 = vmatprep.mubr.msk.f32.mxu0 %vm2991_vm0, %v14870_v32  ;;  %v8066_v19 = vpop.permute.xlu0 %8065 }
 0x533   : > { %10602 = vmatprep.subr.mxu1 %v8082_v7  ;;  %10622 = vmatprep.subr.mxu0 %v8082_v7  ;;  %v15564_v47 = vpop.f32.mrf.mxu0  ;;  %v8079_v14 = vsel %vm437_vm1, %v15194_v56, %v8066_v19  ;;  %v15629_v56 = vld [vmem:[%s16227_s3 + $0xa8] sm:$0xff]  ;;  %v17114_v19 = vld [vmem:[#allocation7_spill] sm:$0xff] }
 0x534   : > { %10537 = vmatmul.mubr.msk.f32.gmra.mxu1 %vm2991_vm0, %v17103_v29  ;;  %10557 = vmatmul.mubr.msk.f32.gmra.mxu0 %vm2991_vm0, %v17089_v24  ;;  %17106 = vst [vmem:[#allocation29_spill] sm:$0xff] %v15564_v47  ;;  %v10739_v24 = vunpack.i.h.bf16 %v15176_v5  ;;  %17111 = vst [vmem:[#allocation60_spill] sm:$0xff] %v15629_v56 }
 0x535   : > { %10539 = vmatprep.mubr.msk.f32.mxu1 %vm2991_vm0, %v17104_v51  ;;  %10559 = vmatprep.mubr.msk.f32.mxu0 %vm2991_vm0, %v17092_v11 }
 0x536   : > { %v15556_v32 = vpop.permute.xlu0 %10741  ;;  %v8081_v5 = vsel %vm437_vm1, %v8072_v40, %v10739_v24  ;;  %v4952_v24 = vadd.f32 %v15285_v50, %v17114_v19  ;;  %v17118_v50 = vld [vmem:[#allocation15_spill] sm:$0xff] }
 0x537   : > { %v10743_v21 = vunpack.i.l.bf16 %v15556_v32 }
 0x538   : > { %10540 = vmatmul.mubr.msk.f32.gmra.mxu1 %vm2991_vm0, %v17105_v22  ;;  %10560 = vmatmul.mubr.msk.f32.gmra.mxu0 %vm2991_vm0, %v17096_v12  ;;  %v5280_v53 = vadd.f32 %v15451_v30, %v4952_v24 }
 0x539   : > { %10570 = vmatprep.mubr.msk.f32.mxu1 %vm2991_vm0, %v17093_v18  ;;  %10590 = vmatprep.mubr.msk.f32.mxu0 %vm2991_vm0, %v17107_v39  ;;  %v15585_v18 = vld [vmem:[%s16227_s3 + $0x90] sm:$0xff] }
 0x53a   : > { %v15571_v11 = vpop.permute.xlu0 %8349 }
 0x53b   : > { %v15573_v0 = vpop.f32.mrf.mxu1 }
 0x53c   : > { %10571 = vmatmul.mubr.msk.f32.vlgmr.msra.gmra.mxu1 %vm2991_vm0, %v17098_v46  ;;  %10591 = vmatmul.mubr.msk.f32.vlgmr.msra.gmra.mxu0 %vm2991_vm0, %v15059_v37  ;;  %v15579_v27 = vpop.f32.mrf.mxu0 }
 0x53d   : > { %10603 = vmatpush3.msra.mxu1 %v8082_v7  ;;  %10623 = vmatpush3.msra.mxu0 %v8082_v7  ;;  %v15587_v12 = vpop.f32.mrf.mxu1  ;;  %v4710_v7 = vadd.f32 %v17113_v45, %v17112_v4 }
 0x53e   : > { %10604 = vmatprep.subr.mxu1 %v8081_v5  ;;  %10624 = vmatprep.subr.mxu0 %v8081_v5  ;;  %v15589_v35 = vpop.permute.xlu0 %8345  ;;  %v15591_v46 = vpop.f32.mrf.mxu0 }
 0x53f   : > { %10605 = vmatpush3.msra.mxu1 %v8081_v5  ;;  %10625 = vmatpush3.msra.mxu0 %v8081_v5  ;;  %v17115_v5 = vld [vmem:[#allocation5_spill] sm:$0xff] }
 0x540   : > { %10573 = vmatprep.mubr.msk.f32.mxu1 %vm2991_vm0, %v17099_v3  ;;  %10593 = vmatprep.mubr.msk.f32.mxu0 %vm2991_vm0, %v15585_v18  ;;  %v15618_v3 = vld [vmem:[%s16227_s3 + $0xa0] sm:$0xff] }
 0x541   : > { %10606 = vmatprep.subr.mxu1 %v8080_v23  ;;  %10626 = vmatprep.subr.mxu0 %v8080_v23  ;;  %v15604_v40 = vpop.f32.mrf.mxu1  ;;  %17109 = vst [vmem:[#allocation30_spill] sm:$0xff] %v15618_v3 }
 0x542   : > { %10574 = vmatmul.mubr.msk.f32.gmra.mxu1 %vm2991_vm0, %v17101_v10  ;;  %10594 = vmatmul.mubr.msk.f32.gmra.mxu0 %vm2991_vm0, %v15596_v62  ;;  %v15611_v33 = vpop.f32.mrf.mxu0  ;;  %v15622_v10 = vpop.permute.xlu0 %8639 }
 0x543   : > { %17108 = vst [vmem:[#allocation37_spill] sm:$0xff] %v15611_v33  ;;  %10607 = vmatpush3.msra.mxu1 %v8080_v23  ;;  %10627 = vmatpush3.msra.mxu0 %v8080_v23  ;;  %v15620_v54 = vpop.f32.mrf.mxu1  ;;  %17110 = vst [vmem:[#allocation14_spill] sm:$0xff] %v15622_v10  ;;  %v8364_v23 = vsel %vm3953_vm2, %v17115_v5, %v10743_v21  ;;  %v15663_v21 = vld [vmem:[%s16227_s3 + $0xb8] sm:$0xff]  ;;  %v17121_v5 = vld [vmem:[#allocation64_spill] sm:$0xff] }
 0x544   : > { %10608 = vmatprep.subr.mxu1 %v8079_v14  ;;  %10628 = vmatprep.subr.mxu0 %v8079_v14  ;;  %v15624_v52 = vpop.f32.mrf.mxu0  ;;  %v17135_v10 = vld [vmem:[#allocation67_spill] sm:$0xff] }
 0x545   : > { %10609 = vmatpush3.msra.mxu1 %v8079_v14  ;;  %10629 = vmatpush3.msra.mxu0 %v8079_v14  ;;  %v15644_v14 = vld [vmem:[%s16227_s3 + $0xb0] sm:$0xff] }
 0x546   : > { %10576 = vmatprep.mubr.msk.f32.mxu1 %vm2991_vm0, %v17102_v44  ;;  %10596 = vmatprep.mubr.msk.f32.mxu0 %vm2991_vm0, %v15618_v3  ;;  %17116 = vst [vmem:[#allocation65_spill] sm:$0xff] %v15644_v14  ;;  %v4957_v44 = vadd.f32 %v15262_v43, %v17118_v50  ;;  %v15675_v47 = vpop.permute.xlu0 %8635  ;;  %v17136_v3 = vld [vmem:[#allocation56_spill] sm:$0xff] }
 0x547   : > { %10642 = vmatprep.subr.mxu1 %v8364_v23  ;;  %10662 = vmatprep.subr.mxu0 %v8364_v23  ;;  %v15646_v4 = vpop.f32.mrf.mxu1  ;;  %v15648_v45 = vpop.f32.mrf.mxu0  ;;  %17125 = vst [vmem:[#allocation77_spill] sm:$0xff] %v15675_v47  ;;  %v17134_v47 = vld [vmem:[#allocation34_spill] sm:$0xff] }
 0x548   : > { %17117 = vst [vmem:[#allocation62_spill] sm:$0xff] %v15648_v45  ;;  %10577 = vmatmul.mubr.msk.f32.gmra.mxu1 %vm2991_vm0, %v17103_v29  ;;  %10597 = vmatmul.mubr.msk.f32.gmra.mxu0 %vm2991_vm0, %v15629_v56  ;;  %v17122_v29 = vld [vmem:[#allocation85_spill] sm:$0xff]  ;;  %v17128_v45 = vld [vmem:[#allocation92_spill] sm:$0xff]  ;;  %v17130_v56 = vld [vmem:[#allocation94_spill] sm:$0xff]  ;;  %v4972_v33 = vadd.f32 %v15349_v31, %v17134_v47  ;;  %v10744_v47 = vunpack.i.h.bf16 %v15556_v32 }
 0x549   : > { %10579 = vmatprep.mubr.msk.f32.mxu1 %vm2991_vm0, %v17104_v51  ;;  %10599 = vmatprep.mubr.msk.f32.mxu0 %vm2991_vm0, %v15644_v14  ;;  %v15665_v19 = vpop.f32.mrf.mxu1  ;;  %v15667_v43 = vpop.f32.mrf.mxu0  ;;  %v4720_v50 = vadd.f32 %v17122_v29, %v17121_v5  ;;  %v5135_v51 = vadd.f32 %v15287_v2, %v4710_v7  ;;  %v15680_v14 = vld [vmem:[%s16227_s3 + $0xc0] sm:$0xff]  ;;  %v4967_v5 = vadd.f32 %v15294_v28, %v17128_v45  ;;  %v17129_v29 = vld [vmem:[#allocation22_spill] sm:$0xff] }
 0x54a   : > { %17119 = vst [vmem:[#allocation86_spill] sm:$0xff] %v15665_v19  ;;  %17120 = vst [vmem:[#allocation18_spill] sm:$0xff] %v15667_v43  ;;  %v4740_v43 = vadd.f32 %v15236_v36, %v17127_v48  ;;  %v4962_v60 = vadd.f32 %v17130_v56, %v17129_v29  ;;  %v17132_v2 = vld [vmem:[#allocation50_spill] sm:$0xff]  ;;  %v5136_v19 = vadd.f32 %v17136_v3, %v17135_v10  ;;  %v17139_v29 = vld [vmem:[#allocation75_spill] sm:$0xff] }
 0x54b   : > { %17126 = vst [vmem:[#allocation54_spill] sm:$0xff] %v15680_v14  ;;  %v4977_v7 = vadd.f32 %v17132_v2, %v17131_v16  ;;  %v15690_v30 = vpop.f32.mrf.mxu1  ;;  %v15692_v24 = vpop.f32.mrf.mxu0  ;;  %v5281_v36 = vadd.f32 %v15417_v61, %v4957_v44  ;;  %v17137_v28 = vld [vmem:[#allocation10_spill] sm:$0xff]  ;;  %v17140_v16 = vld [vmem:[#allocation87_spill] sm:$0xff]  ;;  %v15717_v61 = vld [vmem:[%s16227_s3 + $0xc8] sm:$0xff]  ;;  %v5425_v32 = vadd.f32 %v15459_v55, %v5135_v51  ;;  %v5562_v2 = vadd.f32 %v15587_v12, %v5280_v53 }
 0x54c   : > { %17133 = vst [vmem:[#allocation89_spill] sm:$0xff] %v15692_v24  ;;  %10580 = vmatmul.mubr.msk.f32.gmra.mxu1 %vm2991_vm0, %v17105_v22  ;;  %10600 = vmatmul.mubr.msk.f32.gmra.mxu0 %vm2991_vm0, %v15663_v21  ;;  %v4987_v48 = vadd.f32 %v15369_v42, %v17137_v28  ;;  %v17138_v56 = vld [vmem:[#allocation74_spill] sm:$0xff]  ;;  %v5138_v31 = vadd.f32 %v17140_v16, %v17139_v29  ;;  %v17141_v22 = vld [vmem:[#allocation91_spill] sm:$0xff]  ;;  %v17142_v3 = vld [vmem:[#allocation68_spill] sm:$0xff]  ;;  %v15738_v53 = vpop.permute.xlu0 %8633 }
 0x54d   : > { %v4982_v45 = vadd.f32 %v15392_v41, %v17138_v56  ;;  %10610 = vmatprep.mubr.msk.f32.mxu1 %vm2991_vm0, %v17107_v39  ;;  %10630 = vmatprep.mubr.msk.f32.mxu0 %vm2991_vm0, %v15680_v14  ;;  %v15719_v42 = vpop.f32.mrf.mxu1  ;;  %v5137_v41 = vadd.f32 %v17141_v22, %v4720_v50  ;;  %v17143_v10 = vld [vmem:[#allocation52_spill] sm:$0xff]  ;;  %v5283_v39 = vadd.f32 %v15480_v20, %v4967_v5  ;;  %v17144_v29 = vld [vmem:[#allocation51_spill] sm:$0xff]  ;;  %v15731_v14 = vpop.f32.mrf.mxu0  ;;  %v15751_v20 = vld [vmem:[%s16227_s3 + $0xd0] sm:$0xff] }
 0x54e   : > { %v5140_v44 = vadd.f32 %v17143_v10, %v17142_v3  ;;  %v5139_v28 = vadd.f32 %v15357_v57, %v4730_v6  ;;  %v5282_v56 = vadd.f32 %v15498_v17, %v4962_v60  ;;  %v5142_v16 = vadd.f32 %v15376_v25, %v17144_v29  ;;  %v17145_v25 = vld [vmem:[#allocation31_spill] sm:$0xff]  ;;  %v15806_v3 = vld [vmem:[%s16227_s3 + $0xe8] sm:$0xff] }
 0x54f   : > { %v10292_v24 = vpop.f32.mrf.mxu1  ;;  %v5285_v50 = vadd.f32 %v15516_v63, %v4977_v7  ;;  %v15735_v22 = vadd.f32 %v15398_v9, %v4740_v43  ;;  %v5563_v55 = vadd.f32 %v15573_v0, %v5281_v36  ;;  %v5284_v57 = vadd.f32 %v15532_v26, %v4972_v33  ;;  %v17148_v7 = vld [vmem:[#allocation38_spill] sm:$0xff] }
 0x550   : > { %10611 = vmatmul.mubr.msk.f32.vlgmr.msra.gmra.mxu1 %vm2991_vm0, %v15059_v37  ;;  %10631 = vmatmul.mubr.msk.f32.vlgmr.msra.gmra.mxu0 %vm2991_vm0, %v15717_v61  ;;  %v5426_v6 = vadd.f32 %v15429_v59, %v5136_v19  ;;  %v8363_v9 = vsel %vm3953_vm2, %v17145_v25, %v10744_v47  ;;  %v15753_v63 = vpop.f32.mrf.mxu0  ;;  %v15756_v37 = vadd.f32 %v15544_v15, %v4987_v48  ;;  %v17146_v15 = vld [vmem:[#allocation81_spill] sm:$0xff] }
 0x551   : > { %10643 = vmatpush3.msra.mxu1 %v8364_v23  ;;  %10663 = vmatpush3.msra.mxu0 %v8364_v23  ;;  %v5805_v17 = vpop.f32.mrf.mxu1  ;;  %v5707_v59 = vadd.f32 %v15591_v46, %v5425_v32  ;;  %v15760_v0 = vadd.f32 %v15558_v34, %v4982_v45  ;;  %v5427_v12 = vadd.f32 %v15504_v13, %v5137_v41  ;;  %v15767_v23 = vld [vmem:[%s16227_s3 + $0xd8] sm:$0xff]  ;;  %v17149_v41 = vld [vmem:[#allocation86_spill] sm:$0xff] }
 0x552   : > { %10644 = vmatprep.subr.mxu1 %v8363_v9  ;;  %10664 = vmatprep.subr.mxu0 %v8363_v9  ;;  %v5844_v26 = vadd.f32 %v5805_v17, %v5562_v2  ;;  %v5564_v33 = vadd.f32 %v15620_v54, %v5282_v56  ;;  %v8362_v19 = vsel %vm3953_vm2, %v15571_v11, %v17146_v15  ;;  %v15779_v5 = vpop.f32.mrf.mxu0  ;;  %v17147_v11 = vld [vmem:[#allocation57_spill] sm:$0xff] }
 0x553   : > { %10645 = vmatpush3.msra.mxu1 %v8363_v9  ;;  %10665 = vmatpush3.msra.mxu0 %v8363_v9  ;;  %v5845_v13 = vadd.f32 %v10292_v24, %v5563_v55  ;;  %v5428_v54 = vadd.f32 %v15484_v8, %v5138_v31  ;;  %v5430_v43 = vadd.f32 %v15520_v38, %v5140_v44  ;;  %v10748_v60 = vunpack.i.l.bf16 %v17147_v11  ;;  %v15791_v24 = vpop.permute.xlu0 %8629  ;;  %v17152_v2 = vld [vmem:[#allocation37_spill] sm:$0xff] }
 0x554   : > { %10613 = vmatprep.mubr.msk.f32.mxu1 %vm2991_vm0, %v15585_v18  ;;  %10633 = vmatprep.mubr.msk.f32.mxu0 %vm2991_vm0, %v15751_v20  ;;  %v5852_v34 = vmax.f32 %v5707_v59, %v5844_v26  ;;  %v10295_v46 = vpop.f32.mrf.mxu1  ;;  %v5565_v51 = vadd.f32 %v15604_v40, %v5283_v39  ;;  %v8361_v18 = vsel %vm3953_vm2, %v15589_v35, %v17148_v7  ;;  %v15797_v35 = vld [vmem:[%s16227_s3 + $0xe0] sm:$0xff]  ;;  %v17157_v17 = vld [vmem:[#allocation65_spill] sm:$0xff]  ;;  %v17158_v59 = vld [vmem:[#allocation83_spill] sm:$0xff] }
 0x555   : > { %10646 = vmatprep.subr.mxu1 %v8362_v19  ;;  %10666 = vmatprep.subr.mxu0 %v8362_v19  ;;  %v5708_v8 = vadd.f32 %v15579_v27, %v5426_v6  ;;  %v5567_v36 = vadd.f32 %v15646_v4, %v5285_v50  ;;  %v5429_v45 = vadd.f32 %v15535_v1, %v5139_v28  ;;  %v17150_v1 = vld [vmem:[#allocation30_spill] sm:$0xff]  ;;  %v17156_v6 = vld [vmem:[#allocation88_spill] sm:$0xff]  ;;  %v17159_v26 = vld [vmem:[#allocation19_spill] sm:$0xff] }
 0x556   : > { %10614 = vmatmul.mubr.msk.f32.gmra.mxu1 %vm2991_vm0, %v15596_v62  ;;  %10634 = vmatmul.mubr.msk.f32.gmra.mxu0 %vm2991_vm0, %v15767_v23  ;;  %v5860_v38 = vadd.f32 %v5852_v34, %v15415_v49  ;;  %v5815_v40 = vpop.f32.mrf.mxu1  ;;  %v5709_v62 = vadd.f32 %v15624_v52, %v5427_v12  ;;  %v5432_v27 = vadd.f32 %v15550_v58, %v5142_v16  ;;  %v15808_v44 = vpop.f32.mrf.mxu0  ;;  %v17151_v58 = vld [vmem:[#allocation14_spill] sm:$0xff]  ;;  %v17153_v16 = vld [vmem:[#allocation60_spill] sm:$0xff] }
 0x557   : > { %10647 = vmatpush3.msra.mxu1 %v8362_v19  ;;  %10667 = vmatpush3.msra.mxu0 %v8362_v19  ;;  %v5846_v48 = vadd.f32 %v5815_v40, %v5564_v33  ;;  %v5853_v31 = vmax.f32 %v5708_v8, %v5845_v13  ;;  %v5566_v4 = vadd.f32 %v17149_v41, %v5284_v57  ;;  %v15822_v28 = vld [vmem:[%s16227_s3 + $0xf0] sm:$0xff]  ;;  %v17162_v40 = vld [vmem:[#allocation29_spill] sm:$0xff]  ;;  %v17166_v41 = vld [vmem:[#allocation43_spill] sm:$0xff] }
 0x558   : > { %10648 = vmatprep.subr.mxu1 %v8361_v18  ;;  %10668 = vmatprep.subr.mxu0 %v8361_v18  ;;  %v5868_v47 = vmax.f32 %v5860_v38, 0.0  ;;  %v5847_v10 = vadd.f32 %v10295_v46, %v5565_v51  ;;  %v15816_v32 = vsel %vm3953_vm2, %v17151_v58, %v10748_v60  ;;  %v5710_v39 = vadd.f32 %v17152_v2, %v5428_v54  ;;  %v17154_v50 = vld [vmem:[#allocation62_spill] sm:$0xff]  ;;  %v15849_v54 = vld [vmem:[%s16227_s3 + $0xf8] sm:$0xff]  ;;  %v15851_v7 = vpop.f32.mrf.mxu0  ;;  %v17169_v2 = vld [vmem:[#allocation40_spill] sm:$0xff] }
 0x559   : > { %10649 = vmatpush3.msra.mxu1 %v8361_v18  ;;  %10669 = vmatpush3.msra.mxu0 %v8361_v18  ;;  %v5854_v52 = vmax.f32 %v5709_v62, %v5846_v48  ;;  %v5712_v55 = vadd.f32 %v17154_v50, %v5430_v43  ;;  %v17160_v12 = vmax.f32 %v17158_v59, %v17159_v26  ;;  %v17161_v19 = vld [vmem:[#allocation18_spill] sm:$0xff]  ;;  %v10749_v18 = vunpack.i.h.bf16 %v17147_v11  ;;  %v17170_v50 = vld [vmem:[#allocation77_spill] sm:$0xff] }
 0x55a   : > { %10616 = vmatprep.mubr.msk.f32.mxu1 %vm2991_vm0, %v17150_v1  ;;  %10636 = vmatprep.mubr.msk.f32.mxu0 %vm2991_vm0, %v15797_v35  ;;  %v9398_v56 = vpack.c.bf16 %v5868_v47, %v5868_v47  ;;  %v10298_v29 = vpop.f32.mrf.mxu1  ;;  %v5711_v13 = vadd.f32 %v17161_v19, %v5429_v45  ;;  %v5569_v46 = vadd.f32 %v15690_v30, %v15756_v37  ;;  %v15859_v30 = vld [vmem:[%s16227_s3 + $0x100] sm:$0xff]  ;;  %v17173_v19 = vld [vmem:[#allocation71_spill] sm:$0xff] }
 0x55b   : > { %10682 = vmatprep.subr.mxu1 %v15816_v32  ;;  %10617 = vmatmul.mubr.msk.f32.gmra.mxu1 %vm2991_vm0, %v17153_v16  ;;  %v15828_v57 = vpop.permute.xlu0 %4373  ;;  %v5862_v25 = vadd.f32 %v5854_v52, %v17156_v6  ;;  %v5849_v9 = vadd.f32 %v10298_v29, %v5567_v36  ;;  %v5855_v43 = vmax.f32 %v5710_v39, %v5847_v10  ;;  %v15880_v10 = vld [vmem:[%s16227_s3 + $0x108] sm:$0xff] }
 0x55c   : > { %17155 = vst [vmem:[#allocation79_spill] sm:$0xff] %v15828_v57  ;;  %10637 = vmatmul.mubr.msk.f32.gmra.mxu0 %vm2991_vm0, %v15806_v3  ;;  %10619 = vmatprep.mubr.msk.f32.mxu1 %vm2991_vm0, %v17157_v17  ;;  %5908 = vst [vmem:[%s15446_s12 + $0x4] sm:$0xf] %v9398_v56  ;;  %v4407_v33 = vadd.f32 %v15828_v57, %v17160_v12  ;;  %v5861_v15 = vadd.f32 %v5853_v31, %v15828_v57  ;;  %v5825_v34 = vpop.f32.mrf.mxu1  ;;  %v17168_v52 = vld [vmem:[#allocation89_spill] sm:$0xff]  ;;  %v15886_v16 = vpop.f32.mrf.mxu0 }
 0x55d   : > { %10639 = vmatprep.mubr.msk.f32.mxu0 %vm2991_vm0, %v15822_v28  ;;  %v5870_v51 = vmax.f32 %v5862_v25, 0.0  ;;  %v5848_v60 = vadd.f32 %v5825_v34, %v5566_v4  ;;  %v5568_v8 = vadd.f32 %v15719_v42, %v15760_v0  ;;  %v5431_v36 = vadd.f32 %v17162_v40, %v15735_v22  ;;  %v17164_v0 = vld [vmem:[#allocation54_spill] sm:$0xff]  ;;  %v17165_v22 = vld [vmem:[#allocation73_spill] sm:$0xff] }
 0x55e   : > { %v4415_v37 = vmax.f32 %v4407_v33, 0.0  ;;  %v5869_v38 = vmax.f32 %v5861_v15, 0.0  ;;  %v5857_v48 = vmax.f32 %v5712_v55, %v5849_v9  ;;  %v17167_v4 = vmax.f32 %v17165_v22, %v17166_v41 }
 0x55f   : > { %10620 = vmatmul.mubr.msk.f32.gmra.mxu1 %vm2991_vm0, %v15663_v21  ;;  %v9400_v62 = vpack.c.bf16 %v5870_v51, %v5870_v51  ;;  %v15865_v11 = vpop.permute.xlu0 %4383  ;;  %v5856_v45 = vmax.f32 %v5711_v13, %v5848_v60  ;;  %v10301_v42 = vpop.f32.mrf.mxu1  ;;  %v5714_v1 = vadd.f32 %v17168_v52, %v5432_v27  ;;  %v8645_v55 = vsel %vm3953_vm2, %v17170_v50, %v10749_v18  ;;  %v15897_v27 = vld [vmem:[%s16227_s3 + $0x110] sm:$0xff]  ;;  %v17175_v18 = vld [vmem:[#allocation44_spill] sm:$0xff] }
 0x560   : > { %17163 = vst [vmem:[#allocation76_spill] sm:$0xff] %v15865_v11  ;;  %10640 = vmatmul.mubr.msk.f32.gmra.mxu0 %vm2991_vm0, %v15849_v54  ;;  %10650 = vmatprep.mubr.msk.f32.mxu1 %vm2991_vm0, %v17164_v0  ;;  %v9391_v31 = vpack.c.bf16 %v4415_v37, %v4415_v37  ;;  %v9399_v47 = vpack.c.bf16 %v5869_v38, %v5869_v38  ;;  %v15915_v60 = vpop.f32.mrf.mxu0  ;;  %v17176_v38 = vld [vmem:[#allocation41_spill] sm:$0xff]  ;;  %v17180_v0 = vld [vmem:[#allocation78_spill] sm:$0xff] }
 0x561   : > { %v4409_v21 = vadd.f32 %v15865_v11, %v17167_v4  ;;  %10670 = vmatprep.mubr.msk.f32.mxu0 %vm2991_vm0, %v15859_v30  ;;  %5910 = vst [vmem:[%s15446_s12 + $0x24] sm:$0xf] %v9400_v62  ;;  %v5863_v58 = vadd.f32 %v5855_v43, %v15865_v11  ;;  %v5864_v39 = vadd.f32 %v5856_v45, %v17169_v2  ;;  %v5835_v29 = vpop.f32.mrf.mxu1  ;;  %v17177_v62 = vld [vmem:[#allocation39_spill] sm:$0xff] }
 0x562   : > { %v5851_v56 = vadd.f32 %v10301_v42, %v5569_v46  ;;  %4455 = vst [vmem:[%s15446_s12 + $0x10] sm:$0xf] %v9391_v31  ;;  %5909 = vst [vmem:[%s15446_s12 + $0x14] sm:$0xf] %v9399_v47  ;;  %v5850_v9 = vadd.f32 %v5835_v29, %v5568_v8  ;;  %v5713_v59 = vadd.f32 %v15731_v14, %v5431_v36  ;;  %v9358_v14 = vld [vmem:[%s16227_s3 + $0x118] sm:$0xff]  ;;  %v9359_v36 = vld [vmem:[%s16227_s3 + $0x120] sm:$0xff]  ;;  %v15947_v4 = vpop.f32.mrf.mxu0 }
 0x563   : > { %v4417_v25 = vmax.f32 %v4409_v21, 0.0  ;;  %10651 = vmatmul.mubr.msk.f32.vlgmr.msra.gmra.mxu1 %vm2991_vm0, %v15717_v61  ;;  %v5871_v17 = vmax.f32 %v5863_v58, 0.0  ;;  %v5872_v26 = vmax.f32 %v5864_v39, 0.0  ;;  %v15900_v33 = vpop.permute.xlu0 %4393  ;;  %v17172_v61 = vld [vmem:[#allocation59_spill] sm:$0xff]  ;;  %v8644_v8 = vsel %vm3953_vm2, %v17175_v18, %v15738_v53  ;;  %v17179_v42 = vld [vmem:[#allocation84_spill] sm:$0xff]  ;;  %v9360_v47 = vld [vmem:[%s16227_s3 + $0x128] sm:$0xff] }
 0x564   : > { %v5859_v12 = vmax.f32 %v5714_v1, %v5851_v56  ;;  %17171 = vst [vmem:[#allocation35_spill] sm:$0xff] %v15900_v33  ;;  %10671 = vmatmul.mubr.msk.f32.vlgmr.msra.gmra.mxu0 %vm2991_vm0, %v15880_v10  ;;  %10683 = vmatpush3.msra.mxu1 %v15816_v32  ;;  %v17174_v13 = vmax.f32 %v17172_v61, %v17173_v19  ;;  %v9362_v39 = vld [vmem:[%s16227_s3 + $0x138] sm:$0xff]  ;;  %v15965_v29 = vpop.f32.mrf.mxu0 }
 0x565   : > { %v9393_v15 = vpack.c.bf16 %v4417_v25, %v4417_v25  ;;  %v5865_v46 = vadd.f32 %v5857_v48, %v15900_v33  ;;  %10684 = vmatprep.subr.mxu1 %v8645_v55  ;;  %10653 = vmatprep.mubr.msk.f32.mxu1 %vm2991_vm0, %v15751_v20  ;;  %v9401_v43 = vpack.c.bf16 %v5871_v17, %v5871_v17 }
 0x566   : > { %v4411_v34 = vadd.f32 %v15900_v33, %v17174_v13  ;;  %v9402_v32 = vpack.c.bf16 %v5872_v26, %v5872_v26  ;;  %v5858_v51 = vmax.f32 %v5713_v59, %v5850_v9  ;;  %10685 = vmatpush3.msra.mxu1 %v8645_v55  ;;  %10673 = vmatprep.mubr.msk.f32.mxu0 %vm2991_vm0, %v15897_v27 }
 0x567   : > { %4457 = vst [vmem:[%s15446_s12 + $0x30] sm:$0xf] %v9393_v15  ;;  %v5873_v37 = vmax.f32 %v5865_v46, 0.0  ;;  %10686 = vmatprep.subr.mxu1 %v8644_v8  ;;  %10654 = vmatmul.mubr.msk.f32.gmra.mxu1 %vm2991_vm0, %v15767_v23  ;;  %5911 = vst [vmem:[%s15446_s12 + $0x34] sm:$0xf] %v9401_v43  ;;  %v8643_v40 = vsel %vm3953_vm2, %v17176_v38, %v15791_v24  ;;  %v15934_v48 = vpop.permute.xlu0 %4403  ;;  %v17181_v31 = vmax.f32 %v17179_v42, %v17180_v0 }
 0x568   : > { %v4419_v20 = vmax.f32 %v4411_v34, 0.0  ;;  %5912 = vst [vmem:[%s15446_s12 + $0x44] sm:$0xf] %v9402_v32  ;;  %v5866_v53 = vadd.f32 %v5858_v51, %v17177_v62  ;;  %17178 = vst [vmem:[#allocation48_spill] sm:$0xff] %v15934_v48  ;;  %10674 = vmatmul.mubr.msk.f32.gmra.mxu0 %vm2991_vm0, %v9358_v14  ;;  %10687 = vmatpush3.msra.mxu1 %v8644_v8  ;;  %v5867_v41 = vadd.f32 %v5859_v12, %v15934_v48 }
 0x569   : > { %v9403_v45 = vpack.c.bf16 %v5873_v37, %v5873_v37  ;;  %v4413_v24 = vadd.f32 %v15934_v48, %v17181_v31  ;;  %10688 = vmatprep.subr.mxu1 %v8643_v40  ;;  %10656 = vmatprep.mubr.msk.f32.mxu1 %vm2991_vm0, %v15797_v35  ;;  %v9361_v35 = vld [vmem:[%s16227_s3 + $0x130] sm:$0xff] }
 0x56a   : > { %v9395_v23 = vpack.c.bf16 %v4419_v20, %v4419_v20  ;;  %v5874_v22 = vmax.f32 %v5866_v53, 0.0  ;;  %10689 = vmatpush3.msra.mxu1 %v8643_v40  ;;  %10676 = vmatprep.mubr.msk.f32.mxu0 %vm2991_vm0, %v9359_v36  ;;  %v5875_v1 = vmax.f32 %v5867_v41, 0.0 }
 0x56b   : > { %5913 = vst [vmem:[%s15446_s12 + $0x54] sm:$0xf] %v9403_v45  ;;  %v4421_v21 = vmax.f32 %v4413_v24, 0.0  ;;  %10657 = vmatmul.mubr.msk.f32.gmra.mxu1 %vm2991_vm0, %v15806_v3  ;;  %v15974_v3 = vpop.f32.mrf.mxu1 }
 0x56c   : > { %4459 = vst [vmem:[%s15446_s12 + $0x50] sm:$0xf] %v9395_v23  ;;  %v9404_v52 = vpack.c.bf16 %v5874_v22, %v5874_v22  ;;  %10677 = vmatmul.mubr.msk.f32.gmra.mxu0 %vm2991_vm0, %v9360_v47  ;;  %10659 = vmatprep.mubr.msk.f32.mxu1 %vm2991_vm0, %v15822_v28  ;;  %v9405_v56 = vpack.c.bf16 %v5875_v1, %v5875_v1  ;;  %v15976_v28 = vpop.f32.mrf.mxu0 }
 0x56d   : > { %v9397_v58 = vpack.c.bf16 %v4421_v21, %v4421_v21  ;;  %10679 = vmatprep.mubr.msk.f32.mxu0 %vm2991_vm0, %v9361_v35  ;;  %v15982_v50 = vpop.f32.mrf.mxu1 }
 0x56e   : > { %5914 = vst [vmem:[%s15446_s12 + $0x64] sm:$0xf] %v9404_v52  ;;  %5915 = vst [vmem:[%s15446_s12 + $0x74] sm:$0xf] %v9405_v56  ;;  %v15984_v55 = vpop.f32.mrf.mxu0 }
 0x56f   : > { %4461 = vst [vmem:[%s15446_s12 + $0x70] sm:$0xf] %v9397_v58  ;;  %10660 = vmatmul.mubr.msk.f32.gmra.mxu1 %vm2991_vm0, %v15849_v54  ;;  %v10335_v54 = vpop.f32.mrf.mxu1 }
 0x570   : > { %10680 = vmatmul.mubr.msk.f32.gmra.mxu0 %vm2991_vm0, %v9362_v39  ;;  %10690 = vmatprep.mubr.msk.f32.mxu1 %vm2991_vm0, %v15859_v30  ;;  %v15988_v30 = vpop.f32.mrf.mxu0 }
 0x571   : > { %v6173_v25 = vpop.f32.mrf.mxu1 }
 0x573   : > { %10691 = vmatmul.mubr.msk.f32.vlgmr.msra.gmra.mxu1 %vm2991_vm0, %v15880_v10  ;;  %v15992_v10 = vpop.f32.mrf.mxu0  ;;  %v10338_v9 = vpop.f32.mrf.mxu1 }
 0x574   : > { %10693 = vmatprep.mubr.msk.f32.mxu1 %vm2991_vm0, %v15897_v27 }
 0x575   : > { %v15995_v27 = vpop.f32.mrf.mxu0  ;;  %v6183_v17 = vpop.f32.mrf.mxu1 }
 0x577   : > { %10694 = vmatmul.mubr.msk.f32.gmra.mxu1 %vm2991_vm0, %v9358_v14  ;;  %v15997_v59 = vpop.f32.mrf.mxu0  ;;  %v10341_v26 = vpop.f32.mrf.mxu1 }
 0x578   : > { %10696 = vmatprep.mubr.msk.f32.mxu1 %vm2991_vm0, %v9359_v36 }
 0x579   : > { %v15999_v12 = vpop.f32.mrf.mxu0  ;;  %v6193_v15 = vpop.f32.mrf.mxu1 }
 0x57b   : > { %10697 = vmatmul.mubr.msk.f32.gmra.mxu1 %vm2991_vm0, %v9360_v47  ;;  %v16001_v61 = vpop.f32.mrf.mxu0  ;;  %v10372_v19 = vpop.f32.mrf.mxu1 }
 0x57c   : > { %10699 = vmatprep.mubr.msk.f32.mxu1 %vm2991_vm0, %v9361_v35 }
 0x57d   : > { %v10392_v13 = vpop.f32.mrf.mxu0  ;;  %v6405_v34 = vpop.f32.mrf.mxu1 }
 0x57f   : > { %10700 = vmatmul.mubr.msk.f32.gmra.mxu1 %vm2991_vm0, %v9362_v39  ;;  %v6550_v46 = vpop.f32.mrf.mxu0  ;;  %v10375_v14 = vpop.f32.mrf.mxu1 }
 0x581   : > { %v10395_v43 = vpop.f32.mrf.mxu0  ;;  %v6415_v32 = vpop.f32.mrf.mxu1 }
 0x583   : > { %v6560_v51 = vpop.f32.mrf.mxu0  ;;  %v10378_v18 = vpop.f32.mrf.mxu1 }
 0x585   : > { %v10398_v8 = vpop.f32.mrf.mxu0  ;;  %v6425_v20 = vpop.f32.mrf.mxu1 }
 0x587   : > { %v6570_v37 = vpop.f32.mrf.mxu0  ;;  %v16003_v38 = vpop.f32.mrf.mxu1 }
 0x589   : > { %v10401_v40 = vpop.f32.mrf.mxu0  ;;  %v16005_v36 = vpop.f32.mrf.mxu1 }
 0x58b   : > { %v16007_v53 = vpop.f32.mrf.mxu0 }
 0x5ae   : > { %v10412_v23 = vpop.f32.mrf.mxu1 }
 0x5af   : > { %v10432_v45 = vpop.f32.mrf.mxu0 }
 0x5b0   : > { %v6695_v42 = vpop.f32.mrf.mxu1 }
 0x5b1   : > { %v6840_v0 = vpop.f32.mrf.mxu0 }
 0x5b3   : > { %v10415_v31 = vpop.f32.mrf.mxu1  ;;  %v16009_v24 = vpop.f32.mrf.mxu0 }
 0x5b5   : > { %v16011_v47 = vpop.f32.mrf.mxu1  ;;  %v16013_v22 = vpop.f32.mrf.mxu0 }
 0x5b6   : > { %17182 = vst [vmem:[#allocation20_spill] sm:$0xff] %v16013_v22 }
 0x5b9   : > { %v16015_v41 = vpop.f32.mrf.mxu1  ;;  %v16017_v35 = vpop.f32.mrf.mxu0 }
 0x5ba   : > { %17183 = vst [vmem:[#allocation46_spill] sm:$0xff] %v16015_v41  ;;  %17184 = vst [vmem:[#allocation25_spill] sm:$0xff] %v16017_v35  ;;  %v6164_v35 = vadd.f32 %v15982_v50, %v15779_v5  ;;  %v6179_v41 = vadd.f32 %v10335_v54, %v15808_v44  ;;  %v6406_v5 = vadd.f32 %v6405_v34, %v15984_v55 }
 0x5bb   : > { %v16019_v21 = vpop.f32.mrf.mxu1  ;;  %v16021_v52 = vpop.f32.mrf.mxu0  ;;  %v6421_v54 = vadd.f32 %v10375_v14, %v15988_v30  ;;  %v6441_v34 = vadd.f32 %v16003_v38, %v15999_v12 }
 0x5bc   : > { %17185 = vst [vmem:[#allocation61_spill] sm:$0xff] %v16019_v21  ;;  %17186 = vst [vmem:[#allocation26_spill] sm:$0xff] %v16021_v52  ;;  %v6592_v50 = vadd.f32 %v10395_v43, %v6179_v41 }
 0x5bd   : > { %v17197_v38 = vld [vmem:[#allocation20_spill] sm:$0xff] }
 0x5be   : > { %v16023_v1 = vpop.f32.mrf.mxu1  ;;  %v16025_v58 = vpop.f32.mrf.mxu0 }
 0x5bf   : > { %17187 = vst [vmem:[#allocation11_spill] sm:$0xff] %v16023_v1  ;;  %17188 = vst [vmem:[#allocation98_spill] sm:$0xff] %v16025_v58 }
 0x5c0   : > { %v16027_v39 = vpop.f32.mrf.mxu1  ;;  %v16029_v56 = vpop.f32.mrf.mxu0 }
 0x5c1   : > { %17189 = vst [vmem:[#allocation82_spill] sm:$0xff] %v16027_v39  ;;  %17190 = vst [vmem:[#allocation16_spill] sm:$0xff] %v16029_v56  ;;  %v6169_v39 = vadd.f32 %v15974_v3, %v15753_v63  ;;  %v6411_v63 = vadd.f32 %v10372_v19, %v15976_v28  ;;  %v6416_v28 = vadd.f32 %v6415_v32, %v15992_v10 }
 0x5c2   : > { %v10472_v62 = vpop.f32.mrf.mxu0  ;;  %v6436_v32 = vadd.f32 %v16005_v36, %v16001_v61  ;;  %v17200_v36 = vld [vmem:[#allocation79_spill] sm:$0xff] }
 0x5c3   : > { %v10452_v48 = vpop.f32.mrf.mxu1  ;;  %v6590_v3 = vadd.f32 %v10392_v13, %v6169_v39 }
 0x5c4   : > { %v7122_v2 = vpop.f32.mrf.mxu0 }
 0x5c5   : > { %v6977_v33 = vpop.f32.mrf.mxu1  ;;  %v6880_v55 = vadd.f32 %v10432_v45, %v6590_v3  ;;  %v17205_v3 = vld [vmem:[#allocation28_spill] sm:$0xff] }
 0x5c7   : > { %v10475_v6 = vpop.f32.mrf.mxu0  ;;  %v7162_v14 = vadd.f32 %v10472_v62, %v6880_v55 }
 0x5c8   : > { %v10455_v11 = vpop.f32.mrf.mxu1 }
 0x5c9   : > { %v16031_v49 = vpop.f32.mrf.mxu0 }
 0x5ca   : > { %17191 = vst [vmem:[#allocation23_spill] sm:$0xff] %v16031_v49  ;;  %v6987_v57 = vpop.f32.mrf.mxu1  ;;  %v6174_v49 = vadd.f32 %v6173_v25, %v15851_v7  ;;  %v6735_v25 = vadd.f32 %v10412_v23, %v6411_v63  ;;  %v17199_v23 = vld [vmem:[#allocation25_spill] sm:$0xff] }
 0x5cb   : > { %v16033_v21 = vpop.f32.mrf.mxu0 }
 0x5cc   : > { %17192 = vst [vmem:[#allocation95_spill] sm:$0xff] %v16033_v21  ;;  %v6189_v21 = vadd.f32 %v10338_v9, %v15886_v16  ;;  %v6589_v16 = vadd.f32 %v6550_v46, %v6164_v35  ;;  %v6591_v9 = vadd.f32 %v6560_v51, %v6174_v49  ;;  %v6737_v49 = vadd.f32 %v10415_v31, %v6421_v54  ;;  %v17202_v35 = vld [vmem:[#allocation26_spill] sm:$0xff] }
 0x5cd   : > { %v16035_v52 = vpop.f32.mrf.mxu1  ;;  %v16037_v1 = vpop.f32.mrf.mxu0  ;;  %v17207_v54 = vld [vmem:[#allocation82_spill] sm:$0xff] }
 0x5ce   : > { %17193 = vst [vmem:[#allocation58_spill] sm:$0xff] %v16035_v52  ;;  %17194 = vst [vmem:[#allocation12_spill] sm:$0xff] %v16037_v1  ;;  %v6184_v1 = vadd.f32 %v6183_v17, %v15915_v60  ;;  %v6594_v60 = vadd.f32 %v10398_v8, %v6189_v21  ;;  %v6431_v17 = vadd.f32 %v10378_v18, %v15995_v27 }
 0x5cf   : > { %v16041_v58 = vpop.f32.mrf.mxu1  ;;  %v16043_v56 = vpop.f32.mrf.mxu0  ;;  %v6879_v30 = vadd.f32 %v6840_v0, %v6589_v16  ;;  %v7019_v12 = vadd.f32 %v10455_v11, %v6737_v49  ;;  %v6881_v62 = vadd.f32 %v17197_v38, %v6591_v9  ;;  %v17203_v11 = vld [vmem:[#allocation11_spill] sm:$0xff]  ;;  %v17206_v16 = vld [vmem:[#allocation98_spill] sm:$0xff] }
 0x5d0   : > { %17195 = vst [vmem:[#allocation63_spill] sm:$0xff] %v16041_v58  ;;  %17196 = vst [vmem:[#allocation6_spill] sm:$0xff] %v16043_v56  ;;  %v6199_v56 = vadd.f32 %v10341_v26, %v15947_v4  ;;  %v6194_v58 = vadd.f32 %v6193_v15, %v15965_v29  ;;  %v6426_v29 = vadd.f32 %v6425_v20, %v15997_v59 }
 0x5d1   : > { %v16050_v22 = vpop.f32.mrf.mxu1  ;;  %v16052_v52 = vpop.f32.mrf.mxu0  ;;  %v6734_v26 = vadd.f32 %v6695_v42, %v6406_v5  ;;  %v7017_v15 = vadd.f32 %v10452_v48, %v6735_v25  ;;  %v6593_v19 = vadd.f32 %v6570_v37, %v6184_v1  ;;  %v6882_v59 = vadd.f32 %v16009_v24, %v6592_v50  ;;  %v17204_v1 = vld [vmem:[#allocation23_spill] sm:$0xff] }
 0x5d2   : > { %v6596_v13 = vadd.f32 %v10401_v40, %v6199_v56  ;;  %v6595_v27 = vadd.f32 %v16007_v53, %v6194_v58  ;;  %v6736_v48 = vadd.f32 %v16011_v47, %v6416_v28  ;;  %v7161_v8 = vadd.f32 %v7122_v2, %v6879_v30  ;;  %v17201_v47 = vld [vmem:[#allocation61_spill] sm:$0xff] }
 0x5d3   : > { %v16059_v44 = vpop.f32.mrf.mxu1  ;;  %v16061_v7 = vpop.f32.mrf.mxu0  ;;  %v7016_v43 = vadd.f32 %v6977_v33, %v6734_v26  ;;  %v17198_v33 = vld [vmem:[#allocation46_spill] sm:$0xff]  ;;  %v6884_v53 = vadd.f32 %v17199_v23, %v6594_v60  ;;  %v7164_v45 = vadd.f32 %v10475_v6, %v6882_v59  ;;  %v6738_v41 = vadd.f32 %v17201_v47, %v6426_v29  ;;  %v17211_v30 = vld [vmem:[#allocation95_spill] sm:$0xff] }
 0x5d4   : > { %v6739_v40 = vadd.f32 %v17198_v33, %v6431_v17  ;;  %v7018_v61 = vadd.f32 %v6987_v57, %v6736_v48  ;;  %v6883_v2 = vadd.f32 %v17202_v35, %v6593_v19  ;;  %v6741_v21 = vadd.f32 %v17203_v11, %v6441_v34 }
 0x5d5   : > { %v16066_v4 = vpop.f32.mrf.mxu0  ;;  %v7163_v58 = vadd.f32 %v17204_v1, %v6881_v62  ;;  %v6886_v50 = vadd.f32 %v17206_v16, %v6596_v13  ;;  %v6740_v25 = vadd.f32 %v17207_v54, %v6436_v32  ;;  %v17208_v9 = vld [vmem:[#allocation58_spill] sm:$0xff]  ;;  %v17212_v49 = vld [vmem:[#allocation12_spill] sm:$0xff]  ;;  %v17219_v54 = vld [vmem:[#allocation39_spill] sm:$0xff] }
 0x5d6   : > { %v7021_v60 = vadd.f32 %v17208_v9, %v6739_v40 }
 0x5d7   : > { %v10492_v46 = vpop.f32.mrf.mxu1  ;;  %v17209_v28 = vld [vmem:[#allocation63_spill] sm:$0xff]  ;;  %v17215_v38 = vld [vmem:[#allocation6_spill] sm:$0xff]  ;;  %v7022_v33 = vadd.f32 %v16059_v44, %v6740_v25 }
 0x5d8   : > { %v7299_v10 = vadd.f32 %v10492_v46, %v7017_v15  ;;  %v7020_v17 = vadd.f32 %v17209_v28, %v6738_v41  ;;  %v17210_v15 = vld [vmem:[#allocation76_spill] sm:$0xff]  ;;  %v7166_v46 = vadd.f32 %v17211_v30, %v6884_v53  ;;  %v7168_v62 = vadd.f32 %v17215_v38, %v6886_v50 }
 0x5d9   : > { %v7259_v51 = vpop.f32.mrf.mxu1  ;;  %v16076_v18 = vpop.f32.mrf.mxu0  ;;  %v17217_v41 = vld [vmem:[#allocation40_spill] sm:$0xff] }
 0x5da   : > { %v7307_v20 = vmax.f32 %v7162_v14, %v7299_v10  ;;  %v7298_v37 = vadd.f32 %v7259_v51, %v7016_v43  ;;  %v7165_v14 = vadd.f32 %v17212_v49, %v6883_v2  ;;  %v7023_v43 = vadd.f32 %v16050_v22, %v6741_v21  ;;  %v17213_v51 = vld [vmem:[#allocation88_spill] sm:$0xff] }
 0x5db   : > { %v10495_v42 = vpop.f32.mrf.mxu1  ;;  %v16086_v56 = vpop.f32.mrf.mxu0 }
 0x5dc   : > { %v7315_v0 = vadd.f32 %v7307_v20, %v17200_v36  ;;  %v7306_v31 = vmax.f32 %v7161_v8, %v7298_v37  ;;  %v7301_v24 = vadd.f32 %v10495_v42, %v7019_v12  ;;  %v17214_v20 = vld [vmem:[#allocation16_spill] sm:$0xff] }
 0x5dd   : > { %v7269_v39 = vpop.f32.mrf.mxu1  ;;  %v6885_v37 = vadd.f32 %v17214_v20, %v6595_v27 }
 0x5de   : > { %v7323_v63 = vmax.f32 %v7315_v0, 0.0  ;;  %v7314_v6 = vadd.f32 %v7306_v31, %v17205_v3  ;;  %v7309_v5 = vmax.f32 %v7164_v45, %v7301_v24  ;;  %v7300_v57 = vadd.f32 %v7269_v39, %v7018_v61  ;;  %v17216_v31 = vld [vmem:[#allocation35_spill] sm:$0xff]  ;;  %v17218_v39 = vld [vmem:[#allocation48_spill] sm:$0xff] }
 0x5df   : > { %v10498_v29 = vpop.f32.mrf.mxu1  ;;  %v7167_v0 = vadd.f32 %v16052_v52, %v6885_v37 }
 0x5e0   : > { %v9407_v55 = vpack.c.bf16 %v7323_v63, %v7323_v63  ;;  %v7322_v26 = vmax.f32 %v7314_v6, 0.0  ;;  %v7317_v19 = vadd.f32 %v7309_v5, %v17210_v15  ;;  %v7308_v34 = vmax.f32 %v7163_v58, %v7300_v57 }
 0x5e1   : > { %v7303_v13 = vadd.f32 %v10498_v29, %v7021_v60  ;;  %v16097_v10 = vpop.f32.mrf.mxu0  ;;  %v7279_v32 = vpop.f32.mrf.mxu1 }
 0x5e2   : > { %7363 = vst [vmem:[%s15446_s12 + $0x18] sm:$0xf] %v9407_v55  ;;  %v9406_v59 = vpack.c.bf16 %v7322_v26, %v7322_v26  ;;  %v7325_v48 = vmax.f32 %v7317_v19, 0.0  ;;  %v7316_v8 = vadd.f32 %v7308_v34, %v17213_v51  ;;  %v7302_v12 = vadd.f32 %v7279_v32, %v7020_v17 }
 0x5e3   : > { %v7311_v40 = vmax.f32 %v7166_v46, %v7303_v13  ;;  %v16104_v23 = vpop.f32.mrf.mxu0  ;;  %v10501_v22 = vpop.f32.mrf.mxu1 }
 0x5e4   : > { %7362 = vst [vmem:[%s15446_s12 + $0x8] sm:$0xf] %v9406_v59  ;;  %v9409_v53 = vpack.c.bf16 %v7325_v48, %v7325_v48  ;;  %v7324_v45 = vmax.f32 %v7316_v8, 0.0  ;;  %v7310_v42 = vmax.f32 %v7165_v14, %v7302_v12  ;;  %v7305_v61 = vadd.f32 %v10501_v22, %v7023_v43 }
 0x5e5   : > { %v7319_v24 = vadd.f32 %v7311_v40, %v17216_v31  ;;  %v7289_v47 = vpop.f32.mrf.mxu1 }
 0x5e6   : > { %7365 = vst [vmem:[%s15446_s12 + $0x38] sm:$0xf] %v9409_v53  ;;  %v9408_v27 = vpack.c.bf16 %v7324_v45, %v7324_v45  ;;  %v7318_v35 = vadd.f32 %v7310_v42, %v17217_v41  ;;  %v7313_v44 = vmax.f32 %v7168_v62, %v7305_v61  ;;  %v16111_v2 = vpop.f32.mrf.mxu0  ;;  %v7304_v11 = vadd.f32 %v7289_v47, %v7022_v33 }
 0x5e7   : > { %v7327_v21 = vmax.f32 %v7319_v24, 0.0  ;;  %v16113_v1 = vpop.f32.mrf.mxu1 }
 0x5e8   : > { %7364 = vst [vmem:[%s15446_s12 + $0x28] sm:$0xf] %v9408_v27  ;;  %v7326_v58 = vmax.f32 %v7318_v35, 0.0  ;;  %v7321_v52 = vadd.f32 %v7313_v44, %v17218_v39  ;;  %v7312_v63 = vmax.f32 %v7167_v0, %v7304_v11  ;;  %v16117_v6 = vpop.f32.mrf.mxu0 }
 0x5e9   : > { %v9411_v5 = vpack.c.bf16 %v7327_v21, %v7327_v21  ;;  %v16119_v57 = vpop.f32.mrf.mxu1 }
 0x5ea   : > { %v9410_v16 = vpack.c.bf16 %v7326_v58, %v7326_v58  ;;  %v7329_v50 = vmax.f32 %v7321_v52, 0.0  ;;  %v7320_v25 = vadd.f32 %v7312_v63, %v17219_v54  ;;  %v16122_v9 = vpop.f32.mrf.mxu0 }
 0x5eb   : > { %7367 = vst [vmem:[%s15446_s12 + $0x58] sm:$0xf] %v9411_v5 }
 0x5ec   : > { %7366 = vst [vmem:[%s15446_s12 + $0x48] sm:$0xf] %v9410_v16  ;;  %v9413_v60 = vpack.c.bf16 %v7329_v50, %v7329_v50  ;;  %v7328_v28 = vmax.f32 %v7320_v25, 0.0  ;;  %v16126_v17 = vpop.f32.mrf.mxu0 }
 0x5ed   : > { %v10535_v29 = vpop.f32.mrf.mxu1 }
 0x5ee   : > { %7369 = vst [vmem:[%s15446_s12 + $0x78] sm:$0xf] %v9413_v60  ;;  %v9412_v55 = vpack.c.bf16 %v7328_v28, %v7328_v28  ;;  %v16129_v26 = vpop.f32.mrf.mxu0 }
 0x5ef   : > { %v7631_v19 = vpop.f32.mrf.mxu1 }
 0x5f0   : > { %7368 = vst [vmem:[%s15446_s12 + $0x68] sm:$0xf] %v9412_v55  ;;  %v16132_v34 = vpop.f32.mrf.mxu0 }
 0x5f4   : > { %v10538_v30 = vpop.f32.mrf.mxu1  ;;  %v16134_v46 = vpop.f32.mrf.mxu0 }
 0x5f6   : > { %v7641_v49 = vpop.f32.mrf.mxu1  ;;  %v16136_v14 = vpop.f32.mrf.mxu0 }
 0x5f8   : > { %v10541_v43 = vpop.f32.mrf.mxu1  ;;  %v16138_v13 = vpop.f32.mrf.mxu0 }
 0x5fa   : > { %v7651_v32 = vpop.f32.mrf.mxu1  ;;  %v16140_v59 = vpop.f32.mrf.mxu0 }
 0x5fc   : > { %v10572_v48 = vpop.f32.mrf.mxu1  ;;  %v10592_v8 = vpop.f32.mrf.mxu0 }
 0x5fe   : > { %v7863_v12 = vpop.f32.mrf.mxu1  ;;  %v8008_v20 = vpop.f32.mrf.mxu0 }
 0x602   : > { %v10575_v37 = vpop.f32.mrf.mxu1  ;;  %v10595_v38 = vpop.f32.mrf.mxu0 }
 0x604   : > { %v7873_v62 = vpop.f32.mrf.mxu1  ;;  %v8018_v33 = vpop.f32.mrf.mxu0 }
 0x608   : > { %v10578_v40 = vpop.f32.mrf.mxu1  ;;  %v10598_v22 = vpop.f32.mrf.mxu0 }
 0x60a   : > { %v7883_v53 = vpop.f32.mrf.mxu1  ;;  %v8028_v45 = vpop.f32.mrf.mxu0 }
 0x60c   : > { %v10581_v42 = vpop.f32.mrf.mxu1  ;;  %v10601_v61 = vpop.f32.mrf.mxu0 }
 0x60e   : > { %v16142_v0 = vpop.f32.mrf.mxu1  ;;  %v16144_v24 = vpop.f32.mrf.mxu0 }
 0x610   : > { %v10612_v47 = vpop.f32.mrf.mxu1  ;;  %v10632_v27 = vpop.f32.mrf.mxu0 }
 0x612   : > { %v8153_v35 = vpop.f32.mrf.mxu1  ;;  %v8298_v44 = vpop.f32.mrf.mxu0 }
 0x616   : > { %v10615_v11 = vpop.f32.mrf.mxu1  ;;  %v10635_v21 = vpop.f32.mrf.mxu0 }
 0x618   : > { %v8163_v58 = vpop.f32.mrf.mxu1  ;;  %v16146_v52 = vpop.f32.mrf.mxu0 }
 0x619   : > { %17220 = vst [vmem:[#allocation47_spill] sm:$0xff] %v16146_v52 }
 0x61b   : > { %v16148_v63 = vpop.f32.mrf.mxu1 }
 0x61c   : > { %17221 = vst [vmem:[#allocation24_spill] sm:$0xff] %v16148_v63  ;;  %v16150_v5 = vpop.f32.mrf.mxu0  ;;  %v7869_v63 = vadd.f32 %v10572_v48, %v16122_v9  ;;  %v7889_v9 = vadd.f32 %v10578_v40, %v16134_v46  ;;  %v7894_v46 = vadd.f32 %v16142_v0, %v16140_v59  ;;  %v17233_v59 = vld [vmem:[#allocation79_spill] sm:$0xff] }
 0x61d   : > { %17222 = vst [vmem:[#allocation97_spill] sm:$0xff] %v16150_v5  ;;  %v16152_v16 = vpop.f32.mrf.mxu1  ;;  %v7642_v5 = vadd.f32 %v7641_v49, %v16104_v23 }
 0x61e   : > { %17223 = vst [vmem:[#allocation36_spill] sm:$0xff] %v16152_v16  ;;  %v16154_v50 = vpop.f32.mrf.mxu0  ;;  %v7647_v16 = vadd.f32 %v10538_v30, %v16097_v10  ;;  %v7874_v10 = vadd.f32 %v7873_v62, %v16132_v34 }
 0x61f   : > { %17224 = vst [vmem:[#allocation53_spill] sm:$0xff] %v16154_v50  ;;  %v16156_v25 = vpop.f32.mrf.mxu1  ;;  %v7627_v50 = vadd.f32 %v16113_v1, %v16061_v7  ;;  %v7652_v7 = vadd.f32 %v7651_v32, %v16117_v6  ;;  %v8051_v48 = vadd.f32 %v8028_v45, %v7642_v5 }
 0x620   : > { %17225 = vst [vmem:[#allocation70_spill] sm:$0xff] %v16156_v25  ;;  %v16158_v60 = vpop.f32.mrf.mxu0  ;;  %v7622_v25 = vadd.f32 %v16119_v57, %v16066_v4  ;;  %v7864_v4 = vadd.f32 %v7863_v12, %v16126_v17  ;;  %v8052_v30 = vadd.f32 %v10598_v22, %v7647_v16  ;;  %v8194_v40 = vadd.f32 %v8163_v58, %v7874_v10 }
 0x621   : > { %17226 = vst [vmem:[#allocation13_spill] sm:$0xff] %v16158_v60  ;;  %v16160_v28 = vpop.f32.mrf.mxu1  ;;  %v7637_v60 = vadd.f32 %v10535_v29, %v16076_v18  ;;  %v8048_v1 = vadd.f32 %v10592_v8, %v7627_v50  ;;  %v7879_v29 = vadd.f32 %v10575_v37, %v16129_v26  ;;  %v7899_v8 = vadd.f32 %v10581_v42, %v16138_v13 }
 0x622   : > { %17227 = vst [vmem:[#allocation72_spill] sm:$0xff] %v16160_v28  ;;  %v16162_v55 = vpop.f32.mrf.mxu0  ;;  %v8047_v18 = vadd.f32 %v8008_v20, %v7622_v25 }
 0x623   : > { %17228 = vst [vmem:[#allocation45_spill] sm:$0xff] %v16162_v55  ;;  %v10652_v54 = vpop.f32.mrf.mxu1  ;;  %v7632_v55 = vadd.f32 %v7631_v19, %v16086_v56  ;;  %v8050_v56 = vadd.f32 %v10595_v38, %v7637_v60  ;;  %v8193_v19 = vadd.f32 %v10612_v47, %v7869_v63  ;;  %v8338_v6 = vadd.f32 %v10632_v27, %v8048_v1 }
 0x624   : > { %v10672_v39 = vpop.f32.mrf.mxu0  ;;  %v8337_v12 = vadd.f32 %v8298_v44, %v8047_v18  ;;  %v8195_v37 = vadd.f32 %v10615_v11, %v7879_v29 }
 0x625   : > { %v8435_v41 = vpop.f32.mrf.mxu1  ;;  %v8049_v23 = vadd.f32 %v8018_v33, %v7632_v55  ;;  %v8475_v17 = vadd.f32 %v10652_v54, %v8193_v19  ;;  %v8620_v34 = vadd.f32 %v10672_v39, %v8338_v6  ;;  %v8053_v33 = vadd.f32 %v16144_v24, %v7652_v7  ;;  %v17232_v39 = vld [vmem:[#allocation97_spill] sm:$0xff]  ;;  %v17234_v58 = vld [vmem:[#allocation36_spill] sm:$0xff] }
 0x626   : > { %v8580_v31 = vpop.f32.mrf.mxu0  ;;  %v17237_v7 = vld [vmem:[#allocation28_spill] sm:$0xff] }
 0x627   : > { %v10655_v51 = vpop.f32.mrf.mxu1  ;;  %v8619_v54 = vadd.f32 %v8580_v31, %v8337_v12  ;;  %v17235_v31 = vld [vmem:[#allocation53_spill] sm:$0xff]  ;;  %v17236_v5 = vld [vmem:[#allocation70_spill] sm:$0xff] }
 0x628   : > { %v10675_v3 = vpop.f32.mrf.mxu0  ;;  %v8199_v16 = vadd.f32 %v17236_v5, %v7899_v8  ;;  %v17238_v18 = vld [vmem:[#allocation13_spill] sm:$0xff] }
 0x629   : > { %v8445_v15 = vpop.f32.mrf.mxu1  ;;  %v17239_v29 = vld [vmem:[#allocation72_spill] sm:$0xff] }
 0x62a   : > { %v8590_v52 = vpop.f32.mrf.mxu0  ;;  %v8476_v11 = vadd.f32 %v8445_v15, %v8194_v40 }
 0x62b   : > { %v16164_v36 = vpop.f32.mrf.mxu1 }
 0x62c   : > { %17229 = vst [vmem:[#allocation21_spill] sm:$0xff] %v16164_v36  ;;  %v7657_v36 = vadd.f32 %v10541_v43, %v16111_v2  ;;  %v7884_v2 = vadd.f32 %v7883_v53, %v16136_v14  ;;  %v8192_v43 = vadd.f32 %v8153_v35, %v7864_v4  ;;  %v10678_v32 = vpop.f32.mrf.mxu0  ;;  %v8340_v14 = vadd.f32 %v10635_v21, %v8050_v56 }
 0x62d   : > { %v16171_v28 = vpop.f32.mrf.mxu1  ;;  %v8477_v53 = vadd.f32 %v10655_v51, %v8195_v37  ;;  %v8341_v51 = vadd.f32 %v17235_v31, %v8051_v48  ;;  %v8198_v56 = vadd.f32 %v17239_v29, %v7894_v46  ;;  %v17243_v46 = vld [vmem:[#allocation45_spill] sm:$0xff] }
 0x62e   : > { %v8054_v26 = vadd.f32 %v10601_v61, %v7657_v36  ;;  %v8474_v38 = vadd.f32 %v8435_v41, %v8192_v43  ;;  %v8600_v45 = vpop.f32.mrf.mxu0  ;;  %v17230_v36 = vld [vmem:[#allocation47_spill] sm:$0xff]  ;;  %v17231_v61 = vld [vmem:[#allocation24_spill] sm:$0xff]  ;;  %v8342_v41 = vadd.f32 %v17232_v39, %v8052_v30  ;;  %v8622_v35 = vadd.f32 %v10675_v3, %v8340_v14 }
 0x62f   : > { %v16180_v57 = vpop.f32.mrf.mxu1  ;;  %v8339_v42 = vadd.f32 %v17230_v36, %v8049_v23  ;;  %v8197_v27 = vadd.f32 %v17231_v61, %v7889_v9  ;;  %v8196_v63 = vadd.f32 %v17234_v58, %v7884_v2  ;;  %v8623_v48 = vadd.f32 %v8600_v45, %v8341_v51  ;;  %v17244_v36 = vld [vmem:[#allocation35_spill] sm:$0xff] }
 0x630   : > { %v10681_v60 = vpop.f32.mrf.mxu0  ;;  %v8344_v15 = vadd.f32 %v17238_v18, %v8054_v26  ;;  %v8481_v8 = vadd.f32 %v16180_v57, %v8199_v16  ;;  %v8343_v14 = vadd.f32 %v17243_v46, %v8053_v33  ;;  %v17245_v33 = vld [vmem:[#allocation40_spill] sm:$0xff] }
 0x631   : > { %v16185_v49 = vpop.f32.mrf.mxu1  ;;  %v8621_v50 = vadd.f32 %v8590_v52, %v8339_v42  ;;  %v8478_v23 = vadd.f32 %v16171_v28, %v8196_v63  ;;  %v17241_v52 = vld [vmem:[#allocation76_spill] sm:$0xff]  ;;  %v17247_v63 = vld [vmem:[#allocation39_spill] sm:$0xff] }
 0x632   : > { %v8610_v26 = vpop.f32.mrf.mxu0  ;;  %v8626_v40 = vadd.f32 %v10681_v60, %v8344_v15 }
 0x633   : > { %v10692_v20 = vpop.f32.mrf.mxu1  ;;  %v17240_v19 = vld [vmem:[#allocation21_spill] sm:$0xff] }
 0x634   : > { %v8757_v62 = vadd.f32 %v10692_v20, %v8475_v17  ;;  %v8479_v10 = vadd.f32 %v17240_v19, %v8197_v27  ;;  %v8624_v17 = vadd.f32 %v10678_v32, %v8342_v41 }
 0x635   : > { %v8717_v22 = vpop.f32.mrf.mxu1 }
 0x636   : > { %v8765_v47 = vmax.f32 %v8620_v34, %v8757_v62  ;;  %v8756_v13 = vadd.f32 %v8717_v22, %v8474_v38  ;;  %v17242_v38 = vld [vmem:[#allocation88_spill] sm:$0xff]  ;;  %v8480_v22 = vadd.f32 %v16185_v49, %v8198_v56 }
 0x637   : > { %v10695_v44 = vpop.f32.mrf.mxu1 }
 0x638   : > { %v8773_v0 = vadd.f32 %v8765_v47, %v17233_v59  ;;  %v8764_v24 = vmax.f32 %v8619_v54, %v8756_v13  ;;  %v8759_v21 = vadd.f32 %v10695_v44, %v8477_v53  ;;  %v8625_v13 = vadd.f32 %v8610_v26, %v8343_v14 }
 0x639   : > { %v8727_v25 = vpop.f32.mrf.mxu1 }
 0x63a   : > { %v8781_v55 = vmax.f32 %v8773_v0, 0.0  ;;  %v8772_v1 = vadd.f32 %v8764_v24, %v17237_v7  ;;  %v8767_v4 = vmax.f32 %v8622_v35, %v8759_v21  ;;  %v8758_v3 = vadd.f32 %v8727_v25, %v8476_v11  ;;  %v17246_v11 = vld [vmem:[#allocation48_spill] sm:$0xff] }
 0x63b   : > { %v10698_v9 = vpop.f32.mrf.mxu1 }
 0x63c   : > { %v9415_v30 = vpack.c.bf16 %v8781_v55, %v8781_v55  ;;  %v8780_v2 = vmax.f32 %v8772_v1, 0.0  ;;  %v8775_v6 = vadd.f32 %v8767_v4, %v17241_v52  ;;  %v8766_v43 = vmax.f32 %v8621_v50, %v8758_v3 }
 0x63d   : > { %v8761_v12 = vadd.f32 %v10698_v9, %v8479_v10  ;;  %v8737_v20 = vpop.f32.mrf.mxu1 }
 0x63e   : > { %8821 = vst [vmem:[%s15446_s12 + $0x1c] sm:$0xf] %v9415_v30  ;;  %v9414_v37 = vpack.c.bf16 %v8780_v2, %v8780_v2  ;;  %v8783_v34 = vmax.f32 %v8775_v6, 0.0  ;;  %v8774_v28 = vadd.f32 %v8766_v43, %v17242_v38  ;;  %v8760_v62 = vadd.f32 %v8737_v20, %v8478_v23 }
 0x63f   : > { %v8769_v32 = vmax.f32 %v8624_v17, %v8761_v12  ;;  %v10701_v54 = vpop.f32.mrf.mxu1 }
 0x640   : > { %8820 = vst [vmem:[%s15446_s12 + $0xc] sm:$0xf] %v9414_v37  ;;  %v9417_v57 = vpack.c.bf16 %v8783_v34, %v8783_v34  ;;  %v8782_v53 = vmax.f32 %v8774_v28, 0.0  ;;  %v8768_v45 = vmax.f32 %v8623_v48, %v8760_v62  ;;  %v8763_v47 = vadd.f32 %v10701_v54, %v8481_v8 }
 0x641   : > { %v8777_v42 = vadd.f32 %v8769_v32, %v17244_v36  ;;  %v8747_v61 = vpop.f32.mrf.mxu1 }
 0x642   : > { %8823 = vst [vmem:[%s15446_s12 + $0x3c] sm:$0xf] %v9417_v57  ;;  %v9416_v27 = vpack.c.bf16 %v8782_v53, %v8782_v53  ;;  %v8776_v39 = vadd.f32 %v8768_v45, %v17245_v33  ;;  %v8771_v49 = vmax.f32 %v8626_v40, %v8763_v47  ;;  %v8762_v41 = vadd.f32 %v8747_v61, %v8480_v22 }
 0x643   : > { %v8785_v35 = vmax.f32 %v8777_v42, 0.0 }
 0x644   : > { %8822 = vst [vmem:[%s15446_s12 + $0x2c] sm:$0xf] %v9416_v27  ;;  %v8784_v44 = vmax.f32 %v8776_v39, 0.0  ;;  %v8779_v59 = vadd.f32 %v8771_v49, %v17246_v11  ;;  %v8770_v0 = vmax.f32 %v8625_v13, %v8762_v41 }
 0x645   : > { %v9419_v24 = vpack.c.bf16 %v8785_v35, %v8785_v35 }
 0x646   : > { %v9418_v21 = vpack.c.bf16 %v8784_v44, %v8784_v44  ;;  %v8787_v58 = vmax.f32 %v8779_v59, 0.0  ;;  %v8778_v31 = vadd.f32 %v8770_v0, %v17247_v63 }
 0x647   : > { %8825 = vst [vmem:[%s15446_s12 + $0x5c] sm:$0xf] %v9419_v24 }
 0x648   : > { %8824 = vst [vmem:[%s15446_s12 + $0x4c] sm:$0xf] %v9418_v21  ;;  %v9421_v51 = vpack.c.bf16 %v8787_v58, %v8787_v58  ;;  %v8786_v5 = vmax.f32 %v8778_v31, 0.0 }
 0x64a   : > { %8827 = vst [vmem:[%s15446_s12 + $0x7c] sm:$0xf] %v9421_v51  ;;  %v9420_v16 = vpack.c.bf16 %v8786_v5, %v8786_v5 }
 0x64c   : > { %8826 = vst [vmem:[%s15446_s12 + $0x6c] sm:$0xf] %v9420_v16 }
 0x64d PF: > { %s15_s18 = sadd.s32 1, %s10776_s18  }
 0x64e   : > { %p12_p4 = scmp.ge.s32.totalorder %s15_s18, 4  }
 0x650   :  { %14 = sbr.rel (!%p12_p4) target bundleno = 1 (0x1), region = 74 }

</bundles_post_ra>
